<compile_context>
chip_gen: v5e
topology: v5e:2x2
jax: 0.10.0
libtpu: 0.0.40
codegen_flags: <defaults>
</compile_context>

<pallas_src>
import functools
import math

import jax
import jax.numpy as jnp
import numpy as np
from jax.experimental import pallas as pl
from jax.experimental.pallas import tpu as pltpu

DIM = 3        # input point dimension
HIDDEN = 32    # hidden_dim (small demo size; module default is 512)
C_DIM = 16     # latent code dim (module default is 128)
_PAD_D = 8     # points + mask packed/padded to 8 channels (single DMA)


def _relu(x):
    return jnp.maximum(x, 0.0)


def _pointnet_kernel(hidden, mask_ch, compute_dtype,
                     pin_ref, pool_ref, bcast_ref,
                     wpos_ref, bpos_ref, w0_ref, ws_ref, w1_ref, bblk_ref,
                     wc_ref, bc_ref, o_ref):
    """One grid step == G batch elements flattened to G*N rows.

    pin_ref:   (G*N, 8)   f32  [x, y, z, mask, 0, ...]
    pool_ref:  (G, G*N)   f32  0/1 group-sum selector (masked pool on the MXU)
    bcast_ref: (G*N, G)   f32  0/1 row-broadcast selector
    weights:   packed slabs stored in `compute_dtype` (f32 accumulation)
    biases:    f32
    o_ref:     (G, c_dim) f32
    """
    H = hidden
    f32 = jnp.float32

    def mm(a, b):
        # Main MXU matmuls: compute_dtype inputs, f32 accumulation.
        return jnp.dot(a.astype(compute_dtype), b.astype(compute_dtype),
                       preferred_element_type=f32)

    def mm32(a, b):
        # Masked pool / broadcast matmuls stay in f32.
        return jnp.dot(a, b, preferred_element_type=f32)

    pin = pin_ref[...]                           # (G*N, 8)
    msk = pin[:, mask_ch:mask_ch + 1]            # (G*N, 1) point mask
    pool = pool_ref[...]                         # (G, G*N)
    bcast = bcast_ref[...]                       # (G*N, G)

    # fc_pos (mask + pad channels hit zero weight rows -> no effect)
    x0 = mm(pin, wpos_ref[...]) + bpos_ref[...]                  # (G*N, 2H)

    # block_0 (plain ResnetBlockFC, size_in = 2H -> shortcut has weights)
    h = _relu(mm(_relu(x0), w0_ref[0]) + bblk_ref[0:1, :])
    dx = mm(h, w1_ref[0]) + bblk_ref[1:2, :]
    net = mm(x0, ws_ref[0]) + dx                                 # (G*N, H)

    # blocks 1..4: x = concat([net, pooled]) realized as split matmuls,
    # pooled contribution broadcast back to rows via the selector matmul.
    for i in range(1, 5):
        pooled = mm32(pool, net * msk)                           # (G, H) masked sum-pool
        b0 = bblk_ref[2 * i:2 * i + 1, :]
        b1 = bblk_ref[2 * i + 1:2 * i + 2, :]
        # fc_0 consumes relu(x): relu the pooled half too.
        h = (mm(_relu(net), w0_ref[i, :H, :])
             + mm32(bcast, mm(_relu(pooled), w0_ref[i, H:, :])) + b0)
        h = _relu(h)
        dx = mm(h, w1_ref[i]) + b1
        # shortcut consumes x without relu.
        net = (mm(net, ws_ref[i, :H, :])
               + mm32(bcast, mm(pooled, ws_ref[i, H:, :])) + dx)  # (G*N, H)

    pooled = mm32(pool, net * msk)                               # (G, H) final pool
    o_ref[...] = mm(_relu(pooled), wc_ref[...]) + bc_ref[...]    # (G, c_dim)


def _pick_group(batch, n_pts, target_rows=256):
    """Largest divisor of `batch` with group*n_pts near the target MXU rows."""
    g = max(1, min(batch, max(1, target_rows // n_pts)))
    while batch % g:
        g -= 1
    return g


def _pack_params(flat, compute_dtype):
    """Pack the 29 torch-like params (weights stored (in, out)) into 8 slabs."""
    w_pos, b_pos = flat[0], flat[1]            # (D, 2H), (1, 2H)
    blk = flat[2:27]
    w_c, b_c = flat[27], flat[28]
    d_in, two_h = w_pos.shape
    f32 = jnp.float32
    w_pos_pad = jnp.zeros((_PAD_D, two_h), f32).at[:d_in, :].set(w_pos)
    w0_all = jnp.stack([blk[5 * i + 0] for i in range(5)])       # (5, 2H, H)
    ws_all = jnp.stack([blk[5 * i + 4] for i in range(5)])       # (5, 2H, H)
    w1_all = jnp.stack([blk[5 * i + 2] for i in range(5)])       # (5, H, H)
    b_blk = jnp.concatenate(
        [jnp.concatenate([blk[5 * i + 1], blk[5 * i + 3]], axis=0)
         for i in range(5)], axis=0)                             # (10, H)
    cd = compute_dtype
    return (w_pos_pad.astype(cd), b_pos.astype(f32),
            w0_all.astype(cd), ws_all.astype(cd), w1_all.astype(cd),
            b_blk.astype(f32), w_c.astype(cd), b_c.astype(f32))


def resnet_pointnet_masked(p, m, flat_params, *, compute_dtype=jnp.bfloat16,
                           target_rows=256):
    B, N, D = p.shape
    assert D + 1 <= _PAD_D, "point dim must fit the 8-channel packed slab"
    assert N % 8 == 0, "demo kernel assumes N is a multiple of 8 (sublane tiling)"
    hidden = flat_params[2].shape[1]          # block_0 fc_0 weight: (2H, H)
    c_dim = flat_params[27].shape[1]
    G = _pick_group(B, N, target_rows)
    steps = B // G
    GN = G * N

    # Pack points + mask into one lane-padded slab: [x, y, z, mask, 0, ...].
    pin = jnp.zeros((B, N, _PAD_D), jnp.float32)
    pin = pin.at[:, :, :D].set(p.astype(jnp.float32))
    pin = pin.at[:, :, D].set(m.astype(jnp.float32))
    pin = pin.reshape(steps, GN, _PAD_D)

    # Static 0/1 selectors: group-sum (masked pool) and row-broadcast.
    grp = jnp.arange(GN, dtype=jnp.int32) // N
    pool_mat = (grp[None, :] == jnp.arange(G, dtype=jnp.int32)[:, None]
                ).astype(jnp.float32)                            # (G, GN)
    bcast_mat = pool_mat.T                                       # (GN, G)

    params = _pack_params(flat_params, compute_dtype)

    def _const_spec(a):
        nd = a.ndim
        return pl.BlockSpec(a.shape, lambda b, nd=nd: (0,) * nd)

    in_specs = [
        pl.BlockSpec((None, GN, _PAD_D), lambda b: (b, 0, 0)),   # points + mask
        _const_spec(pool_mat),
        _const_spec(bcast_mat),
    ] + [_const_spec(a) for a in params]

    out_specs = pl.BlockSpec((None, G, c_dim), lambda b: (b, 0, 0))
    out_shape = jax.ShapeDtypeStruct((steps, G, c_dim), jnp.float32)

    # Scoped-VMEM budget: params (x2 windows) + activations + IO, with headroom;
    # capped well below v7x's 64 MiB physical VMEM, at least the 32 MiB default.
    param_bytes = sum(int(np.prod(a.shape)) * a.dtype.itemsize for a in params)
    act_bytes = GN * (2 * hidden + 6 * hidden) * 4
    io_bytes = 2 * (GN * _PAD_D + G * c_dim) * 4 + 2 * G * GN * 4
    est = 2 * param_bytes + act_bytes + io_bytes
    vmem_limit = int(min(48 * 2 ** 20, max(32 * 2 ** 20, 8 * est)))

    kernel = functools.partial(_pointnet_kernel, hidden, D, compute_dtype)
    out = pl.pallas_call(
        kernel,
        out_shape=out_shape,
        grid=(steps,),
        in_specs=in_specs,
        out_specs=out_specs,
        compiler_params=pltpu.CompilerParams(
            dimension_semantics=("parallel",),   # independent batch blocks (v7x megacore)
            vmem_limit_bytes=vmem_limit),
    )(pin, pool_mat, bcast_mat, *params)
    return out.reshape(B, c_dim)


def init_params(key, dim=DIM, hidden=HIDDEN, c_dim=C_DIM):
    """Deterministic init. Shapes mirror the module's __init__ (weights stored (in, out))."""
    keys = iter(jax.random.split(key, 64))

    def linear(fan_in, fan_out, bias=True):
        bound = 1.0 / math.sqrt(fan_in)
        w = jax.random.uniform(next(keys), (fan_in, fan_out), jnp.float32, -bound, bound)
        b = (jax.random.uniform(next(keys), (1, fan_out), jnp.float32, -bound, bound)
             if bias else None)
        return w, b

    flat = []
    w_pos, b_pos = linear(dim, 2 * hidden)                       # fc_pos
    flat += [w_pos, b_pos]
    for _ in range(5):                                           # block_0..block_4
        w0, b0 = linear(2 * hidden, hidden)                      # fc_0
        # NOTE: PyTorch __init__ zero-inits fc_1.weight; we use deterministic
        # random weights so the second matmul path is numerically exercised.
        w1, b1 = linear(hidden, hidden)                          # fc_1
        ws, _ = linear(2 * hidden, hidden, bias=False)           # shortcut (no bias)
        flat += [w0, b0, w1, b1, ws]
    w_c, b_c = linear(hidden, c_dim)                             # fc_c
    flat += [w_c, b_c]
    return flat


def ref_forward(flat, p, m, compute_dtype=jnp.float32):
    """Pure-JAX reference of the PyTorch forward (matmul inputs quantized to
    `compute_dtype`, f32 accumulation -> matches the kernel's numerics)."""
    f32 = jnp.float32
    cd = compute_dtype

    def lin(x, w, b=None):
        y = jnp.dot(x.astype(cd), w.astype(cd), preferred_element_type=f32)
        return y if b is None else y + b

    p = p.astype(f32)
    m3 = m.astype(f32)[..., None]
    w_pos, b_pos = flat[0], flat[1]
    blk = flat[2:27]
    w_c, b_c = flat[27], flat[28]

    def block(x, w0, b0, w1, b1, ws):
        net = lin(_relu(x), w0, b0)
        dx = lin(_relu(net), w1, b1)
        return lin(x, ws) + dx

    net = lin(p, w_pos, b_pos)
    net = block(net, *blk[0:5])
    for i in range(1, 5):
        pooled = jnp.sum(net * m3, axis=1, keepdims=True)
        x = jnp.concatenate([net, jnp.broadcast_to(pooled, net.shape)], axis=2)
        net = block(x, *blk[5 * i:5 * i + 5])
    ret = jnp.sum(net * m3, axis=1)
    return lin(_relu(ret), w_c, b_c)


if __name__ == "__main__":
    key = jax.random.PRNGKey(0)
    kp, kd, km = jax.random.split(key, 3)
    B, N = 16, 32                                 # -> G=8, 256 rows/step, grid=(2,)

    flat = init_params(kp)
    p = jax.random.normal(kd, (B, N, DIM), jnp.float32)
    m = (jax.random.uniform(km, (B, N)) > 0.3).astype(jnp.float32)   # point mask

    # f32 compute path.  (TPU default matmul precision is bf16-pass based, so
    # the structural re-ordering vs. the reference still gives ~1e-3 diffs.)
    out32 = jax.block_until_ready(
        resnet_pointnet_masked(p, m, flat, compute_dtype=jnp.float32))
    ref32 = ref_forward(flat, p, m, compute_dtype=jnp.float32)
    np.testing.assert_allclose(np.asarray(out32), np.asarray(ref32),
                               rtol=3e-2, atol=3e-2)

    # bf16 compute path (recommended on v6e/v7x) vs. a bf16-quantized reference.
    outbf = jax.block_until_ready(
        resnet_pointnet_masked(p, m, flat, compute_dtype=jnp.bfloat16))
    refbf = ref_forward(flat, p, m, compute_dtype=jnp.bfloat16)
    np.testing.assert_allclose(np.asarray(outbf), np.asarray(refbf),
                               rtol=3e-2, atol=3e-2)

    print("KERNEL_OK")
</pallas_src>

<mosaic_0001>
module attributes {stable_mosaic.version = 11 : i64} {
  func.func @_pointnet_kernel(%arg0: i32, %arg1: memref<1x256x8xf32, #tpu.memory_space<vmem>>, %arg2: memref<8x256xf32, #tpu.memory_space<vmem>>, %arg3: memref<256x8xf32, #tpu.memory_space<vmem>>, %arg4: memref<8x64xf32, #tpu.memory_space<vmem>>, %arg5: memref<1x64xf32, #tpu.memory_space<vmem>>, %arg6: memref<5x64x32xf32, #tpu.memory_space<vmem>>, %arg7: memref<5x64x32xf32, #tpu.memory_space<vmem>>, %arg8: memref<5x32x32xf32, #tpu.memory_space<vmem>>, %arg9: memref<10x32xf32, #tpu.memory_space<vmem>>, %arg10: memref<32x16xf32, #tpu.memory_space<vmem>>, %arg11: memref<1x16xf32, #tpu.memory_space<vmem>>, %arg12: memref<1x8x16xf32, #tpu.memory_space<vmem>>) attributes {dimension_semantics = [#tpu.dimension_semantics<parallel>], iteration_bounds = array<i64: 2>, scalar_prefetch = 0 : i64, scratch_operands = 0 : i64, tpu.core_type = #tpu.core_type<tc>, window_params = [{transform_indices = @transform_0, window_bounds = array<i64: 1, 256, 8>}, {pipeline_mode = #tpu.pipeline_mode<synchronous>, transform_indices = @transform_1, window_bounds = array<i64: 8, 256>}, {pipeline_mode = #tpu.pipeline_mode<synchronous>, transform_indices = @transform_2, window_bounds = array<i64: 256, 8>}, {pipeline_mode = #tpu.pipeline_mode<synchronous>, transform_indices = @transform_3, window_bounds = array<i64: 8, 64>}, {pipeline_mode = #tpu.pipeline_mode<synchronous>, transform_indices = @transform_4, window_bounds = array<i64: 1, 64>}, {pipeline_mode = #tpu.pipeline_mode<synchronous>, transform_indices = @transform_5, window_bounds = array<i64: 5, 64, 32>}, {pipeline_mode = #tpu.pipeline_mode<synchronous>, transform_indices = @transform_6, window_bounds = array<i64: 5, 64, 32>}, {pipeline_mode = #tpu.pipeline_mode<synchronous>, transform_indices = @transform_7, window_bounds = array<i64: 5, 32, 32>}, {pipeline_mode = #tpu.pipeline_mode<synchronous>, transform_indices = @transform_8, window_bounds = array<i64: 10, 32>}, {pipeline_mode = #tpu.pipeline_mode<synchronous>, transform_indices = @transform_9, window_bounds = array<i64: 32, 16>}, {pipeline_mode = #tpu.pipeline_mode<synchronous>, transform_indices = @transform_10, window_bounds = array<i64: 1, 16>}, {transform_indices = @transform_11, window_bounds = array<i64: 1, 8, 16>}]} {
    %c0 = arith.constant 0 : index
    %c0_0 = arith.constant 0 : index
    %c0_1 = arith.constant 0 : index
    %0 = vector.load %arg1[%c0, %c0_0, %c0_1] : memref<1x256x8xf32, #tpu.memory_space<vmem>>, vector<1x256x8xf32>
    %1 = vector.shape_cast %0 : vector<1x256x8xf32> to vector<256x8xf32>
    %2 = vector.extract_strided_slice %1 {offsets = [0, 3], sizes = [256, 1], strides = [1, 1]} : vector<256x8xf32> to vector<256x1xf32>
    %c0_2 = arith.constant 0 : index
    %c0_3 = arith.constant 0 : index
    %3 = vector.load %arg2[%c0_2, %c0_3] : memref<8x256xf32, #tpu.memory_space<vmem>>, vector<8x256xf32>
    %c0_4 = arith.constant 0 : index
    %c0_5 = arith.constant 0 : index
    %4 = vector.load %arg3[%c0_4, %c0_5] : memref<256x8xf32, #tpu.memory_space<vmem>>, vector<256x8xf32>
    %c0_6 = arith.constant 0 : index
    %c0_7 = arith.constant 0 : index
    %5 = vector.load %arg4[%c0_6, %c0_7] : memref<8x64xf32, #tpu.memory_space<vmem>>, vector<8x64xf32>
    %cst = arith.constant dense<0.000000e+00> : vector<256x64xf32>
    %6 = tpu.matmul %1, %5, %cst {dimension_numbers = #tpu.dot_dimension_numbers<[1], [0], [0], [1], [0, 0, 1, 1], [], []>} : vector<256x8xf32>, vector<8x64xf32>, vector<256x64xf32> -> vector<256x64xf32>
    %c0_8 = arith.constant 0 : index
    %c0_9 = arith.constant 0 : index
    %7 = vector.load %arg5[%c0_8, %c0_9] : memref<1x64xf32, #tpu.memory_space<vmem>>, vector<1x64xf32>
    %8 = vector.broadcast %7 : vector<1x64xf32> to vector<256x64xf32>
    %9 = arith.addf %6, %8 : vector<256x64xf32>
    %cst_10 = arith.constant 0.000000e+00 : f32
    %10 = vector.broadcast %cst_10 : f32 to vector<256x64xf32>
    %11 = arith.maximumf %9, %10 : vector<256x64xf32>
    %c0_11 = arith.constant 0 : index
    %c0_12 = arith.constant 0 : index
    %c0_13 = arith.constant 0 : index
    %12 = vector.load %arg6[%c0_11, %c0_12, %c0_13] : memref<5x64x32xf32, #tpu.memory_space<vmem>>, vector<1x64x32xf32>
    %13 = vector.shape_cast %12 : vector<1x64x32xf32> to vector<64x32xf32>
    %cst_14 = arith.constant dense<0.000000e+00> : vector<256x32xf32>
    %14 = tpu.matmul %11, %13, %cst_14 {dimension_numbers = #tpu.dot_dimension_numbers<[1], [0], [0], [1], [0, 0, 1, 1], [], []>} : vector<256x64xf32>, vector<64x32xf32>, vector<256x32xf32> -> vector<256x32xf32>
    %c0_15 = arith.constant 0 : index
    %c0_16 = arith.constant 0 : index
    %15 = vector.load %arg9[%c0_15, %c0_16] : memref<10x32xf32, #tpu.memory_space<vmem>>, vector<1x32xf32>
    %16 = vector.broadcast %15 : vector<1x32xf32> to vector<256x32xf32>
    %17 = arith.addf %14, %16 : vector<256x32xf32>
    %cst_17 = arith.constant 0.000000e+00 : f32
    %18 = vector.broadcast %cst_17 : f32 to vector<256x32xf32>
    %19 = arith.maximumf %17, %18 : vector<256x32xf32>
    %c0_18 = arith.constant 0 : index
    %c0_19 = arith.constant 0 : index
    %c0_20 = arith.constant 0 : index
    %20 = vector.load %arg8[%c0_18, %c0_19, %c0_20] : memref<5x32x32xf32, #tpu.memory_space<vmem>>, vector<1x32x32xf32>
    %21 = vector.shape_cast %20 : vector<1x32x32xf32> to vector<32x32xf32>
    %cst_21 = arith.constant dense<0.000000e+00> : vector<256x32xf32>
    %22 = tpu.matmul %19, %21, %cst_21 {dimension_numbers = #tpu.dot_dimension_numbers<[1], [0], [0], [1], [0, 0, 1, 1], [], []>} : vector<256x32xf32>, vector<32x32xf32>, vector<256x32xf32> -> vector<256x32xf32>
    %c1 = arith.constant 1 : index
    %c0_22 = arith.constant 0 : index
    %23 = vector.load %arg9[%c1, %c0_22] : memref<10x32xf32, #tpu.memory_space<vmem>>, vector<1x32xf32>
    %24 = vector.broadcast %23 : vector<1x32xf32> to vector<256x32xf32>
    %25 = arith.addf %22, %24 : vector<256x32xf32>
    %c0_23 = arith.constant 0 : index
    %c0_24 = arith.constant 0 : index
    %c0_25 = arith.constant 0 : index
    %26 = vector.load %arg7[%c0_23, %c0_24, %c0_25] : memref<5x64x32xf32, #tpu.memory_space<vmem>>, vector<1x64x32xf32>
    %27 = vector.shape_cast %26 : vector<1x64x32xf32> to vector<64x32xf32>
    %cst_26 = arith.constant dense<0.000000e+00> : vector<256x32xf32>
    %28 = tpu.matmul %9, %27, %cst_26 {dimension_numbers = #tpu.dot_dimension_numbers<[1], [0], [0], [1], [0, 0, 1, 1], [], []>} : vector<256x64xf32>, vector<64x32xf32>, vector<256x32xf32> -> vector<256x32xf32>
    %29 = arith.addf %28, %25 : vector<256x32xf32>
    %30 = vector.broadcast %2 : vector<256x1xf32> to vector<256x32xf32>
    %31 = arith.mulf %29, %30 : vector<256x32xf32>
    %cst_27 = arith.constant dense<0.000000e+00> : vector<8x32xf32>
    %32 = tpu.matmul %3, %31, %cst_27 {dimension_numbers = #tpu.dot_dimension_numbers<[1], [0], [0], [1], [0, 0, 1, 1], [], []>} : vector<8x256xf32>, vector<256x32xf32>, vector<8x32xf32> -> vector<8x32xf32>
    %c2 = arith.constant 2 : index
    %c0_28 = arith.constant 0 : index
    %33 = vector.load %arg9[%c2, %c0_28] : memref<10x32xf32, #tpu.memory_space<vmem>>, vector<1x32xf32>
    %c3 = arith.constant 3 : index
    %c0_29 = arith.constant 0 : index
    %34 = vector.load %arg9[%c3, %c0_29] : memref<10x32xf32, #tpu.memory_space<vmem>>, vector<1x32xf32>
    %cst_30 = arith.constant 0.000000e+00 : f32
    %35 = vector.broadcast %cst_30 : f32 to vector<256x32xf32>
    %36 = arith.maximumf %29, %35 : vector<256x32xf32>
    %c1_31 = arith.constant 1 : index
    %c0_32 = arith.constant 0 : index
    %c0_33 = arith.constant 0 : index
    %37 = vector.load %arg6[%c1_31, %c0_32, %c0_33] : memref<5x64x32xf32, #tpu.memory_space<vmem>>, vector<1x32x32xf32>
    %38 = vector.shape_cast %37 : vector<1x32x32xf32> to vector<32x32xf32>
    %cst_34 = arith.constant dense<0.000000e+00> : vector<256x32xf32>
    %39 = tpu.matmul %36, %38, %cst_34 {dimension_numbers = #tpu.dot_dimension_numbers<[1], [0], [0], [1], [0, 0, 1, 1], [], []>} : vector<256x32xf32>, vector<32x32xf32>, vector<256x32xf32> -> vector<256x32xf32>
    %cst_35 = arith.constant 0.000000e+00 : f32
    %40 = vector.broadcast %cst_35 : f32 to vector<8x32xf32>
    %41 = arith.maximumf %32, %40 : vector<8x32xf32>
    %c1_36 = arith.constant 1 : index
    %c32 = arith.constant 32 : index
    %c0_37 = arith.constant 0 : index
    %42 = vector.load %arg6[%c1_36, %c32, %c0_37] : memref<5x64x32xf32, #tpu.memory_space<vmem>>, vector<1x32x32xf32>
    %43 = vector.shape_cast %42 : vector<1x32x32xf32> to vector<32x32xf32>
    %cst_38 = arith.constant dense<0.000000e+00> : vector<8x32xf32>
    %44 = tpu.matmul %41, %43, %cst_38 {dimension_numbers = #tpu.dot_dimension_numbers<[1], [0], [0], [1], [0, 0, 1, 1], [], []>} : vector<8x32xf32>, vector<32x32xf32>, vector<8x32xf32> -> vector<8x32xf32>
    %cst_39 = arith.constant dense<0.000000e+00> : vector<256x32xf32>
    %45 = tpu.matmul %4, %44, %cst_39 {dimension_numbers = #tpu.dot_dimension_numbers<[1], [0], [0], [1], [0, 0, 1, 1], [], []>} : vector<256x8xf32>, vector<8x32xf32>, vector<256x32xf32> -> vector<256x32xf32>
    %46 = arith.addf %39, %45 : vector<256x32xf32>
    %47 = vector.broadcast %33 : vector<1x32xf32> to vector<256x32xf32>
    %48 = arith.addf %46, %47 : vector<256x32xf32>
    %cst_40 = arith.constant 0.000000e+00 : f32
    %49 = vector.broadcast %cst_40 : f32 to vector<256x32xf32>
    %50 = arith.maximumf %48, %49 : vector<256x32xf32>
    %c1_41 = arith.constant 1 : index
    %c0_42 = arith.constant 0 : index
    %c0_43 = arith.constant 0 : index
    %51 = vector.load %arg8[%c1_41, %c0_42, %c0_43] : memref<5x32x32xf32, #tpu.memory_space<vmem>>, vector<1x32x32xf32>
    %52 = vector.shape_cast %51 : vector<1x32x32xf32> to vector<32x32xf32>
    %cst_44 = arith.constant dense<0.000000e+00> : vector<256x32xf32>
    %53 = tpu.matmul %50, %52, %cst_44 {dimension_numbers = #tpu.dot_dimension_numbers<[1], [0], [0], [1], [0, 0, 1, 1], [], []>} : vector<256x32xf32>, vector<32x32xf32>, vector<256x32xf32> -> vector<256x32xf32>
    %54 = vector.broadcast %34 : vector<1x32xf32> to vector<256x32xf32>
    %55 = arith.addf %53, %54 : vector<256x32xf32>
    %c1_45 = arith.constant 1 : index
    %c0_46 = arith.constant 0 : index
    %c0_47 = arith.constant 0 : index
    %56 = vector.load %arg7[%c1_45, %c0_46, %c0_47] : memref<5x64x32xf32, #tpu.memory_space<vmem>>, vector<1x32x32xf32>
    %57 = vector.shape_cast %56 : vector<1x32x32xf32> to vector<32x32xf32>
    %cst_48 = arith.constant dense<0.000000e+00> : vector<256x32xf32>
    %58 = tpu.matmul %29, %57, %cst_48 {dimension_numbers = #tpu.dot_dimension_numbers<[1], [0], [0], [1], [0, 0, 1, 1], [], []>} : vector<256x32xf32>, vector<32x32xf32>, vector<256x32xf32> -> vector<256x32xf32>
    %c1_49 = arith.constant 1 : index
    %c32_50 = arith.constant 32 : index
    %c0_51 = arith.constant 0 : index
    %59 = vector.load %arg7[%c1_49, %c32_50, %c0_51] : memref<5x64x32xf32, #tpu.memory_space<vmem>>, vector<1x32x32xf32>
    %60 = vector.shape_cast %59 : vector<1x32x32xf32> to vector<32x32xf32>
    %cst_52 = arith.constant dense<0.000000e+00> : vector<8x32xf32>
    %61 = tpu.matmul %32, %60, %cst_52 {dimension_numbers = #tpu.dot_dimension_numbers<[1], [0], [0], [1], [0, 0, 1, 1], [], []>} : vector<8x32xf32>, vector<32x32xf32>, vector<8x32xf32> -> vector<8x32xf32>
    %cst_53 = arith.constant dense<0.000000e+00> : vector<256x32xf32>
    %62 = tpu.matmul %4, %61, %cst_53 {dimension_numbers = #tpu.dot_dimension_numbers<[1], [0], [0], [1], [0, 0, 1, 1], [], []>} : vector<256x8xf32>, vector<8x32xf32>, vector<256x32xf32> -> vector<256x32xf32>
    %63 = arith.addf %58, %62 : vector<256x32xf32>
    %64 = arith.addf %63, %55 : vector<256x32xf32>
    %65 = vector.broadcast %2 : vector<256x1xf32> to vector<256x32xf32>
    %66 = arith.mulf %64, %65 : vector<256x32xf32>
    %cst_54 = arith.constant dense<0.000000e+00> : vector<8x32xf32>
    %67 = tpu.matmul %3, %66, %cst_54 {dimension_numbers = #tpu.dot_dimension_numbers<[1], [0], [0], [1], [0, 0, 1, 1], [], []>} : vector<8x256xf32>, vector<256x32xf32>, vector<8x32xf32> -> vector<8x32xf32>
    %c4 = arith.constant 4 : index
    %c0_55 = arith.constant 0 : index
    %68 = vector.load %arg9[%c4, %c0_55] : memref<10x32xf32, #tpu.memory_space<vmem>>, vector<1x32xf32>
    %c5 = arith.constant 5 : index
    %c0_56 = arith.constant 0 : index
    %69 = vector.load %arg9[%c5, %c0_56] : memref<10x32xf32, #tpu.memory_space<vmem>>, vector<1x32xf32>
    %cst_57 = arith.constant 0.000000e+00 : f32
    %70 = vector.broadcast %cst_57 : f32 to vector<256x32xf32>
    %71 = arith.maximumf %64, %70 : vector<256x32xf32>
    %c2_58 = arith.constant 2 : index
    %c0_59 = arith.constant 0 : index
    %c0_60 = arith.constant 0 : index
    %72 = vector.load %arg6[%c2_58, %c0_59, %c0_60] : memref<5x64x32xf32, #tpu.memory_space<vmem>>, vector<1x32x32xf32>
    %73 = vector.shape_cast %72 : vector<1x32x32xf32> to vector<32x32xf32>
    %cst_61 = arith.constant dense<0.000000e+00> : vector<256x32xf32>
    %74 = tpu.matmul %71, %73, %cst_61 {dimension_numbers = #tpu.dot_dimension_numbers<[1], [0], [0], [1], [0, 0, 1, 1], [], []>} : vector<256x32xf32>, vector<32x32xf32>, vector<256x32xf32> -> vector<256x32xf32>
    %cst_62 = arith.constant 0.000000e+00 : f32
    %75 = vector.broadcast %cst_62 : f32 to vector<8x32xf32>
    %76 = arith.maximumf %67, %75 : vector<8x32xf32>
    %c2_63 = arith.constant 2 : index
    %c32_64 = arith.constant 32 : index
    %c0_65 = arith.constant 0 : index
    %77 = vector.load %arg6[%c2_63, %c32_64, %c0_65] : memref<5x64x32xf32, #tpu.memory_space<vmem>>, vector<1x32x32xf32>
    %78 = vector.shape_cast %77 : vector<1x32x32xf32> to vector<32x32xf32>
    %cst_66 = arith.constant dense<0.000000e+00> : vector<8x32xf32>
    %79 = tpu.matmul %76, %78, %cst_66 {dimension_numbers = #tpu.dot_dimension_numbers<[1], [0], [0], [1], [0, 0, 1, 1], [], []>} : vector<8x32xf32>, vector<32x32xf32>, vector<8x32xf32> -> vector<8x32xf32>
    %cst_67 = arith.constant dense<0.000000e+00> : vector<256x32xf32>
    %80 = tpu.matmul %4, %79, %cst_67 {dimension_numbers = #tpu.dot_dimension_numbers<[1], [0], [0], [1], [0, 0, 1, 1], [], []>} : vector<256x8xf32>, vector<8x32xf32>, vector<256x32xf32> -> vector<256x32xf32>
    %81 = arith.addf %74, %80 : vector<256x32xf32>
    %82 = vector.broadcast %68 : vector<1x32xf32> to vector<256x32xf32>
    %83 = arith.addf %81, %82 : vector<256x32xf32>
    %cst_68 = arith.constant 0.000000e+00 : f32
    %84 = vector.broadcast %cst_68 : f32 to vector<256x32xf32>
    %85 = arith.maximumf %83, %84 : vector<256x32xf32>
    %c2_69 = arith.constant 2 : index
    %c0_70 = arith.constant 0 : index
    %c0_71 = arith.constant 0 : index
    %86 = vector.load %arg8[%c2_69, %c0_70, %c0_71] : memref<5x32x32xf32, #tpu.memory_space<vmem>>, vector<1x32x32xf32>
    %87 = vector.shape_cast %86 : vector<1x32x32xf32> to vector<32x32xf32>
    %cst_72 = arith.constant dense<0.000000e+00> : vector<256x32xf32>
    %88 = tpu.matmul %85, %87, %cst_72 {dimension_numbers = #tpu.dot_dimension_numbers<[1], [0], [0], [1], [0, 0, 1, 1], [], []>} : vector<256x32xf32>, vector<32x32xf32>, vector<256x32xf32> -> vector<256x32xf32>
    %89 = vector.broadcast %69 : vector<1x32xf32> to vector<256x32xf32>
    %90 = arith.addf %88, %89 : vector<256x32xf32>
    %c2_73 = arith.constant 2 : index
    %c0_74 = arith.constant 0 : index
    %c0_75 = arith.constant 0 : index
    %91 = vector.load %arg7[%c2_73, %c0_74, %c0_75] : memref<5x64x32xf32, #tpu.memory_space<vmem>>, vector<1x32x32xf32>
    %92 = vector.shape_cast %91 : vector<1x32x32xf32> to vector<32x32xf32>
    %cst_76 = arith.constant dense<0.000000e+00> : vector<256x32xf32>
    %93 = tpu.matmul %64, %92, %cst_76 {dimension_numbers = #tpu.dot_dimension_numbers<[1], [0], [0], [1], [0, 0, 1, 1], [], []>} : vector<256x32xf32>, vector<32x32xf32>, vector<256x32xf32> -> vector<256x32xf32>
    %c2_77 = arith.constant 2 : index
    %c32_78 = arith.constant 32 : index
    %c0_79 = arith.constant 0 : index
    %94 = vector.load %arg7[%c2_77, %c32_78, %c0_79] : memref<5x64x32xf32, #tpu.memory_space<vmem>>, vector<1x32x32xf32>
    %95 = vector.shape_cast %94 : vector<1x32x32xf32> to vector<32x32xf32>
    %cst_80 = arith.constant dense<0.000000e+00> : vector<8x32xf32>
    %96 = tpu.matmul %67, %95, %cst_80 {dimension_numbers = #tpu.dot_dimension_numbers<[1], [0], [0], [1], [0, 0, 1, 1], [], []>} : vector<8x32xf32>, vector<32x32xf32>, vector<8x32xf32> -> vector<8x32xf32>
    %cst_81 = arith.constant dense<0.000000e+00> : vector<256x32xf32>
    %97 = tpu.matmul %4, %96, %cst_81 {dimension_numbers = #tpu.dot_dimension_numbers<[1], [0], [0], [1], [0, 0, 1, 1], [], []>} : vector<256x8xf32>, vector<8x32xf32>, vector<256x32xf32> -> vector<256x32xf32>
    %98 = arith.addf %93, %97 : vector<256x32xf32>
    %99 = arith.addf %98, %90 : vector<256x32xf32>
    %100 = vector.broadcast %2 : vector<256x1xf32> to vector<256x32xf32>
    %101 = arith.mulf %99, %100 : vector<256x32xf32>
    %cst_82 = arith.constant dense<0.000000e+00> : vector<8x32xf32>
    %102 = tpu.matmul %3, %101, %cst_82 {dimension_numbers = #tpu.dot_dimension_numbers<[1], [0], [0], [1], [0, 0, 1, 1], [], []>} : vector<8x256xf32>, vector<256x32xf32>, vector<8x32xf32> -> vector<8x32xf32>
    %c6 = arith.constant 6 : index
    %c0_83 = arith.constant 0 : index
    %103 = vector.load %arg9[%c6, %c0_83] : memref<10x32xf32, #tpu.memory_space<vmem>>, vector<1x32xf32>
    %c7 = arith.constant 7 : index
    %c0_84 = arith.constant 0 : index
    %104 = vector.load %arg9[%c7, %c0_84] : memref<10x32xf32, #tpu.memory_space<vmem>>, vector<1x32xf32>
    %cst_85 = arith.constant 0.000000e+00 : f32
    %105 = vector.broadcast %cst_85 : f32 to vector<256x32xf32>
    %106 = arith.maximumf %99, %105 : vector<256x32xf32>
    %c3_86 = arith.constant 3 : index
    %c0_87 = arith.constant 0 : index
    %c0_88 = arith.constant 0 : index
    %107 = vector.load %arg6[%c3_86, %c0_87, %c0_88] : memref<5x64x32xf32, #tpu.memory_space<vmem>>, vector<1x32x32xf32>
    %108 = vector.shape_cast %107 : vector<1x32x32xf32> to vector<32x32xf32>
    %cst_89 = arith.constant dense<0.000000e+00> : vector<256x32xf32>
    %109 = tpu.matmul %106, %108, %cst_89 {dimension_numbers = #tpu.dot_dimension_numbers<[1], [0], [0], [1], [0, 0, 1, 1], [], []>} : vector<256x32xf32>, vector<32x32xf32>, vector<256x32xf32> -> vector<256x32xf32>
    %cst_90 = arith.constant 0.000000e+00 : f32
    %110 = vector.broadcast %cst_90 : f32 to vector<8x32xf32>
    %111 = arith.maximumf %102, %110 : vector<8x32xf32>
    %c3_91 = arith.constant 3 : index
    %c32_92 = arith.constant 32 : index
    %c0_93 = arith.constant 0 : index
    %112 = vector.load %arg6[%c3_91, %c32_92, %c0_93] : memref<5x64x32xf32, #tpu.memory_space<vmem>>, vector<1x32x32xf32>
    %113 = vector.shape_cast %112 : vector<1x32x32xf32> to vector<32x32xf32>
    %cst_94 = arith.constant dense<0.000000e+00> : vector<8x32xf32>
    %114 = tpu.matmul %111, %113, %cst_94 {dimension_numbers = #tpu.dot_dimension_numbers<[1], [0], [0], [1], [0, 0, 1, 1], [], []>} : vector<8x32xf32>, vector<32x32xf32>, vector<8x32xf32> -> vector<8x32xf32>
    %cst_95 = arith.constant dense<0.000000e+00> : vector<256x32xf32>
    %115 = tpu.matmul %4, %114, %cst_95 {dimension_numbers = #tpu.dot_dimension_numbers<[1], [0], [0], [1], [0, 0, 1, 1], [], []>} : vector<256x8xf32>, vector<8x32xf32>, vector<256x32xf32> -> vector<256x32xf32>
    %116 = arith.addf %109, %115 : vector<256x32xf32>
    %117 = vector.broadcast %103 : vector<1x32xf32> to vector<256x32xf32>
    %118 = arith.addf %116, %117 : vector<256x32xf32>
    %cst_96 = arith.constant 0.000000e+00 : f32
    %119 = vector.broadcast %cst_96 : f32 to vector<256x32xf32>
    %120 = arith.maximumf %118, %119 : vector<256x32xf32>
    %c3_97 = arith.constant 3 : index
    %c0_98 = arith.constant 0 : index
    %c0_99 = arith.constant 0 : index
    %121 = vector.load %arg8[%c3_97, %c0_98, %c0_99] : memref<5x32x32xf32, #tpu.memory_space<vmem>>, vector<1x32x32xf32>
    %122 = vector.shape_cast %121 : vector<1x32x32xf32> to vector<32x32xf32>
    %cst_100 = arith.constant dense<0.000000e+00> : vector<256x32xf32>
    %123 = tpu.matmul %120, %122, %cst_100 {dimension_numbers = #tpu.dot_dimension_numbers<[1], [0], [0], [1], [0, 0, 1, 1], [], []>} : vector<256x32xf32>, vector<32x32xf32>, vector<256x32xf32> -> vector<256x32xf32>
    %124 = vector.broadcast %104 : vector<1x32xf32> to vector<256x32xf32>
    %125 = arith.addf %123, %124 : vector<256x32xf32>
    %c3_101 = arith.constant 3 : index
    %c0_102 = arith.constant 0 : index
    %c0_103 = arith.constant 0 : index
    %126 = vector.load %arg7[%c3_101, %c0_102, %c0_103] : memref<5x64x32xf32, #tpu.memory_space<vmem>>, vector<1x32x32xf32>
    %127 = vector.shape_cast %126 : vector<1x32x32xf32> to vector<32x32xf32>
    %cst_104 = arith.constant dense<0.000000e+00> : vector<256x32xf32>
    %128 = tpu.matmul %99, %127, %cst_104 {dimension_numbers = #tpu.dot_dimension_numbers<[1], [0], [0], [1], [0, 0, 1, 1], [], []>} : vector<256x32xf32>, vector<32x32xf32>, vector<256x32xf32> -> vector<256x32xf32>
    %c3_105 = arith.constant 3 : index
    %c32_106 = arith.constant 32 : index
    %c0_107 = arith.constant 0 : index
    %129 = vector.load %arg7[%c3_105, %c32_106, %c0_107] : memref<5x64x32xf32, #tpu.memory_space<vmem>>, vector<1x32x32xf32>
    %130 = vector.shape_cast %129 : vector<1x32x32xf32> to vector<32x32xf32>
    %cst_108 = arith.constant dense<0.000000e+00> : vector<8x32xf32>
    %131 = tpu.matmul %102, %130, %cst_108 {dimension_numbers = #tpu.dot_dimension_numbers<[1], [0], [0], [1], [0, 0, 1, 1], [], []>} : vector<8x32xf32>, vector<32x32xf32>, vector<8x32xf32> -> vector<8x32xf32>
    %cst_109 = arith.constant dense<0.000000e+00> : vector<256x32xf32>
    %132 = tpu.matmul %4, %131, %cst_109 {dimension_numbers = #tpu.dot_dimension_numbers<[1], [0], [0], [1], [0, 0, 1, 1], [], []>} : vector<256x8xf32>, vector<8x32xf32>, vector<256x32xf32> -> vector<256x32xf32>
    %133 = arith.addf %128, %132 : vector<256x32xf32>
    %134 = arith.addf %133, %125 : vector<256x32xf32>
    %135 = vector.broadcast %2 : vector<256x1xf32> to vector<256x32xf32>
    %136 = arith.mulf %134, %135 : vector<256x32xf32>
    %cst_110 = arith.constant dense<0.000000e+00> : vector<8x32xf32>
    %137 = tpu.matmul %3, %136, %cst_110 {dimension_numbers = #tpu.dot_dimension_numbers<[1], [0], [0], [1], [0, 0, 1, 1], [], []>} : vector<8x256xf32>, vector<256x32xf32>, vector<8x32xf32> -> vector<8x32xf32>
    %c8 = arith.constant 8 : index
    %c0_111 = arith.constant 0 : index
    %138 = vector.load %arg9[%c8, %c0_111] : memref<10x32xf32, #tpu.memory_space<vmem>>, vector<1x32xf32>
    %c9 = arith.constant 9 : index
    %c0_112 = arith.constant 0 : index
    %139 = vector.load %arg9[%c9, %c0_112] : memref<10x32xf32, #tpu.memory_space<vmem>>, vector<1x32xf32>
    %cst_113 = arith.constant 0.000000e+00 : f32
    %140 = vector.broadcast %cst_113 : f32 to vector<256x32xf32>
    %141 = arith.maximumf %134, %140 : vector<256x32xf32>
    %c4_114 = arith.constant 4 : index
    %c0_115 = arith.constant 0 : index
    %c0_116 = arith.constant 0 : index
    %142 = vector.load %arg6[%c4_114, %c0_115, %c0_116] : memref<5x64x32xf32, #tpu.memory_space<vmem>>, vector<1x32x32xf32>
    %143 = vector.shape_cast %142 : vector<1x32x32xf32> to vector<32x32xf32>
    %cst_117 = arith.constant dense<0.000000e+00> : vector<256x32xf32>
    %144 = tpu.matmul %141, %143, %cst_117 {dimension_numbers = #tpu.dot_dimension_numbers<[1], [0], [0], [1], [0, 0, 1, 1], [], []>} : vector<256x32xf32>, vector<32x32xf32>, vector<256x32xf32> -> vector<256x32xf32>
    %cst_118 = arith.constant 0.000000e+00 : f32
    %145 = vector.broadcast %cst_118 : f32 to vector<8x32xf32>
    %146 = arith.maximumf %137, %145 : vector<8x32xf32>
    %c4_119 = arith.constant 4 : index
    %c32_120 = arith.constant 32 : index
    %c0_121 = arith.constant 0 : index
    %147 = vector.load %arg6[%c4_119, %c32_120, %c0_121] : memref<5x64x32xf32, #tpu.memory_space<vmem>>, vector<1x32x32xf32>
    %148 = vector.shape_cast %147 : vector<1x32x32xf32> to vector<32x32xf32>
    %cst_122 = arith.constant dense<0.000000e+00> : vector<8x32xf32>
    %149 = tpu.matmul %146, %148, %cst_122 {dimension_numbers = #tpu.dot_dimension_numbers<[1], [0], [0], [1], [0, 0, 1, 1], [], []>} : vector<8x32xf32>, vector<32x32xf32>, vector<8x32xf32> -> vector<8x32xf32>
    %cst_123 = arith.constant dense<0.000000e+00> : vector<256x32xf32>
    %150 = tpu.matmul %4, %149, %cst_123 {dimension_numbers = #tpu.dot_dimension_numbers<[1], [0], [0], [1], [0, 0, 1, 1], [], []>} : vector<256x8xf32>, vector<8x32xf32>, vector<256x32xf32> -> vector<256x32xf32>
    %151 = arith.addf %144, %150 : vector<256x32xf32>
    %152 = vector.broadcast %138 : vector<1x32xf32> to vector<256x32xf32>
    %153 = arith.addf %151, %152 : vector<256x32xf32>
    %cst_124 = arith.constant 0.000000e+00 : f32
    %154 = vector.broadcast %cst_124 : f32 to vector<256x32xf32>
    %155 = arith.maximumf %153, %154 : vector<256x32xf32>
    %c4_125 = arith.constant 4 : index
    %c0_126 = arith.constant 0 : index
    %c0_127 = arith.constant 0 : index
    %156 = vector.load %arg8[%c4_125, %c0_126, %c0_127] : memref<5x32x32xf32, #tpu.memory_space<vmem>>, vector<1x32x32xf32>
    %157 = vector.shape_cast %156 : vector<1x32x32xf32> to vector<32x32xf32>
    %cst_128 = arith.constant dense<0.000000e+00> : vector<256x32xf32>
    %158 = tpu.matmul %155, %157, %cst_128 {dimension_numbers = #tpu.dot_dimension_numbers<[1], [0], [0], [1], [0, 0, 1, 1], [], []>} : vector<256x32xf32>, vector<32x32xf32>, vector<256x32xf32> -> vector<256x32xf32>
    %159 = vector.broadcast %139 : vector<1x32xf32> to vector<256x32xf32>
    %160 = arith.addf %158, %159 : vector<256x32xf32>
    %c4_129 = arith.constant 4 : index
    %c0_130 = arith.constant 0 : index
    %c0_131 = arith.constant 0 : index
    %161 = vector.load %arg7[%c4_129, %c0_130, %c0_131] : memref<5x64x32xf32, #tpu.memory_space<vmem>>, vector<1x32x32xf32>
    %162 = vector.shape_cast %161 : vector<1x32x32xf32> to vector<32x32xf32>
    %cst_132 = arith.constant dense<0.000000e+00> : vector<256x32xf32>
    %163 = tpu.matmul %134, %162, %cst_132 {dimension_numbers = #tpu.dot_dimension_numbers<[1], [0], [0], [1], [0, 0, 1, 1], [], []>} : vector<256x32xf32>, vector<32x32xf32>, vector<256x32xf32> -> vector<256x32xf32>
    %c4_133 = arith.constant 4 : index
    %c32_134 = arith.constant 32 : index
    %c0_135 = arith.constant 0 : index
    %164 = vector.load %arg7[%c4_133, %c32_134, %c0_135] : memref<5x64x32xf32, #tpu.memory_space<vmem>>, vector<1x32x32xf32>
    %165 = vector.shape_cast %164 : vector<1x32x32xf32> to vector<32x32xf32>
    %cst_136 = arith.constant dense<0.000000e+00> : vector<8x32xf32>
    %166 = tpu.matmul %137, %165, %cst_136 {dimension_numbers = #tpu.dot_dimension_numbers<[1], [0], [0], [1], [0, 0, 1, 1], [], []>} : vector<8x32xf32>, vector<32x32xf32>, vector<8x32xf32> -> vector<8x32xf32>
    %cst_137 = arith.constant dense<0.000000e+00> : vector<256x32xf32>
    %167 = tpu.matmul %4, %166, %cst_137 {dimension_numbers = #tpu.dot_dimension_numbers<[1], [0], [0], [1], [0, 0, 1, 1], [], []>} : vector<256x8xf32>, vector<8x32xf32>, vector<256x32xf32> -> vector<256x32xf32>
    %168 = arith.addf %163, %167 : vector<256x32xf32>
    %169 = arith.addf %168, %160 : vector<256x32xf32>
    %170 = vector.broadcast %2 : vector<256x1xf32> to vector<256x32xf32>
    %171 = arith.mulf %169, %170 : vector<256x32xf32>
    %cst_138 = arith.constant dense<0.000000e+00> : vector<8x32xf32>
    %172 = tpu.matmul %3, %171, %cst_138 {dimension_numbers = #tpu.dot_dimension_numbers<[1], [0], [0], [1], [0, 0, 1, 1], [], []>} : vector<8x256xf32>, vector<256x32xf32>, vector<8x32xf32> -> vector<8x32xf32>
    %cst_139 = arith.constant 0.000000e+00 : f32
    %173 = vector.broadcast %cst_139 : f32 to vector<8x32xf32>
    %174 = arith.maximumf %172, %173 : vector<8x32xf32>
    %c0_140 = arith.constant 0 : index
    %c0_141 = arith.constant 0 : index
    %175 = vector.load %arg10[%c0_140, %c0_141] : memref<32x16xf32, #tpu.memory_space<vmem>>, vector<32x16xf32>
    %cst_142 = arith.constant dense<0.000000e+00> : vector<8x16xf32>
    %176 = tpu.matmul %174, %175, %cst_142 {dimension_numbers = #tpu.dot_dimension_numbers<[1], [0], [0], [1], [0, 0, 1, 1], [], []>} : vector<8x32xf32>, vector<32x16xf32>, vector<8x16xf32> -> vector<8x16xf32>
    %c0_143 = arith.constant 0 : index
    %c0_144 = arith.constant 0 : index
    %177 = vector.load %arg11[%c0_143, %c0_144] : memref<1x16xf32, #tpu.memory_space<vmem>>, vector<1x16xf32>
    %178 = vector.broadcast %177 : vector<1x16xf32> to vector<8x16xf32>
    %179 = arith.addf %176, %178 : vector<8x16xf32>
    %c0_145 = arith.constant 0 : index
    %c0_146 = arith.constant 0 : index
    %c0_147 = arith.constant 0 : index
    %180 = vector.load %arg12[%c0_145, %c0_146, %c0_147] : memref<1x8x16xf32, #tpu.memory_space<vmem>>, vector<1x8x16xf32>
    %181 = vector.shape_cast %180 : vector<1x8x16xf32> to vector<8x16xf32>
    %182 = vector.shape_cast %179 : vector<8x16xf32> to vector<1x8x16xf32>
    tpu.vector_store %arg12[%c0_145, %c0_146, %c0_147], %182 {strides = array<i32>} : memref<1x8x16xf32, #tpu.memory_space<vmem>>, vector<1x8x16xf32>,
    return
  }
  func.func @transform_0(%arg0: i32) -> (i32, i32, i32) {
    %c0_i32 = arith.constant 0 : i32
    %c0_i32_0 = arith.constant 0 : i32
    %c0_i32_1 = arith.constant 0 : i32
    return %arg0, %c0_i32, %c0_i32_0 : i32, i32, i32
  }
  func.func @transform_1(%arg0: i32) -> (i32, i32) {
    %c0_i32 = arith.constant 0 : i32
    %c0_i32_0 = arith.constant 0 : i32
    %c0_i32_1 = arith.constant 0 : i32
    return %c0_i32, %c0_i32_0 : i32, i32
  }
  func.func @transform_2(%arg0: i32) -> (i32, i32) {
    %c0_i32 = arith.constant 0 : i32
    %c0_i32_0 = arith.constant 0 : i32
    %c0_i32_1 = arith.constant 0 : i32
    return %c0_i32, %c0_i32_0 : i32, i32
  }
  func.func @transform_3(%arg0: i32) -> (i32, i32) {
    %c0_i32 = arith.constant 0 : i32
    %c0_i32_0 = arith.constant 0 : i32
    %c0_i32_1 = arith.constant 0 : i32
    return %c0_i32, %c0_i32_0 : i32, i32
  }
  func.func @transform_4(%arg0: i32) -> (i32, i32) {
    %c0_i32 = arith.constant 0 : i32
    %c0_i32_0 = arith.constant 0 : i32
    %c0_i32_1 = arith.constant 0 : i32
    return %c0_i32, %c0_i32_0 : i32, i32
  }
  func.func @transform_5(%arg0: i32) -> (i32, i32, i32) {
    %c0_i32 = arith.constant 0 : i32
    %c0_i32_0 = arith.constant 0 : i32
    %c0_i32_1 = arith.constant 0 : i32
    %c0_i32_2 = arith.constant 0 : i32
    return %c0_i32, %c0_i32_0, %c0_i32_1 : i32, i32, i32
  }
  func.func @transform_6(%arg0: i32) -> (i32, i32, i32) {
    %c0_i32 = arith.constant 0 : i32
    %c0_i32_0 = arith.constant 0 : i32
    %c0_i32_1 = arith.constant 0 : i32
    %c0_i32_2 = arith.constant 0 : i32
    return %c0_i32, %c0_i32_0, %c0_i32_1 : i32, i32, i32
  }
  func.func @transform_7(%arg0: i32) -> (i32, i32, i32) {
    %c0_i32 = arith.constant 0 : i32
    %c0_i32_0 = arith.constant 0 : i32
    %c0_i32_1 = arith.constant 0 : i32
    %c0_i32_2 = arith.constant 0 : i32
    return %c0_i32, %c0_i32_0, %c0_i32_1 : i32, i32, i32
  }
  func.func @transform_8(%arg0: i32) -> (i32, i32) {
    %c0_i32 = arith.constant 0 : i32
    %c0_i32_0 = arith.constant 0 : i32
    %c0_i32_1 = arith.constant 0 : i32
    return %c0_i32, %c0_i32_0 : i32, i32
  }
  func.func @transform_9(%arg0: i32) -> (i32, i32) {
    %c0_i32 = arith.constant 0 : i32
    %c0_i32_0 = arith.constant 0 : i32
    %c0_i32_1 = arith.constant 0 : i32
    return %c0_i32, %c0_i32_0 : i32, i32
  }
  func.func @transform_10(%arg0: i32) -> (i32, i32) {
    %c0_i32 = arith.constant 0 : i32
    %c0_i32_0 = arith.constant 0 : i32
    %c0_i32_1 = arith.constant 0 : i32
    return %c0_i32, %c0_i32_0 : i32, i32
  }
  func.func @transform_11(%arg0: i32) -> (i32, i32, i32) {
    %c0_i32 = arith.constant 0 : i32
    %c0_i32_0 = arith.constant 0 : i32
    %c0_i32_1 = arith.constant 0 : i32
    return %arg0, %c0_i32, %c0_i32_0 : i32, i32, i32
  }
}

</mosaic_0001>

<bundles_post_ra>
// kernel: tpu_custom_call.1
= control target key start
LH: loop header
LB: loop body
LE: loop exit
PB: predicated region body
PF: predicated region fallthrough
CT: control target
= control target key end

     0   :  { %s11280_s0 = inlined_call_operand.vmem [shape: f32[2,256,8], index: 0, kind: input, shape index: {}]   ;;  %s11281_s1 = inlined_call_operand.vmem [shape: f32[8,256], index: 1, kind: input, shape index: {}]   ;;  %s11282_s2 = inlined_call_operand.vmem [shape: f32[256,8], index: 2, kind: input, shape index: {}]   ;;  %s11283_s3 = inlined_call_operand.vmem [shape: f32[8,64], index: 3, kind: input, shape index: {}]   ;;  %s11284_s4 = inlined_call_operand.vmem [shape: f32[1,64], index: 4, kind: input, shape index: {}]   ;;  %s11285_s5 = inlined_call_operand.vmem [shape: f32[5,64,32], index: 5, kind: input, shape index: {}]   ;;  %s11286_s6 = inlined_call_operand.vmem [shape: f32[5,64,32], index: 6, kind: input, shape index: {}]   ;;  %s11287_s7 = inlined_call_operand.vmem [shape: f32[5,32,32], index: 7, kind: input, shape index: {}]   ;;  %s11288_s8 = inlined_call_operand.vmem [shape: f32[10,32], index: 8, kind: input, shape index: {}]   ;;  %s11289_s9 = inlined_call_operand.vmem [shape: f32[32,16], index: 9, kind: input, shape index: {}]   ;;  %s11290_s10 = inlined_call_operand.vmem [shape: f32[1,16], index: 10, kind: input, shape index: {}]   ;;  %s11291_s11 = inlined_call_operand.hbm [shape: f32[2,8,16], index: 11, kind: output, shape index: {}]  }
   0x1   :  { %11413 = sst [smem:[#allocation52_spill]] %s11280_s0 }
   0x2   :  { %11414 = sst [smem:[#allocation53_spill]] %s11281_s1 }
   0x3   :  { %11415 = sst [smem:[#allocation54_spill]] %s11282_s2 }
   0x4   :  { %16 = vsyncpa [#allocation3], 0 }
   0x5   :  { %18 = vsyncpa [#allocation3 + $0x1], 0  ;;  %s7451_s17 = smov 0   ;;  %s7453_s18 = smov 0  }
   0x6   :  { %s7455_s19 = smov 0   ;;  %s7457_s20 = smov 0  }
   0x7 LB: > { %s7472_s21 = sadd.s32 4294967295, %s7388_s20   ;;  %s6296_s22 = sadd.s32 4294967294, %s7388_s20   ;;  %s7388_s20 = sphi %s7457_s20, %s11615_s20   ;;  %s7384_s19 = sphi %s7455_s19, %s11614_s19   ;;  %s7380_s18 = sphi %s7453_s18, %s11613_s18   ;;  %s7376_s17 = sphi %s7451_s17, %s11612_s17  }
   0x8   : > { %s7476_s23 = sadd.s32 1, %s7388_s20   ;;  %s267_s24 = sadd.s32 1, %s7384_s19 }
   0x9   : > { %s264_s25 = ssub.s32 %s7388_s20, %s7476_s23  ;;  %p277_p0 = scmp.ne.s32.totalorder %s7384_s19, %s7380_s18 }
   0xa   : > { %p265_p1 = scmp.eq.s32.totalorder %s264_s25, 0  ;;  %p278_p2 = scmp.eq.s32.totalorder %s7472_s21, 1 }
   0xb   : > { %p283_p3 = scmp.ne.s32.totalorder %s7380_s18, %s7376_s17  ;;  %p284_p4 = scmp.eq.s32.totalorder %s6296_s22, 1 }
   0xc   : > { %s7487_s26 = scalar_select %p265_p1, %s7384_s19, %s267_s24  }
   0xd   : > { %p7489_p5 = por %p278_p2, %p277_p0  ;;  %p7493_p6 = por %p284_p4, %p283_p3 }
   0xe   : > { %p6299_p7 = scmp.ge.s32.totalorder %s7388_s20, 1  ;;  %p340_p8 = scmp.lt.s32.totalorder %s7388_s20, 3 }
  0x10   : > { %p341_p9 = pnand %p6299_p7, %p340_p8 }
  0x12   : > { %344 = sbr.rel (%p341_p9) target bundleno = 4699 (0x125b), region = 64 }
  0x17   : > { %v451_v0 = vld [vmem:[%s11283_s3] sm:$0xff]  ;;  %p380_p10 = scmp.lt.s32.totalorder %s7472_s21, 1  ;;  %vm456_vm0 = vcmask 64512   ;;  %s11418_s0 = sld [smem:[#allocation52_spill]]  ;;  %v1173_v14 = vld [vmem:[%s11286_s6 + $0x38] sm:$0xff]  ;;  %v1172_v17 = vld [vmem:[%s11286_s6 + $0x30] sm:$0xff] }
  0x18   : > { %568 = vmatpush.msra.mxu0 %v451_v0  ;;  %7165 = vmatpush.msra.mxu1 %v451_v0  ;;  %v705_v16 = vld [vmem:[%s11285_s5 + $0x38] sm:$0xff]  ;;  %v704_v18 = vld [vmem:[%s11285_s5 + $0x30] sm:$0xff]  ;;  %v1171_v19 = vld [vmem:[%s11286_s6 + $0x28] sm:$0xff]  ;;  %vm708_vm1 = vcmask 523264   ;;  %v7390_v62 = vmov 3   ;;  %vm956_vm2 = vcmask 261120  }
  0x19   : > { %s381_s12 = scalar_select %p380_p10, %s7472_s21, 1  ;;  %1278 = vmatpush.msra.mxu3 %v1173_v14  ;;  %v703_v20 = vld [vmem:[%s11285_s5 + $0x28] sm:$0xff]  ;;  %v1170_v21 = vld [vmem:[%s11286_s6 + $0x20] sm:$0xff]  ;;  %v1169_v24 = vld [vmem:[%s11286_s6 + $0x18] sm:$0xff]  ;;  %7208 = vset.pattern.permute.xlu1 %v7390_v62  ;;  %vm6219_vm3 = vcmask 130048  }
  0x1a   : > { %813 = vmatpush.msrb.mxu1 %v705_v16  ;;  %v702_v23 = vld [vmem:[%s11285_s5 + $0x20] sm:$0xff]  ;;  %v701_v26 = vld [vmem:[%s11285_s5 + $0x18] sm:$0xff]  ;;  %v1168_v27 = vld [vmem:[%s11286_s6 + $0x10] sm:$0xff]  ;;  %7207 = vset.pattern.permute.xlu0 %v7390_v62  ;;  %s11466_s1 = sld [smem:[#allocation53_spill]]  ;;  %s377_s29 = sand.u32 1, %s7380_s18  }
  0x1b   : > { %s7164_s13 = sshll.u32 %s381_s12, 8  ;;  %1279 = vmatpush.msra.mxu3 %v1172_v17  ;;  %v700_v28 = vld [vmem:[%s11285_s5 + $0x10] sm:$0xff]  ;;  %v1167_v29 = vld [vmem:[%s11286_s6 + $0x8] sm:$0xff]  ;;  %v1166_v32 = vld [vmem:[%s11286_s6] sm:$0xff]  ;;  %7209 = vset.pattern.permute.xlu2 %v7390_v62  ;;  %s11478_s2 = sld [smem:[#allocation54_spill]] }
  0x1c   : > { %814 = vmatpush.msrb.mxu1 %v704_v18  ;;  %v699_v31 = vld [vmem:[%s11285_s5 + $0x8] sm:$0xff]  ;;  %v698_v33 = vld [vmem:[%s11285_s5] sm:$0xff]  ;;  %s7161_s30 = sshll.u32 %s7472_s21, 3 }
  0x1d   : > { %s7507_s16 = scalar_lea.vmem %s11418_s0, %s7164_s13  ;;  %1280 = vmatpush.msra.mxu3 %v1171_v19  ;;  %v7657_v37 = vld [vmem:[%s11284_s4] ss:$0 sm:$0xff]  ;;  %s6232_s14 = scalar_lea.hbm %s11291_s11, %s7161_s30 }
  0x1e   : > { %v7510_v1 = vld [vmem:[%s7507_s16] sm:$0xff]  ;;  %v7515_v2 = vld [vmem:[%s7507_s16 + $0x8] sm:$0xff]  ;;  %v7520_v3 = vld [vmem:[%s7507_s16 + $0x10] sm:$0xff]  ;;  %815 = vmatpush.msrb.mxu1 %v703_v20  ;;  %s6236_s25 = sshll.u32 %s6232_s14, 4  ;;  %s6237_s25 = int_to_ptr.hbm [resolvable:$true] %s6236_s25 }
  0x1f   : > { %6303 = vmatmul.msk.f32.vlgmr.msra.gmra.mxu0 %vm456_vm0, %v7510_v1  ;;  %v7525_v4 = vld [vmem:[%s7507_s16 + $0x18] sm:$0xff]  ;;  %v7530_v5 = vld [vmem:[%s7507_s16 + $0x20] sm:$0xff]  ;;  %v7535_v6 = vld [vmem:[%s7507_s16 + $0x28] sm:$0xff]  ;;  %1281 = vmatpush.msra.mxu3 %v1170_v21  ;;  %s7340_s21 = sshra.s32 %s6237_s25, 4  ;;  %s7341_s21 = int_to_ptr.hbm [resolvable:$true] %s7340_s21 }
  0x20   : > { %v7540_v7 = vld [vmem:[%s7507_s16 + $0x30] sm:$0xff]  ;;  %v7545_v8 = vld [vmem:[%s7507_s16 + $0x38] sm:$0xff]  ;;  %v7550_v9 = vld [vmem:[%s7507_s16 + $0x40] sm:$0xff]  ;;  %816 = vmatpush.msrb.mxu1 %v702_v23  ;;  %p7347_p0 = scmp.lt.s32.totalorder %s7341_s21, %s11291_s11 }
  0x21   : > { %v7555_v10 = vld [vmem:[%s7507_s16 + $0xe0] sm:$0xff]  ;;  %v7560_v11 = vld [vmem:[%s7507_s16 + $0x48] sm:$0xff]  ;;  %v7570_v13 = vld [vmem:[%s7507_s16 + $0x50] sm:$0xff]  ;;  %1282 = vmatpush.msra.mxu3 %v1169_v24 }
  0x22   : > { %6331 = vmatmul.msk.f32.vlgmr.msra.gmra.mxu1 %vm456_vm0, %v7555_v10  ;;  %v7565_v12 = vld [vmem:[%s7507_s16 + $0xe8] sm:$0xff]  ;;  %v7578_v15 = vld [vmem:[%s7507_s16 + $0xf0] sm:$0xff]  ;;  %v7601_v22 = vld [vmem:[%s7507_s16 + $0x58] sm:$0xff]  ;;  %1496 = vperm.xlu2 %7209, %v7555_v10  }
  0x23   : > { %v7612_v25 = vld [vmem:[%s7507_s16 + $0xf8] sm:$0xff]  ;;  %817 = vmatpush.msrb.mxu1 %v701_v26  ;;  %1283 = vmatpush.msra.mxu3 %v1168_v27  ;;  %v7629_v30 = vld [vmem:[%s7507_s16 + $0x60] sm:$0xff]  ;;  %v7643_v34 = vld [vmem:[%s7507_s16 + $0x68] sm:$0xff] }
  0x24   : > { %v7648_v35 = vld [vmem:[%s7507_s16 + $0x70] sm:$0xff]  ;;  %v400_v36 = vld [vmem:[%s7507_s16 + $0x78] sm:$0xff]  ;;  %v7660_v39 = vld [vmem:[%s7507_s16 + $0x80] sm:$0xff]  ;;  %1500 = vperm.xlu1 %7208, %v7565_v12   ;;  %1508 = vperm.xlu0 %7207, %v7612_v25  }
  0x25   : > { %818 = vmatpush.msrb.mxu1 %v700_v28  ;;  %1284 = vmatpush.msra.mxu3 %v1167_v29  ;;  %v7668_v43 = vld [vmem:[%s7507_s16 + $0x88] sm:$0xff]  ;;  %v7676_v47 = vld [vmem:[%s7507_s16 + $0x90] sm:$0xff]  ;;  %v7684_v51 = vld [vmem:[%s7507_s16 + $0x98] sm:$0xff] }
  0x26   : > { %v7692_v55 = vld [vmem:[%s7507_s16 + $0xa0] sm:$0xff]  ;;  %v7700_v59 = vld [vmem:[%s7507_s16 + $0xa8] sm:$0xff]  ;;  %v407_v0 = vld [vmem:[%s7507_s16 + $0xb0] sm:$0xff] }
  0x27   : > { %6304 = vmatmul.msk.f32.gmra.mxu0 %vm456_vm0, %v7515_v2  ;;  %819 = vmatpush.msrb.mxu1 %v699_v31  ;;  %v412_v19 = vld [vmem:[%s7507_s16 + $0xd8] sm:$0xff]  ;;  %v411_v20 = vld [vmem:[%s7507_s16 + $0xd0] sm:$0xff]  ;;  %v409_v21 = vld [vmem:[%s7507_s16 + $0xc0] sm:$0xff] }
  0x28   : > { %1285 = vmatpush.msra.mxu3 %v1166_v32 }
  0x29   : > { %820 = vmatpush.msrb.mxu1 %v698_v33 }
  0x2a   : > { %6332 = vmatmul.msk.f32.gmra.mxu1 %vm456_vm0, %v7565_v12  ;;  %1440 = vperm.xlu2 %7209, %v7648_v35   ;;  %v408_v12 = vld [vmem:[%s7507_s16 + $0xb8] sm:$0xff] }
  0x2c   : > { %1444 = vperm.xlu1 %7208, %v400_v36   ;;  %1504 = vperm.xlu0 %7207, %v7578_v15  }
  0x2f   : > { %6305 = vmatmul.msk.f32.gmra.mxu0 %vm456_vm0, %v7520_v3 }
  0x32   : > { %6333 = vmatmul.msk.f32.gmra.mxu1 %vm456_vm0, %v7578_v15  ;;  %1488 = vperm.xlu2 %7209, %v411_v20  }
  0x34   : > { %1436 = vperm.xlu1 %7208, %v7643_v34   ;;  %1492 = vperm.xlu0 %7207, %v412_v19  }
  0x37   : > { %6306 = vmatmul.msk.f32.gmra.mxu0 %vm456_vm0, %v7525_v4 }
  0x3a   : > { %6334 = vmatmul.msk.f32.gmra.mxu1 %vm456_vm0, %v7612_v25  ;;  %v410_v25 = vld [vmem:[%s7507_s16 + $0xc8] sm:$0xff]  ;;  %1428 = vperm.xlu2 %7209, %v7601_v22   ;;  %s6300_s16 = sshll.u32 %s377_s29, 3 }
  0x3b   : > { %s379_s22 = scalar_lea.vmem [#allocation2], %s6300_s16  ;;  %s7346_s16 = scalar_lea.hbm %s11291_s11, 16 }
  0x3c   : > { %1484 = vperm.xlu1 %7208, %v410_v25   ;;  %1432 = vperm.xlu0 %7207, %v7629_v30   ;;  %s6234_s24 = sshll.u32 %s379_s22, 4  ;;  %s6235_s24 = int_to_ptr.vmem [resolvable:$true] %s6234_s24 }
  0x3f   : > { %6307 = vmatmul.msk.f32.gmra.mxu0 %vm456_vm0, %v7530_v5 }
  0x42   : > { %1476 = vperm.xlu2 %7209, %v408_v12  }
  0x44   : > { %1424 = vperm.xlu1 %7208, %v7570_v13   ;;  %1480 = vperm.xlu0 %7207, %v409_v21  }
  0x47   : > { %6308 = vmatmul.msk.f32.gmra.mxu0 %vm456_vm0, %v7535_v6 }
  0x4a   : > { %1416 = vperm.xlu2 %7209, %v7550_v9  }
  0x4c   : > { %1472 = vperm.xlu1 %7208, %v407_v0   ;;  %1420 = vperm.xlu0 %7207, %v7560_v11  }
  0x4f   : > { %6309 = vmatmul.msk.f32.gmra.mxu0 %vm456_vm0, %v7540_v7 }
  0x52   : > { %1464 = vperm.xlu2 %7209, %v7692_v55  }
  0x54   : > { %1412 = vperm.xlu1 %7208, %v7545_v8   ;;  %1468 = vperm.xlu0 %7207, %v7700_v59  }
  0x57   : > { %6310 = vmatmul.msk.f32.gmra.mxu0 %vm456_vm0, %v7545_v8  ;;  %v951_v8 = vld [vmem:[%s11287_s7 + $0x8] sm:$0xff] }
  0x5a   : > { %1404 = vperm.xlu2 %7209, %v7535_v6  }
  0x5c   : > { %1460 = vperm.xlu1 %7208, %v7684_v51   ;;  %1408 = vperm.xlu0 %7207, %v7540_v7  }
  0x5f   : > { %6311 = vmatmul.msk.f32.gmra.mxu0 %vm456_vm0, %v7550_v9  ;;  %v953_v9 = vld [vmem:[%s11287_s7 + $0x18] sm:$0xff] }
  0x60   : > { %1065 = vmatpush.msra.mxu2 %v953_v9 }
  0x62   : > { %1452 = vperm.xlu2 %7209, %v7668_v43  }
  0x64   : > { %1400 = vperm.xlu1 %7208, %v7530_v5   ;;  %1456 = vperm.xlu0 %7207, %v7676_v47  }
  0x67   : > { %6312 = vmatmul.msk.f32.gmra.mxu0 %vm456_vm0, %v7560_v11 }
  0x6a   : > { %1392 = vperm.xlu2 %7209, %v7520_v3  }
  0x6c   : > { %1448 = vperm.xlu1 %7208, %v7660_v39   ;;  %1396 = vperm.xlu0 %7207, %v7525_v4   ;;  %v7797_v4 = vld [vmem:[%s11288_s8] ss:$0 sm:$0xff] }
  0x6f   : > { %6313 = vmatmul.msk.f32.gmra.mxu0 %vm456_vm0, %v7570_v13 }
  0x74   : > { %1384 = vperm.xlu1 %7208, %v7510_v1   ;;  %1388 = vperm.xlu0 %7207, %v7515_v2  }
  0x77   : > { %6314 = vmatmul.msk.f32.gmra.mxu0 %vm456_vm0, %v7601_v22 }
  0x7f   : > { %6315 = vmatmul.msk.f32.gmra.mxu0 %vm456_vm0, %v7629_v30 }
  0x87   : > { %6316 = vmatmul.msk.f32.gmra.mxu0 %vm456_vm0, %v7643_v34 }
  0x8f   : > { %6317 = vmatmul.msk.f32.gmra.mxu0 %vm456_vm0, %v7648_v35  ;;  %v952_v35 = vld [vmem:[%s11287_s7 + $0x10] sm:$0xff] }
  0x90   : > { %1066 = vmatpush.msra.mxu2 %v952_v35 }
  0x92   : > { %1067 = vmatpush.msra.mxu2 %v951_v8 }
  0x97   : > { %6318 = vmatmul.msk.f32.gmra.mxu0 %vm456_vm0, %v400_v36 }
  0x9c   : > { %v570_v38 = vpop.f32.mrf.mxu0 }
  0x9d   : > { %v571_v40 = vadd.f32 %v7657_v37, %v570_v38 }
  0x9f   : > { %v666_v41 = vmax.f32 %v571_v40, 0.0  ;;  %6319 = vmatmul.msk.f32.gmra.mxu0 %vm456_vm0, %v7660_v39  ;;  %6399 = vmatmul.msk.f32.vlgmr.msra.gmra.mxu3 %vm708_vm1, %v571_v40  ;;  %v7745_v32 = vpop.f32.mrf.mxu1  ;;  %v950_v40 = vld [vmem:[%s11287_s7] sm:$0xff] }
  0xa0   : > { %1068 = vmatpush.msra.mxu2 %v950_v40 }
  0xa1   : > { %6335 = vmatmul.msk.f32.vlgmr.msrb.gmra.mxu1 %vm708_vm1, %v666_v41 }
  0xa4   : > { %v573_v42 = vpop.f32.mrf.mxu0 }
  0xa5   : > { %v574_v44 = vadd.f32 %v7657_v37, %v573_v42 }
  0xa7   : > { %v667_v45 = vmax.f32 %v574_v44, 0.0  ;;  %6320 = vmatmul.msk.f32.gmra.mxu0 %vm456_vm0, %v7668_v43  ;;  %6400 = vmatmul.msk.f32.gmra.mxu3 %vm708_vm1, %v574_v44  ;;  %v7764_v38 = vpop.f32.mrf.mxu1 }
  0xa9   : > { %6336 = vmatmul.msk.f32.gmra.mxu1 %vm708_vm1, %v667_v45 }
  0xac   : > { %v576_v46 = vpop.f32.mrf.mxu0 }
  0xad   : > { %v577_v48 = vadd.f32 %v7657_v37, %v576_v46 }
  0xaf   : > { %v668_v49 = vmax.f32 %v577_v48, 0.0  ;;  %6321 = vmatmul.msk.f32.gmra.mxu0 %vm456_vm0, %v7676_v47  ;;  %6401 = vmatmul.msk.f32.gmra.mxu3 %vm708_vm1, %v577_v48  ;;  %v7777_v45 = vpop.f32.mrf.mxu1 }
  0xb1   : > { %6337 = vmatmul.msk.f32.gmra.mxu1 %vm708_vm1, %v668_v49 }
  0xb4   : > { %v579_v50 = vpop.f32.mrf.mxu0 }
  0xb5   : > { %v580_v52 = vadd.f32 %v7657_v37, %v579_v50 }
  0xb7   : > { %v669_v53 = vmax.f32 %v580_v52, 0.0  ;;  %6322 = vmatmul.msk.f32.gmra.mxu0 %vm456_vm0, %v7684_v51  ;;  %6402 = vmatmul.msk.f32.gmra.mxu3 %vm708_vm1, %v580_v52  ;;  %v7787_v48 = vpop.f32.mrf.mxu1 }
  0xb9   : > { %6338 = vmatmul.msk.f32.gmra.mxu1 %vm708_vm1, %v669_v53 }
  0xbc   : > { %v582_v54 = vpop.f32.mrf.mxu0 }
  0xbd   : > { %v583_v56 = vadd.f32 %v7657_v37, %v582_v54 }
  0xbf   : > { %v670_v57 = vmax.f32 %v583_v56, 0.0  ;;  %6323 = vmatmul.msk.f32.gmra.mxu0 %vm456_vm0, %v7692_v55  ;;  %6403 = vmatmul.msk.f32.gmra.mxu3 %vm708_vm1, %v583_v56 }
  0xc1   : > { %6339 = vmatmul.msk.f32.gmra.mxu1 %vm708_vm1, %v670_v57 }
  0xc4   : > { %v585_v58 = vpop.f32.mrf.mxu0 }
  0xc5   : > { %v586_v60 = vadd.f32 %v7657_v37, %v585_v58 }
  0xc7   : > { %v671_v61 = vmax.f32 %v586_v60, 0.0  ;;  %6324 = vmatmul.msk.f32.gmra.mxu0 %vm456_vm0, %v7700_v59  ;;  %6404 = vmatmul.msk.f32.gmra.mxu3 %vm708_vm1, %v586_v60 }
  0xc9   : > { %6340 = vmatmul.msk.f32.gmra.mxu1 %vm708_vm1, %v671_v61 }
  0xcc   : > { %v588_v63 = vpop.f32.mrf.mxu0 }
  0xcd   : > { %v589_v14 = vadd.f32 %v7657_v37, %v588_v63 }
  0xcf   : > { %v672_v16 = vmax.f32 %v589_v14, 0.0  ;;  %6325 = vmatmul.msk.f32.gmra.mxu0 %vm456_vm0, %v407_v0  ;;  %6405 = vmatmul.msk.f32.gmra.mxu3 %vm708_vm1, %v589_v14 }
  0xd1   : > { %6341 = vmatmul.msk.f32.gmra.mxu1 %vm708_vm1, %v672_v16 }
  0xd4   : > { %v591_v10 = vpop.f32.mrf.mxu0 }
  0xd5   : > { %v592_v17 = vadd.f32 %v7657_v37, %v591_v10 }
  0xd7   : > { %v673_v18 = vmax.f32 %v592_v17, 0.0  ;;  %6326 = vmatmul.msk.f32.gmra.mxu0 %vm456_vm0, %v408_v12  ;;  %6406 = vmatmul.msk.f32.gmra.mxu3 %vm708_vm1, %v592_v17 }
  0xd9   : > { %6342 = vmatmul.msk.f32.gmra.mxu1 %vm708_vm1, %v673_v18 }
  0xdc   : > { %v594_v15 = vpop.f32.mrf.mxu0 }
  0xdd   : > { %v595_v23 = vadd.f32 %v7657_v37, %v594_v15 }
  0xdf   : > { %v674_v24 = vmax.f32 %v595_v23, 0.0  ;;  %6327 = vmatmul.msk.f32.gmra.mxu0 %vm456_vm0, %v409_v21  ;;  %6407 = vmatmul.msk.f32.gmra.mxu3 %vm708_vm1, %v595_v23 }
  0xe1   : > { %6343 = vmatmul.msk.f32.gmra.mxu1 %vm708_vm1, %v674_v24 }
  0xe4   : > { %v597_v26 = vpop.f32.mrf.mxu0 }
  0xe5   : > { %v598_v27 = vadd.f32 %v7657_v37, %v597_v26 }
  0xe7   : > { %v675_v28 = vmax.f32 %v598_v27, 0.0  ;;  %6328 = vmatmul.msk.f32.gmra.mxu0 %vm456_vm0, %v410_v25  ;;  %6408 = vmatmul.msk.f32.gmra.mxu3 %vm708_vm1, %v598_v27 }
  0xe9   : > { %6344 = vmatmul.msk.f32.gmra.mxu1 %vm708_vm1, %v675_v28 }
  0xec   : > { %v600_v29 = vpop.f32.mrf.mxu0 }
  0xed   : > { %v601_v31 = vadd.f32 %v7657_v37, %v600_v29 }
  0xef   : > { %v676_v30 = vmax.f32 %v601_v31, 0.0  ;;  %6329 = vmatmul.msk.f32.gmra.mxu0 %vm456_vm0, %v411_v20  ;;  %6409 = vmatmul.msk.f32.gmra.mxu3 %vm708_vm1, %v601_v31 }
  0xf1   : > { %6345 = vmatmul.msk.f32.gmra.mxu1 %vm708_vm1, %v676_v30 }
  0xf4   : > { %v603_v22 = vpop.f32.mrf.mxu0 }
  0xf5   : > { %v604_v13 = vadd.f32 %v7657_v37, %v603_v22 }
  0xf7   : > { %v677_v33 = vmax.f32 %v604_v13, 0.0  ;;  %6330 = vmatmul.msk.f32.gmra.mxu0 %vm456_vm0, %v412_v19  ;;  %6410 = vmatmul.msk.f32.gmra.mxu3 %vm708_vm1, %v604_v13 }
  0xf9   : > { %6346 = vmatmul.msk.f32.gmra.mxu1 %vm708_vm1, %v677_v33 }
  0xfc   : > { %v606_v11 = vpop.f32.mrf.mxu0 }
  0xfd   : > { %v607_v34 = vadd.f32 %v7657_v37, %v606_v11 }
  0xff   : > { %v678_v36 = vmax.f32 %v607_v34, 0.0  ;;  %6411 = vmatmul.msk.f32.gmra.mxu3 %vm708_vm1, %v607_v34 }
 0x101   : > { %6347 = vmatmul.msk.f32.gmra.mxu1 %vm708_vm1, %v678_v36 }
 0x104   : > { %v609_v41 = vpop.f32.mrf.mxu0 }
 0x105   : > { %v610_v42 = vadd.f32 %v7657_v37, %v609_v41 }
 0x107   : > { %v679_v44 = vmax.f32 %v610_v42, 0.0  ;;  %6412 = vmatmul.msk.f32.gmra.mxu3 %vm708_vm1, %v610_v42 }
 0x109   : > { %6348 = vmatmul.msk.f32.gmra.mxu1 %vm708_vm1, %v679_v44 }
 0x10c   : > { %v612_v46 = vpop.f32.mrf.mxu0 }
 0x10d   : > { %v613_v7 = vadd.f32 %v7657_v37, %v612_v46 }
 0x10f   : > { %v680_v6 = vmax.f32 %v613_v7, 0.0  ;;  %6413 = vmatmul.msk.f32.gmra.mxu3 %vm708_vm1, %v613_v7 }
 0x111   : > { %6349 = vmatmul.msk.f32.gmra.mxu1 %vm708_vm1, %v680_v6 }
 0x114   : > { %v615_v5 = vpop.f32.mrf.mxu0 }
 0x115   : > { %v616_v47 = vadd.f32 %v7657_v37, %v615_v5 }
 0x117   : > { %v681_v43 = vmax.f32 %v616_v47, 0.0  ;;  %6414 = vmatmul.msk.f32.gmra.mxu3 %vm708_vm1, %v616_v47 }
 0x119   : > { %6350 = vmatmul.msk.f32.gmra.mxu1 %vm708_vm1, %v681_v43 }
 0x11c   : > { %v618_v3 = vpop.f32.mrf.mxu0 }
 0x11d   : > { %v619_v39 = vadd.f32 %v7657_v37, %v618_v3 }
 0x11e   : > { %v822_v49 = vpop.f32.mrf.mxu1 }
 0x11f   : > { %v682_v50 = vmax.f32 %v619_v39, 0.0  ;;  %v823_v51 = vadd.f32 %v7797_v4, %v822_v49  ;;  %6415 = vmatmul.msk.f32.gmra.mxu3 %vm708_vm1, %v619_v39 }
 0x121   : > { %v918_v52 = vmax.f32 %v823_v51, 0.0  ;;  %6351 = vmatmul.msk.f32.gmra.mxu1 %vm708_vm1, %v682_v50 }
 0x122   : > { %v7832_v33 = vpop.f32.mrf.mxu3 }
 0x123   : > { %6367 = vmatmul.msk.f32.vlgmr.msra.gmra.mxu2 %vm956_vm2, %v918_v52 }
 0x124   : > { %v621_v1 = vpop.f32.mrf.mxu0 }
 0x125   : > { %v622_v2 = vadd.f32 %v7657_v37, %v621_v1 }
 0x126   : > { %v825_v53 = vpop.f32.mrf.mxu1 }
 0x127   : > { %v683_v54 = vmax.f32 %v622_v2, 0.0  ;;  %v826_v55 = vadd.f32 %v7797_v4, %v825_v53  ;;  %6416 = vmatmul.msk.f32.gmra.mxu3 %vm708_vm1, %v622_v2 }
 0x129   : > { %v919_v56 = vmax.f32 %v826_v55, 0.0  ;;  %6352 = vmatmul.msk.f32.gmra.mxu1 %vm708_vm1, %v683_v54 }
 0x12a   : > { %v7840_v41 = vpop.f32.mrf.mxu3 }
 0x12b   : > { %6368 = vmatmul.msk.f32.gmra.mxu2 %vm956_vm2, %v919_v56 }
 0x12c   : > { %v624_v57 = vpop.f32.mrf.mxu0 }
 0x12d   : > { %v625_v58 = vadd.f32 %v7657_v37, %v624_v57 }
 0x12e   : > { %v828_v59 = vpop.f32.mrf.mxu1 }
 0x12f   : > { %v684_v60 = vmax.f32 %v625_v58, 0.0  ;;  %v829_v61 = vadd.f32 %v7797_v4, %v828_v59  ;;  %6417 = vmatmul.msk.f32.gmra.mxu3 %vm708_vm1, %v625_v58 }
 0x131   : > { %v920_v62 = vmax.f32 %v829_v61, 0.0  ;;  %6353 = vmatmul.msk.f32.gmra.mxu1 %vm708_vm1, %v684_v60 }
 0x132   : > { %v7848_v43 = vpop.f32.mrf.mxu3 }
 0x133   : > { %6369 = vmatmul.msk.f32.gmra.mxu2 %vm956_vm2, %v920_v62 }
 0x134   : > { %v627_v63 = vpop.f32.mrf.mxu0 }
 0x135   : > { %v628_v0 = vadd.f32 %v7657_v37, %v627_v63 }
 0x136   : > { %v831_v14 = vpop.f32.mrf.mxu1 }
 0x137   : > { %v685_v16 = vmax.f32 %v628_v0, 0.0  ;;  %v832_v10 = vadd.f32 %v7797_v4, %v831_v14  ;;  %6418 = vmatmul.msk.f32.gmra.mxu3 %vm708_vm1, %v628_v0  ;;  %v655_v0 = vadd.f32 %v7657_v37, %v7745_v32 }
 0x139   : > { %v921_v12 = vmax.f32 %v832_v10, 0.0  ;;  %6354 = vmatmul.msk.f32.gmra.mxu1 %vm708_vm1, %v685_v16  ;;  %v694_v16 = vmax.f32 %v655_v0, 0.0 }
 0x13a   : > { %v7856_v53 = vpop.f32.mrf.mxu3 }
 0x13b   : > { %6370 = vmatmul.msk.f32.gmra.mxu2 %vm956_vm2, %v921_v12 }
 0x13c   : > { %v630_v17 = vpop.f32.mrf.mxu0 }
 0x13d   : > { %v631_v18 = vadd.f32 %v7657_v37, %v630_v17  ;;  %v658_v17 = vadd.f32 %v7657_v37, %v7764_v38 }
 0x13e   : > { %v834_v19 = vpop.f32.mrf.mxu1 }
 0x13f   : > { %v686_v20 = vmax.f32 %v631_v18, 0.0  ;;  %v835_v15 = vadd.f32 %v7797_v4, %v834_v19  ;;  %6419 = vmatmul.msk.f32.gmra.mxu3 %vm708_vm1, %v631_v18  ;;  %v695_v32 = vmax.f32 %v658_v17, 0.0 }
 0x141   : > { %v922_v21 = vmax.f32 %v835_v15, 0.0  ;;  %6355 = vmatmul.msk.f32.gmra.mxu1 %vm708_vm1, %v686_v20 }
 0x142   : > { %v7865_v62 = vpop.f32.mrf.mxu3 }
 0x143   : > { %6371 = vmatmul.msk.f32.gmra.mxu2 %vm956_vm2, %v922_v21  ;;  %v661_v21 = vadd.f32 %v7657_v37, %v7777_v45 }
 0x144   : > { %v633_v23 = vpop.f32.mrf.mxu0 }
 0x145   : > { %v634_v24 = vadd.f32 %v7657_v37, %v633_v23 }
 0x146   : > { %v837_v25 = vpop.f32.mrf.mxu1 }
 0x147   : > { %v687_v26 = vmax.f32 %v634_v24, 0.0  ;;  %v838_v27 = vadd.f32 %v7797_v4, %v837_v25  ;;  %6420 = vmatmul.msk.f32.gmra.mxu3 %vm708_vm1, %v634_v24  ;;  %v696_v24 = vmax.f32 %v661_v21, 0.0 }
 0x149   : > { %v923_v28 = vmax.f32 %v838_v27, 0.0  ;;  %6356 = vmatmul.msk.f32.gmra.mxu1 %vm708_vm1, %v687_v26  ;;  %v664_v27 = vadd.f32 %v7657_v37, %v7787_v48 }
 0x14a   : > { %v7876_v18 = vpop.f32.mrf.mxu3 }
 0x14b   : > { %6372 = vmatmul.msk.f32.gmra.mxu2 %vm956_vm2, %v923_v28  ;;  %v697_v45 = vmax.f32 %v664_v27, 0.0 }
 0x14c   : > { %v636_v29 = vpop.f32.mrf.mxu0 }
 0x14d   : > { %v637_v31 = vadd.f32 %v7657_v37, %v636_v29 }
 0x14e   : > { %v840_v30 = vpop.f32.mrf.mxu1 }
 0x14f   : > { %v688_v22 = vmax.f32 %v637_v31, 0.0  ;;  %v841_v13 = vadd.f32 %v7797_v4, %v840_v30  ;;  %6421 = vmatmul.msk.f32.gmra.mxu3 %vm708_vm1, %v637_v31 }
 0x151   : > { %v924_v9 = vmax.f32 %v841_v13, 0.0  ;;  %6357 = vmatmul.msk.f32.gmra.mxu1 %vm708_vm1, %v688_v22 }
 0x152   : > { %v7885_v23 = vpop.f32.mrf.mxu3 }
 0x153   : > { %6373 = vmatmul.msk.f32.gmra.mxu2 %vm956_vm2, %v924_v9 }
 0x154   : > { %v639_v11 = vpop.f32.mrf.mxu0 }
 0x155   : > { %v640_v34 = vadd.f32 %v7657_v37, %v639_v11 }
 0x156   : > { %v843_v35 = vpop.f32.mrf.mxu1 }
 0x157   : > { %v689_v36 = vmax.f32 %v640_v34, 0.0  ;;  %v844_v8 = vadd.f32 %v7797_v4, %v843_v35  ;;  %6422 = vmatmul.msk.f32.gmra.mxu3 %vm708_vm1, %v640_v34 }
 0x159   : > { %v925_v40 = vmax.f32 %v844_v8, 0.0  ;;  %6358 = vmatmul.msk.f32.gmra.mxu1 %vm708_vm1, %v689_v36 }
 0x15a   : > { %v7893_v29 = vpop.f32.mrf.mxu3 }
 0x15b   : > { %6374 = vmatmul.msk.f32.gmra.mxu2 %vm956_vm2, %v925_v40 }
 0x15c   : > { %v642_v42 = vpop.f32.mrf.mxu0 }
 0x15d   : > { %v643_v44 = vadd.f32 %v7657_v37, %v642_v42 }
 0x15e   : > { %v846_v46 = vpop.f32.mrf.mxu1 }
 0x15f   : > { %v690_v7 = vmax.f32 %v643_v44, 0.0  ;;  %v847_v6 = vadd.f32 %v7797_v4, %v846_v46  ;;  %6423 = vmatmul.msk.f32.gmra.mxu3 %vm708_vm1, %v643_v44 }
 0x161   : > { %v926_v5 = vmax.f32 %v847_v6, 0.0  ;;  %6359 = vmatmul.msk.f32.gmra.mxu1 %vm708_vm1, %v690_v7 }
 0x162   : > { %v7912_v7 = vpop.f32.mrf.mxu3 }
 0x163   : > { %6375 = vmatmul.msk.f32.gmra.mxu2 %vm956_vm2, %v926_v5 }
 0x164   : > { %v645_v47 = vpop.f32.mrf.mxu0 }
 0x165   : > { %v646_v3 = vadd.f32 %v7657_v37, %v645_v47 }
 0x166   : > { %v849_v39 = vpop.f32.mrf.mxu1 }
 0x167   : > { %v691_v49 = vmax.f32 %v646_v3, 0.0  ;;  %v850_v50 = vadd.f32 %v7797_v4, %v849_v39  ;;  %6424 = vmatmul.msk.f32.gmra.mxu3 %vm708_vm1, %v646_v3 }
 0x169   : > { %v927_v51 = vmax.f32 %v850_v50, 0.0  ;;  %6360 = vmatmul.msk.f32.gmra.mxu1 %vm708_vm1, %v691_v49 }
 0x16a   : > { %v7918_v49 = vpop.f32.mrf.mxu3 }
 0x16b   : > { %6376 = vmatmul.msk.f32.gmra.mxu2 %vm956_vm2, %v927_v51 }
 0x16c   : > { %v648_v52 = vpop.f32.mrf.mxu0 }
 0x16d   : > { %v649_v1 = vadd.f32 %v7657_v37, %v648_v52 }
 0x16e   : > { %v852_v2 = vpop.f32.mrf.mxu1 }
 0x16f   : > { %v692_v54 = vmax.f32 %v649_v1, 0.0  ;;  %v853_v55 = vadd.f32 %v7797_v4, %v852_v2  ;;  %6425 = vmatmul.msk.f32.gmra.mxu3 %vm708_vm1, %v649_v1 }
 0x171   : > { %v928_v56 = vmax.f32 %v853_v55, 0.0  ;;  %6361 = vmatmul.msk.f32.gmra.mxu1 %vm708_vm1, %v692_v54 }
 0x172   : > { %v7925_v2 = vpop.f32.mrf.mxu3 }
 0x173   : > { %6377 = vmatmul.msk.f32.gmra.mxu2 %vm956_vm2, %v928_v56 }
 0x174   : > { %v651_v57 = vpop.f32.mrf.mxu0 }
 0x175   : > { %v652_v58 = vadd.f32 %v7657_v37, %v651_v57 }
 0x176   : > { %v855_v59 = vpop.f32.mrf.mxu1 }
 0x177   : > { %v693_v60 = vmax.f32 %v652_v58, 0.0  ;;  %v856_v61 = vadd.f32 %v7797_v4, %v855_v59  ;;  %6426 = vmatmul.msk.f32.gmra.mxu3 %vm708_vm1, %v652_v58 }
 0x179   : > { %v929_v63 = vmax.f32 %v856_v61, 0.0  ;;  %6362 = vmatmul.msk.f32.gmra.mxu1 %vm708_vm1, %v693_v60  ;;  %v7933_v60 = vpop.permute.xlu0 %1508 }
 0x17a   : > { %11419 = vst [vmem:[#allocation5_spill] sm:$0xff] %v7933_v60  ;;  %v7935_v61 = vpop.f32.mrf.mxu3 }
 0x17b   : > { %6378 = vmatmul.msk.f32.gmra.mxu2 %vm956_vm2, %v929_v63 }
 0x17e   : > { %v858_v14 = vpop.f32.mrf.mxu1 }
 0x17f   : > { %v859_v10 = vadd.f32 %v7797_v4, %v858_v14  ;;  %6427 = vmatmul.msk.f32.gmra.mxu3 %vm708_vm1, %v655_v0  ;;  %v7938_v0 = vpop.permute.xlu1 %1500 }
 0x180   : > { %11420 = vst [vmem:[#allocation6_spill] sm:$0xff] %v7938_v0 }
 0x181   : > { %v930_v12 = vmax.f32 %v859_v10, 0.0  ;;  %6363 = vmatmul.msk.f32.gmra.mxu1 %vm708_vm1, %v694_v16 }
 0x183   : > { %6379 = vmatmul.msk.f32.gmra.mxu2 %vm956_vm2, %v930_v12  ;;  %v7943_v12 = vpop.permute.xlu2 %1496 }
 0x184   : > { %11421 = vst [vmem:[#allocation7_spill] sm:$0xff] %v7943_v12 }
 0x186   : > { %v861_v19 = vpop.f32.mrf.mxu1 }
 0x187   : > { %v862_v20 = vadd.f32 %v7797_v4, %v861_v19  ;;  %6428 = vmatmul.msk.f32.gmra.mxu3 %vm708_vm1, %v658_v17  ;;  %v7946_v19 = vpop.permute.xlu0 %1504 }
 0x188   : > { %11422 = vst [vmem:[#allocation8_spill] sm:$0xff] %v7946_v19 }
 0x189   : > { %v931_v15 = vmax.f32 %v862_v20, 0.0  ;;  %6364 = vmatmul.msk.f32.gmra.mxu1 %vm708_vm1, %v695_v32  ;;  %v7948_v32 = vpop.f32.mrf.mxu3 }
 0x18b   : > { %6380 = vmatmul.msk.f32.gmra.mxu2 %vm956_vm2, %v931_v15  ;;  %v7950_v15 = vpop.permute.xlu1 %1444 }
 0x18c   : > { %11423 = vst [vmem:[#allocation9_spill] sm:$0xff] %v7950_v15 }
 0x18e   : > { %v864_v38 = vpop.f32.mrf.mxu1 }
 0x18f   : > { %v865_v25 = vadd.f32 %v7797_v4, %v864_v38  ;;  %6429 = vmatmul.msk.f32.gmra.mxu3 %vm708_vm1, %v661_v21 }
 0x191   : > { %v932_v26 = vmax.f32 %v865_v25, 0.0  ;;  %6365 = vmatmul.msk.f32.gmra.mxu1 %vm708_vm1, %v696_v24  ;;  %v7956_v25 = vpop.permute.xlu2 %1440 }
 0x192   : > { %11424 = vst [vmem:[#allocation10_spill] sm:$0xff] %v7956_v25 }
 0x193   : > { %6381 = vmatmul.msk.f32.gmra.mxu2 %vm956_vm2, %v932_v26 }
 0x196   : > { %v867_v28 = vpop.f32.mrf.mxu1 }
 0x197   : > { %v868_v31 = vadd.f32 %v7797_v4, %v867_v28  ;;  %6430 = vmatmul.msk.f32.gmra.mxu3 %vm708_vm1, %v664_v27  ;;  %v7958_v27 = vpop.permute.xlu0 %1492  ;;  %v1326_v28 = vpop.f32.mrf.mxu3 }
 0x198   : > { %11425 = vst [vmem:[#allocation11_spill] sm:$0xff] %v7958_v27 }
 0x199   : > { %v933_v30 = vmax.f32 %v868_v31, 0.0  ;;  %6366 = vmatmul.msk.f32.gmra.mxu1 %vm708_vm1, %v697_v45  ;;  %v7961_v45 = vpop.permute.xlu1 %1436 }
 0x19a   : > { %11426 = vst [vmem:[#allocation12_spill] sm:$0xff] %v7961_v45 }
 0x19b   : > { %6382 = vmatmul.msk.f32.gmra.mxu2 %vm956_vm2, %v933_v30 }
 0x19e   : > { %v870_v22 = vpop.f32.mrf.mxu1 }
 0x19f   : > { %v871_v13 = vadd.f32 %v7797_v4, %v870_v22 }
 0x1a1   : > { %v934_v9 = vmax.f32 %v871_v13, 0.0 }
 0x1a3   : > { %6383 = vmatmul.msk.f32.gmra.mxu2 %vm956_vm2, %v934_v9  ;;  %v7966_v9 = vpop.permute.xlu2 %1488 }
 0x1a4   : > { %11427 = vst [vmem:[#allocation13_spill] sm:$0xff] %v7966_v9 }
 0x1a6   : > { %v873_v37 = vpop.f32.mrf.mxu1  ;;  %v7901_v48 = vpop.f32.mrf.mxu2 }
 0x1a7   : > { %v874_v11 = vadd.f32 %v7797_v4, %v873_v37  ;;  %v7969_v37 = vpop.permute.xlu0 %1432 }
 0x1a8   : > { %11428 = vst [vmem:[#allocation14_spill] sm:$0xff] %v7969_v37 }
 0x1a9   : > { %v935_v34 = vmax.f32 %v874_v11, 0.0  ;;  %v1329_v11 = vpop.f32.mrf.mxu3 }
 0x1ab   : > { %6384 = vmatmul.msk.f32.gmra.mxu2 %vm956_vm2, %v935_v34 }
 0x1ae   : > { %v876_v35 = vpop.f32.mrf.mxu1  ;;  %v7905_v36 = vpop.f32.mrf.mxu2 }
 0x1af   : > { %v877_v8 = vadd.f32 %v7797_v4, %v876_v35 }
 0x1b1   : > { %v936_v40 = vmax.f32 %v877_v8, 0.0  ;;  %v7971_v8 = vpop.permute.xlu1 %1484 }
 0x1b2   : > { %11429 = vst [vmem:[#allocation15_spill] sm:$0xff] %v7971_v8 }
 0x1b3   : > { %6385 = vmatmul.msk.f32.gmra.mxu2 %vm956_vm2, %v936_v40 }
 0x1b6   : > { %v879_v42 = vpop.f32.mrf.mxu1  ;;  %v7909_v44 = vpop.f32.mrf.mxu2 }
 0x1b7   : > { %v880_v46 = vadd.f32 %v7797_v4, %v879_v42 }
 0x1b9   : > { %v937_v6 = vmax.f32 %v880_v46, 0.0  ;;  %v7975_v46 = vpop.permute.xlu2 %1428 }
 0x1ba   : > { %11430 = vst [vmem:[#allocation16_spill] sm:$0xff] %v7975_v46 }
 0x1bb   : > { %6386 = vmatmul.msk.f32.gmra.mxu2 %vm956_vm2, %v937_v6 }
 0x1be   : > { %v882_v5 = vpop.f32.mrf.mxu1  ;;  %v7915_v47 = vpop.f32.mrf.mxu2 }
 0x1bf   : > { %v883_v3 = vadd.f32 %v7797_v4, %v882_v5 }
 0x1c1   : > { %v938_v39 = vmax.f32 %v883_v3, 0.0  ;;  %v7977_v3 = vpop.permute.xlu0 %1480 }
 0x1c2   : > { %11431 = vst [vmem:[#allocation17_spill] sm:$0xff] %v7977_v3 }
 0x1c3   : > { %6387 = vmatmul.msk.f32.gmra.mxu2 %vm956_vm2, %v938_v39 }
 0x1c6   : > { %v885_v50 = vpop.f32.mrf.mxu1  ;;  %v7921_v51 = vpop.f32.mrf.mxu2 }
 0x1c7   : > { %v886_v52 = vadd.f32 %v7797_v4, %v885_v50  ;;  %v1332_v50 = vpop.f32.mrf.mxu3 }
 0x1c9   : > { %v939_v1 = vmax.f32 %v886_v52, 0.0  ;;  %v7980_v52 = vpop.permute.xlu1 %1424 }
 0x1ca   : > { %11432 = vst [vmem:[#allocation18_spill] sm:$0xff] %v7980_v52 }
 0x1cb   : > { %6388 = vmatmul.msk.f32.gmra.mxu2 %vm956_vm2, %v939_v1 }
 0x1ce   : > { %v888_v54 = vpop.f32.mrf.mxu1  ;;  %v7927_v55 = vpop.f32.mrf.mxu2 }
 0x1cf   : > { %v889_v56 = vadd.f32 %v7797_v4, %v888_v54 }
 0x1d1   : > { %v940_v57 = vmax.f32 %v889_v56, 0.0 }
 0x1d3   : > { %6389 = vmatmul.msk.f32.gmra.mxu2 %vm956_vm2, %v940_v57 }
 0x1d6   : > { %v891_v58 = vpop.f32.mrf.mxu1  ;;  %v7931_v59 = vpop.f32.mrf.mxu2 }
 0x1d7   : > { %v892_v63 = vadd.f32 %v7797_v4, %v891_v58  ;;  %v7984_v58 = vpop.permute.xlu2 %1476 }
 0x1d8   : > { %11433 = vst [vmem:[#allocation19_spill] sm:$0xff] %v7984_v58 }
 0x1d9   : > { %v941_v14 = vmax.f32 %v892_v63, 0.0  ;;  %v7986_v63 = vpop.permute.xlu0 %1420 }
 0x1da   : > { %11434 = vst [vmem:[#allocation20_spill] sm:$0xff] %v7986_v63 }
 0x1db   : > { %6390 = vmatmul.msk.f32.gmra.mxu2 %vm956_vm2, %v941_v14 }
 0x1de   : > { %v894_v16 = vpop.f32.mrf.mxu1  ;;  %v7941_v10 = vpop.f32.mrf.mxu2 }
 0x1df   : > { %v895_v17 = vadd.f32 %v7797_v4, %v894_v16  ;;  %v7988_v16 = vpop.f32.mrf.mxu3 }
 0x1e0   : > { %11435 = vst [vmem:[#allocation21_spill] sm:$0xff] %v7988_v16 }
 0x1e1   : > { %v942_v20 = vmax.f32 %v895_v17, 0.0  ;;  %v7990_v17 = vpop.permute.xlu1 %1472 }
 0x1e2   : > { %11436 = vst [vmem:[#allocation22_spill] sm:$0xff] %v7990_v17 }
 0x1e3   : > { %6391 = vmatmul.msk.f32.gmra.mxu2 %vm956_vm2, %v942_v20 }
 0x1e6   : > { %v897_v21 = vpop.f32.mrf.mxu1  ;;  %v7953_v38 = vpop.f32.mrf.mxu2 }
 0x1e7   : > { %v898_v24 = vadd.f32 %v7797_v4, %v897_v21 }
 0x1e9   : > { %v943_v26 = vmax.f32 %v898_v24, 0.0 }
 0x1eb   : > { %6392 = vmatmul.msk.f32.gmra.mxu2 %vm956_vm2, %v943_v26 }
 0x1ee   : > { %v900_v31 = vpop.f32.mrf.mxu1  ;;  %v7963_v30 = vpop.f32.mrf.mxu2 }
 0x1ef   : > { %v901_v22 = vadd.f32 %v7797_v4, %v900_v31  ;;  %v7994_v31 = vpop.permute.xlu2 %1416 }
 0x1f0   : > { %11437 = vst [vmem:[#allocation23_spill] sm:$0xff] %v7994_v31 }
 0x1f1   : > { %v944_v13 = vmax.f32 %v901_v22, 0.0  ;;  %v7996_v22 = vpop.permute.xlu0 %1468 }
 0x1f2   : > { %11438 = vst [vmem:[#allocation24_spill] sm:$0xff] %v7996_v22 }
 0x1f3   : > { %6393 = vmatmul.msk.f32.gmra.mxu2 %vm956_vm2, %v944_v13  ;;  %v7999_v13 = vpop.f32.mrf.mxu3 }
 0x1f4   : > { %11439 = vst [vmem:[#allocation25_spill] sm:$0xff] %v7999_v13 }
 0x1f6   : > { %v903_v34 = vpop.f32.mrf.mxu1  ;;  %v1100_v35 = vpop.f32.mrf.mxu2 }
 0x1f7   : > { %v904_v40 = vadd.f32 %v7797_v4, %v903_v34  ;;  %v8001_v34 = vpop.permute.xlu1 %1412 }
 0x1f8   : > { %11440 = vst [vmem:[#allocation26_spill] sm:$0xff] %v8001_v34 }
 0x1f9   : > { %v945_v42 = vmax.f32 %v904_v40, 0.0 }
 0x1fb   : > { %6394 = vmatmul.msk.f32.gmra.mxu2 %vm956_vm2, %v945_v42 }
 0x1fe   : > { %v906_v6 = vpop.f32.mrf.mxu1  ;;  %v1103_v5 = vpop.f32.mrf.mxu2 }
 0x1ff   : > { %v907_v39 = vadd.f32 %v7797_v4, %v906_v6 }
 0x201   : > { %v946_v1 = vmax.f32 %v907_v39, 0.0 }
 0x203   : > { %6395 = vmatmul.msk.f32.gmra.mxu2 %vm956_vm2, %v946_v1  ;;  %v8007_v1 = vld [vmem:[%s11288_s8 + $0x1] ss:$0 sm:$0xff] }
 0x204   : > { %v1104_v13 = vadd.f32 %v8007_v1, %v1103_v5 }
 0x206   : > { %v909_v54 = vpop.f32.mrf.mxu1  ;;  %v1106_v56 = vpop.f32.mrf.mxu2  ;;  %v8044_v5 = vadd.f32 %v7935_v61, %v1104_v13  ;;  %v1092_v13 = vadd.f32 %v8007_v1, %v7941_v10 }
 0x207   : > { %v910_v57 = vadd.f32 %v7797_v4, %v909_v54  ;;  %v8010_v54 = vpop.permute.xlu2 %1464 }
 0x208   : > { %11441 = vst [vmem:[#allocation27_spill] sm:$0xff] %v8010_v54  ;;  %v8080_v10 = vadd.f32 %v7893_v29, %v1092_v13  ;;  %v1077_v13 = vadd.f32 %v8007_v1, %v7909_v44 }
 0x209   : > { %v947_v14 = vmax.f32 %v910_v57, 0.0  ;;  %v8012_v57 = vpop.permute.xlu0 %1408  ;;  %11450 = vst [vmem:[#allocation36_spill] sm:$0xff] %v8044_v5 }
 0x20a   : > { %11442 = vst [vmem:[#allocation28_spill] sm:$0xff] %v8012_v57  ;;  %v8125_v44 = vadd.f32 %v7848_v43, %v1077_v13 }
 0x20b   : > { %6396 = vmatmul.msk.f32.gmra.mxu2 %vm956_vm2, %v947_v14 }
 0x20e   : > { %v912_v20 = vpop.f32.mrf.mxu1  ;;  %v1109_v21 = vpop.f32.mrf.mxu2 }
 0x20f   : > { %v913_v24 = vadd.f32 %v7797_v4, %v912_v20  ;;  %v8015_v20 = vpop.f32.mrf.mxu3 }
 0x210   : > { %11443 = vst [vmem:[#allocation29_spill] sm:$0xff] %v8015_v20  ;;  %v1101_v20 = vadd.f32 %v8007_v1, %v1100_v35 }
 0x211   : > { %v948_v26 = vmax.f32 %v913_v24, 0.0 }
 0x213   : > { %6397 = vmatmul.msk.f32.gmra.mxu2 %vm956_vm2, %v948_v26  ;;  %v1110_v26 = vadd.f32 %v8007_v1, %v1109_v21 }
 0x215   : > { %v8027_v54 = vadd.f32 %v1326_v28, %v1110_v26  ;;  %v1098_v28 = vadd.f32 %v8007_v1, %v7963_v30  ;;  %v8055_v26 = vadd.f32 %v7925_v2, %v1101_v20  ;;  %v1089_v2 = vadd.f32 %v8007_v1, %v7931_v59 }
 0x216   : > { %v915_v40 = vpop.f32.mrf.mxu1  ;;  %v1112_v42 = vpop.f32.mrf.mxu2 }
 0x217   : > { %v916_v6 = vadd.f32 %v7797_v4, %v915_v40  ;;  %v1113_v14 = vadd.f32 %v8007_v1, %v1112_v42  ;;  %v8019_v40 = vpop.permute.xlu1 %1460  ;;  %11447 = vst [vmem:[#allocation33_spill] sm:$0xff] %v8027_v54  ;;  %v1524_v35 = vmul.f32 %v7961_v45, %v8027_v54  ;;  %v1521_v20 = vmul.f32 %v7980_v52, %v8055_v26 }
 0x218   : > { %11444 = vst [vmem:[#allocation30_spill] sm:$0xff] %v8019_v40 }
 0x219   : > { %v949_v39 = vmax.f32 %v916_v6, 0.0  ;;  %v1107_v6 = vadd.f32 %v8007_v1, %v1106_v56  ;;  %v8022_v16 = vadd.f32 %v1329_v11, %v1113_v14  ;;  %v8037_v11 = vpop.permute.xlu2 %1404  ;;  %v8050_v14 = vpop.f32.mrf.mxu3  ;;  %11452 = vst [vmem:[#allocation38_spill] sm:$0xff] %v8055_v26 }
 0x21a   : > { %11449 = vst [vmem:[#allocation35_spill] sm:$0xff] %v8037_v11 }
 0x21b   : > { %6398 = vmatmul.msk.f32.gmra.mxu2 %vm956_vm2, %v949_v39  ;;  %11445 = vst [vmem:[#allocation31_spill] sm:$0xff] %v8022_v16  ;;  %v8033_v21 = vadd.f32 %v7948_v32, %v1107_v6  ;;  %v1525_v56 = vmul.f32 %v7956_v25, %v8022_v16  ;;  %v8048_v32 = vpop.permute.xlu0 %1456  ;;  %v1522_v6 = vmul.f32 %v7975_v46, %v8044_v5 }
 0x21c   : > { %11451 = vst [vmem:[#allocation37_spill] sm:$0xff] %v8048_v32 }
 0x21d   : > { %11448 = vst [vmem:[#allocation34_spill] sm:$0xff] %v8033_v21  ;;  %v1523_v30 = vmul.f32 %v7969_v37, %v8033_v21 }
 0x21e   : > { %v1115_v24 = vpop.f32.mrf.mxu2 }
 0x21f   : > { %v1116_v4 = vadd.f32 %v8007_v1, %v1115_v24  ;;  %v1095_v24 = vadd.f32 %v8007_v1, %v7953_v38  ;;  %v8059_v61 = vpop.permute.xlu1 %1400 }
 0x220   : > { %11453 = vst [vmem:[#allocation39_spill] sm:$0xff] %v8059_v61 }
 0x221   : > { %v8024_v39 = vadd.f32 %v1332_v50, %v1116_v4  ;;  %v8064_v4 = vadd.f32 %v7918_v49, %v1098_v28  ;;  %v8071_v38 = vadd.f32 %v7912_v7, %v1095_v24  ;;  %v1086_v49 = vadd.f32 %v8007_v1, %v7927_v55  ;;  %v8084_v59 = vpop.permute.xlu2 %1452  ;;  %v8095_v29 = vpop.f32.mrf.mxu3 }
 0x222   : > { %11455 = vst [vmem:[#allocation41_spill] sm:$0xff] %v8084_v59  ;;  %v1083_v7 = vadd.f32 %v8007_v1, %v7921_v51  ;;  %v8089_v28 = vadd.f32 %v7885_v23, %v1089_v2  ;;  %v1080_v24 = vadd.f32 %v8007_v1, %v7915_v47  ;;  %v1518_v51 = vmul.f32 %v8001_v34, %v8080_v10 }
 0x223   : > { %11446 = vst [vmem:[#allocation32_spill] sm:$0xff] %v8024_v39  ;;  %v1526_v42 = vmul.f32 %v7950_v15, %v8024_v39  ;;  %v8093_v55 = vpop.permute.xlu0 %1396 }
 0x224   : > { %11454 = vst [vmem:[#allocation40_spill] sm:$0xff] %v8064_v4  ;;  %v1517_v2 = vmul.f32 %v8012_v57, %v8089_v28 }
 0x225   : > { %1543 = vmatpush.msrb.mxu0 %v1526_v42  ;;  %11456 = vst [vmem:[#allocation42_spill] sm:$0xff] %v8093_v55 }
 0x226   : > { %v8039_v50 = vpop.f32.mrf.mxu2 }
 0x227   : > { %1544 = vmatpush.msrb.mxu0 %v1525_v56  ;;  %v1520_v56 = vmul.f32 %v7986_v63, %v8064_v4  ;;  %v8104_v23 = vpop.permute.xlu1 %1448 }
 0x228   : > { %11457 = vst [vmem:[#allocation43_spill] sm:$0xff] %v8104_v23 }
 0x229   : > { %1545 = vmatpush.msrb.mxu0 %v1524_v35  ;;  %v1519_v35 = vmul.f32 %v7994_v31, %v8071_v38 }
 0x22b   : > { %1546 = vmatpush.msrb.mxu0 %v1523_v30  ;;  %v8100_v30 = vadd.f32 %v7876_v18, %v1086_v49  ;;  %v1074_v18 = vadd.f32 %v8007_v1, %v7905_v36 }
 0x22d   : > { %1547 = vmatpush.msrb.mxu0 %v1522_v6  ;;  %v8109_v6 = vadd.f32 %v7865_v62, %v1083_v7  ;;  %v1516_v49 = vmul.f32 %v8037_v11, %v8100_v30  ;;  %v1071_v62 = vadd.f32 %v8007_v1, %v7901_v48  ;;  %v8129_v7 = vpop.permute.xlu2 %1392  ;;  %v8132_v36 = vadd.f32 %v7840_v41, %v1074_v18 }
 0x22e   : > { %v8075_v42 = vpop.f32.mrf.mxu2  ;;  %11458 = vst [vmem:[#allocation44_spill] sm:$0xff] %v8129_v7  ;;  %v1513_v48 = vmul.f32 %v8129_v7, %v8125_v44 }
 0x22f   : > { %1548 = vmatpush.msrb.mxu0 %v1521_v20  ;;  %v8118_v20 = vadd.f32 %v7856_v53, %v1080_v24  ;;  %v8138_v24 = vpop.f32.mrf.mxu3  ;;  %v8141_v43 = vadd.f32 %v7832_v33, %v1071_v62 }
 0x231   : > { %1549 = vmatpush.msrb.mxu0 %v1520_v56  ;;  %v1515_v56 = vmul.f32 %v8059_v61, %v8109_v6  ;;  %v1514_v53 = vmul.f32 %v8093_v55, %v8118_v20 }
 0x233   : > { %1550 = vmatpush.msrb.mxu0 %v1519_v35  ;;  %v8136_v35 = vpop.permute.xlu0 %1388 }
 0x234   : > { %11459 = vst [vmem:[#allocation45_spill] sm:$0xff] %v8136_v35  ;;  %v1512_v41 = vmul.f32 %v8136_v35, %v8132_v36 }
 0x235   : > { %1551 = vmatpush.msrb.mxu0 %v1518_v51  ;;  %v8145_v51 = vpop.permute.xlu1 %1384 }
 0x236   : > { %v8113_v47 = vpop.f32.mrf.mxu2  ;;  %11460 = vst [vmem:[#allocation46_spill] sm:$0xff] %v8145_v51 }
 0x237   : > { %1552 = vmatpush.msrb.mxu0 %v1517_v2  ;;  %v1511_v2 = vmul.f32 %v8145_v51, %v8141_v43  ;;  %v1353_v18 = vpop.f32.mrf.mxu3 }
 0x239   : > { %1553 = vmatpush.msrb.mxu0 %v1516_v49 }
 0x23b   : > { %1554 = vmatpush.msrb.mxu0 %v1515_v56 }
 0x23d   : > { %1555 = vmatpush.msrb.mxu0 %v1514_v53 }
 0x23e   : > { %v8147_v13 = vpop.f32.mrf.mxu2 }
 0x23f   : > { %1556 = vmatpush.msrb.mxu0 %v1513_v48  ;;  %v1356_v62 = vpop.f32.mrf.mxu3 }
 0x241   : > { %1557 = vmatpush.msrb.mxu0 %v1512_v41 }
 0x243   : > { %1558 = vmatpush.msrb.mxu0 %v1511_v2 }
 0x246   : > { %v1130_v33 = vpop.f32.mrf.mxu2 }
 0x247   : > { %v1359_v53 = vpop.f32.mrf.mxu3 }
 0x24e   : > { %v1133_v49 = vpop.f32.mrf.mxu2 }
 0x24f   : > { %v1362_v55 = vpop.f32.mrf.mxu3 }
 0x256   : > { %v1136_v56 = vpop.f32.mrf.mxu2 }
 0x257   : > { %v1365_v11 = vpop.f32.mrf.mxu3 }
 0x25e   : > { %v1139_v7 = vpop.f32.mrf.mxu2 }
 0x25f   : > { %v1368_v34 = vpop.f32.mrf.mxu3 }
 0x266   : > { %v1142_v61 = vpop.f32.mrf.mxu2 }
 0x267   : > { %v1371_v35 = vpop.f32.mrf.mxu3 }
 0x26e   : > { %v1145_v57 = vpop.f32.mrf.mxu2 }
 0x26f   : > { %v1374_v63 = vpop.f32.mrf.mxu3 }
 0x276   : > { %v1148_v48 = vpop.f32.mrf.mxu2 }
 0x277   : > { %v1377_v51 = vpop.f32.mrf.mxu3 }
 0x27e   : > { %v1151_v31 = vpop.f32.mrf.mxu2 }
 0x27f   : > { %v1380_v15 = vpop.f32.mrf.mxu3  ;;  %v1152_v21 = vadd.f32 %v8007_v1, %v1151_v31  ;;  %v417_v31 = vld [vmem:[%s11466_s1] sm:$0xff] }
 0x280   : > { %1559 = vmatmul.f32.vlgmr.msrb.gmra.mxu0 %v417_v31 }
 0x286   : > { %v1154_v41 = vpop.f32.mrf.mxu2 }
 0x287   : > { %v1155_v39 = vadd.f32 %v8007_v1, %v1154_v41 }
 0x289   : > { %v8167_v4 = vadd.f32 %v1371_v35, %v1155_v39 }
 0x28b   : > { %11464 = vst [vmem:[#allocation50_spill] sm:$0xff] %v8167_v4 }
 0x28e   : > { %v1157_v52 = vpop.f32.mrf.mxu2 }
 0x28f   : > { %v1158_v45 = vadd.f32 %v8007_v1, %v1157_v52  ;;  %v8172_v52 = vadd.f32 %v1368_v34, %v1152_v21  ;;  %v1140_v34 = vadd.f32 %v8007_v1, %v1139_v7  ;;  %v1137_v21 = vadd.f32 %v8007_v1, %v1136_v56 }
 0x290   : > { %v1131_v7 = vadd.f32 %v8007_v1, %v1130_v33 }
 0x291   : > { %v8162_v5 = vadd.f32 %v1374_v63, %v1158_v45  ;;  %11465 = vst [vmem:[#allocation51_spill] sm:$0xff] %v8172_v52  ;;  %v1539_v63 = vmul.f32 %v7943_v12, %v8167_v4  ;;  %v1538_v39 = vmul.f32 %v7958_v27, %v8172_v52  ;;  %v8195_v35 = vadd.f32 %v1356_v62, %v1140_v34  ;;  %v418_v34 = vld [vmem:[%s11466_s1 + $0x8] sm:$0xff] }
 0x292   : > { %v1125_v62 = vadd.f32 %v8007_v1, %v8113_v47  ;;  %v1119_v47 = vadd.f32 %v8007_v1, %v8039_v50  ;;  %v8506_v12 = vld [vmem:[%s11478_s2 + $0x88] sm:$0xff] }
 0x293   : > { %11463 = vst [vmem:[#allocation49_spill] sm:$0xff] %v8162_v5 }
 0x296   : > { %v1160_v2 = vpop.f32.mrf.mxu2 }
 0x297   : > { %v1161_v46 = vadd.f32 %v8007_v1, %v1160_v2  ;;  %v1149_v2 = vadd.f32 %v8007_v1, %v1148_v48 }
 0x299   : > { %v8157_v16 = vadd.f32 %v1377_v51, %v1161_v46  ;;  %v1146_v46 = vadd.f32 %v8007_v1, %v1145_v57  ;;  %v8177_v45 = vadd.f32 %v1365_v11, %v1149_v2  ;;  %v8200_v51 = vadd.f32 %v1353_v18, %v1137_v21  ;;  %v11467_v2 = vld [vmem:[#allocation29_spill] sm:$0xff] }
 0x29a   : > { %v8214_v18 = vadd.f32 %v8095_v29, %v1131_v7  ;;  %v8228_v29 = vadd.f32 %v11467_v2, %v1125_v62  ;;  %v6433_v21 = vld [vmem:[%s11285_s5 + $0x50] sm:$0xff]  ;;  %v1586_v7 = vmax.f32 %v8132_v36, 0.0  ;;  %v1590_v62 = vmax.f32 %v8100_v30, 0.0 }
 0x29b   : > { %11461 = vst [vmem:[#allocation47_spill] sm:$0xff] %v8157_v16  ;;  %v8185_v57 = vadd.f32 %v1362_v55, %v1146_v46  ;;  %v1533_v33 = vmul.f32 %v7990_v17, %v8200_v51  ;;  %v8464_v17 = vld [vmem:[%s11478_s2 + $0x68] sm:$0xff] }
 0x29d   : > { %v1536_v55 = vmul.f32 %v7971_v8, %v8185_v57  ;;  %v6504_v8 = vld [vmem:[%s11287_s7 + $0x20] sm:$0xff] }
 0x29e   : > { %v1163_v37 = vpop.f32.mrf.mxu2 }
 0x29f   : > { %v1164_v25 = vadd.f32 %v8007_v1, %v1163_v37  ;;  %v1541_v37 = vmul.f32 %v7946_v19, %v8157_v16 }
 0x2a1   : > { %v8159_v54 = vadd.f32 %v1380_v15, %v1164_v25  ;;  %v1540_v15 = vmul.f32 %v7938_v0, %v8162_v5  ;;  %v1143_v25 = vadd.f32 %v8007_v1, %v1142_v61  ;;  %v1134_v61 = vadd.f32 %v8007_v1, %v1133_v49 }
 0x2a2   : > { %v1534_v49 = vmul.f32 %v7984_v58, %v8195_v35  ;;  %v6506_v58 = vld [vmem:[%s11287_s7 + $0x30] sm:$0xff] }
 0x2a3   : > { %11462 = vst [vmem:[#allocation48_spill] sm:$0xff] %v8159_v54  ;;  %v1542_v26 = vmul.f32 %v7933_v60, %v8159_v54  ;;  %v8190_v11 = vadd.f32 %v1359_v53, %v1143_v25  ;;  %v1128_v53 = vadd.f32 %v8007_v1, %v8147_v13  ;;  %v8207_v48 = vadd.f32 %v8138_v24, %v1134_v61  ;;  %v6431_v61 = vld [vmem:[%s11285_s5 + $0x40] sm:$0xff] }
 0x2a4   : > { %v1122_v13 = vadd.f32 %v8007_v1, %v8075_v42  ;;  %v11470_v42 = vld [vmem:[#allocation21_spill] sm:$0xff]  ;;  %v1529_v1 = vmul.f32 %v8048_v32, %v8228_v29 }
 0x2a5   : > { %1563 = vmatpush.msrb.mxu2 %v1542_v26  ;;  %v1537_v26 = vmul.f32 %v7966_v9, %v8177_v45  ;;  %v1535_v56 = vmul.f32 %v7977_v3, %v8190_v11  ;;  %v8221_v24 = vadd.f32 %v8050_v14, %v1128_v53  ;;  %v1532_v41 = vmul.f32 %v7996_v22, %v8207_v48  ;;  %v8440_v32 = vld [vmem:[%s11478_s2 + $0x50] sm:$0xff]  ;;  %v6507_v22 = vld [vmem:[%s11287_s7 + $0x38] sm:$0xff]  ;;  %v6505_v3 = vld [vmem:[%s11287_s7 + $0x28] sm:$0xff] }
 0x2a6   : > { %v1588_v53 = vmax.f32 %v8118_v20, 0.0  ;;  %2247 = vmatpush.msrb.mxu3 %v6507_v22  ;;  %v8480_v22 = vld [vmem:[%s11478_s2 + $0x70] sm:$0xff] }
 0x2a7   : > { %1564 = vmatpush.msrb.mxu2 %v1541_v37  ;;  %v11468_v37 = vld [vmem:[#allocation27_spill] sm:$0xff]  ;;  %v1530_v14 = vmul.f32 %v8019_v40, %v8221_v24  ;;  %v8447_v40 = vld [vmem:[%s11478_s2 + $0x58] sm:$0xff] }
 0x2a8   : > { %v1531_v46 = vmul.f32 %v11468_v37, %v8214_v18  ;;  %v8454_v37 = vld [vmem:[%s11478_s2 + $0x60] sm:$0xff]  ;;  %2248 = vmatpush.msrb.mxu3 %v6506_v58  ;;  %v8487_v58 = vld [vmem:[%s11478_s2 + $0x78] sm:$0xff] }
 0x2a9   : > { %1565 = vmatpush.msrb.mxu2 %v1540_v15  ;;  %v11469_v15 = vld [vmem:[#allocation25_spill] sm:$0xff] }
 0x2aa   : > { %v8233_v25 = vadd.f32 %v11469_v15, %v1122_v13  ;;  %v1592_v13 = vmax.f32 %v8080_v10, 0.0  ;;  %2249 = vmatpush.msrb.mxu3 %v6505_v3  ;;  %v8501_v3 = vld [vmem:[%s11288_s8 + $0x2] ss:$0 sm:$0xff] }
 0x2ab   : > { %1566 = vmatpush.msrb.mxu2 %v1539_v63  ;;  %v8238_v63 = vadd.f32 %v11470_v42, %v1119_v47  ;;  %v11471_v47 = vld [vmem:[#allocation40_spill] sm:$0xff] }
 0x2ac   : > { %v1528_v50 = vmul.f32 %v8084_v59, %v8233_v25  ;;  %v1594_v2 = vmax.f32 %v11471_v47, 0.0  ;;  %v8433_v59 = vld [vmem:[%s11478_s2 + $0x48] sm:$0xff]  ;;  %2250 = vmatpush.msrb.mxu3 %v6504_v8  ;;  %v8494_v8 = vld [vmem:[%s11478_s2 + $0x80] sm:$0xff] }
 0x2ad   : > { %1567 = vmatpush.msrb.mxu2 %v1538_v39  ;;  %v1527_v31 = vmul.f32 %v8104_v23, %v8238_v63  ;;  %v6434_v39 = vld [vmem:[%s11285_s5 + $0x58] sm:$0xff]  ;;  %v8426_v23 = vld [vmem:[%s11478_s2 + $0x40] sm:$0xff] }
 0x2af   : > { %1568 = vmatpush.msrb.mxu2 %v1537_v26  ;;  %v6432_v26 = vld [vmem:[%s11285_s5 + $0x48] sm:$0xff] }
 0x2b1   : > { %1569 = vmatpush.msrb.mxu2 %v1536_v55  ;;  %v1585_v55 = vmax.f32 %v8141_v43, 0.0 }
 0x2b3   : > { %1570 = vmatpush.msrb.mxu2 %v1535_v56  ;;  %v1587_v56 = vmax.f32 %v8125_v44, 0.0 }
 0x2b5   : > { %1571 = vmatpush.msrb.mxu2 %v1534_v49  ;;  %v1589_v49 = vmax.f32 %v8109_v6, 0.0 }
 0x2b7   : > { %1572 = vmatpush.msrb.mxu2 %v1533_v33  ;;  %v1591_v33 = vmax.f32 %v8089_v28, 0.0 }
 0x2b9   : > { %1573 = vmatpush.msrb.mxu2 %v1532_v41  ;;  %v1593_v41 = vmax.f32 %v8071_v38, 0.0 }
 0x2bb   : > { %1574 = vmatpush.msrb.mxu2 %v1531_v46  ;;  %v11472_v46 = vld [vmem:[#allocation38_spill] sm:$0xff] }
 0x2bc   : > { %v1595_v15 = vmax.f32 %v11472_v46, 0.0 }
 0x2bd   : > { %1575 = vmatpush.msrb.mxu2 %v1530_v14  ;;  %v11473_v14 = vld [vmem:[#allocation36_spill] sm:$0xff] }
 0x2be   : > { %v1596_v42 = vmax.f32 %v11473_v14, 0.0 }
 0x2bf   : > { %1576 = vmatpush.msrb.mxu2 %v1529_v1  ;;  %v6438_v1 = vld [vmem:[%s11285_s5 + $0x78] sm:$0xff] }
 0x2c0   : > { %1642 = vmatpush.msra.mxu0 %v6438_v1  ;;  %v1605_v1 = vmax.f32 %v8214_v18, 0.0 }
 0x2c1   : > { %1577 = vmatpush.msrb.mxu2 %v1528_v50  ;;  %v6437_v50 = vld [vmem:[%s11285_s5 + $0x70] sm:$0xff] }
 0x2c2   : > { %1643 = vmatpush.msra.mxu0 %v6437_v50  ;;  %v1606_v50 = vmax.f32 %v8207_v48, 0.0 }
 0x2c3   : > { %1578 = vmatpush.msrb.mxu2 %v1527_v31  ;;  %v6436_v31 = vld [vmem:[%s11285_s5 + $0x68] sm:$0xff] }
 0x2c4   : > { %1579 = vmatmul.f32.vlgmr.msrb.gmra.mxu2 %v418_v34  ;;  %1644 = vmatpush.msra.mxu0 %v6436_v31  ;;  %v11474_v34 = vld [vmem:[#allocation34_spill] sm:$0xff]  ;;  %v1607_v31 = vmax.f32 %v8200_v51, 0.0 }
 0x2c5   : > { %1967 = vmatpush.msra.mxu2 %v6434_v39  ;;  %v1597_v39 = vmax.f32 %v11474_v34, 0.0 }
 0x2c7   : > { %1968 = vmatpush.msra.mxu2 %v6433_v21  ;;  %v6435_v21 = vld [vmem:[%s11285_s5 + $0x60] sm:$0xff] }
 0x2c8   : > { %1645 = vmatpush.msra.mxu0 %v6435_v21  ;;  %v1608_v21 = vmax.f32 %v8195_v35, 0.0 }
 0x2c9   : > { %1969 = vmatpush.msra.mxu2 %v6432_v26  ;;  %v11475_v26 = vld [vmem:[#allocation33_spill] sm:$0xff] }
 0x2cb   : > { %1970 = vmatpush.msra.mxu2 %v6431_v61  ;;  %v1598_v61 = vmax.f32 %v11475_v26, 0.0 }
 0x2cc   : > { %6472 = vmatmul.msk.f32.vlgmr.msra.gmra.mxu2 %vm956_vm2, %v1585_v55  ;;  %v11476_v55 = vld [vmem:[#allocation31_spill] sm:$0xff] }
 0x2d4   : > { %6473 = vmatmul.msk.f32.gmra.mxu2 %vm956_vm2, %v1586_v7  ;;  %v1599_v7 = vmax.f32 %v11476_v55, 0.0 }
 0x2dc   : > { %6474 = vmatmul.msk.f32.gmra.mxu2 %vm956_vm2, %v1587_v56  ;;  %v11477_v56 = vld [vmem:[#allocation32_spill] sm:$0xff] }
 0x2e4   : > { %6475 = vmatmul.msk.f32.gmra.mxu2 %vm956_vm2, %v1588_v53  ;;  %v1600_v53 = vmax.f32 %v11477_v56, 0.0 }
 0x2ec   : > { %6476 = vmatmul.msk.f32.gmra.mxu2 %vm956_vm2, %v1589_v49 }
 0x2f4   : > { %6477 = vmatmul.msk.f32.gmra.mxu2 %vm956_vm2, %v1590_v62 }
 0x2fc   : > { %6478 = vmatmul.msk.f32.gmra.mxu2 %vm956_vm2, %v1591_v33 }
 0x2fd   : > { %v1560_v49 = vpop.f32.mrf.mxu0 }
 0x304   : > { %6479 = vmatmul.msk.f32.gmra.mxu2 %vm956_vm2, %v1592_v13 }
 0x30c   : > { %6480 = vmatmul.msk.f32.gmra.mxu2 %vm956_vm2, %v1593_v41  ;;  %v1601_v41 = vmax.f32 %v8238_v63, 0.0 }
 0x314   : > { %6481 = vmatmul.msk.f32.gmra.mxu2 %vm956_vm2, %v1594_v2  ;;  %v1602_v2 = vmax.f32 %v8233_v25, 0.0 }
 0x31c   : > { %6482 = vmatmul.msk.f32.gmra.mxu2 %vm956_vm2, %v1595_v15  ;;  %v1603_v15 = vmax.f32 %v8228_v29, 0.0 }
 0x324   : > { %6483 = vmatmul.msk.f32.gmra.mxu2 %vm956_vm2, %v1596_v42  ;;  %v1604_v42 = vmax.f32 %v8221_v24, 0.0 }
 0x32c   : > { %6484 = vmatmul.msk.f32.gmra.mxu2 %vm956_vm2, %v1597_v39 }
 0x334   : > { %6485 = vmatmul.msk.f32.gmra.mxu2 %vm956_vm2, %v1598_v61 }
 0x33c   : > { %6486 = vmatmul.msk.f32.gmra.mxu2 %vm956_vm2, %v1599_v7  ;;  %v1609_v7 = vmax.f32 %v8190_v11, 0.0 }
 0x344   : > { %6487 = vmatmul.msk.f32.gmra.mxu2 %vm956_vm2, %v1600_v53 }
 0x347   : > { %v1580_v62 = vpop.f32.mrf.mxu2 }
 0x348   : > { %v1581_v33 = vadd.f32 %v1580_v62, %v1560_v49  ;;  %v1610_v49 = vmax.f32 %v8185_v57, 0.0  ;;  %v1611_v62 = vmax.f32 %v8177_v45, 0.0 }
 0x34a   : > { %v1622_v13 = vmax.f32 %v1581_v33, 0.0 }
 0x34c   : > { %6439 = vmatmul.msk.f32.vlgmr.msra.gmra.mxu0 %vm956_vm2, %v1622_v13  ;;  %6488 = vmatmul.msk.f32.gmra.mxu2 %vm956_vm2, %v1601_v41  ;;  %v1612_v41 = vmax.f32 %v8172_v52, 0.0 }
 0x34f   : > { %v8320_v39 = vpop.f32.mrf.mxu2 }
 0x354   : > { %6489 = vmatmul.msk.f32.gmra.mxu2 %vm956_vm2, %v1602_v2 }
 0x357   : > { %v8324_v61 = vpop.f32.mrf.mxu2 }
 0x35c   : > { %6490 = vmatmul.msk.f32.gmra.mxu2 %vm956_vm2, %v1603_v15  ;;  %v1613_v15 = vmax.f32 %v8167_v4, 0.0  ;;  %v8517_v4 = vld [vmem:[%s11478_s2 + $0x90] sm:$0xff] }
 0x35f   : > { %v8328_v53 = vpop.f32.mrf.mxu2 }
 0x364   : > { %6491 = vmatmul.msk.f32.gmra.mxu2 %vm956_vm2, %v1604_v42 }
 0x367   : > { %v8333_v13 = vpop.f32.mrf.mxu2 }
 0x36c   : > { %6492 = vmatmul.msk.f32.gmra.mxu2 %vm956_vm2, %v1605_v1  ;;  %v1614_v1 = vmax.f32 %v8162_v5, 0.0 }
 0x36f   : > { %v8338_v2 = vpop.f32.mrf.mxu2 }
 0x374   : > { %6493 = vmatmul.msk.f32.gmra.mxu2 %vm956_vm2, %v1606_v50 }
 0x377   : > { %v8342_v42 = vpop.f32.mrf.mxu2 }
 0x37c   : > { %6494 = vmatmul.msk.f32.gmra.mxu2 %vm956_vm2, %v1607_v31  ;;  %v1615_v31 = vmax.f32 %v8157_v16, 0.0 }
 0x37f   : > { %v8346_v50 = vpop.f32.mrf.mxu2 }
 0x384   : > { %6495 = vmatmul.msk.f32.gmra.mxu2 %vm956_vm2, %v1608_v21  ;;  %v1616_v21 = vmax.f32 %v8159_v54, 0.0 }
 0x38c   : > { %6496 = vmatmul.msk.f32.gmra.mxu2 %vm956_vm2, %v1609_v7  ;;  %v8351_v7 = vpop.f32.mrf.mxu2 }
 0x394   : > { %6497 = vmatmul.msk.f32.gmra.mxu2 %vm956_vm2, %v1610_v49  ;;  %v8357_v49 = vld [vmem:[%s11478_s2] sm:$0xff] }
 0x39c   : > { %6498 = vmatmul.msk.f32.gmra.mxu2 %vm956_vm2, %v1611_v62  ;;  %v8362_v62 = vld [vmem:[%s11478_s2 + $0x8] sm:$0xff] }
 0x3a4   : > { %6499 = vmatmul.msk.f32.gmra.mxu2 %vm956_vm2, %v1612_v41 }
 0x3ac   : > { %6500 = vmatmul.msk.f32.gmra.mxu2 %vm956_vm2, %v1613_v15  ;;  %v6547_v15 = vld [vmem:[%s11286_s6 + $0x78] sm:$0xff] }
 0x3b4   : > { %6501 = vmatmul.msk.f32.gmra.mxu2 %vm956_vm2, %v1614_v1  ;;  %v6546_v1 = vld [vmem:[%s11286_s6 + $0x70] sm:$0xff] }
 0x3bc   : > { %6502 = vmatmul.msk.f32.gmra.mxu2 %vm956_vm2, %v1615_v31  ;;  %v6545_v31 = vld [vmem:[%s11286_s6 + $0x68] sm:$0xff] }
 0x3c4   : > { %6503 = vmatmul.msk.f32.gmra.mxu2 %vm956_vm2, %v1616_v21  ;;  %v6544_v21 = vld [vmem:[%s11286_s6 + $0x60] sm:$0xff] }
 0x3c9   : > { %v1647_v41 = vpop.f32.mrf.mxu0 }
 0x3ca   : > { %1761 = vmatpush.msrb.mxu0 %v1647_v41  ;;  %7166 = vmatpush.msra.mxu1 %v1647_v41  ;;  %v8383_v41 = vld [vmem:[%s11478_s2 + $0x10] sm:$0xff] }
 0x3cb   : > { %6440 = vmatmul.msk.f32.vlgmr.msrb.gmra.mxu0 %vm456_vm0, %v8357_v49  ;;  %6441 = vmatmul.msk.f32.vlgmr.msra.gmra.mxu1 %vm456_vm0, %v8362_v62 }
 0x3cc   : > { %2372 = vmatpush.msra.mxu0 %v6547_v15  ;;  %v8391_v15 = vld [vmem:[%s11478_s2 + $0x18] sm:$0xff] }
 0x3ce   : > { %2373 = vmatpush.msra.mxu0 %v6546_v1  ;;  %v8398_v1 = vld [vmem:[%s11478_s2 + $0x20] sm:$0xff] }
 0x3d0   : > { %2374 = vmatpush.msra.mxu0 %v6545_v31  ;;  %v8412_v31 = vld [vmem:[%s11478_s2 + $0x30] sm:$0xff] }
 0x3d2   : > { %2375 = vmatpush.msra.mxu0 %v6544_v21  ;;  %v8419_v21 = vld [vmem:[%s11478_s2 + $0x38] sm:$0xff] }
 0x3d3   : > { %6442 = vmatmul.msk.f32.gmra.mxu1 %vm456_vm0, %v8383_v41  ;;  %6548 = vmatmul.msk.f32.vlgmr.msra.gmra.mxu0 %vm956_vm2, %v1581_v33  ;;  %v8405_v33 = vld [vmem:[%s11478_s2 + $0x28] sm:$0xff] }
 0x3db   : > { %6443 = vmatmul.msk.f32.gmra.mxu1 %vm456_vm0, %v8391_v15 }
 0x3e3   : > { %6444 = vmatmul.msk.f32.gmra.mxu1 %vm456_vm0, %v8398_v1 }
 0x3eb   : > { %6445 = vmatmul.msk.f32.gmra.mxu1 %vm456_vm0, %v8405_v33 }
 0x3f3   : > { %6446 = vmatmul.msk.f32.gmra.mxu1 %vm456_vm0, %v8412_v31 }
 0x3fb   : > { %6447 = vmatmul.msk.f32.gmra.mxu1 %vm456_vm0, %v8419_v21 }
 0x403   : > { %6448 = vmatmul.msk.f32.gmra.mxu1 %vm456_vm0, %v8426_v23 }
 0x40b   : > { %6449 = vmatmul.msk.f32.gmra.mxu1 %vm456_vm0, %v8433_v59 }
 0x413   : > { %6450 = vmatmul.msk.f32.gmra.mxu1 %vm456_vm0, %v8440_v32 }
 0x41b   : > { %6451 = vmatmul.msk.f32.gmra.mxu1 %vm456_vm0, %v8447_v40 }
 0x423   : > { %6452 = vmatmul.msk.f32.gmra.mxu1 %vm456_vm0, %v8454_v37 }
 0x42b   : > { %6453 = vmatmul.msk.f32.gmra.mxu1 %vm456_vm0, %v8464_v17 }
 0x433   : > { %6454 = vmatmul.msk.f32.gmra.mxu1 %vm456_vm0, %v8480_v22 }
 0x43b   : > { %6455 = vmatmul.msk.f32.gmra.mxu1 %vm456_vm0, %v8487_v58 }
 0x443   : > { %6456 = vmatmul.msk.f32.gmra.mxu1 %vm456_vm0, %v8494_v8 }
 0x448   : > { %v1763_v9 = vpop.f32.mrf.mxu0  ;;  %v1766_v27 = vpop.f32.mrf.mxu1 }
 0x449   : > { %v1973_v0 = vadd.f32 %v8320_v39, %v1763_v9  ;;  %v1976_v54 = vadd.f32 %v8324_v61, %v1766_v27  ;;  %v8529_v9 = vld [vmem:[%s11478_s2 + $0x98] sm:$0xff]  ;;  %v8541_v61 = vld [vmem:[%s11478_s2 + $0xa0] sm:$0xff] }
 0x44b   : > { %v2069_v19 = vadd.f32 %v8501_v3, %v1973_v0  ;;  %6457 = vmatmul.msk.f32.gmra.mxu1 %vm456_vm0, %v8506_v12  ;;  %v2070_v52 = vadd.f32 %v8501_v3, %v1976_v54  ;;  %v1996_v0 = vpop.f32.mrf.mxu2 }
 0x44d   : > { %v2101_v60 = vmax.f32 %v2069_v19, 0.0  ;;  %v2102_v19 = vmax.f32 %v2070_v52, 0.0 }
 0x44f   : > { %6508 = vmatmul.msk.f32.vlgmr.msrb.gmra.mxu3 %vm956_vm2, %v2101_v60 }
 0x450   : > { %v1769_v16 = vpop.f32.mrf.mxu1  ;;  %v2377_v5 = vpop.f32.mrf.mxu0 }
 0x451   : > { %2395 = vmatpush.msrb.mxu0 %v2377_v5  ;;  %v1979_v60 = vadd.f32 %v8328_v53, %v1769_v16 }
 0x452   : > { %6549 = vmatmul.msk.f32.vlgmr.msrb.gmra.mxu0 %vm456_vm0, %v8357_v49 }
 0x453   : > { %6458 = vmatmul.msk.f32.gmra.mxu1 %vm456_vm0, %v8517_v4  ;;  %v2071_v54 = vadd.f32 %v8501_v3, %v1979_v60  ;;  %v1999_v16 = vpop.f32.mrf.mxu2 }
 0x455   : > { %v2103_v5 = vmax.f32 %v2071_v54, 0.0 }
 0x457   : > { %6509 = vmatmul.msk.f32.gmra.mxu3 %vm956_vm2, %v2102_v19  ;;  %v8553_v19 = vld [vmem:[%s11478_s2 + $0xa8] sm:$0xff] }
 0x458   : > { %v1772_v27 = vpop.f32.mrf.mxu1 }
 0x459   : > { %v1982_v52 = vadd.f32 %v8333_v13, %v1772_v27 }
 0x45a   : > { %6550 = vmatmul.msk.f32.gmra.mxu0 %vm456_vm0, %v8362_v62 }
 0x45b   : > { %6459 = vmatmul.msk.f32.gmra.mxu1 %vm456_vm0, %v8529_v9  ;;  %v2072_v53 = vadd.f32 %v8501_v3, %v1982_v52  ;;  %v2002_v60 = vpop.f32.mrf.mxu2 }
 0x45d   : > { %v2104_v49 = vmax.f32 %v2072_v53, 0.0 }
 0x45f   : > { %6510 = vmatmul.msk.f32.gmra.mxu3 %vm956_vm2, %v2103_v5  ;;  %v8565_v5 = vld [vmem:[%s11478_s2 + $0xb0] sm:$0xff] }
 0x460   : > { %v1775_v39 = vpop.f32.mrf.mxu1 }
 0x461   : > { %v1985_v13 = vadd.f32 %v8338_v2, %v1775_v39 }
 0x462   : > { %6551 = vmatmul.msk.f32.gmra.mxu0 %vm456_vm0, %v8383_v41 }
 0x463   : > { %6460 = vmatmul.msk.f32.gmra.mxu1 %vm456_vm0, %v8541_v61  ;;  %v2073_v27 = vadd.f32 %v8501_v3, %v1985_v13 }
 0x465   : > { %v2105_v41 = vmax.f32 %v2073_v27, 0.0 }
 0x467   : > { %6511 = vmatmul.msk.f32.gmra.mxu3 %vm956_vm2, %v2104_v49  ;;  %v8577_v49 = vld [vmem:[%s11478_s2 + $0xb8] sm:$0xff] }
 0x468   : > { %v1778_v62 = vpop.f32.mrf.mxu1 }
 0x469   : > { %v1988_v2 = vadd.f32 %v8342_v42, %v1778_v62 }
 0x46a   : > { %6552 = vmatmul.msk.f32.gmra.mxu0 %vm456_vm0, %v8391_v15  ;;  %v2005_v15 = vpop.f32.mrf.mxu2 }
 0x46b   : > { %6461 = vmatmul.msk.f32.gmra.mxu1 %vm456_vm0, %v8553_v19  ;;  %v2074_v52 = vadd.f32 %v8501_v3, %v1988_v2 }
 0x46d   : > { %v2106_v39 = vmax.f32 %v2074_v52, 0.0 }
 0x46f   : > { %6512 = vmatmul.msk.f32.gmra.mxu3 %vm956_vm2, %v2105_v41  ;;  %v8589_v41 = vld [vmem:[%s11478_s2 + $0xc0] sm:$0xff] }
 0x470   : > { %v1781_v54 = vpop.f32.mrf.mxu1 }
 0x471   : > { %v1991_v42 = vadd.f32 %v8346_v50, %v1781_v54 }
 0x472   : > { %6553 = vmatmul.msk.f32.gmra.mxu0 %vm456_vm0, %v8398_v1  ;;  %v2008_v1 = vpop.f32.mrf.mxu2 }
 0x473   : > { %6462 = vmatmul.msk.f32.gmra.mxu1 %vm456_vm0, %v8565_v5  ;;  %v2075_v13 = vadd.f32 %v8501_v3, %v1991_v42 }
 0x475   : > { %v2107_v62 = vmax.f32 %v2075_v13, 0.0  ;;  %v8611_v13 = vld [vmem:[%s11478_s2 + $0xd0] sm:$0xff] }
 0x477   : > { %6513 = vmatmul.msk.f32.gmra.mxu3 %vm956_vm2, %v2106_v39  ;;  %v8600_v39 = vld [vmem:[%s11478_s2 + $0xc8] sm:$0xff] }
 0x478   : > { %v1784_v53 = vpop.f32.mrf.mxu1 }
 0x479   : > { %v1994_v50 = vadd.f32 %v8351_v7, %v1784_v53 }
 0x47a   : > { %6554 = vmatmul.msk.f32.gmra.mxu0 %vm456_vm0, %v8405_v33  ;;  %v2011_v52 = vpop.f32.mrf.mxu2 }
 0x47b   : > { %6463 = vmatmul.msk.f32.gmra.mxu1 %vm456_vm0, %v8577_v49  ;;  %v2076_v2 = vadd.f32 %v8501_v3, %v1994_v50 }
 0x47d   : > { %v2108_v33 = vmax.f32 %v2076_v2, 0.0  ;;  %v8622_v2 = vld [vmem:[%s11478_s2 + $0xd8] sm:$0xff] }
 0x47f   : > { %6514 = vmatmul.msk.f32.gmra.mxu3 %vm956_vm2, %v2107_v62 }
 0x480   : > { %v1787_v27 = vpop.f32.mrf.mxu1 }
 0x481   : > { %v1997_v54 = vadd.f32 %v1996_v0, %v1787_v27 }
 0x482   : > { %6555 = vmatmul.msk.f32.gmra.mxu0 %vm456_vm0, %v8412_v31  ;;  %v2014_v62 = vpop.f32.mrf.mxu2 }
 0x483   : > { %6464 = vmatmul.msk.f32.gmra.mxu1 %vm456_vm0, %v8589_v41  ;;  %v2077_v42 = vadd.f32 %v8501_v3, %v1997_v54 }
 0x485   : > { %v2109_v31 = vmax.f32 %v2077_v42, 0.0  ;;  %v6542_v42 = vld [vmem:[%s11286_s6 + $0x50] sm:$0xff] }
 0x487   : > { %6515 = vmatmul.msk.f32.gmra.mxu3 %vm956_vm2, %v2108_v33 }
 0x488   : > { %v1790_v7 = vpop.f32.mrf.mxu1 }
 0x489   : > { %v2000_v53 = vadd.f32 %v1999_v16, %v1790_v7 }
 0x48a   : > { %6556 = vmatmul.msk.f32.gmra.mxu0 %vm456_vm0, %v8419_v21  ;;  %v2017_v54 = vpop.f32.mrf.mxu2 }
 0x48b   : > { %6465 = vmatmul.msk.f32.gmra.mxu1 %vm456_vm0, %v8600_v39  ;;  %v2078_v50 = vadd.f32 %v8501_v3, %v2000_v53  ;;  %v8642_v53 = vld [vmem:[%s11478_s2 + $0xe0] sm:$0xff] }
 0x48d   : > { %v2110_v21 = vmax.f32 %v2078_v50, 0.0 }
 0x48f   : > { %6516 = vmatmul.msk.f32.gmra.mxu3 %vm956_vm2, %v2109_v31 }
 0x490   : > { %v1793_v0 = vpop.f32.mrf.mxu1 }
 0x491   : > { %v2003_v27 = vadd.f32 %v2002_v60, %v1793_v0  ;;  %v6540_v0 = vld [vmem:[%s11286_s6 + $0x40] sm:$0xff] }
 0x492   : > { %6557 = vmatmul.msk.f32.gmra.mxu0 %vm456_vm0, %v8426_v23  ;;  %v6543_v23 = vld [vmem:[%s11286_s6 + $0x58] sm:$0xff]  ;;  %v2020_v50 = vpop.f32.mrf.mxu2 }
 0x493   : > { %6466 = vmatmul.msk.f32.gmra.mxu1 %vm456_vm0, %v8611_v13  ;;  %v2079_v33 = vadd.f32 %v8501_v3, %v2003_v27 }
 0x494   : > { %2601 = vmatpush.msrb.mxu1 %v6543_v23 }
 0x495   : > { %v2111_v60 = vmax.f32 %v2079_v33, 0.0  ;;  %v8656_v33 = vld [vmem:[%s11478_s2 + $0xe8] sm:$0xff] }
 0x496   : > { %2602 = vmatpush.msrb.mxu1 %v6542_v42  ;;  %v8667_v42 = vld [vmem:[%s11478_s2 + $0xf0] sm:$0xff] }
 0x497   : > { %6517 = vmatmul.msk.f32.gmra.mxu3 %vm956_vm2, %v2110_v21 }
 0x498   : > { %v1796_v16 = vpop.f32.mrf.mxu1 }
 0x499   : > { %v2006_v7 = vadd.f32 %v2005_v15, %v1796_v16 }
 0x49a   : > { %6558 = vmatmul.msk.f32.gmra.mxu0 %vm456_vm0, %v8433_v59  ;;  %v6541_v59 = vld [vmem:[%s11286_s6 + $0x48] sm:$0xff] }
 0x49b   : > { %6467 = vmatmul.msk.f32.gmra.mxu1 %vm456_vm0, %v8622_v2  ;;  %v2080_v15 = vadd.f32 %v8501_v3, %v2006_v7  ;;  %v2023_v7 = vpop.f32.mrf.mxu2 }
 0x49c   : > { %2603 = vmatpush.msrb.mxu1 %v6541_v59 }
 0x49d   : > { %v2112_v21 = vmax.f32 %v2080_v15, 0.0  ;;  %v8678_v15 = vld [vmem:[%s11478_s2 + $0xf8] sm:$0xff] }
 0x49e   : > { %2604 = vmatpush.msrb.mxu1 %v6540_v0 }
 0x49f   : > { %6518 = vmatmul.msk.f32.gmra.mxu3 %vm956_vm2, %v2111_v60 }
 0x4a0   : > { %v1799_v31 = vpop.f32.mrf.mxu1 }
 0x4a1   : > { %v2009_v27 = vadd.f32 %v2008_v1, %v1799_v31 }
 0x4a2   : > { %6559 = vmatmul.msk.f32.gmra.mxu0 %vm456_vm0, %v8440_v32 }
 0x4a3   : > { %6468 = vmatmul.msk.f32.gmra.mxu1 %vm456_vm0, %v8642_v53  ;;  %v2081_v23 = vadd.f32 %v8501_v3, %v2009_v27  ;;  %v2026_v0 = vpop.f32.mrf.mxu2 }
 0x4a5   : > { %v2113_v32 = vmax.f32 %v2081_v23, 0.0 }
 0x4a7   : > { %6519 = vmatmul.msk.f32.gmra.mxu3 %vm956_vm2, %v2112_v21 }
 0x4a8   : > { %v1802_v16 = vpop.f32.mrf.mxu1 }
 0x4a9   : > { %v2012_v60 = vadd.f32 %v2011_v52, %v1802_v16 }
 0x4aa   : > { %6560 = vmatmul.msk.f32.gmra.mxu0 %vm456_vm0, %v8447_v40 }
 0x4ab   : > { %6469 = vmatmul.msk.f32.gmra.mxu1 %vm456_vm0, %v8656_v33  ;;  %v2082_v59 = vadd.f32 %v8501_v3, %v2012_v60  ;;  %v2029_v23 = vpop.f32.mrf.mxu2 }
 0x4ad   : > { %v2114_v40 = vmax.f32 %v2082_v59, 0.0 }
 0x4af   : > { %6520 = vmatmul.msk.f32.gmra.mxu3 %vm956_vm2, %v2113_v32 }
 0x4b0   : > { %v1805_v1 = vpop.f32.mrf.mxu1 }
 0x4b1   : > { %v2015_v31 = vadd.f32 %v2014_v62, %v1805_v1 }
 0x4b2   : > { %6561 = vmatmul.msk.f32.gmra.mxu0 %vm456_vm0, %v8454_v37 }
 0x4b3   : > { %6470 = vmatmul.msk.f32.gmra.mxu1 %vm456_vm0, %v8667_v42  ;;  %v2083_v21 = vadd.f32 %v8501_v3, %v2015_v31 }
 0x4b5   : > { %v2115_v37 = vmax.f32 %v2083_v21, 0.0 }
 0x4b7   : > { %6521 = vmatmul.msk.f32.gmra.mxu3 %vm956_vm2, %v2114_v40 }
 0x4b8   : > { %v1808_v52 = vpop.f32.mrf.mxu1 }
 0x4b9   : > { %v2018_v27 = vadd.f32 %v2017_v54, %v1808_v52  ;;  %v2032_v54 = vpop.f32.mrf.mxu2 }
 0x4ba   : > { %6562 = vmatmul.msk.f32.gmra.mxu0 %vm456_vm0, %v8464_v17 }
 0x4bb   : > { %6471 = vmatmul.msk.f32.gmra.mxu1 %vm456_vm0, %v8678_v15  ;;  %v2084_v16 = vadd.f32 %v8501_v3, %v2018_v27 }
 0x4bd   : > { %v2116_v32 = vmax.f32 %v2084_v16, 0.0 }
 0x4bf   : > { %6522 = vmatmul.msk.f32.gmra.mxu3 %vm956_vm2, %v2115_v37 }
 0x4c0   : > { %v1811_v62 = vpop.f32.mrf.mxu1 }
 0x4c1   : > { %v2021_v60 = vadd.f32 %v2020_v50, %v1811_v62  ;;  %v2035_v52 = vpop.f32.mrf.mxu2 }
 0x4c2   : > { %6563 = vmatmul.msk.f32.gmra.mxu0 %vm456_vm0, %v8480_v22 }
 0x4c3   : > { %6581 = vmatmul.msk.f32.vlgmr.msrb.gmra.mxu1 %vm956_vm2, %v8141_v43  ;;  %v2085_v1 = vadd.f32 %v8501_v3, %v2021_v60 }
 0x4c5   : > { %v2117_v59 = vmax.f32 %v2085_v1, 0.0 }
 0x4c7   : > { %6523 = vmatmul.msk.f32.gmra.mxu3 %vm956_vm2, %v2116_v32 }
 0x4c8   : > { %v1814_v17 = vpop.f32.mrf.mxu1 }
 0x4c9   : > { %v2024_v22 = vadd.f32 %v2023_v7, %v1814_v17  ;;  %v2038_v27 = vpop.f32.mrf.mxu2 }
 0x4ca   : > { %6564 = vmatmul.msk.f32.gmra.mxu0 %vm456_vm0, %v8487_v58 }
 0x4cb   : > { %6582 = vmatmul.msk.f32.gmra.mxu1 %vm956_vm2, %v8132_v36  ;;  %v2086_v50 = vadd.f32 %v8501_v3, %v2024_v22 }
 0x4cd   : > { %v2118_v58 = vmax.f32 %v2086_v50, 0.0 }
 0x4cf   : > { %6524 = vmatmul.msk.f32.gmra.mxu3 %vm956_vm2, %v2117_v59  ;;  %v8698_v40 = vpop.f32.mrf.mxu0 }
 0x4d0   : > { %v1817_v43 = vpop.f32.mrf.mxu1 }
 0x4d1   : > { %v2027_v31 = vadd.f32 %v2026_v0, %v1817_v43  ;;  %v2041_v60 = vpop.f32.mrf.mxu2 }
 0x4d2   : > { %6565 = vmatmul.msk.f32.gmra.mxu0 %vm456_vm0, %v8494_v8 }
 0x4d3   : > { %6583 = vmatmul.msk.f32.gmra.mxu1 %vm956_vm2, %v8125_v44  ;;  %v2087_v21 = vadd.f32 %v8501_v3, %v2027_v31 }
 0x4d5   : > { %v2119_v8 = vmax.f32 %v2087_v21, 0.0 }
 0x4d7   : > { %6525 = vmatmul.msk.f32.gmra.mxu3 %vm956_vm2, %v2118_v58  ;;  %v8706_v36 = vpop.f32.mrf.mxu0 }
 0x4d8   : > { %v1820_v7 = vpop.f32.mrf.mxu1 }
 0x4d9   : > { %v2030_v37 = vadd.f32 %v2029_v23, %v1820_v7 }
 0x4da   : > { %6566 = vmatmul.msk.f32.gmra.mxu0 %vm456_vm0, %v8506_v12 }
 0x4db   : > { %6584 = vmatmul.msk.f32.gmra.mxu1 %vm956_vm2, %v8118_v20  ;;  %v2088_v62 = vadd.f32 %v8501_v3, %v2030_v37 }
 0x4dd   : > { %v2120_v12 = vmax.f32 %v2088_v62, 0.0 }
 0x4df   : > { %6526 = vmatmul.msk.f32.gmra.mxu3 %vm956_vm2, %v2119_v8  ;;  %v8714_v44 = vpop.f32.mrf.mxu0 }
 0x4e0   : > { %v1823_v0 = vpop.f32.mrf.mxu1 }
 0x4e1   : > { %v2033_v16 = vadd.f32 %v2032_v54, %v1823_v0 }
 0x4e2   : > { %6567 = vmatmul.msk.f32.gmra.mxu0 %vm456_vm0, %v8517_v4 }
 0x4e3   : > { %6585 = vmatmul.msk.f32.gmra.mxu1 %vm956_vm2, %v8109_v6  ;;  %v2089_v32 = vadd.f32 %v8501_v3, %v2033_v16 }
 0x4e5   : > { %v2121_v4 = vmax.f32 %v2089_v32, 0.0 }
 0x4e7   : > { %6527 = vmatmul.msk.f32.gmra.mxu3 %vm956_vm2, %v2120_v12  ;;  %v8722_v20 = vpop.f32.mrf.mxu0 }
 0x4e8   : > { %v1826_v23 = vpop.f32.mrf.mxu1 }
 0x4e9   : > { %v2036_v17 = vadd.f32 %v2035_v52, %v1826_v23 }
 0x4ea   : > { %6568 = vmatmul.msk.f32.gmra.mxu0 %vm456_vm0, %v8529_v9  ;;  %v2044_v9 = vpop.f32.mrf.mxu2 }
 0x4eb   : > { %6586 = vmatmul.msk.f32.gmra.mxu1 %vm956_vm2, %v8100_v30  ;;  %v2090_v54 = vadd.f32 %v8501_v3, %v2036_v17 }
 0x4ed   : > { %v2122_v59 = vmax.f32 %v2090_v54, 0.0 }
 0x4ef   : > { %6528 = vmatmul.msk.f32.gmra.mxu3 %vm956_vm2, %v2121_v4  ;;  %v8730_v6 = vpop.f32.mrf.mxu0 }
 0x4f0   : > { %v1829_v1 = vpop.f32.mrf.mxu1 }
 0x4f1   : > { %v2039_v22 = vadd.f32 %v2038_v27, %v1829_v1 }
 0x4f2   : > { %6569 = vmatmul.msk.f32.gmra.mxu0 %vm456_vm0, %v8541_v61  ;;  %v2047_v31 = vpop.f32.mrf.mxu2 }
 0x4f3   : > { %6587 = vmatmul.msk.f32.gmra.mxu1 %vm956_vm2, %v8089_v28  ;;  %v2091_v50 = vadd.f32 %v8501_v3, %v2039_v22  ;;  %v8745_v28 = vpop.f32.mrf.mxu3 }
 0x4f5   : > { %v2123_v61 = vmax.f32 %v2091_v50, 0.0 }
 0x4f7   : > { %6529 = vmatmul.msk.f32.gmra.mxu3 %vm956_vm2, %v2122_v59  ;;  %v8738_v30 = vpop.f32.mrf.mxu0 }
 0x4f8   : > { %v1832_v43 = vpop.f32.mrf.mxu1 }
 0x4f9   : > { %v2042_v58 = vadd.f32 %v2041_v60, %v1832_v43 }
 0x4fa   : > { %6570 = vmatmul.msk.f32.gmra.mxu0 %vm456_vm0, %v8553_v19  ;;  %v2050_v37 = vpop.f32.mrf.mxu2 }
 0x4fb   : > { %6588 = vmatmul.msk.f32.gmra.mxu1 %vm956_vm2, %v8080_v10  ;;  %v2092_v21 = vadd.f32 %v8501_v3, %v2042_v58  ;;  %v8756_v0 = vpop.f32.mrf.mxu3 }
 0x4fd   : > { %v2124_v19 = vmax.f32 %v2092_v21, 0.0 }
 0x4ff   : > { %6530 = vmatmul.msk.f32.gmra.mxu3 %vm956_vm2, %v2123_v61  ;;  %v8748_v52 = vpop.f32.mrf.mxu0 }
 0x500   : > { %v1835_v7 = vpop.f32.mrf.mxu1 }
 0x501   : > { %v2045_v10 = vadd.f32 %v2044_v9, %v1835_v7 }
 0x502   : > { %6571 = vmatmul.msk.f32.gmra.mxu0 %vm456_vm0, %v8565_v5  ;;  %v2053_v23 = vpop.f32.mrf.mxu2 }
 0x503   : > { %6589 = vmatmul.msk.f32.gmra.mxu1 %vm956_vm2, %v8071_v38  ;;  %v2093_v27 = vadd.f32 %v8501_v3, %v2045_v10  ;;  %v8769_v32 = vpop.f32.mrf.mxu3 }
 0x505   : > { %v2125_v5 = vmax.f32 %v2093_v27, 0.0 }
 0x507   : > { %6531 = vmatmul.msk.f32.gmra.mxu3 %vm956_vm2, %v2124_v19  ;;  %v8759_v62 = vpop.f32.mrf.mxu0  ;;  %v6614_v19 = vld [vmem:[%s11285_s5 + $0x88] sm:$0xff] }
 0x508   : > { %v1838_v8 = vpop.f32.mrf.mxu1 }
 0x509   : > { %v2048_v38 = vadd.f32 %v2047_v31, %v1838_v8 }
 0x50a   : > { %6572 = vmatmul.msk.f32.gmra.mxu0 %vm456_vm0, %v8577_v49 }
 0x50b   : > { %6590 = vmatmul.msk.f32.gmra.mxu1 %vm956_vm2, %v11471_v47  ;;  %v2094_v16 = vadd.f32 %v8501_v3, %v2048_v38  ;;  %v8781_v1 = vpop.f32.mrf.mxu3 }
 0x50d   : > { %v2126_v60 = vmax.f32 %v2094_v16, 0.0 }
 0x50f   : > { %6532 = vmatmul.msk.f32.gmra.mxu3 %vm956_vm2, %v2125_v5  ;;  %v8773_v49 = vpop.f32.mrf.mxu0 }
 0x510   : > { %v1841_v12 = vpop.f32.mrf.mxu1 }
 0x511   : > { %v2051_v47 = vadd.f32 %v2050_v37, %v1841_v12 }
 0x512   : > { %6573 = vmatmul.msk.f32.gmra.mxu0 %vm456_vm0, %v8589_v41  ;;  %v2056_v41 = vpop.f32.mrf.mxu2 }
 0x513   : > { %6591 = vmatmul.msk.f32.gmra.mxu1 %vm956_vm2, %v11472_v46  ;;  %v2095_v17 = vadd.f32 %v8501_v3, %v2051_v47  ;;  %v8791_v50 = vpop.f32.mrf.mxu3 }
 0x515   : > { %v2127_v54 = vmax.f32 %v2095_v17, 0.0 }
 0x517   : > { %6533 = vmatmul.msk.f32.gmra.mxu3 %vm956_vm2, %v2126_v60  ;;  %v8783_v9 = vpop.f32.mrf.mxu0 }
 0x518   : > { %v1844_v4 = vpop.f32.mrf.mxu1 }
 0x519   : > { %v2054_v46 = vadd.f32 %v2053_v23, %v1844_v4 }
 0x51a   : > { %6574 = vmatmul.msk.f32.gmra.mxu0 %vm456_vm0, %v8600_v39  ;;  %v2059_v43 = vpop.f32.mrf.mxu2 }
 0x51b   : > { %6592 = vmatmul.msk.f32.gmra.mxu1 %vm956_vm2, %v11473_v14  ;;  %v2096_v22 = vadd.f32 %v8501_v3, %v2054_v46  ;;  %v8814_v10 = vpop.f32.mrf.mxu3 }
 0x51d   : > { %v2128_v39 = vmax.f32 %v2096_v22, 0.0 }
 0x51f   : > { %6534 = vmatmul.msk.f32.gmra.mxu3 %vm956_vm2, %v2127_v54  ;;  %v8794_v61 = vpop.f32.mrf.mxu0 }
 0x520   : > { %v1847_v59 = vpop.f32.mrf.mxu1 }
 0x521   : > { %v2057_v14 = vadd.f32 %v2056_v41, %v1847_v59 }
 0x522   : > { %6575 = vmatmul.msk.f32.gmra.mxu0 %vm456_vm0, %v8611_v13  ;;  %v6616_v13 = vld [vmem:[%s11285_s5 + $0x98] sm:$0xff]  ;;  %v2062_v37 = vpop.f32.mrf.mxu2 }
 0x523   : > { %6593 = vmatmul.msk.f32.gmra.mxu1 %vm956_vm2, %v11474_v34  ;;  %v2097_v31 = vadd.f32 %v8501_v3, %v2057_v14  ;;  %3094 = vmatpush.msra.mxu0 %v6616_v13  ;;  %v6615_v34 = vld [vmem:[%s11285_s5 + $0x90] sm:$0xff]  ;;  %v8827_v23 = vpop.f32.mrf.mxu3 }
 0x525   : > { %v2129_v7 = vmax.f32 %v2097_v31, 0.0  ;;  %3095 = vmatpush.msra.mxu0 %v6615_v34 }
 0x527   : > { %6535 = vmatmul.msk.f32.gmra.mxu3 %vm956_vm2, %v2128_v39  ;;  %3096 = vmatpush.msra.mxu0 %v6614_v19  ;;  %v8817_v27 = vpop.f32.mrf.mxu0 }
 0x528   : > { %v1850_v58 = vpop.f32.mrf.mxu1 }
 0x529   : > { %v2060_v21 = vadd.f32 %v2059_v43, %v1850_v58 }
 0x52a   : > { %6576 = vmatmul.msk.f32.gmra.mxu0 %vm456_vm0, %v8622_v2  ;;  %v2065_v60 = vpop.f32.mrf.mxu2 }
 0x52b   : > { %6594 = vmatmul.msk.f32.gmra.mxu1 %vm956_vm2, %v11475_v26  ;;  %v6613_v26 = vld [vmem:[%s11285_s5 + $0x80] sm:$0xff]  ;;  %v2098_v8 = vadd.f32 %v8501_v3, %v2060_v21 }
 0x52c   : > { %3097 = vmatpush.msra.mxu0 %v6613_v26 }
 0x52d   : > { %v2130_v5 = vmax.f32 %v2098_v8, 0.0 }
 0x52f   : > { %6536 = vmatmul.msk.f32.gmra.mxu3 %vm956_vm2, %v2129_v7 }
 0x530   : > { %v1853_v2 = vpop.f32.mrf.mxu1 }
 0x531   : > { %v2063_v38 = vadd.f32 %v2062_v37, %v1853_v2 }
 0x532   : > { %6577 = vmatmul.msk.f32.gmra.mxu0 %vm456_vm0, %v8642_v53  ;;  %v8831_v53 = vpop.f32.mrf.mxu0 }
 0x533   : > { %6595 = vmatmul.msk.f32.gmra.mxu1 %vm956_vm2, %v11476_v55  ;;  %v2099_v16 = vadd.f32 %v8501_v3, %v2063_v38 }
 0x535   : > { %v2131_v47 = vmax.f32 %v2099_v16, 0.0 }
 0x537   : > { %6537 = vmatmul.msk.f32.gmra.mxu3 %vm956_vm2, %v2130_v5 }
 0x538   : > { %v1856_v12 = vpop.f32.mrf.mxu1 }
 0x539   : > { %v2066_v55 = vadd.f32 %v2065_v60, %v1856_v12 }
 0x53a   : > { %6578 = vmatmul.msk.f32.gmra.mxu0 %vm456_vm0, %v8656_v33  ;;  %v8839_v33 = vpop.f32.mrf.mxu3  ;;  %v8846_v54 = vpop.f32.mrf.mxu0 }
 0x53b   : > { %6596 = vmatmul.msk.f32.gmra.mxu1 %vm956_vm2, %v11477_v56  ;;  %v2100_v17 = vadd.f32 %v8501_v3, %v2066_v55  ;;  %v8844_v56 = vld [vmem:[%s11288_s8 + $0x3] ss:$0 sm:$0xff] }
 0x53c   : > { %v2262_v7 = vadd.f32 %v8844_v56, %v8781_v1  ;;  %v2265_v26 = vadd.f32 %v8844_v56, %v8791_v50  ;;  %v2268_v38 = vadd.f32 %v8844_v56, %v8814_v10 }
 0x53d   : > { %v2132_v41 = vmax.f32 %v2100_v17, 0.0 }
 0x53f   : > { %6538 = vmatmul.msk.f32.gmra.mxu3 %vm956_vm2, %v2131_v47  ;;  %v2271_v47 = vadd.f32 %v8844_v56, %v8827_v23 }
 0x540   : > { %v2606_v4 = vpop.f32.mrf.mxu1 }
 0x541   : > { %v2607_v3 = vadd.f32 %v2606_v4, %v8698_v40 }
 0x542   : > { %6579 = vmatmul.msk.f32.gmra.mxu0 %vm456_vm0, %v8667_v42  ;;  %v2253_v42 = vadd.f32 %v8844_v56, %v8745_v28  ;;  %v8858_v59 = vpop.f32.mrf.mxu3  ;;  %v8860_v22 = vpop.f32.mrf.mxu0  ;;  %v2256_v28 = vadd.f32 %v8844_v56, %v8756_v0 }
 0x543   : > { %6597 = vmatmul.msk.f32.gmra.mxu1 %vm956_vm2, %v8238_v63 }
 0x544   : > { %v8856_v63 = vadd.f32 %v2607_v3, %v2253_v42 }
 0x546   : > { %v2808_v39 = vmax.f32 %v8856_v63, 0.0 }
 0x547   : > { %6539 = vmatmul.msk.f32.gmra.mxu3 %vm956_vm2, %v2132_v41 }
 0x548   : > { %v2609_v46 = vpop.f32.mrf.mxu1 }
 0x549   : > { %v2610_v40 = vadd.f32 %v2609_v46, %v8706_v36  ;;  %v2259_v36 = vadd.f32 %v8844_v56, %v8769_v32  ;;  %v2277_v46 = vadd.f32 %v8844_v56, %v8858_v59 }
 0x54a   : > { %6580 = vmatmul.msk.f32.gmra.mxu0 %vm456_vm0, %v8678_v15  ;;  %v2279_v31 = vpop.f32.mrf.mxu3  ;;  %v8875_v13 = vpop.f32.mrf.mxu0 }
 0x54b   : > { %6598 = vmatmul.msk.f32.gmra.mxu1 %vm956_vm2, %v8233_v25  ;;  %v8869_v25 = vadd.f32 %v2610_v40, %v2256_v28 }
 0x54d   : > { %v2809_v58 = vmax.f32 %v8869_v25, 0.0 }
 0x550   : > { %v2612_v14 = vpop.f32.mrf.mxu1 }
 0x551   : > { %v2613_v15 = vadd.f32 %v2612_v14, %v8714_v44  ;;  %v2280_v14 = vadd.f32 %v8844_v56, %v2279_v31  ;;  %v11479_v31 = vld [vmem:[#allocation51_spill] sm:$0xff] }
 0x552   : > { %6654 = vmatmul.msk.f32.vlgmr.msra.gmra.mxu0 %vm956_vm2, %v2808_v39  ;;  %v2282_v32 = vpop.f32.mrf.mxu3  ;;  %v8889_v21 = vpop.f32.mrf.mxu0 }
 0x553   : > { %6599 = vmatmul.msk.f32.gmra.mxu1 %vm956_vm2, %v8228_v29  ;;  %v8880_v0 = vadd.f32 %v2613_v15, %v2259_v36 }
 0x555   : > { %v2810_v44 = vmax.f32 %v8880_v0, 0.0 }
 0x558   : > { %v2615_v43 = vpop.f32.mrf.mxu1 }
 0x559   : > { %v2616_v29 = vadd.f32 %v2615_v43, %v8722_v20 }
 0x55a   : > { %6655 = vmatmul.msk.f32.gmra.mxu0 %vm956_vm2, %v2809_v58  ;;  %v8902_v8 = vpop.f32.mrf.mxu0  ;;  %v2283_v58 = vadd.f32 %v8844_v56, %v2282_v32  ;;  %v11480_v32 = vld [vmem:[#allocation50_spill] sm:$0xff] }
 0x55b   : > { %6600 = vmatmul.msk.f32.gmra.mxu1 %vm956_vm2, %v8221_v24  ;;  %v8891_v19 = vadd.f32 %v2616_v29, %v2262_v7 }
 0x55d   : > { %v2811_v20 = vmax.f32 %v8891_v19, 0.0 }
 0x560   : > { %v2618_v34 = vpop.f32.mrf.mxu1 }
 0x561   : > { %v2619_v24 = vadd.f32 %v2618_v34, %v8730_v6 }
 0x562   : > { %6656 = vmatmul.msk.f32.gmra.mxu0 %vm956_vm2, %v2810_v44  ;;  %v8913_v12 = vpop.f32.mrf.mxu0 }
 0x563   : > { %6601 = vmatmul.msk.f32.gmra.mxu1 %vm956_vm2, %v8214_v18  ;;  %v8900_v1 = vadd.f32 %v2619_v24, %v2265_v26  ;;  %v2285_v18 = vpop.f32.mrf.mxu3 }
 0x564   : > { %v2286_v7 = vadd.f32 %v8844_v56, %v2285_v18  ;;  %v11481_v18 = vld [vmem:[#allocation49_spill] sm:$0xff] }
 0x565   : > { %v2812_v6 = vmax.f32 %v8900_v1, 0.0 }
 0x568   : > { %v2621_v2 = vpop.f32.mrf.mxu1 }
 0x569   : > { %v2622_v37 = vadd.f32 %v2621_v2, %v8738_v30 }
 0x56a   : > { %6657 = vmatmul.msk.f32.gmra.mxu0 %vm956_vm2, %v2811_v20  ;;  %v8928_v41 = vpop.f32.mrf.mxu0 }
 0x56b   : > { %6602 = vmatmul.msk.f32.gmra.mxu1 %vm956_vm2, %v8207_v48  ;;  %v8911_v50 = vadd.f32 %v2622_v37, %v2268_v38  ;;  %v2288_v48 = vpop.f32.mrf.mxu3 }
 0x56d   : > { %v2813_v30 = vmax.f32 %v8911_v50, 0.0 }
 0x570   : > { %v2624_v5 = vpop.f32.mrf.mxu1 }
 0x571   : > { %v2625_v16 = vadd.f32 %v2624_v5, %v8748_v52  ;;  %v2274_v52 = vadd.f32 %v8844_v56, %v8839_v33 }
 0x572   : > { %6658 = vmatmul.msk.f32.gmra.mxu0 %vm956_vm2, %v2812_v6  ;;  %v8942_v42 = vpop.f32.mrf.mxu0 }
 0x573   : > { %6603 = vmatmul.msk.f32.gmra.mxu1 %vm956_vm2, %v8200_v51  ;;  %v8922_v10 = vadd.f32 %v2625_v16, %v2271_v47  ;;  %v2291_v17 = vpop.f32.mrf.mxu3 }
 0x575   : > { %v2814_v4 = vmax.f32 %v8922_v10, 0.0 }
 0x578   : > { %v2627_v60 = vpop.f32.mrf.mxu1 }
 0x579   : > { %v2628_v51 = vadd.f32 %v2627_v60, %v8759_v62  ;;  %v2292_v60 = vadd.f32 %v8844_v56, %v2291_v17 }
 0x57a   : > { %6659 = vmatmul.msk.f32.gmra.mxu0 %vm956_vm2, %v2813_v30 }
 0x57b   : > { %6604 = vmatmul.msk.f32.gmra.mxu1 %vm956_vm2, %v8195_v35  ;;  %v8933_v23 = vadd.f32 %v2628_v51, %v2274_v52  ;;  %v2294_v33 = vpop.f32.mrf.mxu3 }
 0x57c   : > { %v2295_v52 = vadd.f32 %v8844_v56, %v2294_v33  ;;  %v11485_v33 = vld [vmem:[#allocation10_spill] sm:$0xff] }
 0x57d   : > { %v2815_v62 = vmax.f32 %v8933_v23, 0.0 }
 0x580   : > { %v2630_v55 = vpop.f32.mrf.mxu1 }
 0x581   : > { %v2631_v35 = vadd.f32 %v2630_v55, %v8773_v49 }
 0x582   : > { %6660 = vmatmul.msk.f32.gmra.mxu0 %vm956_vm2, %v2814_v4 }
 0x583   : > { %6605 = vmatmul.msk.f32.gmra.mxu1 %vm956_vm2, %v8190_v11  ;;  %v8944_v39 = vadd.f32 %v2631_v35, %v2277_v46  ;;  %v2297_v28 = vpop.f32.mrf.mxu3  ;;  %v11483_v46 = vld [vmem:[#allocation48_spill] sm:$0xff] }
 0x584   : > { %v2298_v17 = vadd.f32 %v8844_v56, %v2297_v28 }
 0x585   : > { %v2816_v49 = vmax.f32 %v8944_v39, 0.0 }
 0x588   : > { %v2633_v3 = vpop.f32.mrf.mxu1 }
 0x589   : > { %v2634_v11 = vadd.f32 %v2633_v3, %v8783_v9 }
 0x58a   : > { %6661 = vmatmul.msk.f32.gmra.mxu0 %vm956_vm2, %v2815_v62 }
 0x58b   : > { %6606 = vmatmul.msk.f32.gmra.mxu1 %vm956_vm2, %v8185_v57  ;;  %v8952_v59 = vadd.f32 %v2634_v11, %v2280_v14  ;;  %v8954_v57 = vpop.f32.mrf.mxu0 }
 0x58d   : > { %v2817_v9 = vmax.f32 %v8952_v59, 0.0 }
 0x590   : > { %v2636_v40 = vpop.f32.mrf.mxu1 }
 0x591   : > { %v2637_v15 = vadd.f32 %v2636_v40, %v8794_v61 }
 0x592   : > { %6662 = vmatmul.msk.f32.gmra.mxu0 %vm956_vm2, %v2816_v49 }
 0x593   : > { %6607 = vmatmul.msk.f32.gmra.mxu1 %vm956_vm2, %v8177_v45  ;;  %v8962_v36 = vadd.f32 %v2637_v15, %v2283_v58  ;;  %v2300_v45 = vpop.f32.mrf.mxu3  ;;  %v8964_v29 = vpop.f32.mrf.mxu0  ;;  %v11486_v15 = vld [vmem:[#allocation12_spill] sm:$0xff] }
 0x595   : > { %v2818_v61 = vmax.f32 %v8962_v36, 0.0 }
 0x598   : > { %v2639_v43 = vpop.f32.mrf.mxu1 }
 0x599   : > { %v2640_v34 = vadd.f32 %v2639_v43, %v8817_v27  ;;  %v2289_v27 = vadd.f32 %v8844_v56, %v2288_v48  ;;  %v11482_v48 = vld [vmem:[#allocation47_spill] sm:$0xff] }
 0x59a   : > { %6663 = vmatmul.msk.f32.gmra.mxu0 %vm956_vm2, %v2817_v9  ;;  %v11487_v9 = vld [vmem:[#allocation14_spill] sm:$0xff] }
 0x59b   : > { %6608 = vmatmul.msk.f32.gmra.mxu1 %vm956_vm2, %v11479_v31  ;;  %v8972_v24 = vadd.f32 %v2640_v34, %v2286_v7  ;;  %v8976_v37 = vpop.f32.mrf.mxu3  ;;  %v8979_v5 = vpop.f32.mrf.mxu0  ;;  %v11488_v31 = vld [vmem:[#allocation16_spill] sm:$0xff] }
 0x59d   : > { %v2819_v26 = vmax.f32 %v8972_v24, 0.0  ;;  %v2745_v34 = vmul.f32 %v8972_v24, %v11488_v31 }
 0x5a0   : > { %v2642_v44 = vpop.f32.mrf.mxu1 }
 0x5a1   : > { %v2643_v2 = vadd.f32 %v2642_v44, %v8831_v53 }
 0x5a2   : > { %6664 = vmatmul.msk.f32.gmra.mxu0 %vm956_vm2, %v2818_v61  ;;  %v11489_v61 = vld [vmem:[#allocation18_spill] sm:$0xff] }
 0x5a3   : > { %6609 = vmatmul.msk.f32.gmra.mxu1 %vm956_vm2, %v11480_v32  ;;  %v8984_v6 = vadd.f32 %v2643_v2, %v2289_v27  ;;  %v8990_v30 = vpop.f32.mrf.mxu3  ;;  %v8994_v47 = vpop.f32.mrf.mxu0  ;;  %v2744_v7 = vmul.f32 %v8962_v36, %v11489_v61  ;;  %v11490_v27 = vld [vmem:[#allocation20_spill] sm:$0xff] }
 0x5a5   : > { %v2820_v53 = vmax.f32 %v8984_v6, 0.0  ;;  %v2746_v58 = vmul.f32 %v8984_v6, %v11487_v9 }
 0x5a8   : > { %v2645_v20 = vpop.f32.mrf.mxu1 }
 0x5a9   : > { %v2646_v38 = vadd.f32 %v2645_v20, %v8846_v54 }
 0x5aa   : > { %6665 = vmatmul.msk.f32.gmra.mxu0 %vm956_vm2, %v2819_v26 }
 0x5ab   : > { %6610 = vmatmul.msk.f32.gmra.mxu1 %vm956_vm2, %v11481_v18  ;;  %v8996_v51 = vadd.f32 %v2646_v38, %v2292_v60  ;;  %v9010_v11 = vpop.f32.mrf.mxu3  ;;  %v9014_v49 = vpop.f32.mrf.mxu0  ;;  %v2743_v18 = vmul.f32 %v8952_v59, %v11490_v27  ;;  %v2301_v38 = vadd.f32 %v8844_v56, %v2300_v45 }
 0x5ad   : > { %v2821_v54 = vmax.f32 %v8996_v51, 0.0  ;;  %v2747_v43 = vmul.f32 %v8996_v51, %v11486_v15 }
 0x5b0   : > { %v2648_v16 = vpop.f32.mrf.mxu1 }
 0x5b1   : > { %v2649_v55 = vadd.f32 %v2648_v16, %v8860_v22  ;;  %v11484_v22 = vld [vmem:[#allocation9_spill] sm:$0xff]  ;;  %v11491_v16 = vld [vmem:[#allocation23_spill] sm:$0xff] }
 0x5b2   : > { %6666 = vmatmul.msk.f32.gmra.mxu0 %vm956_vm2, %v2820_v53  ;;  %v2742_v53 = vmul.f32 %v8944_v39, %v11491_v16 }
 0x5b3   : > { %6611 = vmatmul.msk.f32.gmra.mxu1 %vm956_vm2, %v11482_v48  ;;  %v9004_v3 = vadd.f32 %v2649_v55, %v2295_v52  ;;  %v2312_v44 = vpop.f32.mrf.mxu3  ;;  %v9028_v32 = vpop.f32.mrf.mxu0  ;;  %v11492_v48 = vld [vmem:[#allocation26_spill] sm:$0xff]  ;;  %v11493_v55 = vld [vmem:[#allocation28_spill] sm:$0xff] }
 0x5b5   : > { %v2822_v28 = vmax.f32 %v9004_v3, 0.0 }
 0x5b8   : > { %v2651_v4 = vpop.f32.mrf.mxu1 }
 0x5b9   : > { %v2652_v35 = vadd.f32 %v2651_v4, %v8875_v13  ;;  %v2748_v13 = vmul.f32 %v9004_v3, %v11485_v33  ;;  %v2740_v4 = vmul.f32 %v8922_v10, %v11493_v55 }
 0x5ba   : > { %6667 = vmatmul.msk.f32.gmra.mxu0 %vm956_vm2, %v2821_v54 }
 0x5bb   : > { %v9006_v62 = vadd.f32 %v2652_v35, %v2298_v17  ;;  %6612 = vmatmul.msk.f32.gmra.mxu1 %vm956_vm2, %v11483_v46  ;;  %v2315_v17 = vpop.f32.mrf.mxu3  ;;  %v11494_v35 = vld [vmem:[#allocation35_spill] sm:$0xff] }
 0x5bc   : > { %v2739_v46 = vmul.f32 %v8911_v50, %v11494_v35 }
 0x5bd   : > { %v2749_v40 = vmul.f32 %v9006_v62, %v11484_v22  ;;  %v2823_v26 = vmax.f32 %v9006_v62, 0.0 }
 0x5bf   : > { %2766 = vmatpush.msrb.mxu2 %v2749_v40  ;;  %v2304_v40 = vadd.f32 %v8844_v56, %v8976_v37 }
 0x5c0   : > { %v2654_v14 = vpop.f32.mrf.mxu1 }
 0x5c1   : > { %2767 = vmatpush.msrb.mxu2 %v2748_v13  ;;  %v2655_v2 = vadd.f32 %v2654_v14, %v8889_v21  ;;  %v2741_v21 = vmul.f32 %v8933_v23, %v11492_v48  ;;  %v9050_v13 = vpop.f32.mrf.mxu0  ;;  %v11495_v14 = vld [vmem:[#allocation39_spill] sm:$0xff] }
 0x5c2   : > { %6668 = vmatmul.msk.f32.gmra.mxu0 %vm956_vm2, %v2822_v28  ;;  %v2738_v28 = vmul.f32 %v8900_v1, %v11495_v14  ;;  %v11501_v14 = vld [vmem:[#allocation8_spill] sm:$0xff] }
 0x5c3   : > { %2768 = vmatpush.msrb.mxu2 %v2747_v43  ;;  %v9038_v60 = vadd.f32 %v2655_v2, %v2301_v38  ;;  %v11496_v43 = vld [vmem:[#allocation42_spill] sm:$0xff]  ;;  %v2307_v38 = vadd.f32 %v8844_v56, %v8990_v30 }
 0x5c5   : > { %2769 = vmatpush.msrb.mxu2 %v2746_v58  ;;  %v2824_v45 = vmax.f32 %v9038_v60, 0.0  ;;  %v2737_v58 = vmul.f32 %v8891_v19, %v11496_v43 }
 0x5c7   : > { %2770 = vmatpush.msrb.mxu2 %v2745_v34  ;;  %v11497_v34 = vld [vmem:[#allocation44_spill] sm:$0xff] }
 0x5c8   : > { %v2657_v20 = vpop.f32.mrf.mxu1 }
 0x5c9   : > { %2771 = vmatpush.msrb.mxu2 %v2744_v7  ;;  %v2658_v54 = vadd.f32 %v2657_v20, %v8902_v8  ;;  %v2736_v7 = vmul.f32 %v8880_v0, %v11497_v34 }
 0x5ca   : > { %6669 = vmatmul.msk.f32.gmra.mxu0 %vm956_vm2, %v2823_v26  ;;  %v11498_v26 = vld [vmem:[#allocation45_spill] sm:$0xff] }
 0x5cb   : > { %2772 = vmatpush.msrb.mxu2 %v2743_v18  ;;  %v9055_v8 = vadd.f32 %v2658_v54, %v2304_v40  ;;  %v2735_v18 = vmul.f32 %v8869_v25, %v11498_v26  ;;  %v9070_v54 = vpop.f32.mrf.mxu0  ;;  %v2310_v40 = vadd.f32 %v8844_v56, %v9010_v11 }
 0x5cd   : > { %2773 = vmatpush.msrb.mxu2 %v2742_v53  ;;  %v2825_v20 = vmax.f32 %v9055_v8, 0.0  ;;  %v2318_v53 = vpop.f32.mrf.mxu3 }
 0x5cf   : > { %2774 = vmatpush.msrb.mxu2 %v2741_v21  ;;  %v11499_v21 = vld [vmem:[#allocation46_spill] sm:$0xff] }
 0x5d0   : > { %v2660_v52 = vpop.f32.mrf.mxu1 }
 0x5d1   : > { %2775 = vmatpush.msrb.mxu2 %v2740_v4  ;;  %v2661_v37 = vadd.f32 %v2660_v52, %v8913_v12  ;;  %v2734_v4 = vmul.f32 %v8856_v63, %v11499_v21  ;;  %v7222_v52 = vld [vmem:[%s11466_s1] sm:$0xff] }
 0x5d2   : > { %6670 = vmatmul.msk.f32.gmra.mxu0 %vm956_vm2, %v2824_v45 }
 0x5d3   : > { %2776 = vmatpush.msrb.mxu2 %v2739_v46  ;;  %v9072_v12 = vadd.f32 %v2661_v37, %v2307_v38 }
 0x5d5   : > { %2777 = vmatpush.msrb.mxu2 %v2738_v28  ;;  %v2826_v46 = vmax.f32 %v9072_v12, 0.0 }
 0x5d7   : > { %2778 = vmatpush.msrb.mxu2 %v2737_v58  ;;  %v2321_v58 = vpop.f32.mrf.mxu3 }
 0x5d8   : > { %v2663_v2 = vpop.f32.mrf.mxu1 }
 0x5d9   : > { %2779 = vmatpush.msrb.mxu2 %v2736_v7  ;;  %v2664_v45 = vadd.f32 %v2663_v2, %v8928_v41  ;;  %v9084_v7 = vpop.f32.mrf.mxu0  ;;  %v2313_v41 = vadd.f32 %v8844_v56, %v2312_v44 }
 0x5da   : > { %6671 = vmatmul.msk.f32.gmra.mxu0 %vm956_vm2, %v2825_v20 }
 0x5db   : > { %2780 = vmatpush.msrb.mxu2 %v2735_v18  ;;  %v9082_v28 = vadd.f32 %v2664_v45, %v2310_v40 }
 0x5dd   : > { %2781 = vmatpush.msrb.mxu2 %v2734_v4  ;;  %v2827_v18 = vmax.f32 %v9082_v28, 0.0 }
 0x5de   : > { %2782 = vmatmul.f32.vlgmr.msrb.gmra.mxu2 %v7222_v52 }
 0x5df   : > { %v2324_v38 = vpop.f32.mrf.mxu3 }
 0x5e0   : > { %v2666_v30 = vpop.f32.mrf.mxu1 }
 0x5e1   : > { %v2667_v37 = vadd.f32 %v2666_v30, %v8942_v42  ;;  %v9092_v11 = vpop.f32.mrf.mxu0 }
 0x5e2   : > { %6672 = vmatmul.msk.f32.gmra.mxu0 %vm956_vm2, %v2826_v46  ;;  %v2316_v46 = vadd.f32 %v8844_v56, %v2315_v17 }
 0x5e3   : > { %v9090_v2 = vadd.f32 %v2667_v37, %v2313_v41 }
 0x5e5   : > { %v2828_v45 = vmax.f32 %v9090_v2, 0.0 }
 0x5e7   : > { %v2327_v37 = vpop.f32.mrf.mxu3 }
 0x5e8   : > { %v2669_v20 = vpop.f32.mrf.mxu1 }
 0x5e9   : > { %v2670_v4 = vadd.f32 %v2669_v20, %v8954_v57  ;;  %v2490_v41 = vpop.f32.mrf.mxu0 }
 0x5ea   : > { %6673 = vmatmul.msk.f32.gmra.mxu0 %vm956_vm2, %v2827_v18  ;;  %v2319_v18 = vadd.f32 %v8844_v56, %v2318_v53 }
 0x5eb   : > { %v9098_v42 = vadd.f32 %v2670_v4, %v2316_v46  ;;  %v2322_v4 = vadd.f32 %v8844_v56, %v2321_v58 }
 0x5ed   : > { %v2829_v40 = vmax.f32 %v9098_v42, 0.0 }
 0x5f0   : > { %v2672_v52 = vpop.f32.mrf.mxu1 }
 0x5f1   : > { %v2673_v44 = vadd.f32 %v2672_v52, %v8964_v29  ;;  %v2330_v29 = vpop.f32.mrf.mxu3  ;;  %v9110_v52 = vpop.f32.mrf.mxu0 }
 0x5f2   : > { %6674 = vmatmul.msk.f32.gmra.mxu0 %vm956_vm2, %v2828_v45  ;;  %v2331_v26 = vadd.f32 %v8844_v56, %v2330_v29 }
 0x5f3   : > { %v9104_v57 = vadd.f32 %v2673_v44, %v2319_v18 }
 0x5f5   : > { %v2830_v45 = vmax.f32 %v9104_v57, 0.0 }
 0x5f8   : > { %v2675_v30 = vpop.f32.mrf.mxu1 }
 0x5f9   : > { %v2676_v20 = vadd.f32 %v2675_v30, %v8979_v5  ;;  %v2333_v30 = vpop.f32.mrf.mxu3  ;;  %v9120_v58 = vpop.f32.mrf.mxu0 }
 0x5fa   : > { %6675 = vmatmul.msk.f32.gmra.mxu0 %vm956_vm2, %v2829_v40  ;;  %v2325_v40 = vadd.f32 %v8844_v56, %v2324_v38 }
 0x5fb   : > { %v9112_v46 = vadd.f32 %v2676_v20, %v2322_v4  ;;  %v2328_v4 = vadd.f32 %v8844_v56, %v2327_v37 }
 0x5fd   : > { %v2831_v44 = vmax.f32 %v9112_v46, 0.0 }
 0x600   : > { %v2678_v17 = vpop.f32.mrf.mxu1 }
 0x601   : > { %v2679_v53 = vadd.f32 %v2678_v17, %v8994_v47  ;;  %v2336_v17 = vpop.f32.mrf.mxu3  ;;  %v9128_v38 = vpop.f32.mrf.mxu0 }
 0x602   : > { %6676 = vmatmul.msk.f32.gmra.mxu0 %vm956_vm2, %v2830_v45 }
 0x603   : > { %v9118_v5 = vadd.f32 %v2679_v53, %v2325_v40 }
 0x605   : > { %v2832_v20 = vmax.f32 %v9118_v5, 0.0 }
 0x608   : > { %v2681_v21 = vpop.f32.mrf.mxu1 }
 0x609   : > { %v2682_v18 = vadd.f32 %v2681_v21, %v9014_v49  ;;  %v9139_v34 = vpop.f32.mrf.mxu0 }
 0x60a   : > { %6677 = vmatmul.msk.f32.gmra.mxu0 %vm956_vm2, %v2831_v44 }
 0x60b   : > { %v9126_v47 = vadd.f32 %v2682_v18, %v2328_v4  ;;  %v2339_v4 = vpop.f32.mrf.mxu3 }
 0x60d   : > { %v2833_v40 = vmax.f32 %v9126_v47, 0.0 }
 0x610   : > { %v2684_v45 = vpop.f32.mrf.mxu1 }
 0x611   : > { %v2685_v53 = vadd.f32 %v2684_v45, %v9028_v32 }
 0x612   : > { %6678 = vmatmul.msk.f32.gmra.mxu0 %vm956_vm2, %v2832_v20  ;;  %v2334_v20 = vadd.f32 %v8844_v56, %v2333_v30 }
 0x613   : > { %v9134_v49 = vadd.f32 %v2685_v53, %v2331_v26  ;;  %v2337_v53 = vadd.f32 %v8844_v56, %v2336_v17 }
 0x615   : > { %v2834_v18 = vmax.f32 %v9134_v49, 0.0 }
 0x618   : > { %v2687_v44 = vpop.f32.mrf.mxu1 }
 0x619   : > { %v2688_v21 = vadd.f32 %v2687_v44, %v9050_v13  ;;  %v2342_v13 = vpop.f32.mrf.mxu3  ;;  %v9148_v44 = vpop.f32.mrf.mxu0 }
 0x61a   : > { %6679 = vmatmul.msk.f32.gmra.mxu0 %vm956_vm2, %v2833_v40 }
 0x61b   : > { %v9142_v32 = vadd.f32 %v2688_v21, %v2334_v20 }
 0x61d   : > { %v2835_v26 = vmax.f32 %v9142_v32, 0.0 }
 0x620   : > { %v2690_v37 = vpop.f32.mrf.mxu1 }
 0x621   : > { %v2691_v29 = vadd.f32 %v2690_v37, %v9070_v54  ;;  %v2345_v37 = vpop.f32.mrf.mxu3  ;;  %v9158_v17 = vpop.f32.mrf.mxu0 }
 0x622   : > { %6680 = vmatmul.msk.f32.gmra.mxu0 %vm956_vm2, %v2834_v18  ;;  %v2340_v18 = vadd.f32 %v8844_v56, %v2339_v4 }
 0x623   : > { %v9150_v30 = vadd.f32 %v2691_v29, %v2337_v53  ;;  %v2343_v53 = vadd.f32 %v8844_v56, %v2342_v13 }
 0x625   : > { %v2836_v21 = vmax.f32 %v9150_v30, 0.0 }
 0x628   : > { %v2693_v45 = vpop.f32.mrf.mxu1 }
 0x629   : > { %v2694_v40 = vadd.f32 %v2693_v45, %v9084_v7  ;;  %v2346_v7 = vadd.f32 %v8844_v56, %v2345_v37  ;;  %v11502_v56 = vld [vmem:[#allocation6_spill] sm:$0xff]  ;;  %v11503_v37 = vld [vmem:[#allocation7_spill] sm:$0xff] }
 0x62a   : > { %6681 = vmatmul.msk.f32.gmra.mxu0 %vm956_vm2, %v2835_v26 }
 0x62b   : > { %v9156_v54 = vadd.f32 %v2694_v40, %v2340_v18  ;;  %v11500_v40 = vld [vmem:[#allocation5_spill] sm:$0xff] }
 0x62d   : > { %v2837_v29 = vmax.f32 %v9156_v54, 0.0 }
 0x630   : > { %v2696_v43 = vpop.f32.mrf.mxu1 }
 0x631   : > { %v2697_v20 = vadd.f32 %v2696_v43, %v9092_v11  ;;  %v9173_v11 = vpop.f32.mrf.mxu0 }
 0x632   : > { %6682 = vmatmul.msk.f32.gmra.mxu0 %vm956_vm2, %v2836_v21 }
 0x633   : > { %v9165_v4 = vadd.f32 %v2697_v20, %v2343_v53  ;;  %v2762_v20 = vmul.f32 %v9150_v30, %v11503_v37  ;;  %v11505_v53 = vld [vmem:[#allocation13_spill] sm:$0xff]  ;;  %v11511_v37 = vld [vmem:[#allocation27_spill] sm:$0xff] }
 0x635   : > { %v2764_v43 = vmul.f32 %v9165_v4, %v11501_v14  ;;  %v2838_v13 = vmax.f32 %v9165_v4, 0.0 }
 0x638   : > { %v2699_v26 = vpop.f32.mrf.mxu1 }
 0x639   : > { %v2700_v45 = vadd.f32 %v2699_v26, %v2490_v41  ;;  %v2763_v41 = vmul.f32 %v9156_v54, %v11502_v56  ;;  %v11504_v26 = vld [vmem:[#allocation11_spill] sm:$0xff]  ;;  %v9188_v56 = vpop.f32.mrf.mxu0 }
 0x63a   : > { %6683 = vmatmul.msk.f32.gmra.mxu0 %vm956_vm2, %v2837_v29  ;;  %v2761_v29 = vmul.f32 %v9142_v32, %v11504_v26 }
 0x63b   : > { %v9167_v21 = vadd.f32 %v2700_v45, %v2346_v7  ;;  %v2760_v7 = vmul.f32 %v9134_v49, %v11505_v53  ;;  %v11509_v53 = vld [vmem:[#allocation22_spill] sm:$0xff] }
 0x63c   : > { %v2756_v26 = vmul.f32 %v9104_v57, %v11509_v53 }
 0x63d   : > { %v2765_v18 = vmul.f32 %v9167_v21, %v11500_v40  ;;  %v2839_v45 = vmax.f32 %v9167_v21, 0.0 }
 0x63f   : > { %2786 = vmatpush.msra.mxu3 %v2765_v18  ;;  %v11506_v18 = vld [vmem:[#allocation15_spill] sm:$0xff] }
 0x641   : > { %2787 = vmatpush.msra.mxu3 %v2764_v43  ;;  %v2759_v43 = vmul.f32 %v9126_v47, %v11506_v18 }
 0x642   : > { %6684 = vmatmul.msk.f32.gmra.mxu0 %vm956_vm2, %v2838_v13  ;;  %v11507_v13 = vld [vmem:[#allocation17_spill] sm:$0xff] }
 0x643   : > { %2788 = vmatpush.msra.mxu3 %v2763_v41  ;;  %v2758_v41 = vmul.f32 %v9118_v5, %v11507_v13 }
 0x645   : > { %2789 = vmatpush.msra.mxu3 %v2762_v20  ;;  %v11508_v20 = vld [vmem:[#allocation19_spill] sm:$0xff] }
 0x647   : > { %2790 = vmatpush.msra.mxu3 %v2761_v29  ;;  %v2757_v29 = vmul.f32 %v9112_v46, %v11508_v20 }
 0x649   : > { %2791 = vmatpush.msra.mxu3 %v2760_v7  ;;  %v11510_v7 = vld [vmem:[#allocation24_spill] sm:$0xff] }
 0x64a   : > { %6685 = vmatmul.msk.f32.gmra.mxu0 %vm956_vm2, %v2839_v45  ;;  %v2755_v18 = vmul.f32 %v9098_v42, %v11510_v7  ;;  %v2754_v45 = vmul.f32 %v9090_v2, %v11511_v37 }
 0x64b   : > { %2792 = vmatpush.msra.mxu3 %v2759_v43  ;;  %v11512_v43 = vld [vmem:[#allocation30_spill] sm:$0xff] }
 0x64c   : > { %v2753_v13 = vmul.f32 %v9082_v28, %v11512_v43 }
 0x64d   : > { %2793 = vmatpush.msra.mxu3 %v2758_v41  ;;  %v11513_v41 = vld [vmem:[#allocation37_spill] sm:$0xff] }
 0x64e   : > { %v2752_v20 = vmul.f32 %v9072_v12, %v11513_v41 }
 0x64f   : > { %2794 = vmatpush.msra.mxu3 %v2757_v29  ;;  %v11514_v29 = vld [vmem:[#allocation41_spill] sm:$0xff] }
 0x650   : > { %v2751_v53 = vmul.f32 %v9055_v8, %v11514_v29 }
 0x651   : > { %2795 = vmatpush.msra.mxu3 %v2756_v26  ;;  %v11515_v26 = vld [vmem:[#allocation43_spill] sm:$0xff] }
 0x652   : > { %v2750_v7 = vmul.f32 %v9038_v60, %v11515_v26 }
 0x653   : > { %2796 = vmatpush.msra.mxu3 %v2755_v18  ;;  %v7223_v18 = vld [vmem:[%s11466_s1 + $0x8] sm:$0xff] }
 0x655   : > { %2797 = vmatpush.msra.mxu3 %v2754_v45  ;;  %v6727_v45 = vld [vmem:[%s11286_s6 + $0xa8] sm:$0xff] }
 0x657   : > { %2798 = vmatpush.msra.mxu3 %v2753_v13  ;;  %v6620_v13 = vld [vmem:[%s11285_s5 + $0xb8] sm:$0xff] }
 0x658   : > { %2865 = vmatpush.msra.mxu2 %v6620_v13  ;;  %v6726_v13 = vld [vmem:[%s11286_s6 + $0xa0] sm:$0xff] }
 0x659   : > { %2799 = vmatpush.msra.mxu3 %v2752_v20  ;;  %v6729_v20 = vld [vmem:[%s11286_s6 + $0xb8] sm:$0xff] }
 0x65a   : > { %3499 = vmatpush.msra.mxu1 %v6729_v20  ;;  %v6617_v20 = vld [vmem:[%s11285_s5 + $0xa0] sm:$0xff] }
 0x65b   : > { %2800 = vmatpush.msra.mxu3 %v2751_v53  ;;  %v6728_v53 = vld [vmem:[%s11286_s6 + $0xb0] sm:$0xff] }
 0x65c   : > { %3500 = vmatpush.msra.mxu1 %v6728_v53 }
 0x65d   : > { %2801 = vmatpush.msra.mxu3 %v2750_v7  ;;  %v6619_v7 = vld [vmem:[%s11285_s5 + $0xb0] sm:$0xff] }
 0x65e   : > { %2802 = vmatmul.f32.vlgmr.msra.gmra.mxu3 %v7223_v18  ;;  %2866 = vmatpush.msra.mxu2 %v6619_v7  ;;  %v6618_v18 = vld [vmem:[%s11285_s5 + $0xa8] sm:$0xff] }
 0x65f   : > { %3501 = vmatpush.msra.mxu1 %v6727_v45 }
 0x660   : > { %2867 = vmatpush.msra.mxu2 %v6618_v18  ;;  %v7224_v18 = vld [vmem:[%s11478_s2] sm:$0xff] }
 0x661   : > { %3502 = vmatpush.msra.mxu1 %v6726_v13  ;;  %v2783_v53 = vpop.f32.mrf.mxu2 }
 0x662   : > { %2868 = vmatpush.msra.mxu2 %v6617_v20  ;;  %v7227_v20 = vld [vmem:[%s11478_s2 + $0x18] sm:$0xff] }
 0x6e1   : > { %v2803_v26 = vpop.f32.mrf.mxu3 }
 0x6e2   : > { %v2804_v29 = vadd.f32 %v2803_v26, %v2783_v53  ;;  %v7225_v26 = vld [vmem:[%s11478_s2 + $0x8] sm:$0xff]  ;;  %v7228_v53 = vld [vmem:[%s11478_s2 + $0x20] sm:$0xff] }
 0x6e4   : > { %v2845_v7 = vmax.f32 %v2804_v29, 0.0  ;;  %6730 = vmatmul.msk.f32.vlgmr.msra.gmra.mxu1 %vm956_vm2, %v2804_v29  ;;  %v7226_v29 = vld [vmem:[%s11478_s2 + $0x10] sm:$0xff] }
 0x6e6   : > { %6621 = vmatmul.msk.f32.vlgmr.msra.gmra.mxu2 %vm956_vm2, %v2845_v7  ;;  %v7229_v7 = vld [vmem:[%s11478_s2 + $0x28] sm:$0xff] }
 0x761   : > { %v3504_v45 = vpop.f32.mrf.mxu1 }
 0x762   : > { %3522 = vmatpush.msrb.mxu1 %v3504_v45  ;;  %v7230_v45 = vld [vmem:[%s11478_s2 + $0x30] sm:$0xff] }
 0x763   : > { %6731 = vmatmul.msk.f32.vlgmr.msrb.gmra.mxu1 %vm456_vm0, %v7224_v18 }
 0x769   : > { %v2870_v13 = vpop.f32.mrf.mxu2 }
 0x76a   : > { %2888 = vmatpush.msrb.mxu3 %v2870_v13  ;;  %v7232_v13 = vld [vmem:[%s11478_s2 + $0x40] sm:$0xff] }
 0x76b   : > { %6622 = vmatmul.msk.f32.vlgmr.msrb.gmra.mxu3 %vm456_vm0, %v7224_v18  ;;  %6732 = vmatmul.msk.f32.gmra.mxu1 %vm456_vm0, %v7225_v26  ;;  %v7231_v18 = vld [vmem:[%s11478_s2 + $0x38] sm:$0xff] }
 0x773   : > { %6623 = vmatmul.msk.f32.gmra.mxu3 %vm456_vm0, %v7225_v26  ;;  %6733 = vmatmul.msk.f32.gmra.mxu1 %vm456_vm0, %v7226_v29  ;;  %v7233_v26 = vld [vmem:[%s11478_s2 + $0x48] sm:$0xff] }
 0x77b   : > { %6624 = vmatmul.msk.f32.gmra.mxu3 %vm456_vm0, %v7226_v29  ;;  %6734 = vmatmul.msk.f32.gmra.mxu1 %vm456_vm0, %v7227_v20  ;;  %v7234_v29 = vld [vmem:[%s11478_s2 + $0x50] sm:$0xff] }
 0x783   : > { %6625 = vmatmul.msk.f32.gmra.mxu3 %vm456_vm0, %v7227_v20  ;;  %6735 = vmatmul.msk.f32.gmra.mxu1 %vm456_vm0, %v7228_v53  ;;  %v7235_v20 = vld [vmem:[%s11478_s2 + $0x58] sm:$0xff] }
 0x78b   : > { %6626 = vmatmul.msk.f32.gmra.mxu3 %vm456_vm0, %v7228_v53  ;;  %6736 = vmatmul.msk.f32.gmra.mxu1 %vm456_vm0, %v7229_v7  ;;  %v7236_v53 = vld [vmem:[%s11478_s2 + $0x60] sm:$0xff] }
 0x793   : > { %6627 = vmatmul.msk.f32.gmra.mxu3 %vm456_vm0, %v7229_v7  ;;  %6737 = vmatmul.msk.f32.gmra.mxu1 %vm456_vm0, %v7230_v45  ;;  %v7237_v7 = vld [vmem:[%s11478_s2 + $0x68] sm:$0xff] }
 0x79b   : > { %6628 = vmatmul.msk.f32.gmra.mxu3 %vm456_vm0, %v7230_v45  ;;  %6738 = vmatmul.msk.f32.gmra.mxu1 %vm456_vm0, %v7231_v18  ;;  %v6689_v45 = vld [vmem:[%s11287_s7 + $0x58] sm:$0xff] }
 0x79c   : > { %3374 = vmatpush.msrb.mxu2 %v6689_v45  ;;  %v9342_v45 = vld [vmem:[%s11288_s8 + $0x4] ss:$0 sm:$0xff] }
 0x7a3   : > { %6629 = vmatmul.msk.f32.gmra.mxu3 %vm456_vm0, %v7231_v18  ;;  %6739 = vmatmul.msk.f32.gmra.mxu1 %vm456_vm0, %v7232_v13  ;;  %v6688_v18 = vld [vmem:[%s11287_s7 + $0x50] sm:$0xff] }
 0x7a4   : > { %3375 = vmatpush.msrb.mxu2 %v6688_v18 }
 0x7ab   : > { %6630 = vmatmul.msk.f32.gmra.mxu3 %vm456_vm0, %v7232_v13  ;;  %6740 = vmatmul.msk.f32.gmra.mxu1 %vm456_vm0, %v7233_v26  ;;  %v6687_v13 = vld [vmem:[%s11287_s7 + $0x48] sm:$0xff] }
 0x7ac   : > { %3376 = vmatpush.msrb.mxu2 %v6687_v13 }
 0x7b3   : > { %6631 = vmatmul.msk.f32.gmra.mxu3 %vm456_vm0, %v7233_v26  ;;  %6741 = vmatmul.msk.f32.gmra.mxu1 %vm456_vm0, %v7234_v29  ;;  %v6686_v26 = vld [vmem:[%s11287_s7 + $0x40] sm:$0xff] }
 0x7b4   : > { %3377 = vmatpush.msrb.mxu2 %v6686_v26 }
 0x7bb   : > { %6632 = vmatmul.msk.f32.gmra.mxu3 %vm456_vm0, %v7234_v29  ;;  %6742 = vmatmul.msk.f32.gmra.mxu1 %vm456_vm0, %v7235_v20  ;;  %v7238_v29 = vld [vmem:[%s11478_s2 + $0x70] sm:$0xff] }
 0x7c3   : > { %6633 = vmatmul.msk.f32.gmra.mxu3 %vm456_vm0, %v7235_v20  ;;  %6743 = vmatmul.msk.f32.gmra.mxu1 %vm456_vm0, %v7236_v53  ;;  %v7239_v20 = vld [vmem:[%s11478_s2 + $0x78] sm:$0xff] }
 0x7cb   : > { %6634 = vmatmul.msk.f32.gmra.mxu3 %vm456_vm0, %v7236_v53  ;;  %6744 = vmatmul.msk.f32.gmra.mxu1 %vm456_vm0, %v7237_v7  ;;  %v7240_v53 = vld [vmem:[%s11478_s2 + $0x80] sm:$0xff] }
 0x7d3   : > { %6635 = vmatmul.msk.f32.gmra.mxu3 %vm456_vm0, %v7237_v7  ;;  %6745 = vmatmul.msk.f32.gmra.mxu1 %vm456_vm0, %v7238_v29  ;;  %v7241_v7 = vld [vmem:[%s11478_s2 + $0x88] sm:$0xff] }
 0x7db   : > { %6636 = vmatmul.msk.f32.gmra.mxu3 %vm456_vm0, %v7238_v29  ;;  %6746 = vmatmul.msk.f32.gmra.mxu1 %vm456_vm0, %v7239_v20 }
 0x7e3   : > { %6637 = vmatmul.msk.f32.gmra.mxu3 %vm456_vm0, %v7239_v20  ;;  %6747 = vmatmul.msk.f32.gmra.mxu1 %vm456_vm0, %v7240_v53  ;;  %v7242_v20 = vld [vmem:[%s11478_s2 + $0x90] sm:$0xff] }
 0x7eb   : > { %6638 = vmatmul.msk.f32.gmra.mxu3 %vm456_vm0, %v7240_v53  ;;  %6748 = vmatmul.msk.f32.gmra.mxu1 %vm456_vm0, %v7241_v7 }
 0x7ee   : > { %v2890_v18 = vpop.f32.mrf.mxu3 }
 0x7ef   : > { %v3100_v13 = vadd.f32 %v9110_v52, %v2890_v18  ;;  %v7243_v52 = vld [vmem:[%s11478_s2 + $0x98] sm:$0xff] }
 0x7f1   : > { %v3196_v26 = vadd.f32 %v9342_v45, %v3100_v13  ;;  %v3123_v13 = vpop.f32.mrf.mxu0 }
 0x7f3   : > { %v3228_v29 = vmax.f32 %v3196_v26, 0.0  ;;  %6639 = vmatmul.msk.f32.gmra.mxu3 %vm456_vm0, %v7241_v7  ;;  %6749 = vmatmul.msk.f32.gmra.mxu1 %vm456_vm0, %v7242_v20 }
 0x7f5   : > { %6690 = vmatmul.msk.f32.vlgmr.msrb.gmra.mxu2 %vm956_vm2, %v3228_v29 }
 0x7f6   : > { %v2893_v53 = vpop.f32.mrf.mxu3 }
 0x7f7   : > { %v3103_v41 = vadd.f32 %v9120_v58, %v2893_v53  ;;  %v7245_v53 = vld [vmem:[%s11478_s2 + $0xa8] sm:$0xff] }
 0x7f9   : > { %v3197_v43 = vadd.f32 %v9342_v45, %v3103_v41 }
 0x7fb   : > { %v3229_v37 = vmax.f32 %v3197_v43, 0.0  ;;  %6640 = vmatmul.msk.f32.gmra.mxu3 %vm456_vm0, %v7242_v20  ;;  %6750 = vmatmul.msk.f32.gmra.mxu1 %vm456_vm0, %v7243_v52  ;;  %v7244_v43 = vld [vmem:[%s11478_s2 + $0xa0] sm:$0xff] }
 0x7fd   : > { %6691 = vmatmul.msk.f32.gmra.mxu2 %vm956_vm2, %v3229_v37 }
 0x7fe   : > { %v2896_v7 = vpop.f32.mrf.mxu3 }
 0x7ff   : > { %v3106_v18 = vadd.f32 %v9128_v38, %v2896_v7  ;;  %v3126_v38 = vpop.f32.mrf.mxu0 }
 0x801   : > { %v3198_v26 = vadd.f32 %v9342_v45, %v3106_v18 }
 0x803   : > { %v3230_v58 = vmax.f32 %v3198_v26, 0.0  ;;  %6641 = vmatmul.msk.f32.gmra.mxu3 %vm456_vm0, %v7243_v52  ;;  %6751 = vmatmul.msk.f32.gmra.mxu1 %vm456_vm0, %v7244_v43  ;;  %v7246_v26 = vld [vmem:[%s11478_s2 + $0xb0] sm:$0xff] }
 0x805   : > { %6692 = vmatmul.msk.f32.gmra.mxu2 %vm956_vm2, %v3230_v58 }
 0x806   : > { %v2899_v41 = vpop.f32.mrf.mxu3 }
 0x807   : > { %v3109_v37 = vadd.f32 %v9139_v34, %v2899_v41  ;;  %v3129_v58 = vpop.f32.mrf.mxu0 }
 0x809   : > { %v3199_v29 = vadd.f32 %v9342_v45, %v3109_v37 }
 0x80b   : > { %v3231_v20 = vmax.f32 %v3199_v29, 0.0  ;;  %6642 = vmatmul.msk.f32.gmra.mxu3 %vm456_vm0, %v7244_v43  ;;  %6752 = vmatmul.msk.f32.gmra.mxu1 %vm456_vm0, %v7245_v53  ;;  %v7247_v29 = vld [vmem:[%s11478_s2 + $0xb8] sm:$0xff] }
 0x80d   : > { %6693 = vmatmul.msk.f32.gmra.mxu2 %vm956_vm2, %v3231_v20 }
 0x80e   : > { %v2902_v52 = vpop.f32.mrf.mxu3 }
 0x80f   : > { %v3112_v7 = vadd.f32 %v9148_v44, %v2902_v52  ;;  %v3132_v20 = vpop.f32.mrf.mxu0 }
 0x811   : > { %v3200_v18 = vadd.f32 %v9342_v45, %v3112_v7 }
 0x813   : > { %v3232_v34 = vmax.f32 %v3200_v18, 0.0  ;;  %6643 = vmatmul.msk.f32.gmra.mxu3 %vm456_vm0, %v7245_v53  ;;  %6753 = vmatmul.msk.f32.gmra.mxu1 %vm456_vm0, %v7246_v26 }
 0x815   : > { %6694 = vmatmul.msk.f32.gmra.mxu2 %vm956_vm2, %v3232_v34 }
 0x816   : > { %v2905_v43 = vpop.f32.mrf.mxu3 }
 0x817   : > { %v3115_v41 = vadd.f32 %v9158_v17, %v2905_v43 }
 0x819   : > { %v3201_v37 = vadd.f32 %v9342_v45, %v3115_v41 }
 0x81b   : > { %v3233_v44 = vmax.f32 %v3201_v37, 0.0  ;;  %6644 = vmatmul.msk.f32.gmra.mxu3 %vm456_vm0, %v7246_v26  ;;  %6754 = vmatmul.msk.f32.gmra.mxu1 %vm456_vm0, %v7247_v29  ;;  %v3135_v26 = vpop.f32.mrf.mxu0  ;;  %v9401_v37 = vld [vmem:[%s11478_s2 + $0xc0] sm:$0xff] }
 0x81d   : > { %6695 = vmatmul.msk.f32.gmra.mxu2 %vm956_vm2, %v3233_v44 }
 0x81e   : > { %v2908_v53 = vpop.f32.mrf.mxu3 }
 0x81f   : > { %v3118_v52 = vadd.f32 %v9173_v11, %v2908_v53 }
 0x821   : > { %v3202_v7 = vadd.f32 %v9342_v45, %v3118_v52  ;;  %v9410_v52 = vld [vmem:[%s11478_s2 + $0xc8] sm:$0xff] }
 0x823   : > { %v3234_v17 = vmax.f32 %v3202_v7, 0.0  ;;  %6645 = vmatmul.msk.f32.gmra.mxu3 %vm456_vm0, %v7247_v29  ;;  %v3138_v53 = vpop.f32.mrf.mxu0 }
 0x825   : > { %6696 = vmatmul.msk.f32.gmra.mxu2 %vm956_vm2, %v3234_v17 }
 0x826   : > { %v2911_v18 = vpop.f32.mrf.mxu3 }
 0x827   : > { %v3121_v34 = vadd.f32 %v9188_v56, %v2911_v18 }
 0x829   : > { %v3203_v43 = vadd.f32 %v9342_v45, %v3121_v34 }
 0x82b   : > { %v3235_v41 = vmax.f32 %v3203_v43, 0.0  ;;  %6646 = vmatmul.msk.f32.gmra.mxu3 %vm456_vm0, %v9401_v37  ;;  %v3141_v43 = vpop.f32.mrf.mxu0 }
 0x82d   : > { %6697 = vmatmul.msk.f32.gmra.mxu2 %vm956_vm2, %v3235_v41 }
 0x82e   : > { %v2914_v11 = vpop.f32.mrf.mxu3 }
 0x82f   : > { %v3124_v44 = vadd.f32 %v3123_v13, %v2914_v11  ;;  %v9419_v13 = vld [vmem:[%s11478_s2 + $0xd0] sm:$0xff] }
 0x831   : > { %v3204_v29 = vadd.f32 %v9342_v45, %v3124_v44 }
 0x833   : > { %v3236_v56 = vmax.f32 %v3204_v29, 0.0  ;;  %6647 = vmatmul.msk.f32.gmra.mxu3 %vm456_vm0, %v9410_v52 }
 0x835   : > { %6698 = vmatmul.msk.f32.gmra.mxu2 %vm956_vm2, %v3236_v56  ;;  %v6725_v56 = vld [vmem:[%s11286_s6 + $0x98] sm:$0xff] }
 0x836   : > { %v2917_v7 = vpop.f32.mrf.mxu3  ;;  %3728 = vmatpush.msra.mxu3 %v6725_v56 }
 0x837   : > { %v3127_v17 = vadd.f32 %v3126_v38, %v2917_v7  ;;  %v9428_v38 = vld [vmem:[%s11478_s2 + $0xd8] sm:$0xff]  ;;  %v3144_v7 = vpop.f32.mrf.mxu0 }
 0x839   : > { %v3205_v18 = vadd.f32 %v9342_v45, %v3127_v17 }
 0x83b   : > { %v3237_v34 = vmax.f32 %v3205_v18, 0.0  ;;  %6648 = vmatmul.msk.f32.gmra.mxu3 %vm456_vm0, %v9419_v13 }
 0x83d   : > { %6699 = vmatmul.msk.f32.gmra.mxu2 %vm956_vm2, %v3237_v34  ;;  %v6723_v34 = vld [vmem:[%s11286_s6 + $0x88] sm:$0xff] }
 0x83e   : > { %v2920_v41 = vpop.f32.mrf.mxu3 }
 0x83f   : > { %v3130_v11 = vadd.f32 %v3129_v58, %v2920_v41  ;;  %v6724_v58 = vld [vmem:[%s11286_s6 + $0x90] sm:$0xff] }
 0x840   : > { %3729 = vmatpush.msra.mxu3 %v6724_v58  ;;  %v3147_v58 = vpop.f32.mrf.mxu0 }
 0x841   : > { %v3206_v44 = vadd.f32 %v9342_v45, %v3130_v11  ;;  %v6722_v11 = vld [vmem:[%s11286_s6 + $0x80] sm:$0xff] }
 0x842   : > { %3730 = vmatpush.msra.mxu3 %v6723_v34  ;;  %v9458_v34 = vld [vmem:[%s11478_s2 + $0xe8] sm:$0xff] }
 0x843   : > { %v3238_v29 = vmax.f32 %v3206_v44, 0.0  ;;  %6649 = vmatmul.msk.f32.gmra.mxu3 %vm456_vm0, %v9428_v38 }
 0x844   : > { %3731 = vmatpush.msra.mxu3 %v6722_v11 }
 0x845   : > { %6700 = vmatmul.msk.f32.gmra.mxu2 %vm956_vm2, %v3238_v29  ;;  %v9449_v29 = vld [vmem:[%s11478_s2 + $0xe0] sm:$0xff] }
 0x846   : > { %v2923_v17 = vpop.f32.mrf.mxu3 }
 0x847   : > { %v3133_v18 = vadd.f32 %v3132_v20, %v2923_v17 }
 0x848   : > { %v3150_v14 = vpop.f32.mrf.mxu0 }
 0x849   : > { %v3207_v41 = vadd.f32 %v9342_v45, %v3133_v18 }
 0x84b   : > { %v3239_v44 = vmax.f32 %v3207_v41, 0.0  ;;  %6650 = vmatmul.msk.f32.gmra.mxu3 %vm456_vm0, %v9449_v29 }
 0x84d   : > { %6701 = vmatmul.msk.f32.gmra.mxu2 %vm956_vm2, %v3239_v44 }
 0x84e   : > { %v2926_v20 = vpop.f32.mrf.mxu3 }
 0x84f   : > { %v3136_v56 = vadd.f32 %v3135_v26, %v2926_v20  ;;  %v9467_v20 = vld [vmem:[%s11478_s2 + $0xf0] sm:$0xff] }
 0x851   : > { %v3208_v17 = vadd.f32 %v9342_v45, %v3136_v56 }
 0x853   : > { %v3240_v18 = vmax.f32 %v3208_v17, 0.0  ;;  %6651 = vmatmul.msk.f32.gmra.mxu3 %vm456_vm0, %v9458_v34 }
 0x855   : > { %6702 = vmatmul.msk.f32.gmra.mxu2 %vm956_vm2, %v3240_v18 }
 0x856   : > { %v2929_v41 = vpop.f32.mrf.mxu3 }
 0x857   : > { %v3139_v11 = vadd.f32 %v3138_v53, %v2929_v41  ;;  %v9476_v53 = vld [vmem:[%s11478_s2 + $0xf8] sm:$0xff]  ;;  %v3153_v41 = vpop.f32.mrf.mxu0 }
 0x859   : > { %v3209_v44 = vadd.f32 %v9342_v45, %v3139_v11 }
 0x85b   : > { %v3241_v26 = vmax.f32 %v3209_v44, 0.0  ;;  %6652 = vmatmul.msk.f32.gmra.mxu3 %vm456_vm0, %v9467_v20 }
 0x85d   : > { %6703 = vmatmul.msk.f32.gmra.mxu2 %vm956_vm2, %v3241_v26 }
 0x85e   : > { %v2932_v56 = vpop.f32.mrf.mxu3 }
 0x85f   : > { %v3142_v17 = vadd.f32 %v3141_v43, %v2932_v56  ;;  %v3156_v43 = vpop.f32.mrf.mxu0 }
 0x861   : > { %v3210_v18 = vadd.f32 %v9342_v45, %v3142_v17 }
 0x863   : > { %v3242_v40 = vmax.f32 %v3210_v18, 0.0  ;;  %6653 = vmatmul.msk.f32.gmra.mxu3 %vm456_vm0, %v9476_v53 }
 0x865   : > { %6704 = vmatmul.msk.f32.gmra.mxu2 %vm956_vm2, %v3242_v40 }
 0x866   : > { %v2935_v11 = vpop.f32.mrf.mxu3 }
 0x867   : > { %v3145_v44 = vadd.f32 %v3144_v7, %v2935_v11  ;;  %v3159_v11 = vpop.f32.mrf.mxu0 }
 0x869   : > { %v3211_v26 = vadd.f32 %v9342_v45, %v3145_v44 }
 0x86b   : > { %v3243_v35 = vmax.f32 %v3211_v26, 0.0  ;;  %6763 = vmatmul.msk.f32.vlgmr.msra.gmra.mxu3 %vm956_vm2, %v8856_v63 }
 0x86d   : > { %6705 = vmatmul.msk.f32.gmra.mxu2 %vm956_vm2, %v3243_v35 }
 0x86e   : > { %v2938_v56 = vpop.f32.mrf.mxu3 }
 0x86f   : > { %v3148_v17 = vadd.f32 %v3147_v58, %v2938_v56  ;;  %v3162_v56 = vpop.f32.mrf.mxu0 }
 0x871   : > { %v3212_v18 = vadd.f32 %v9342_v45, %v3148_v17 }
 0x873   : > { %v3244_v55 = vmax.f32 %v3212_v18, 0.0  ;;  %6764 = vmatmul.msk.f32.gmra.mxu3 %vm956_vm2, %v8869_v25 }
 0x875   : > { %6706 = vmatmul.msk.f32.gmra.mxu2 %vm956_vm2, %v3244_v55 }
 0x876   : > { %v2941_v40 = vpop.f32.mrf.mxu3 }
 0x877   : > { %v3151_v7 = vadd.f32 %v3150_v14, %v2941_v40 }
 0x879   : > { %v3213_v44 = vadd.f32 %v9342_v45, %v3151_v7 }
 0x87b   : > { %v3245_v26 = vmax.f32 %v3213_v44, 0.0  ;;  %6765 = vmatmul.msk.f32.gmra.mxu3 %vm956_vm2, %v8880_v0  ;;  %v3165_v0 = vpop.f32.mrf.mxu0 }
 0x87d   : > { %6707 = vmatmul.msk.f32.gmra.mxu2 %vm956_vm2, %v3245_v26 }
 0x87e   : > { %v2944_v63 = vpop.f32.mrf.mxu3 }
 0x87f   : > { %v3154_v35 = vadd.f32 %v3153_v41, %v2944_v63 }
 0x881   : > { %v3214_v58 = vadd.f32 %v9342_v45, %v3154_v35 }
 0x883   : > { %v3246_v17 = vmax.f32 %v3214_v58, 0.0  ;;  %6766 = vmatmul.msk.f32.gmra.mxu3 %vm956_vm2, %v8891_v19  ;;  %v3168_v19 = vpop.f32.mrf.mxu0 }
 0x885   : > { %6708 = vmatmul.msk.f32.gmra.mxu2 %vm956_vm2, %v3246_v17 }
 0x886   : > { %v2947_v25 = vpop.f32.mrf.mxu3 }
 0x887   : > { %v3157_v55 = vadd.f32 %v3156_v43, %v2947_v25 }
 0x889   : > { %v3215_v14 = vadd.f32 %v9342_v45, %v3157_v55 }
 0x88b   : > { %v3247_v18 = vmax.f32 %v3215_v14, 0.0  ;;  %6767 = vmatmul.msk.f32.gmra.mxu3 %vm956_vm2, %v8900_v1  ;;  %v3171_v58 = vpop.f32.mrf.mxu0 }
 0x88d   : > { %6709 = vmatmul.msk.f32.gmra.mxu2 %vm956_vm2, %v3247_v18 }
 0x88e   : > { %v2950_v41 = vpop.f32.mrf.mxu3 }
 0x88f   : > { %v3160_v40 = vadd.f32 %v3159_v11, %v2950_v41 }
 0x891   : > { %v3216_v7 = vadd.f32 %v9342_v45, %v3160_v40 }
 0x893   : > { %v3248_v44 = vmax.f32 %v3216_v7, 0.0  ;;  %6768 = vmatmul.msk.f32.gmra.mxu3 %vm956_vm2, %v8911_v50 }
 0x895   : > { %6710 = vmatmul.msk.f32.gmra.mxu2 %vm956_vm2, %v3248_v44 }
 0x896   : > { %v2953_v43 = vpop.f32.mrf.mxu3 }
 0x897   : > { %v3163_v26 = vadd.f32 %v3162_v56, %v2953_v43  ;;  %v9513_v56 = vpop.f32.mrf.mxu2 }
 0x899   : > { %v3217_v63 = vadd.f32 %v9342_v45, %v3163_v26 }
 0x89b   : > { %v3249_v35 = vmax.f32 %v3217_v63, 0.0  ;;  %6769 = vmatmul.msk.f32.gmra.mxu3 %vm956_vm2, %v8922_v10  ;;  %v3174_v10 = vpop.f32.mrf.mxu0 }
 0x89d   : > { %6711 = vmatmul.msk.f32.gmra.mxu2 %vm956_vm2, %v3249_v35 }
 0x89e   : > { %v2956_v1 = vpop.f32.mrf.mxu3 }
 0x89f   : > { %v3166_v11 = vadd.f32 %v3165_v0, %v2956_v1  ;;  %v9519_v40 = vpop.f32.mrf.mxu2 }
 0x8a1   : > { %v3218_v17 = vadd.f32 %v9342_v45, %v3166_v11 }
 0x8a3   : > { %v3250_v25 = vmax.f32 %v3218_v17, 0.0  ;;  %6770 = vmatmul.msk.f32.gmra.mxu3 %vm956_vm2, %v8933_v23  ;;  %v3177_v44 = vpop.f32.mrf.mxu0 }
 0x8a5   : > { %6712 = vmatmul.msk.f32.gmra.mxu2 %vm956_vm2, %v3250_v25 }
 0x8a6   : > { %v2959_v50 = vpop.f32.mrf.mxu3 }
 0x8a7   : > { %v3169_v55 = vadd.f32 %v3168_v19, %v2959_v50 }
 0x8a9   : > { %v3219_v14 = vadd.f32 %v9342_v45, %v3169_v55 }
 0x8ab   : > { %v3251_v18 = vmax.f32 %v3219_v14, 0.0  ;;  %6771 = vmatmul.msk.f32.gmra.mxu3 %vm956_vm2, %v8944_v39  ;;  %v9526_v39 = vpop.f32.mrf.mxu2  ;;  %v3180_v35 = vpop.f32.mrf.mxu0 }
 0x8ad   : > { %6713 = vmatmul.msk.f32.gmra.mxu2 %vm956_vm2, %v3251_v18 }
 0x8ae   : > { %v2962_v0 = vpop.f32.mrf.mxu3 }
 0x8af   : > { %v3172_v41 = vadd.f32 %v3171_v58, %v2962_v0 }
 0x8b1   : > { %v3220_v23 = vadd.f32 %v9342_v45, %v3172_v41 }
 0x8b3   : > { %v3252_v7 = vmax.f32 %v3220_v23, 0.0  ;;  %6772 = vmatmul.msk.f32.gmra.mxu3 %vm956_vm2, %v8952_v59  ;;  %v9534_v17 = vpop.f32.mrf.mxu2  ;;  %v3183_v55 = vpop.f32.mrf.mxu0 }
 0x8b5   : > { %6714 = vmatmul.msk.f32.gmra.mxu2 %vm956_vm2, %v3252_v7 }
 0x8b6   : > { %v2965_v19 = vpop.f32.mrf.mxu3 }
 0x8b7   : > { %v3175_v43 = vadd.f32 %v3174_v10, %v2965_v19  ;;  %v3524_v10 = vpop.f32.mrf.mxu1  ;;  %6755 = vmatmul.msk.f32.gmra.mxu1 %vm456_vm0, %v9401_v37 }
 0x8b9   : > { %v3221_v26 = vadd.f32 %v9342_v45, %v3175_v43 }
 0x8bb   : > { %v3253_v63 = vmax.f32 %v3221_v26, 0.0  ;;  %6773 = vmatmul.msk.f32.gmra.mxu3 %vm956_vm2, %v8962_v36  ;;  %v9543_v18 = vpop.f32.mrf.mxu2  ;;  %v3186_v23 = vpop.f32.mrf.mxu0 }
 0x8bd   : > { %6715 = vmatmul.msk.f32.gmra.mxu2 %vm956_vm2, %v3253_v63 }
 0x8be   : > { %v2968_v1 = vpop.f32.mrf.mxu3 }
 0x8bf   : > { %v3178_v11 = vadd.f32 %v3177_v44, %v2968_v1 }
 0x8c1   : > { %v3222_v59 = vadd.f32 %v9342_v45, %v3178_v11 }
 0x8c3   : > { %v3254_v58 = vmax.f32 %v3222_v59, 0.0  ;;  %6774 = vmatmul.msk.f32.gmra.mxu3 %vm956_vm2, %v8972_v24  ;;  %v9551_v37 = vpop.f32.mrf.mxu2  ;;  %v3189_v63 = vpop.f32.mrf.mxu0 }
 0x8c5   : > { %6716 = vmatmul.msk.f32.gmra.mxu2 %vm956_vm2, %v3254_v58 }
 0x8c6   : > { %v2971_v25 = vpop.f32.mrf.mxu3 }
 0x8c7   : > { %v3181_v50 = vadd.f32 %v3180_v35, %v2971_v25 }
 0x8c9   : > { %v3223_v36 = vadd.f32 %v9342_v45, %v3181_v50 }
 0x8cb   : > { %v3255_v14 = vmax.f32 %v3223_v36, 0.0  ;;  %6775 = vmatmul.msk.f32.gmra.mxu3 %vm956_vm2, %v8984_v6  ;;  %v3527_v6 = vpop.f32.mrf.mxu1  ;;  %6756 = vmatmul.msk.f32.gmra.mxu1 %vm456_vm0, %v9410_v52  ;;  %v3397_v11 = vpop.f32.mrf.mxu2 }
 0x8cd   : > { %6717 = vmatmul.msk.f32.gmra.mxu2 %vm956_vm2, %v3255_v14 }
 0x8ce   : > { %v2974_v24 = vpop.f32.mrf.mxu3 }
 0x8cf   : > { %v3184_v0 = vadd.f32 %v3183_v55, %v2974_v24  ;;  %v9569_v55 = vld [vmem:[%s11288_s8 + $0x5] ss:$0 sm:$0xff] }
 0x8d1   : > { %v3224_v41 = vadd.f32 %v9342_v45, %v3184_v0 }
 0x8d3   : > { %v3256_v7 = vmax.f32 %v3224_v41, 0.0  ;;  %6776 = vmatmul.msk.f32.gmra.mxu3 %vm956_vm2, %v8996_v51  ;;  %v3530_v51 = vpop.f32.mrf.mxu1  ;;  %6757 = vmatmul.msk.f32.gmra.mxu1 %vm456_vm0, %v9419_v13 }
 0x8d5   : > { %6718 = vmatmul.msk.f32.gmra.mxu2 %vm956_vm2, %v3256_v7 }
 0x8d6   : > { %v2977_v44 = vpop.f32.mrf.mxu3 }
 0x8d7   : > { %v3187_v19 = vadd.f32 %v3186_v23, %v2977_v44  ;;  %v3383_v23 = vadd.f32 %v9569_v55, %v9519_v40 }
 0x8d9   : > { %v3225_v43 = vadd.f32 %v9342_v45, %v3187_v19 }
 0x8db   : > { %v3257_v26 = vmax.f32 %v3225_v43, 0.0  ;;  %6777 = vmatmul.msk.f32.gmra.mxu3 %vm956_vm2, %v9004_v3  ;;  %v3533_v58 = vpop.f32.mrf.mxu1  ;;  %6758 = vmatmul.msk.f32.gmra.mxu1 %vm456_vm0, %v9428_v38  ;;  %v3192_v3 = vpop.f32.mrf.mxu0 }
 0x8dd   : > { %6719 = vmatmul.msk.f32.gmra.mxu2 %vm956_vm2, %v3257_v26 }
 0x8de   : > { %v2980_v35 = vpop.f32.mrf.mxu3 }
 0x8df   : > { %v3190_v1 = vadd.f32 %v3189_v63, %v2980_v35 }
 0x8e1   : > { %v3226_v52 = vadd.f32 %v9342_v45, %v3190_v1 }
 0x8e3   : > { %v3258_v59 = vmax.f32 %v3226_v52, 0.0  ;;  %6778 = vmatmul.msk.f32.gmra.mxu3 %vm956_vm2, %v9006_v62  ;;  %v3400_v62 = vpop.f32.mrf.mxu2  ;;  %v3536_v14 = vpop.f32.mrf.mxu1  ;;  %6759 = vmatmul.msk.f32.gmra.mxu1 %vm456_vm0, %v9449_v29 }
 0x8e5   : > { %6720 = vmatmul.msk.f32.gmra.mxu2 %vm956_vm2, %v3258_v59 }
 0x8e6   : > { %v2983_v25 = vpop.f32.mrf.mxu3 }
 0x8e7   : > { %v3193_v50 = vadd.f32 %v3192_v3, %v2983_v25  ;;  %v3398_v25 = vadd.f32 %v9569_v55, %v3397_v11 }
 0x8e9   : > { %v3227_v13 = vadd.f32 %v9342_v45, %v3193_v50  ;;  %v3380_v45 = vadd.f32 %v9569_v55, %v9513_v56 }
 0x8eb   : > { %v3259_v36 = vmax.f32 %v3227_v13, 0.0  ;;  %6779 = vmatmul.msk.f32.gmra.mxu3 %vm956_vm2, %v9038_v60  ;;  %v3539_v41 = vpop.f32.mrf.mxu1  ;;  %6760 = vmatmul.msk.f32.gmra.mxu1 %vm456_vm0, %v9458_v34  ;;  %v9590_v56 = vpop.f32.mrf.mxu2  ;;  %v3386_v34 = vadd.f32 %v9569_v55, %v9526_v39 }
 0x8ed   : > { %6721 = vmatmul.msk.f32.gmra.mxu2 %vm956_vm2, %v3259_v36 }
 0x8ee   : > { %v3733_v38 = vpop.f32.mrf.mxu3 }
 0x8ef   : > { %v3734_v24 = vadd.f32 %v3733_v38, %v3524_v10 }
 0x8f1   : > { %v9578_v0 = vadd.f32 %v3734_v24, %v3380_v45 }
 0x8f3   : > { %6780 = vmatmul.msk.f32.gmra.mxu3 %vm956_vm2, %v9055_v8  ;;  %v3542_v10 = vpop.f32.mrf.mxu1  ;;  %6761 = vmatmul.msk.f32.gmra.mxu1 %vm456_vm0, %v9467_v20  ;;  %v9604_v43 = vpop.f32.mrf.mxu2 }
 0x8f6   : > { %v3736_v60 = vpop.f32.mrf.mxu3 }
 0x8f7   : > { %v3737_v7 = vadd.f32 %v3736_v60, %v3527_v6  ;;  %v3389_v6 = vadd.f32 %v9569_v55, %v9534_v17 }
 0x8f9   : > { %v9586_v29 = vadd.f32 %v3737_v7, %v3383_v23 }
 0x8fb   : > { %6781 = vmatmul.msk.f32.gmra.mxu3 %vm956_vm2, %v9072_v12  ;;  %v3545_v40 = vpop.f32.mrf.mxu1  ;;  %6762 = vmatmul.msk.f32.gmra.mxu1 %vm456_vm0, %v9476_v53  ;;  %v9614_v53 = vpop.f32.mrf.mxu2 }
 0x8fe   : > { %v3739_v8 = vpop.f32.mrf.mxu3 }
 0x8ff   : > { %v3740_v44 = vadd.f32 %v3739_v8, %v3530_v51 }
 0x901   : > { %v9596_v19 = vadd.f32 %v3740_v44, %v3386_v34 }
 0x903   : > { %6782 = vmatmul.msk.f32.gmra.mxu3 %vm956_vm2, %v9082_v28  ;;  %v9610_v39 = vpop.f32.mrf.mxu1  ;;  %v3392_v28 = vadd.f32 %v9569_v55, %v9543_v18 }
 0x906   : > { %v3742_v12 = vpop.f32.mrf.mxu3 }
 0x907   : > { %v3743_v20 = vadd.f32 %v3742_v12, %v3533_v58  ;;  %v3412_v58 = vpop.f32.mrf.mxu2 }
 0x909   : > { %v9606_v26 = vadd.f32 %v3743_v20, %v3389_v6 }
 0x90b   : > { %11516 = vst [vmem:[#allocation29_spill] sm:$0xff] %v9606_v26  ;;  %6783 = vmatmul.msk.f32.gmra.mxu3 %vm956_vm2, %v9090_v2  ;;  %v9620_v17 = vpop.f32.mrf.mxu1  ;;  %v3395_v2 = vadd.f32 %v9569_v55, %v9551_v37 }
 0x90e   : > { %v3745_v63 = vpop.f32.mrf.mxu3 }
 0x90f   : > { %v3746_v51 = vadd.f32 %v3745_v63, %v3536_v14  ;;  %v3401_v14 = vadd.f32 %v9569_v55, %v3400_v62 }
 0x911   : > { %v9616_v35 = vadd.f32 %v3746_v51, %v3392_v28 }
 0x913   : > { %11517 = vst [vmem:[#allocation25_spill] sm:$0xff] %v9616_v35  ;;  %6784 = vmatmul.msk.f32.gmra.mxu3 %vm956_vm2, %v9098_v42  ;;  %v3554_v18 = vpop.f32.mrf.mxu1  ;;  %v3415_v42 = vpop.f32.mrf.mxu2 }
 0x916   : > { %v3748_v1 = vpop.f32.mrf.mxu3 }
 0x917   : > { %v3749_v52 = vadd.f32 %v3748_v1, %v3539_v41 }
 0x919   : > { %v9624_v59 = vadd.f32 %v3749_v52, %v3395_v2 }
 0x91b   : > { %11518 = vst [vmem:[#allocation21_spill] sm:$0xff] %v9624_v59  ;;  %6785 = vmatmul.msk.f32.gmra.mxu3 %vm956_vm2, %v9104_v57  ;;  %v3557_v36 = vpop.f32.mrf.mxu1  ;;  %v3418_v11 = vpop.f32.mrf.mxu2 }
 0x91c   : > { %v3419_v1 = vadd.f32 %v9569_v55, %v3418_v11 }
 0x91e   : > { %v3751_v3 = vpop.f32.mrf.mxu3 }
 0x91f   : > { %v3752_v50 = vadd.f32 %v3751_v3, %v3542_v10  ;;  %v3416_v3 = vadd.f32 %v9569_v55, %v3415_v42 }
 0x921   : > { %v9629_v13 = vadd.f32 %v3752_v50, %v3398_v25 }
 0x923   : > { %11519 = vst [vmem:[#allocation40_spill] sm:$0xff] %v9629_v13  ;;  %6786 = vmatmul.msk.f32.gmra.mxu3 %vm956_vm2, %v9112_v46  ;;  %v3560_v57 = vpop.f32.mrf.mxu1  ;;  %v3421_v46 = vpop.f32.mrf.mxu2 }
 0x926   : > { %v3754_v37 = vpop.f32.mrf.mxu3 }
 0x927   : > { %v3755_v38 = vadd.f32 %v3754_v37, %v3545_v40 }
 0x929   : > { %v9634_v45 = vadd.f32 %v3755_v38, %v3401_v14  ;;  %v3413_v38 = vadd.f32 %v9569_v55, %v3412_v58 }
 0x92b   : > { %11520 = vst [vmem:[#allocation38_spill] sm:$0xff] %v9634_v45  ;;  %6787 = vmatmul.msk.f32.gmra.mxu3 %vm956_vm2, %v9118_v5  ;;  %v3563_v41 = vpop.f32.mrf.mxu1  ;;  %v3424_v7 = vpop.f32.mrf.mxu2 }
 0x92c   : > { %v3425_v63 = vadd.f32 %v9569_v55, %v3424_v7 }
 0x92e   : > { %v3757_v24 = vpop.f32.mrf.mxu3 }
 0x933   : > { %6788 = vmatmul.msk.f32.gmra.mxu3 %vm956_vm2, %v9126_v47  ;;  %v3566_v23 = vpop.f32.mrf.mxu1  ;;  %v9646_v8 = vpop.f32.mrf.mxu2 }
 0x936   : > { %v3760_v60 = vpop.f32.mrf.mxu3 }
 0x93b   : > { %6789 = vmatmul.msk.f32.gmra.mxu3 %vm956_vm2, %v9134_v49  ;;  %v3569_v10 = vpop.f32.mrf.mxu1  ;;  %v9652_v44 = vpop.f32.mrf.mxu2 }
 0x93e   : > { %v3763_v62 = vpop.f32.mrf.mxu3 }
 0x93f   : > { %v3764_v11 = vadd.f32 %v3763_v62, %v3554_v18  ;;  %v3407_v18 = vadd.f32 %v9569_v55, %v9604_v43  ;;  %v3758_v62 = vadd.f32 %v3757_v24, %v9610_v39 }
 0x943   : > { %6790 = vmatmul.msk.f32.gmra.mxu3 %vm956_vm2, %v9142_v32  ;;  %v9648_v34 = vpop.f32.mrf.mxu1  ;;  %v9658_v12 = vpop.f32.mrf.mxu2 }
 0x946   : > { %v3766_v5 = vpop.f32.mrf.mxu3 }
 0x94b   : > { %6791 = vmatmul.msk.f32.gmra.mxu3 %vm956_vm2, %v9150_v30  ;;  %v9654_v40 = vpop.f32.mrf.mxu1  ;;  %v9672_v25 = vpop.f32.mrf.mxu2 }
 0x94e   : > { %v3769_v47 = vpop.f32.mrf.mxu3 }
 0x94f   : > { %v3770_v2 = vadd.f32 %v3769_v47, %v3560_v57 }
 0x951   : > { %v9681_v57 = vadd.f32 %v3770_v2, %v3416_v3  ;;  %v11531_v2 = vld [vmem:[#allocation39_spill] sm:$0xff] }
 0x952   : > { %v3865_v3 = vmul.f32 %v9616_v35, %v11531_v2 }
 0x953   : > { %6792 = vmatmul.msk.f32.gmra.mxu3 %vm956_vm2, %v9156_v54  ;;  %v9660_v30 = vpop.f32.mrf.mxu1  ;;  %v3422_v54 = vadd.f32 %v9569_v55, %v3421_v46  ;;  %11524 = vst [vmem:[#allocation31_spill] sm:$0xff] %v9681_v57  ;;  %v3761_v46 = vadd.f32 %v3760_v60, %v9620_v17 }
 0x955   : > { %v9703_v17 = vadd.f32 %v3761_v46, %v3407_v18  ;;  %v11535_v18 = vld [vmem:[#allocation46_spill] sm:$0xff] }
 0x956   : > { %v3772_v49 = vpop.f32.mrf.mxu3 }
 0x957   : > { %v3773_v28 = vadd.f32 %v3772_v49, %v3563_v41  ;;  %11527 = vst [vmem:[#allocation50_spill] sm:$0xff] %v9703_v17 }
 0x959   : > { %v9674_v50 = vadd.f32 %v3773_v28, %v3419_v1  ;;  %v11530_v28 = vld [vmem:[#allocation35_spill] sm:$0xff] }
 0x95b   : > { %6793 = vmatmul.msk.f32.gmra.mxu3 %vm956_vm2, %v9165_v4  ;;  %11523 = vst [vmem:[#allocation33_spill] sm:$0xff] %v9674_v50  ;;  %v9678_v14 = vpop.f32.mrf.mxu1  ;;  %v3874_v58 = vmul.f32 %v9674_v50, %v11486_v15 }
 0x95e   : > { %v3775_v32 = vpop.f32.mrf.mxu3 }
 0x95f   : > { %v3776_v6 = vadd.f32 %v3775_v32, %v3566_v23  ;;  %v3868_v32 = vmul.f32 %v9634_v45, %v11492_v48 }
 0x961   : > { %v9667_v4 = vadd.f32 %v3776_v6, %v3422_v54  ;;  %v11529_v6 = vld [vmem:[#allocation28_spill] sm:$0xff] }
 0x963   : > { %6794 = vmatmul.msk.f32.gmra.mxu3 %vm956_vm2, %v9167_v21  ;;  %11521 = vst [vmem:[#allocation36_spill] sm:$0xff] %v9667_v4  ;;  %v3767_v21 = vadd.f32 %v3766_v5, %v3557_v36  ;;  %v3875_v41 = vmul.f32 %v9667_v4, %v11485_v33  ;;  %v3410_v36 = vadd.f32 %v9569_v55, %v9614_v53  ;;  %v9707_v5 = vpop.f32.mrf.mxu2  ;;  %v9715_v47 = vpop.f32.mrf.mxu1 }
 0x964   : > { %v3404_v53 = vadd.f32 %v9569_v55, %v9590_v56  ;;  %v3870_v56 = vmul.f32 %v9703_v17, %v11490_v27 }
 0x965   : > { %v9690_v23 = vadd.f32 %v3767_v21, %v3413_v38  ;;  %v9697_v7 = vadd.f32 %v3764_v11, %v3410_v36  ;;  %v11532_v21 = vld [vmem:[#allocation42_spill] sm:$0xff]  ;;  %v11533_v38 = vld [vmem:[#allocation44_spill] sm:$0xff]  ;;  %v11534_v36 = vld [vmem:[#allocation45_spill] sm:$0xff] }
 0x966   : > { %v3778_v20 = vpop.f32.mrf.mxu3  ;;  %v9709_v43 = vadd.f32 %v3758_v62, %v3404_v53  ;;  %v3863_v11 = vmul.f32 %v9596_v19, %v11533_v38  ;;  %v3862_v46 = vmul.f32 %v9586_v29, %v11534_v36  ;;  %v3861_v62 = vmul.f32 %v9578_v0, %v11535_v18  ;;  %v7256_v53 = vld [vmem:[%s11466_s1] sm:$0xff] }
 0x967   : > { %v3779_v51 = vadd.f32 %v3778_v20, %v3569_v10  ;;  %11525 = vst [vmem:[#allocation32_spill] sm:$0xff] %v9690_v23  ;;  %v3873_v10 = vmul.f32 %v9681_v57, %v11487_v9  ;;  %v3872_v60 = vmul.f32 %v9690_v23, %v11488_v31  ;;  %v3871_v39 = vmul.f32 %v9697_v7, %v11489_v61 }
 0x968   : > { %11526 = vst [vmem:[#allocation51_spill] sm:$0xff] %v9697_v7  ;;  %v3869_v49 = vmul.f32 %v9709_v43, %v11491_v16  ;;  %v3867_v20 = vmul.f32 %v9629_v13, %v11529_v6 }
 0x969   : > { %v9669_v52 = vadd.f32 %v3779_v51, %v3425_v63  ;;  %11528 = vst [vmem:[#allocation49_spill] sm:$0xff] %v9709_v43  ;;  %v3866_v51 = vmul.f32 %v9624_v59, %v11530_v28 }
 0x96b   : > { %11522 = vst [vmem:[#allocation34_spill] sm:$0xff] %v9669_v52  ;;  %v3876_v37 = vmul.f32 %v9669_v52, %v11484_v22  ;;  %v9727_v63 = vpop.f32.mrf.mxu2  ;;  %v9731_v1 = vpop.f32.mrf.mxu1 }
 0x96d   : > { %3893 = vmatpush.msrb.mxu0 %v3876_v37  ;;  %v3864_v37 = vmul.f32 %v9606_v26, %v11532_v21 }
 0x96e   : > { %v9685_v42 = vpop.f32.mrf.mxu3 }
 0x96f   : > { %3894 = vmatpush.msrb.mxu0 %v3875_v41 }
 0x971   : > { %3895 = vmatpush.msrb.mxu0 %v3874_v58 }
 0x973   : > { %3896 = vmatpush.msrb.mxu0 %v3873_v10  ;;  %v9743_v58 = vpop.f32.mrf.mxu2  ;;  %v9747_v10 = vpop.f32.mrf.mxu1 }
 0x975   : > { %3897 = vmatpush.msrb.mxu0 %v3872_v60 }
 0x976   : > { %v9713_v24 = vpop.f32.mrf.mxu3 }
 0x977   : > { %3898 = vmatpush.msrb.mxu0 %v3871_v39 }
 0x979   : > { %3899 = vmatpush.msrb.mxu0 %v3870_v56 }
 0x97b   : > { %3900 = vmatpush.msrb.mxu0 %v3869_v49  ;;  %v9754_v39 = vpop.f32.mrf.mxu2  ;;  %v3593_v56 = vpop.f32.mrf.mxu1 }
 0x97d   : > { %3901 = vmatpush.msrb.mxu0 %v3868_v32 }
 0x97e   : > { %v9725_v54 = vpop.f32.mrf.mxu3 }
 0x97f   : > { %3902 = vmatpush.msrb.mxu0 %v3867_v20 }
 0x981   : > { %3903 = vmatpush.msrb.mxu0 %v3866_v51 }
 0x983   : > { %3904 = vmatpush.msrb.mxu0 %v3865_v3  ;;  %v3451_v32 = vpop.f32.mrf.mxu2  ;;  %v3596_v51 = vpop.f32.mrf.mxu1 }
 0x985   : > { %3905 = vmatpush.msrb.mxu0 %v3864_v37 }
 0x986   : > { %v9739_v41 = vpop.f32.mrf.mxu3 }
 0x987   : > { %3906 = vmatpush.msrb.mxu0 %v3863_v11 }
 0x989   : > { %3907 = vmatpush.msrb.mxu0 %v3862_v46 }
 0x98b   : > { %3908 = vmatpush.msrb.mxu0 %v3861_v62  ;;  %v3454_v37 = vpop.f32.mrf.mxu2  ;;  %v3599_v11 = vpop.f32.mrf.mxu1 }
 0x98c   : > { %3909 = vmatmul.f32.vlgmr.msrb.gmra.mxu0 %v7256_v53 }
 0x98e   : > { %v9752_v60 = vpop.f32.mrf.mxu3 }
 0x993   : > { %v3457_v62 = vpop.f32.mrf.mxu2  ;;  %v3602_v18 = vpop.f32.mrf.mxu1 }
 0x996   : > { %v9756_v49 = vpop.f32.mrf.mxu3 }
 0x99b   : > { %v3460_v38 = vpop.f32.mrf.mxu2  ;;  %v3605_v21 = vpop.f32.mrf.mxu1 }
 0x99e   : > { %v3799_v20 = vpop.f32.mrf.mxu3 }
 0x9a3   : > { %v3463_v2 = vpop.f32.mrf.mxu2  ;;  %v3608_v6 = vpop.f32.mrf.mxu1 }
 0x9a4   : > { %v3464_v59 = vadd.f32 %v9569_v55, %v3463_v2 }
 0x9a6   : > { %v3802_v3 = vpop.f32.mrf.mxu3 }
 0x9ab   : > { %v3466_v16 = vpop.f32.mrf.mxu2  ;;  %v3611_v27 = vpop.f32.mrf.mxu1 }
 0x9ac   : > { %v3467_v17 = vadd.f32 %v9569_v55, %v3466_v16 }
 0x9ae   : > { %v3805_v46 = vpop.f32.mrf.mxu3 }
 0x9b3   : > { %v3469_v31 = vpop.f32.mrf.mxu2  ;;  %v3614_v9 = vpop.f32.mrf.mxu1 }
 0x9b4   : > { %v3470_v50 = vadd.f32 %v9569_v55, %v3469_v31  ;;  %v3461_v31 = vadd.f32 %v9569_v55, %v3460_v38  ;;  %v3449_v38 = vadd.f32 %v9569_v55, %v9754_v39 }
 0x9b6   : > { %v3808_v36 = vpop.f32.mrf.mxu3 }
 0x9bb   : > { %v3472_v33 = vpop.f32.mrf.mxu2  ;;  %v3617_v22 = vpop.f32.mrf.mxu1 }
 0x9bc   : > { %v3473_v57 = vadd.f32 %v9569_v55, %v3472_v33 }
 0x9be   : > { %v3811_v53 = vpop.f32.mrf.mxu3 }
 0x9bf   : > { %v3812_v33 = vadd.f32 %v3811_v53, %v3602_v18 }
 0x9c6   : > { %v3814_v28 = vpop.f32.mrf.mxu3 }
 0x9c7   : > { %v3815_v35 = vadd.f32 %v3814_v28, %v3605_v21  ;;  %v3803_v28 = vadd.f32 %v3802_v3, %v3593_v56  ;;  %v3446_v56 = vadd.f32 %v9569_v55, %v9743_v58 }
 0x9c9   : > { %v9804_v3 = vadd.f32 %v3803_v28, %v3449_v38  ;;  %v6911_v28 = vld [vmem:[%s11286_s6 + $0xf8] sm:$0xff]  ;;  %v6801_v38 = vld [vmem:[%s11285_s5 + $0xf0] sm:$0xff] }
 0x9ca   : > { %4626 = vmatpush.msrb.mxu3 %v6911_v28 }
 0x9ce   : > { %v3817_v48 = vpop.f32.mrf.mxu3 }
 0x9cf   : > { %v3818_v43 = vadd.f32 %v3817_v48, %v3608_v6  ;;  %v3458_v48 = vadd.f32 %v9569_v55, %v3457_v62  ;;  %v3452_v6 = vadd.f32 %v9569_v55, %v3451_v32  ;;  %v3797_v32 = vadd.f32 %v9756_v49, %v9731_v1  ;;  %v11543_v62 = vld [vmem:[#allocation17_spill] sm:$0xff] }
 0x9d0   : > { %v3440_v1 = vadd.f32 %v9569_v55, %v9707_v5  ;;  %v3791_v49 = vadd.f32 %v9739_v41, %v9678_v14  ;;  %v3434_v14 = vadd.f32 %v9569_v55, %v9658_v12  ;;  %v3785_v41 = vadd.f32 %v9713_v24, %v9654_v40 }
 0x9d1   : > { %v3428_v40 = vadd.f32 %v9569_v55, %v9646_v8  ;;  %v7257_v8 = vld [vmem:[%s11466_s1 + $0x8] sm:$0xff] }
 0x9d6   : > { %v3820_v61 = vpop.f32.mrf.mxu3 }
 0x9d7   : > { %v3821_v23 = vadd.f32 %v3820_v61, %v3611_v27  ;;  %v9774_v61 = vadd.f32 %v3818_v43, %v3464_v59  ;;  %v11537_v27 = vld [vmem:[#allocation8_spill] sm:$0xff]  ;;  %v11539_v59 = vld [vmem:[#allocation7_spill] sm:$0xff] }
 0x9d9   : > { %v9766_v26 = vadd.f32 %v3821_v23, %v3467_v17  ;;  %v3455_v23 = vadd.f32 %v9569_v55, %v3454_v37  ;;  %v9784_v17 = vadd.f32 %v3812_v33, %v3458_v48  ;;  %v3889_v43 = vmul.f32 %v9774_v61, %v11539_v59 }
 0x9de   : > { %v3823_v15 = vpop.f32.mrf.mxu3 }
 0x9df   : > { %v3824_v52 = vadd.f32 %v3823_v15, %v3614_v9  ;;  %v11536_v15 = vld [vmem:[#allocation5_spill] sm:$0xff] }
 0x9e1   : > { %v9761_v45 = vadd.f32 %v3824_v52, %v3470_v50  ;;  %v9779_v52 = vadd.f32 %v3815_v35, %v3461_v31  ;;  %v11538_v50 = vld [vmem:[#allocation6_spill] sm:$0xff]  ;;  %v11540_v35 = vld [vmem:[#allocation11_spill] sm:$0xff] }
 0x9e3   : > { %v3891_v16 = vmul.f32 %v9761_v45, %v11537_v27  ;;  %v3888_v21 = vmul.f32 %v9779_v52, %v11540_v35 }
 0x9e6   : > { %v3826_v4 = vpop.f32.mrf.mxu3 }
 0x9e7   : > { %v3827_v7 = vadd.f32 %v3826_v4, %v3617_v22  ;;  %v6802_v22 = vld [vmem:[%s11285_s5 + $0xf8] sm:$0xff]  ;;  %v3809_v4 = vadd.f32 %v3808_v36, %v3599_v11  ;;  %v3800_v36 = vadd.f32 %v3799_v20, %v9747_v10  ;;  %v11542_v11 = vld [vmem:[#allocation15_spill] sm:$0xff]  ;;  %v3443_v10 = vadd.f32 %v9569_v55, %v9727_v63 }
 0x9e8   : > { %3992 = vmatpush.msra.mxu0 %v6802_v22  ;;  %v3794_v20 = vadd.f32 %v9752_v60, %v9715_v47  ;;  %v3437_v47 = vadd.f32 %v9569_v55, %v9672_v25  ;;  %v3788_v60 = vadd.f32 %v9725_v54, %v9660_v30  ;;  %v11545_v22 = vld [vmem:[#allocation22_spill] sm:$0xff]  ;;  %v3431_v30 = vadd.f32 %v9569_v55, %v9652_v44  ;;  %v11549_v44 = vld [vmem:[#allocation37_spill] sm:$0xff] }
 0x9e9   : > { %v9763_v13 = vadd.f32 %v3827_v7, %v3473_v57  ;;  %v3890_v57 = vmul.f32 %v9766_v26, %v11538_v50  ;;  %v3806_v7 = vadd.f32 %v3805_v46, %v3596_v51  ;;  %v9789_v2 = vadd.f32 %v3809_v4, %v3455_v23  ;;  %v11541_v51 = vld [vmem:[#allocation13_spill] sm:$0xff]  ;;  %v11547_v4 = vld [vmem:[#allocation27_spill] sm:$0xff] }
 0x9ea   : > { %v3887_v37 = vmul.f32 %v9784_v17, %v11541_v51  ;;  %v9812_v46 = vadd.f32 %v3800_v36, %v3446_v56  ;;  %v9820_v53 = vadd.f32 %v3797_v32, %v3443_v10  ;;  %v9828_v31 = vadd.f32 %v3794_v20, %v3440_v1  ;;  %v6909_v36 = vld [vmem:[%s11286_s6 + $0xe8] sm:$0xff]  ;;  %3993 = vmatpush.msra.mxu0 %v6801_v38  ;;  %v6908_v56 = vld [vmem:[%s11286_s6 + $0xe0] sm:$0xff]  ;;  %v6797_v10 = vld [vmem:[%s11285_s5 + $0xd0] sm:$0xff] }
 0x9eb   : > { %v3892_v9 = vmul.f32 %v9763_v13, %v11536_v15  ;;  %v9796_v18 = vadd.f32 %v3806_v7, %v3452_v6  ;;  %v3886_v39 = vmul.f32 %v9789_v2, %v11542_v11  ;;  %v9836_v33 = vadd.f32 %v3791_v49, %v3437_v47  ;;  %v11551_v6 = vld [vmem:[#allocation43_spill] sm:$0xff]  ;;  %v6796_v20 = vld [vmem:[%s11285_s5 + $0xc8] sm:$0xff] }
 0x9ec   : > { %v3883_v5 = vmul.f32 %v9812_v46, %v11545_v22  ;;  %v3782_v54 = vadd.f32 %v9685_v42, %v9648_v34  ;;  %v9844_v48 = vadd.f32 %v3788_v60, %v3434_v14  ;;  %v3881_v12 = vmul.f32 %v9828_v31, %v11547_v4  ;;  %v11550_v42 = vld [vmem:[#allocation41_spill] sm:$0xff]  ;;  %v6799_v32 = vld [vmem:[%s11285_s5 + $0xe0] sm:$0xff] }
 0x9ed   : > { %3913 = vmatpush.msra.mxu2 %v3892_v9  ;;  %v3885_v58 = vmul.f32 %v9796_v18, %v11543_v62  ;;  %v11544_v9 = vld [vmem:[#allocation19_spill] sm:$0xff]  ;;  %v9850_v24 = vadd.f32 %v3785_v41, %v3431_v30  ;;  %v3935_v60 = vmax.f32 %v9578_v0, 0.0  ;;  %v3937_v14 = vmax.f32 %v9596_v19, 0.0  ;;  %v11552_v41 = vld [vmem:[#allocation29_spill] sm:$0xff] }
 0x9ee   : > { %v3884_v63 = vmul.f32 %v9804_v3, %v11544_v9  ;;  %v9854_v7 = vadd.f32 %v3782_v54, %v3428_v40  ;;  %v3879_v34 = vmul.f32 %v9844_v48, %v11549_v44  ;;  %v11553_v30 = vld [vmem:[#allocation25_spill] sm:$0xff] }
 0x9ef   : > { %3914 = vmatpush.msra.mxu2 %v3891_v16  ;;  %v11546_v16 = vld [vmem:[#allocation24_spill] sm:$0xff]  ;;  %v3939_v54 = vmax.f32 %v11553_v30, 0.0 }
 0x9f0   : > { %v3882_v25 = vmul.f32 %v9820_v53, %v11546_v16  ;;  %v3877_v55 = vmul.f32 %v9854_v7, %v11551_v6 }
 0x9f1   : > { %3915 = vmatpush.msra.mxu2 %v3890_v57  ;;  %v11548_v57 = vld [vmem:[#allocation30_spill] sm:$0xff] }
 0x9f2   : > { %v3880_v23 = vmul.f32 %v9836_v33, %v11548_v57 }
 0x9f3   : > { %3916 = vmatpush.msra.mxu2 %v3889_v43  ;;  %v3878_v43 = vmul.f32 %v9850_v24, %v11550_v42 }
 0x9f5   : > { %3917 = vmatpush.msra.mxu2 %v3888_v21  ;;  %v6910_v21 = vld [vmem:[%s11286_s6 + $0xf0] sm:$0xff] }
 0x9f6   : > { %4627 = vmatpush.msrb.mxu3 %v6910_v21  ;;  %v11558_v21 = vld [vmem:[#allocation50_spill] sm:$0xff] }
 0x9f7   : > { %3918 = vmatpush.msra.mxu2 %v3887_v37  ;;  %v6800_v37 = vld [vmem:[%s11285_s5 + $0xe8] sm:$0xff]  ;;  %v3944_v38 = vmax.f32 %v11558_v21, 0.0 }
 0x9f8   : > { %4628 = vmatpush.msrb.mxu3 %v6909_v36  ;;  %3994 = vmatpush.msra.mxu0 %v6800_v37  ;;  %v11559_v36 = vld [vmem:[#allocation51_spill] sm:$0xff] }
 0x9f9   : > { %3919 = vmatpush.msra.mxu2 %v3886_v39  ;;  %v6798_v39 = vld [vmem:[%s11285_s5 + $0xd8] sm:$0xff]  ;;  %v3945_v37 = vmax.f32 %v11559_v36, 0.0 }
 0x9fa   : > { %4629 = vmatpush.msrb.mxu3 %v6908_v56  ;;  %3995 = vmatpush.msra.mxu0 %v6799_v32  ;;  %v11560_v56 = vld [vmem:[#allocation32_spill] sm:$0xff] }
 0x9fb   : > { %3920 = vmatpush.msra.mxu2 %v3885_v58  ;;  %v6795_v58 = vld [vmem:[%s11285_s5 + $0xc0] sm:$0xff]  ;;  %v3946_v32 = vmax.f32 %v11560_v56, 0.0 }
 0x9fc   : > { %4221 = vmatpush.msrb.mxu0 %v6798_v39  ;;  %v11561_v39 = vld [vmem:[#allocation31_spill] sm:$0xff] }
 0x9fd   : > { %3921 = vmatpush.msra.mxu2 %v3884_v63 }
 0x9fe   : > { %4222 = vmatpush.msrb.mxu0 %v6797_v10  ;;  %v3947_v10 = vmax.f32 %v11561_v39, 0.0 }
 0x9ff   : > { %3922 = vmatpush.msra.mxu2 %v3883_v5  ;;  %v3936_v5 = vmax.f32 %v9586_v29, 0.0 }
 0xa00   : > { %4223 = vmatpush.msrb.mxu0 %v6796_v20  ;;  %v11562_v20 = vld [vmem:[#allocation33_spill] sm:$0xff] }
 0xa01   : > { %3923 = vmatpush.msra.mxu2 %v3882_v25  ;;  %v3938_v25 = vmax.f32 %v11552_v41, 0.0 }
 0xa02   : > { %4224 = vmatpush.msrb.mxu0 %v6795_v58  ;;  %v3948_v58 = vmax.f32 %v11562_v20, 0.0 }
 0xa03   : > { %3924 = vmatpush.msra.mxu2 %v3881_v12  ;;  %v11554_v12 = vld [vmem:[#allocation21_spill] sm:$0xff] }
 0xa04   : > { %v3940_v40 = vmax.f32 %v11554_v12, 0.0 }
 0xa05   : > { %3925 = vmatpush.msra.mxu2 %v3880_v23  ;;  %v11555_v23 = vld [vmem:[#allocation40_spill] sm:$0xff] }
 0xa07   : > { %3926 = vmatpush.msra.mxu2 %v3879_v34  ;;  %v3941_v34 = vmax.f32 %v11555_v23, 0.0 }
 0xa09   : > { %3927 = vmatpush.msra.mxu2 %v3878_v43  ;;  %v3910_v1 = vpop.f32.mrf.mxu0  ;;  %v11556_v43 = vld [vmem:[#allocation38_spill] sm:$0xff] }
 0xa0b   : > { %3928 = vmatpush.msra.mxu2 %v3877_v55  ;;  %v3942_v55 = vmax.f32 %v11556_v43, 0.0 }
 0xa0c   : > { %3929 = vmatmul.f32.vlgmr.msra.gmra.mxu2 %v7257_v8  ;;  %v11557_v8 = vld [vmem:[#allocation49_spill] sm:$0xff] }
 0xa0d   : > { %v3943_v28 = vmax.f32 %v11557_v8, 0.0 }
 0xa8f   : > { %v3930_v49 = vpop.f32.mrf.mxu2 }
 0xa90   : > { %v3931_v63 = vadd.f32 %v3930_v49, %v3910_v1  ;;  %v11563_v1 = vld [vmem:[#allocation36_spill] sm:$0xff] }
 0xa91   : > { %v3949_v49 = vmax.f32 %v11563_v1, 0.0 }
 0xa92   : > { %v3972_v47 = vmax.f32 %v3931_v63, 0.0  ;;  %6912 = vmatmul.msk.f32.vlgmr.msrb.gmra.mxu3 %vm956_vm2, %v3931_v63 }
 0xa94   : > { %6803 = vmatmul.msk.f32.vlgmr.msra.gmra.mxu0 %vm956_vm2, %v3972_v47  ;;  %v11564_v47 = vld [vmem:[#allocation34_spill] sm:$0xff] }
 0xa9c   : > { %6836 = vmatmul.msk.f32.vlgmr.msrb.gmra.mxu0 %vm956_vm2, %v3935_v60  ;;  %v3950_v60 = vmax.f32 %v11564_v47, 0.0 }
 0xaa4   : > { %6837 = vmatmul.msk.f32.gmra.mxu0 %vm956_vm2, %v3936_v5  ;;  %v7258_v5 = vld [vmem:[%s11478_s2] sm:$0xff] }
 0xaac   : > { %6838 = vmatmul.msk.f32.gmra.mxu0 %vm956_vm2, %v3937_v14 }
 0xab4   : > { %6839 = vmatmul.msk.f32.gmra.mxu0 %vm956_vm2, %v3938_v25  ;;  %v3951_v25 = vmax.f32 %v9854_v7, 0.0 }
 0xabc   : > { %6840 = vmatmul.msk.f32.gmra.mxu0 %vm956_vm2, %v3939_v54  ;;  %v7259_v54 = vld [vmem:[%s11478_s2 + $0x8] sm:$0xff] }
 0xac4   : > { %6841 = vmatmul.msk.f32.gmra.mxu0 %vm956_vm2, %v3940_v40  ;;  %v3952_v40 = vmax.f32 %v9850_v24, 0.0 }
 0xacc   : > { %6842 = vmatmul.msk.f32.gmra.mxu0 %vm956_vm2, %v3941_v34  ;;  %v7260_v34 = vld [vmem:[%s11478_s2 + $0x10] sm:$0xff] }
 0xad4   : > { %6843 = vmatmul.msk.f32.gmra.mxu0 %vm956_vm2, %v3942_v55  ;;  %v3953_v55 = vmax.f32 %v9844_v48, 0.0 }
 0xadc   : > { %6844 = vmatmul.msk.f32.gmra.mxu0 %vm956_vm2, %v3943_v28  ;;  %v7261_v28 = vld [vmem:[%s11478_s2 + $0x18] sm:$0xff] }
 0xae4   : > { %6845 = vmatmul.msk.f32.gmra.mxu0 %vm956_vm2, %v3944_v38  ;;  %v3954_v38 = vmax.f32 %v9836_v33, 0.0 }
 0xaec   : > { %6846 = vmatmul.msk.f32.gmra.mxu0 %vm956_vm2, %v3945_v37  ;;  %v7262_v37 = vld [vmem:[%s11478_s2 + $0x20] sm:$0xff] }
 0xaf4   : > { %6847 = vmatmul.msk.f32.gmra.mxu0 %vm956_vm2, %v3946_v32  ;;  %v3955_v32 = vmax.f32 %v9828_v31, 0.0 }
 0xafc   : > { %6848 = vmatmul.msk.f32.gmra.mxu0 %vm956_vm2, %v3947_v10  ;;  %v7263_v10 = vld [vmem:[%s11478_s2 + $0x28] sm:$0xff] }
 0xb04   : > { %6849 = vmatmul.msk.f32.gmra.mxu0 %vm956_vm2, %v3948_v58  ;;  %v3956_v58 = vmax.f32 %v9820_v53, 0.0 }
 0xb0c   : > { %6850 = vmatmul.msk.f32.gmra.mxu0 %vm956_vm2, %v3949_v49  ;;  %v7264_v49 = vld [vmem:[%s11478_s2 + $0x30] sm:$0xff] }
 0xb11   : > { %v3997_v63 = vpop.f32.mrf.mxu0 }
 0xb12   : > { %4015 = vmatpush.msrb.mxu2 %v3997_v63  ;;  %v3957_v63 = vmax.f32 %v9812_v46, 0.0 }
 0xb13   : > { %6804 = vmatmul.msk.f32.vlgmr.msrb.gmra.mxu2 %vm456_vm0, %v7258_v5 }
 0xb14   : > { %6851 = vmatmul.msk.f32.gmra.mxu0 %vm956_vm2, %v3950_v60  ;;  %v7265_v60 = vld [vmem:[%s11478_s2 + $0x38] sm:$0xff] }
 0xb15   : > { %v4631_v14 = vpop.f32.mrf.mxu3 }
 0xb16   : > { %4649 = vmatpush.msra.mxu3 %v4631_v14  ;;  %v3958_v14 = vmax.f32 %v9804_v3, 0.0 }
 0xb17   : > { %6913 = vmatmul.msk.f32.vlgmr.msra.gmra.mxu3 %vm456_vm0, %v7258_v5 }
 0xb19   : > { %v9985_v5 = vpop.f32.mrf.mxu0 }
 0xb1b   : > { %6805 = vmatmul.msk.f32.gmra.mxu2 %vm456_vm0, %v7259_v54 }
 0xb1c   : > { %6852 = vmatmul.msk.f32.gmra.mxu0 %vm956_vm2, %v3951_v25  ;;  %v7266_v25 = vld [vmem:[%s11478_s2 + $0x40] sm:$0xff] }
 0xb1f   : > { %6914 = vmatmul.msk.f32.gmra.mxu3 %vm456_vm0, %v7259_v54 }
 0xb21   : > { %v9995_v54 = vpop.f32.mrf.mxu0 }
 0xb23   : > { %6806 = vmatmul.msk.f32.gmra.mxu2 %vm456_vm0, %v7260_v34 }
 0xb24   : > { %6853 = vmatmul.msk.f32.gmra.mxu0 %vm956_vm2, %v3952_v40  ;;  %v3959_v40 = vmax.f32 %v9796_v18, 0.0 }
 0xb27   : > { %6915 = vmatmul.msk.f32.gmra.mxu3 %vm456_vm0, %v7260_v34  ;;  %v7267_v34 = vld [vmem:[%s11478_s2 + $0x48] sm:$0xff] }
 0xb2b   : > { %6807 = vmatmul.msk.f32.gmra.mxu2 %vm456_vm0, %v7261_v28 }
 0xb2c   : > { %6854 = vmatmul.msk.f32.gmra.mxu0 %vm956_vm2, %v3953_v55  ;;  %v10004_v55 = vpop.f32.mrf.mxu0 }
 0xb2f   : > { %6916 = vmatmul.msk.f32.gmra.mxu3 %vm456_vm0, %v7261_v28  ;;  %v3960_v28 = vmax.f32 %v9789_v2, 0.0 }
 0xb33   : > { %6808 = vmatmul.msk.f32.gmra.mxu2 %vm456_vm0, %v7262_v37 }
 0xb34   : > { %6855 = vmatmul.msk.f32.gmra.mxu0 %vm956_vm2, %v3954_v38  ;;  %v7268_v38 = vld [vmem:[%s11478_s2 + $0x50] sm:$0xff] }
 0xb37   : > { %6917 = vmatmul.msk.f32.gmra.mxu3 %vm456_vm0, %v7262_v37  ;;  %v3961_v37 = vmax.f32 %v9784_v17, 0.0 }
 0xb3b   : > { %6809 = vmatmul.msk.f32.gmra.mxu2 %vm456_vm0, %v7263_v10 }
 0xb3c   : > { %6856 = vmatmul.msk.f32.gmra.mxu0 %vm956_vm2, %v3955_v32  ;;  %v7269_v32 = vld [vmem:[%s11478_s2 + $0x58] sm:$0xff] }
 0xb3f   : > { %6918 = vmatmul.msk.f32.gmra.mxu3 %vm456_vm0, %v7263_v10  ;;  %v10018_v10 = vpop.f32.mrf.mxu0 }
 0xb43   : > { %6810 = vmatmul.msk.f32.gmra.mxu2 %vm456_vm0, %v7264_v49 }
 0xb44   : > { %6857 = vmatmul.msk.f32.gmra.mxu0 %vm956_vm2, %v3956_v58  ;;  %v3962_v58 = vmax.f32 %v9779_v52, 0.0 }
 0xb47   : > { %6919 = vmatmul.msk.f32.gmra.mxu3 %vm456_vm0, %v7264_v49  ;;  %v7270_v49 = vld [vmem:[%s11478_s2 + $0x60] sm:$0xff] }
 0xb4b   : > { %6811 = vmatmul.msk.f32.gmra.mxu2 %vm456_vm0, %v7265_v60 }
 0xb4c   : > { %6858 = vmatmul.msk.f32.gmra.mxu0 %vm956_vm2, %v3957_v63  ;;  %v6871_v63 = vld [vmem:[%s11287_s7 + $0x78] sm:$0xff] }
 0xb4d   : > { %4501 = vmatpush.msra.mxu1 %v6871_v63  ;;  %v7273_v63 = vld [vmem:[%s11478_s2 + $0x78] sm:$0xff] }
 0xb4f   : > { %6920 = vmatmul.msk.f32.gmra.mxu3 %vm456_vm0, %v7265_v60  ;;  %v10031_v60 = vpop.f32.mrf.mxu0 }
 0xb53   : > { %6812 = vmatmul.msk.f32.gmra.mxu2 %vm456_vm0, %v7266_v25 }
 0xb54   : > { %6859 = vmatmul.msk.f32.gmra.mxu0 %vm956_vm2, %v3958_v14  ;;  %v6870_v14 = vld [vmem:[%s11287_s7 + $0x70] sm:$0xff] }
 0xb55   : > { %4502 = vmatpush.msra.mxu1 %v6870_v14  ;;  %v3966_v14 = vmax.f32 %v9763_v13, 0.0 }
 0xb57   : > { %6921 = vmatmul.msk.f32.gmra.mxu3 %vm456_vm0, %v7266_v25  ;;  %v6869_v25 = vld [vmem:[%s11287_s7 + $0x68] sm:$0xff] }
 0xb58   : > { %4503 = vmatpush.msra.mxu1 %v6869_v25  ;;  %v7274_v25 = vld [vmem:[%s11478_s2 + $0x80] sm:$0xff] }
 0xb5b   : > { %6813 = vmatmul.msk.f32.gmra.mxu2 %vm456_vm0, %v7267_v34 }
 0xb5c   : > { %6860 = vmatmul.msk.f32.gmra.mxu0 %vm956_vm2, %v3959_v40  ;;  %v3963_v40 = vmax.f32 %v9774_v61, 0.0 }
 0xb5f   : > { %6922 = vmatmul.msk.f32.gmra.mxu3 %vm456_vm0, %v7267_v34  ;;  %v7271_v34 = vld [vmem:[%s11478_s2 + $0x68] sm:$0xff] }
 0xb63   : > { %6814 = vmatmul.msk.f32.gmra.mxu2 %vm456_vm0, %v7268_v38 }
 0xb64   : > { %6861 = vmatmul.msk.f32.gmra.mxu0 %vm956_vm2, %v3960_v28  ;;  %v6868_v28 = vld [vmem:[%s11287_s7 + $0x60] sm:$0xff] }
 0xb65   : > { %4504 = vmatpush.msra.mxu1 %v6868_v28 }
 0xb67   : > { %6923 = vmatmul.msk.f32.gmra.mxu3 %vm456_vm0, %v7268_v38  ;;  %v4241_v38 = vpop.f32.mrf.mxu0 }
 0xb6b   : > { %6815 = vmatmul.msk.f32.gmra.mxu2 %vm456_vm0, %v7269_v32 }
 0xb6c   : > { %6862 = vmatmul.msk.f32.gmra.mxu0 %vm956_vm2, %v3961_v37  ;;  %v3964_v37 = vmax.f32 %v9766_v26, 0.0 }
 0xb6f   : > { %6924 = vmatmul.msk.f32.gmra.mxu3 %vm456_vm0, %v7269_v32  ;;  %v7272_v32 = vld [vmem:[%s11478_s2 + $0x70] sm:$0xff] }
 0xb73   : > { %6816 = vmatmul.msk.f32.gmra.mxu2 %vm456_vm0, %v7270_v49 }
 0xb74   : > { %6863 = vmatmul.msk.f32.gmra.mxu0 %vm956_vm2, %v3962_v58  ;;  %v10057_v58 = vpop.f32.mrf.mxu0 }
 0xb77   : > { %6925 = vmatmul.msk.f32.gmra.mxu3 %vm456_vm0, %v7270_v49  ;;  %v3965_v49 = vmax.f32 %v9761_v45, 0.0 }
 0xb7b   : > { %6817 = vmatmul.msk.f32.gmra.mxu2 %vm456_vm0, %v7271_v34 }
 0xb7c   : > { %6864 = vmatmul.msk.f32.gmra.mxu0 %vm956_vm2, %v3963_v40  ;;  %v10071_v40 = vpop.f32.mrf.mxu0 }
 0xb7f   : > { %6926 = vmatmul.msk.f32.gmra.mxu3 %vm456_vm0, %v7271_v34  ;;  %v10077_v34 = vld [vmem:[%s11288_s8 + $0x6] ss:$0 sm:$0xff] }
 0xb83   : > { %6818 = vmatmul.msk.f32.gmra.mxu2 %vm456_vm0, %v7272_v32 }
 0xb84   : > { %6865 = vmatmul.msk.f32.gmra.mxu0 %vm956_vm2, %v3964_v37 }
 0xb87   : > { %6927 = vmatmul.msk.f32.gmra.mxu3 %vm456_vm0, %v7272_v32 }
 0xb8b   : > { %6819 = vmatmul.msk.f32.gmra.mxu2 %vm456_vm0, %v7273_v63 }
 0xb8c   : > { %6866 = vmatmul.msk.f32.gmra.mxu0 %vm956_vm2, %v3965_v49 }
 0xb8f   : > { %6928 = vmatmul.msk.f32.gmra.mxu3 %vm456_vm0, %v7273_v63  ;;  %v7275_v63 = vld [vmem:[%s11478_s2 + $0x88] sm:$0xff] }
 0xb93   : > { %6820 = vmatmul.msk.f32.gmra.mxu2 %vm456_vm0, %v7274_v25 }
 0xb94   : > { %6867 = vmatmul.msk.f32.gmra.mxu0 %vm956_vm2, %v3966_v14 }
 0xb96   : > { %v4017_v28 = vpop.f32.mrf.mxu2 }
 0xb97   : > { %v4227_v37 = vadd.f32 %v9985_v5, %v4017_v28  ;;  %6929 = vmatmul.msk.f32.gmra.mxu3 %vm456_vm0, %v7274_v25  ;;  %v7276_v25 = vld [vmem:[%s11478_s2 + $0x90] sm:$0xff] }
 0xb99   : > { %v4323_v32 = vadd.f32 %v10077_v34, %v4227_v37 }
 0xb9b   : > { %v4355_v49 = vmax.f32 %v4323_v32, 0.0  ;;  %6821 = vmatmul.msk.f32.gmra.mxu2 %vm456_vm0, %v7275_v63 }
 0xb9d   : > { %6872 = vmatmul.msk.f32.vlgmr.msra.gmra.mxu1 %vm956_vm2, %v4355_v49  ;;  %v4250_v49 = vpop.f32.mrf.mxu0 }
 0xb9e   : > { %v4020_v14 = vpop.f32.mrf.mxu2 }
 0xb9f   : > { %v4230_v6 = vadd.f32 %v9995_v54, %v4020_v14  ;;  %6930 = vmatmul.msk.f32.gmra.mxu3 %vm456_vm0, %v7275_v63 }
 0xba1   : > { %v4324_v5 = vadd.f32 %v10077_v34, %v4230_v6  ;;  %v7277_v6 = vld [vmem:[%s11478_s2 + $0x98] sm:$0xff] }
 0xba3   : > { %v4356_v28 = vmax.f32 %v4324_v5, 0.0  ;;  %6822 = vmatmul.msk.f32.gmra.mxu2 %vm456_vm0, %v7276_v25 }
 0xba5   : > { %6873 = vmatmul.msk.f32.gmra.mxu1 %vm956_vm2, %v4356_v28  ;;  %v4253_v28 = vpop.f32.mrf.mxu0 }
 0xba6   : > { %v4023_v37 = vpop.f32.mrf.mxu2 }
 0xba7   : > { %v4233_v32 = vadd.f32 %v10004_v55, %v4023_v37  ;;  %6931 = vmatmul.msk.f32.gmra.mxu3 %vm456_vm0, %v7276_v25  ;;  %v7278_v37 = vld [vmem:[%s11478_s2 + $0xa0] sm:$0xff] }
 0xba9   : > { %v4325_v54 = vadd.f32 %v10077_v34, %v4233_v32 }
 0xbab   : > { %v4357_v63 = vmax.f32 %v4325_v54, 0.0  ;;  %6823 = vmatmul.msk.f32.gmra.mxu2 %vm456_vm0, %v7277_v6 }
 0xbad   : > { %6874 = vmatmul.msk.f32.gmra.mxu1 %vm956_vm2, %v4357_v63 }
 0xbae   : > { %v4026_v14 = vpop.f32.mrf.mxu2 }
 0xbaf   : > { %v4236_v5 = vadd.f32 %v10018_v10, %v4026_v14  ;;  %6932 = vmatmul.msk.f32.gmra.mxu3 %vm456_vm0, %v7277_v6  ;;  %v7279_v6 = vld [vmem:[%s11478_s2 + $0xa8] sm:$0xff]  ;;  %v4256_v14 = vpop.f32.mrf.mxu0 }
 0xbb1   : > { %v4326_v55 = vadd.f32 %v10077_v34, %v4236_v5 }
 0xbb3   : > { %v4358_v25 = vmax.f32 %v4326_v55, 0.0  ;;  %6824 = vmatmul.msk.f32.gmra.mxu2 %vm456_vm0, %v7278_v37 }
 0xbb5   : > { %6875 = vmatmul.msk.f32.gmra.mxu1 %vm956_vm2, %v4358_v25 }
 0xbb6   : > { %v4029_v32 = vpop.f32.mrf.mxu2 }
 0xbb7   : > { %v4239_v54 = vadd.f32 %v10031_v60, %v4029_v32  ;;  %6933 = vmatmul.msk.f32.gmra.mxu3 %vm456_vm0, %v7278_v37  ;;  %v7280_v37 = vld [vmem:[%s11478_s2 + $0xb0] sm:$0xff]  ;;  %v4259_v32 = vpop.f32.mrf.mxu0 }
 0xbb9   : > { %v4327_v10 = vadd.f32 %v10077_v34, %v4239_v54 }
 0xbbb   : > { %v4359_v63 = vmax.f32 %v4327_v10, 0.0  ;;  %6825 = vmatmul.msk.f32.gmra.mxu2 %vm456_vm0, %v7279_v6 }
 0xbbd   : > { %6876 = vmatmul.msk.f32.gmra.mxu1 %vm956_vm2, %v4359_v63 }
 0xbbe   : > { %v4032_v5 = vpop.f32.mrf.mxu2 }
 0xbbf   : > { %v4242_v55 = vadd.f32 %v4241_v38, %v4032_v5  ;;  %6934 = vmatmul.msk.f32.gmra.mxu3 %vm456_vm0, %v7279_v6  ;;  %v7281_v6 = vld [vmem:[%s11478_s2 + $0xb8] sm:$0xff] }
 0xbc1   : > { %v4328_v60 = vadd.f32 %v10077_v34, %v4242_v55 }
 0xbc3   : > { %v4360_v25 = vmax.f32 %v4328_v60, 0.0  ;;  %6826 = vmatmul.msk.f32.gmra.mxu2 %vm456_vm0, %v7280_v37  ;;  %v4262_v60 = vpop.f32.mrf.mxu0 }
 0xbc5   : > { %6877 = vmatmul.msk.f32.gmra.mxu1 %vm956_vm2, %v4360_v25 }
 0xbc6   : > { %v4035_v54 = vpop.f32.mrf.mxu2 }
 0xbc7   : > { %v4245_v10 = vadd.f32 %v10057_v58, %v4035_v54  ;;  %6935 = vmatmul.msk.f32.gmra.mxu3 %vm456_vm0, %v7280_v37  ;;  %v10140_v37 = vld [vmem:[%s11478_s2 + $0xc0] sm:$0xff] }
 0xbc9   : > { %v4329_v38 = vadd.f32 %v10077_v34, %v4245_v10 }
 0xbcb   : > { %v4361_v63 = vmax.f32 %v4329_v38, 0.0  ;;  %6827 = vmatmul.msk.f32.gmra.mxu2 %vm456_vm0, %v7281_v6  ;;  %v4265_v38 = vpop.f32.mrf.mxu0 }
 0xbcd   : > { %6878 = vmatmul.msk.f32.gmra.mxu1 %vm956_vm2, %v4361_v63 }
 0xbce   : > { %v4038_v5 = vpop.f32.mrf.mxu2 }
 0xbcf   : > { %v4248_v55 = vadd.f32 %v10071_v40, %v4038_v5  ;;  %6936 = vmatmul.msk.f32.gmra.mxu3 %vm456_vm0, %v7281_v6  ;;  %v10149_v6 = vld [vmem:[%s11478_s2 + $0xc8] sm:$0xff] }
 0xbd1   : > { %v4330_v58 = vadd.f32 %v10077_v34, %v4248_v55 }
 0xbd3   : > { %v4362_v25 = vmax.f32 %v4330_v58, 0.0  ;;  %6828 = vmatmul.msk.f32.gmra.mxu2 %vm456_vm0, %v10140_v37 }
 0xbd5   : > { %6879 = vmatmul.msk.f32.gmra.mxu1 %vm956_vm2, %v4362_v25 }
 0xbd6   : > { %v4041_v54 = vpop.f32.mrf.mxu2 }
 0xbd7   : > { %v4251_v10 = vadd.f32 %v4250_v49, %v4041_v54  ;;  %v10158_v49 = vld [vmem:[%s11478_s2 + $0xd0] sm:$0xff]  ;;  %v4268_v54 = vpop.f32.mrf.mxu0 }
 0xbd9   : > { %v4331_v40 = vadd.f32 %v10077_v34, %v4251_v10 }
 0xbdb   : > { %v4363_v63 = vmax.f32 %v4331_v40, 0.0  ;;  %6829 = vmatmul.msk.f32.gmra.mxu2 %vm456_vm0, %v10149_v6 }
 0xbdd   : > { %6880 = vmatmul.msk.f32.gmra.mxu1 %vm956_vm2, %v4363_v63 }
 0xbde   : > { %v4044_v5 = vpop.f32.mrf.mxu2 }
 0xbdf   : > { %v4254_v55 = vadd.f32 %v4253_v28, %v4044_v5  ;;  %v10167_v28 = vld [vmem:[%s11478_s2 + $0xd8] sm:$0xff] }
 0xbe0   : > { %v6907_v5 = vld [vmem:[%s11286_s6 + $0xd8] sm:$0xff] }
 0xbe1   : > { %v4332_v58 = vadd.f32 %v10077_v34, %v4254_v55  ;;  %4855 = vmatpush.msra.mxu2 %v6907_v5  ;;  %v4271_v55 = vpop.f32.mrf.mxu0  ;;  %v10188_v5 = vld [vmem:[%s11478_s2 + $0xe0] sm:$0xff] }
 0xbe3   : > { %v4364_v25 = vmax.f32 %v4332_v58, 0.0  ;;  %6830 = vmatmul.msk.f32.gmra.mxu2 %vm456_vm0, %v10158_v49 }
 0xbe5   : > { %6881 = vmatmul.msk.f32.gmra.mxu1 %vm956_vm2, %v4364_v25 }
 0xbe6   : > { %v4047_v10 = vpop.f32.mrf.mxu2 }
 0xbe7   : > { %v4257_v40 = vadd.f32 %v4256_v14, %v4047_v10  ;;  %v6906_v14 = vld [vmem:[%s11286_s6 + $0xd0] sm:$0xff]  ;;  %v6905_v10 = vld [vmem:[%s11286_s6 + $0xc8] sm:$0xff] }
 0xbe8   : > { %4856 = vmatpush.msra.mxu2 %v6906_v14 }
 0xbe9   : > { %v4333_v63 = vadd.f32 %v10077_v34, %v4257_v40 }
 0xbea   : > { %4857 = vmatpush.msra.mxu2 %v6905_v10 }
 0xbeb   : > { %v4365_v42 = vmax.f32 %v4333_v63, 0.0  ;;  %6831 = vmatmul.msk.f32.gmra.mxu2 %vm456_vm0, %v10167_v28  ;;  %v6904_v63 = vld [vmem:[%s11286_s6 + $0xc0] sm:$0xff] }
 0xbec   : > { %4858 = vmatpush.msra.mxu2 %v6904_v63 }
 0xbed   : > { %6882 = vmatmul.msk.f32.gmra.mxu1 %vm956_vm2, %v4365_v42 }
 0xbee   : > { %v4050_v58 = vpop.f32.mrf.mxu2 }
 0xbef   : > { %v4260_v25 = vadd.f32 %v4259_v32, %v4050_v58  ;;  %v4274_v58 = vpop.f32.mrf.mxu0 }
 0xbf1   : > { %v4334_v40 = vadd.f32 %v10077_v34, %v4260_v25 }
 0xbf3   : > { %v4366_v42 = vmax.f32 %v4334_v40, 0.0  ;;  %6832 = vmatmul.msk.f32.gmra.mxu2 %vm456_vm0, %v10188_v5  ;;  %v10197_v40 = vld [vmem:[%s11478_s2 + $0xe8] sm:$0xff] }
 0xbf5   : > { %6883 = vmatmul.msk.f32.gmra.mxu1 %vm956_vm2, %v4366_v42 }
 0xbf6   : > { %v4053_v32 = vpop.f32.mrf.mxu2 }
 0xbf7   : > { %v4263_v14 = vadd.f32 %v4262_v60, %v4053_v32  ;;  %v4277_v57 = vpop.f32.mrf.mxu0  ;;  %v10206_v32 = vld [vmem:[%s11478_s2 + $0xf0] sm:$0xff] }
 0xbf9   : > { %v4335_v25 = vadd.f32 %v10077_v34, %v4263_v14 }
 0xbfb   : > { %v4367_v10 = vmax.f32 %v4335_v25, 0.0  ;;  %6833 = vmatmul.msk.f32.gmra.mxu2 %vm456_vm0, %v10197_v40 }
 0xbfd   : > { %6884 = vmatmul.msk.f32.gmra.mxu1 %vm956_vm2, %v4367_v10 }
 0xbfe   : > { %v4056_v63 = vpop.f32.mrf.mxu2 }
 0xbff   : > { %v4266_v44 = vadd.f32 %v4265_v38, %v4056_v63  ;;  %v4280_v38 = vpop.f32.mrf.mxu0 }
 0xc01   : > { %v4336_v42 = vadd.f32 %v10077_v34, %v4266_v44  ;;  %v10215_v44 = vld [vmem:[%s11478_s2 + $0xf8] sm:$0xff] }
 0xc03   : > { %v4368_v60 = vmax.f32 %v4336_v42, 0.0  ;;  %6834 = vmatmul.msk.f32.gmra.mxu2 %vm456_vm0, %v10206_v32 }
 0xc05   : > { %6885 = vmatmul.msk.f32.gmra.mxu1 %vm956_vm2, %v4368_v60 }
 0xc06   : > { %v4059_v14 = vpop.f32.mrf.mxu2 }
 0xc07   : > { %v4269_v25 = vadd.f32 %v4268_v54, %v4059_v14  ;;  %v4283_v54 = vpop.f32.mrf.mxu0 }
 0xc09   : > { %v4337_v10 = vadd.f32 %v10077_v34, %v4269_v25 }
 0xc0b   : > { %v4369_v4 = vmax.f32 %v4337_v10, 0.0  ;;  %6835 = vmatmul.msk.f32.gmra.mxu2 %vm456_vm0, %v10215_v44 }
 0xc0d   : > { %6886 = vmatmul.msk.f32.gmra.mxu1 %vm956_vm2, %v4369_v4 }
 0xc0e   : > { %v4062_v63 = vpop.f32.mrf.mxu2 }
 0xc0f   : > { %v4272_v42 = vadd.f32 %v4271_v55, %v4062_v63  ;;  %v4286_v63 = vpop.f32.mrf.mxu0 }
 0xc11   : > { %v4338_v60 = vadd.f32 %v10077_v34, %v4272_v42 }
 0xc13   : > { %v4370_v16 = vmax.f32 %v4338_v60, 0.0  ;;  %6945 = vmatmul.msk.f32.vlgmr.msra.gmra.mxu2 %vm956_vm2, %v9578_v0 }
 0xc15   : > { %6887 = vmatmul.msk.f32.gmra.mxu1 %vm956_vm2, %v4370_v16 }
 0xc16   : > { %v4065_v14 = vpop.f32.mrf.mxu2 }
 0xc17   : > { %v4275_v25 = vadd.f32 %v4274_v58, %v4065_v14 }
 0xc19   : > { %v4339_v10 = vadd.f32 %v10077_v34, %v4275_v25 }
 0xc1a   : > { %v10225_v22 = vpop.f32.mrf.mxu1 }
 0xc1b   : > { %v4371_v9 = vmax.f32 %v4339_v10, 0.0  ;;  %6946 = vmatmul.msk.f32.gmra.mxu2 %vm956_vm2, %v9586_v29  ;;  %v4289_v29 = vpop.f32.mrf.mxu0 }
 0xc1d   : > { %6888 = vmatmul.msk.f32.gmra.mxu1 %vm956_vm2, %v4371_v9 }
 0xc1e   : > { %v4068_v4 = vpop.f32.mrf.mxu2 }
 0xc1f   : > { %v4278_v55 = vadd.f32 %v4277_v57, %v4068_v4 }
 0xc21   : > { %v4340_v0 = vadd.f32 %v10077_v34, %v4278_v55 }
 0xc22   : > { %v10231_v42 = vpop.f32.mrf.mxu1 }
 0xc23   : > { %v4372_v16 = vmax.f32 %v4340_v0, 0.0  ;;  %6947 = vmatmul.msk.f32.gmra.mxu2 %vm956_vm2, %v9596_v19 }
 0xc25   : > { %6889 = vmatmul.msk.f32.gmra.mxu1 %vm956_vm2, %v4372_v16 }
 0xc26   : > { %v4071_v58 = vpop.f32.mrf.mxu2 }
 0xc27   : > { %v4281_v60 = vadd.f32 %v4280_v38, %v4071_v58  ;;  %v4292_v38 = vpop.f32.mrf.mxu0 }
 0xc29   : > { %v4341_v14 = vadd.f32 %v10077_v34, %v4281_v60 }
 0xc2a   : > { %v10237_v25 = vpop.f32.mrf.mxu1 }
 0xc2b   : > { %v4373_v9 = vmax.f32 %v4341_v14, 0.0  ;;  %6948 = vmatmul.msk.f32.gmra.mxu2 %vm956_vm2, %v11552_v41 }
 0xc2d   : > { %6890 = vmatmul.msk.f32.gmra.mxu1 %vm956_vm2, %v4373_v9 }
 0xc2e   : > { %v4074_v57 = vpop.f32.mrf.mxu2 }
 0xc2f   : > { %v4284_v10 = vadd.f32 %v4283_v54, %v4074_v57  ;;  %v4295_v54 = vpop.f32.mrf.mxu0 }
 0xc31   : > { %v4342_v4 = vadd.f32 %v10077_v34, %v4284_v10 }
 0xc32   : > { %v10243_v19 = vpop.f32.mrf.mxu1 }
 0xc33   : > { %v4374_v55 = vmax.f32 %v4342_v4, 0.0  ;;  %6949 = vmatmul.msk.f32.gmra.mxu2 %vm956_vm2, %v11553_v30 }
 0xc35   : > { %6891 = vmatmul.msk.f32.gmra.mxu1 %vm956_vm2, %v4374_v55 }
 0xc36   : > { %v4077_v0 = vpop.f32.mrf.mxu2 }
 0xc37   : > { %v4287_v16 = vadd.f32 %v4286_v63, %v4077_v0  ;;  %v4298_v55 = vpop.f32.mrf.mxu0 }
 0xc39   : > { %v4343_v58 = vadd.f32 %v10077_v34, %v4287_v16 }
 0xc3a   : > { %v10249_v41 = vpop.f32.mrf.mxu1 }
 0xc3b   : > { %v4375_v60 = vmax.f32 %v4343_v58, 0.0  ;;  %6950 = vmatmul.msk.f32.gmra.mxu2 %vm956_vm2, %v11554_v12 }
 0xc3d   : > { %6892 = vmatmul.msk.f32.gmra.mxu1 %vm956_vm2, %v4375_v60 }
 0xc3e   : > { %v4080_v14 = vpop.f32.mrf.mxu2 }
 0xc3f   : > { %v4290_v9 = vadd.f32 %v4289_v29, %v4080_v14 }
 0xc41   : > { %v4344_v30 = vadd.f32 %v10077_v34, %v4290_v9 }
 0xc42   : > { %v10255_v57 = vpop.f32.mrf.mxu1 }
 0xc43   : > { %v4376_v10 = vmax.f32 %v4344_v30, 0.0  ;;  %6951 = vmatmul.msk.f32.gmra.mxu2 %vm956_vm2, %v11555_v23  ;;  %v4301_v23 = vpop.f32.mrf.mxu0 }
 0xc45   : > { %6893 = vmatmul.msk.f32.gmra.mxu1 %vm956_vm2, %v4376_v10 }
 0xc46   : > { %v4083_v63 = vpop.f32.mrf.mxu2 }
 0xc47   : > { %v4293_v4 = vadd.f32 %v4292_v38, %v4083_v63 }
 0xc49   : > { %v4345_v12 = vadd.f32 %v10077_v34, %v4293_v4 }
 0xc4a   : > { %v10261_v16 = vpop.f32.mrf.mxu1 }
 0xc4b   : > { %v4377_v0 = vmax.f32 %v4345_v12, 0.0  ;;  %6952 = vmatmul.msk.f32.gmra.mxu2 %vm956_vm2, %v11556_v43 }
 0xc4d   : > { %6894 = vmatmul.msk.f32.gmra.mxu1 %vm956_vm2, %v4377_v0 }
 0xc4e   : > { %v4086_v29 = vpop.f32.mrf.mxu2 }
 0xc4f   : > { %v4296_v58 = vadd.f32 %v4295_v54, %v4086_v29  ;;  %v4304_v54 = vpop.f32.mrf.mxu0 }
 0xc51   : > { %v4346_v60 = vadd.f32 %v10077_v34, %v4296_v58 }
 0xc52   : > { %v10269_v38 = vpop.f32.mrf.mxu1 }
 0xc53   : > { %v4378_v14 = vmax.f32 %v4346_v60, 0.0  ;;  %6953 = vmatmul.msk.f32.gmra.mxu2 %vm956_vm2, %v11557_v8 }
 0xc55   : > { %6895 = vmatmul.msk.f32.gmra.mxu1 %vm956_vm2, %v4378_v14 }
 0xc56   : > { %v4089_v9 = vpop.f32.mrf.mxu2 }
 0xc57   : > { %v4299_v30 = vadd.f32 %v4298_v55, %v4089_v9  ;;  %v4307_v55 = vpop.f32.mrf.mxu0 }
 0xc59   : > { %v4347_v10 = vadd.f32 %v10077_v34, %v4299_v30 }
 0xc5a   : > { %v10276_v4 = vpop.f32.mrf.mxu1 }
 0xc5b   : > { %v4379_v43 = vmax.f32 %v4347_v10, 0.0  ;;  %6954 = vmatmul.msk.f32.gmra.mxu2 %vm956_vm2, %v11558_v21 }
 0xc5d   : > { %6896 = vmatmul.msk.f32.gmra.mxu1 %vm956_vm2, %v4379_v43 }
 0xc5e   : > { %v4092_v63 = vpop.f32.mrf.mxu2 }
 0xc5f   : > { %v4302_v12 = vadd.f32 %v4301_v23, %v4092_v63  ;;  %v4310_v30 = vpop.f32.mrf.mxu0 }
 0xc61   : > { %v4348_v8 = vadd.f32 %v10077_v34, %v4302_v12 }
 0xc62   : > { %v10282_v60 = vpop.f32.mrf.mxu1 }
 0xc63   : > { %v4380_v0 = vmax.f32 %v4348_v8, 0.0  ;;  %6955 = vmatmul.msk.f32.gmra.mxu2 %vm956_vm2, %v11559_v36  ;;  %v6979_v8 = vld [vmem:[%s11285_s5 + $0x110] sm:$0xff] }
 0xc65   : > { %6897 = vmatmul.msk.f32.gmra.mxu1 %vm956_vm2, %v4380_v0  ;;  %v6978_v0 = vld [vmem:[%s11285_s5 + $0x108] sm:$0xff] }
 0xc66   : > { %v4095_v29 = vpop.f32.mrf.mxu2 }
 0xc67   : > { %v4305_v58 = vadd.f32 %v4304_v54, %v4095_v29  ;;  %v4651_v54 = vpop.f32.mrf.mxu3  ;;  %6937 = vmatmul.msk.f32.gmra.mxu3 %vm456_vm0, %v10140_v37  ;;  %v6977_v37 = vld [vmem:[%s11285_s5 + $0x100] sm:$0xff] }
 0xc69   : > { %v4349_v21 = vadd.f32 %v10077_v34, %v4305_v58 }
 0xc6a   : > { %v10289_v10 = vpop.f32.mrf.mxu1 }
 0xc6b   : > { %v4381_v14 = vmax.f32 %v4349_v21, 0.0  ;;  %6956 = vmatmul.msk.f32.gmra.mxu2 %vm956_vm2, %v11560_v56  ;;  %v6980_v56 = vld [vmem:[%s11285_s5 + $0x118] sm:$0xff] }
 0xc6c   : > { %5348 = vmatpush.msrb.mxu1 %v6980_v56 }
 0xc6d   : > { %6898 = vmatmul.msk.f32.gmra.mxu1 %vm956_vm2, %v4381_v14 }
 0xc6e   : > { %v4098_v23 = vpop.f32.mrf.mxu2  ;;  %5349 = vmatpush.msrb.mxu1 %v6979_v8 }
 0xc6f   : > { %v4308_v9 = vadd.f32 %v4307_v55, %v4098_v23  ;;  %v4313_v55 = vpop.f32.mrf.mxu0  ;;  %v4654_v21 = vpop.f32.mrf.mxu3  ;;  %6938 = vmatmul.msk.f32.gmra.mxu3 %vm456_vm0, %v10149_v6 }
 0xc70   : > { %5350 = vmatpush.msrb.mxu1 %v6978_v0 }
 0xc71   : > { %v4350_v36 = vadd.f32 %v10077_v34, %v4308_v9 }
 0xc72   : > { %5351 = vmatpush.msrb.mxu1 %v6977_v37  ;;  %v10311_v58 = vpop.f32.mrf.mxu1 }
 0xc73   : > { %v4382_v43 = vmax.f32 %v4350_v36, 0.0  ;;  %6957 = vmatmul.msk.f32.gmra.mxu2 %vm956_vm2, %v11561_v39 }
 0xc75   : > { %6899 = vmatmul.msk.f32.gmra.mxu1 %vm956_vm2, %v4382_v43 }
 0xc76   : > { %v4101_v63 = vpop.f32.mrf.mxu2 }
 0xc77   : > { %v4311_v12 = vadd.f32 %v4310_v30, %v4101_v63  ;;  %v4657_v36 = vpop.f32.mrf.mxu3  ;;  %6939 = vmatmul.msk.f32.gmra.mxu3 %vm456_vm0, %v10158_v49 }
 0xc79   : > { %v4351_v39 = vadd.f32 %v10077_v34, %v4311_v12 }
 0xc7a   : > { %v10322_v56 = vpop.f32.mrf.mxu1 }
 0xc7b   : > { %v4383_v29 = vmax.f32 %v4351_v39, 0.0  ;;  %6958 = vmatmul.msk.f32.gmra.mxu2 %vm956_vm2, %v11562_v20  ;;  %v4316_v20 = vpop.f32.mrf.mxu0 }
 0xc7d   : > { %6900 = vmatmul.msk.f32.gmra.mxu1 %vm956_vm2, %v4383_v29  ;;  %v10336_v29 = vld [vmem:[%s11288_s8 + $0x7] ss:$0 sm:$0xff] }
 0xc7e   : > { %v4104_v14 = vpop.f32.mrf.mxu2 }
 0xc7f   : > { %v4314_v23 = vadd.f32 %v4313_v55, %v4104_v14  ;;  %v4507_v14 = vadd.f32 %v10336_v29, %v10225_v22  ;;  %v4510_v22 = vadd.f32 %v10336_v29, %v10231_v42  ;;  %v4513_v42 = vadd.f32 %v10336_v29, %v10237_v25 }
 0xc81   : > { %v4352_v9 = vadd.f32 %v10077_v34, %v4314_v23 }
 0xc82   : > { %v10330_v49 = vpop.f32.mrf.mxu1 }
 0xc83   : > { %v4384_v30 = vmax.f32 %v4352_v9, 0.0  ;;  %6959 = vmatmul.msk.f32.gmra.mxu2 %vm956_vm2, %v11563_v1  ;;  %v4660_v1 = vpop.f32.mrf.mxu3  ;;  %6940 = vmatmul.msk.f32.gmra.mxu3 %vm456_vm0, %v10167_v28  ;;  %v4319_v8 = vpop.f32.mrf.mxu0 }
 0xc85   : > { %6901 = vmatmul.msk.f32.gmra.mxu1 %vm956_vm2, %v4384_v30 }
 0xc86   : > { %v4107_v43 = vpop.f32.mrf.mxu2 }
 0xc87   : > { %v4317_v63 = vadd.f32 %v4316_v20, %v4107_v43 }
 0xc89   : > { %v4353_v6 = vadd.f32 %v10077_v34, %v4317_v63 }
 0xc8a   : > { %v10347_v9 = vpop.f32.mrf.mxu1 }
 0xc8b   : > { %v4385_v12 = vmax.f32 %v4353_v6, 0.0  ;;  %6960 = vmatmul.msk.f32.gmra.mxu2 %vm956_vm2, %v11564_v47  ;;  %v4663_v47 = vpop.f32.mrf.mxu3  ;;  %6941 = vmatmul.msk.f32.gmra.mxu3 %vm456_vm0, %v10188_v5 }
 0xc8d   : > { %6902 = vmatmul.msk.f32.gmra.mxu1 %vm956_vm2, %v4385_v12 }
 0xc8e   : > { %v4110_v39 = vpop.f32.mrf.mxu2 }
 0xc8f   : > { %v4320_v0 = vadd.f32 %v4319_v8, %v4110_v39 }
 0xc91   : > { %v4354_v55 = vadd.f32 %v10077_v34, %v4320_v0 }
 0xc92   : > { %v10362_v63 = vpop.f32.mrf.mxu1 }
 0xc93   : > { %v4386_v37 = vmax.f32 %v4354_v55, 0.0  ;;  %6961 = vmatmul.msk.f32.gmra.mxu2 %vm956_vm2, %v9854_v7  ;;  %v4666_v7 = vpop.f32.mrf.mxu3  ;;  %6942 = vmatmul.msk.f32.gmra.mxu3 %vm456_vm0, %v10197_v40 }
 0xc95   : > { %6903 = vmatmul.msk.f32.gmra.mxu1 %vm956_vm2, %v4386_v37 }
 0xc96   : > { %v4860_v28 = vpop.f32.mrf.mxu2 }
 0xc97   : > { %v4861_v34 = vadd.f32 %v4860_v28, %v4651_v54 }
 0xc99   : > { %v10345_v23 = vadd.f32 %v4861_v34, %v4507_v14  ;;  %v4522_v34 = vadd.f32 %v10336_v29, %v10255_v57 }
 0xc9a   : > { %v10379_v39 = vpop.f32.mrf.mxu1 }
 0xc9b   : > { %v5062_v30 = vmax.f32 %v10345_v23, 0.0  ;;  %6962 = vmatmul.msk.f32.gmra.mxu2 %vm956_vm2, %v9850_v24  ;;  %v4669_v24 = vpop.f32.mrf.mxu3  ;;  %6943 = vmatmul.msk.f32.gmra.mxu3 %vm456_vm0, %v10206_v32  ;;  %v4516_v32 = vadd.f32 %v10336_v29, %v10243_v19 }
 0xc9d   : > { %7018 = vmatmul.msk.f32.vlgmr.msrb.gmra.mxu1 %vm956_vm2, %v5062_v30 }
 0xc9e   : > { %v4863_v5 = vpop.f32.mrf.mxu2 }
 0xc9f   : > { %v4864_v54 = vadd.f32 %v4863_v5, %v4654_v21 }
 0xca1   : > { %v10357_v20 = vadd.f32 %v4864_v54, %v4510_v22  ;;  %v4525_v54 = vadd.f32 %v10336_v29, %v10261_v16 }
 0xca2   : > { %v10389_v28 = vpop.f32.mrf.mxu1 }
 0xca3   : > { %6963 = vmatmul.msk.f32.gmra.mxu2 %vm956_vm2, %v9844_v48  ;;  %v5063_v43 = vmax.f32 %v10357_v20, 0.0  ;;  %v4672_v12 = vpop.f32.mrf.mxu3  ;;  %6944 = vmatmul.msk.f32.gmra.mxu3 %vm456_vm0, %v10215_v44  ;;  %v4519_v44 = vadd.f32 %v10336_v29, %v10249_v41 }
 0xca5   : > { %7019 = vmatmul.msk.f32.gmra.mxu1 %vm956_vm2, %v5063_v43 }
 0xca6   : > { %v4866_v40 = vpop.f32.mrf.mxu2 }
 0xca7   : > { %v4867_v21 = vadd.f32 %v4866_v40, %v4657_v36 }
 0xca9   : > { %v10369_v6 = vadd.f32 %v4867_v21, %v4513_v42  ;;  %v4528_v21 = vadd.f32 %v10336_v29, %v10269_v38 }
 0xcaa   : > { %v10401_v41 = vpop.f32.mrf.mxu1 }
 0xcab   : > { %6964 = vmatmul.msk.f32.gmra.mxu2 %vm956_vm2, %v9836_v33  ;;  %v5064_v48 = vmax.f32 %v10369_v6, 0.0  ;;  %v4675_v0 = vpop.f32.mrf.mxu3 }
 0xcad   : > { %7020 = vmatmul.msk.f32.gmra.mxu1 %vm956_vm2, %v5064_v48 }
 0xcae   : > { %v4869_v8 = vpop.f32.mrf.mxu2 }
 0xcaf   : > { %v4870_v25 = vadd.f32 %v4869_v8, %v4660_v1 }
 0xcb1   : > { %v10381_v36 = vadd.f32 %v4870_v25, %v4516_v32  ;;  %v4531_v32 = vadd.f32 %v10336_v29, %v10276_v4 }
 0xcb3   : > { %6965 = vmatmul.msk.f32.gmra.mxu2 %vm956_vm2, %v9828_v31  ;;  %v5065_v33 = vmax.f32 %v10381_v36, 0.0  ;;  %v4678_v31 = vpop.f32.mrf.mxu3 }
 0xcb5   : > { %7021 = vmatmul.msk.f32.gmra.mxu1 %vm956_vm2, %v5065_v33 }
 0xcb6   : > { %v4872_v55 = vpop.f32.mrf.mxu2 }
 0xcb7   : > { %v4873_v37 = vadd.f32 %v4872_v55, %v4663_v47 }
 0xcb9   : > { %v10391_v19 = vadd.f32 %v4873_v37, %v4519_v44  ;;  %v4534_v44 = vadd.f32 %v10336_v29, %v10282_v60 }
 0xcbb   : > { %6966 = vmatmul.msk.f32.gmra.mxu2 %vm956_vm2, %v9820_v53  ;;  %v5066_v1 = vmax.f32 %v10391_v19, 0.0  ;;  %v4681_v53 = vpop.f32.mrf.mxu3 }
 0xcbd   : > { %7022 = vmatmul.msk.f32.gmra.mxu1 %vm956_vm2, %v5066_v1 }
 0xcbe   : > { %v4875_v14 = vpop.f32.mrf.mxu2 }
 0xcbf   : > { %v4876_v30 = vadd.f32 %v4875_v14, %v4666_v7  ;;  %v10414_v7 = vpop.f32.mrf.mxu1 }
 0xcc1   : > { %v10399_v5 = vadd.f32 %v4876_v30, %v4522_v34  ;;  %v4537_v34 = vadd.f32 %v10336_v29, %v10289_v10 }
 0xcc3   : > { %6967 = vmatmul.msk.f32.gmra.mxu2 %vm956_vm2, %v9812_v46  ;;  %v5067_v47 = vmax.f32 %v10399_v5, 0.0  ;;  %v4684_v46 = vpop.f32.mrf.mxu3 }
 0xcc5   : > { %7023 = vmatmul.msk.f32.gmra.mxu1 %vm956_vm2, %v5067_v47 }
 0xcc6   : > { %v4878_v22 = vpop.f32.mrf.mxu2 }
 0xcc7   : > { %v4879_v43 = vadd.f32 %v4878_v22, %v4669_v24  ;;  %v10427_v25 = vpop.f32.mrf.mxu1 }
 0xcc9   : > { %v10409_v40 = vadd.f32 %v4879_v43, %v4525_v54  ;;  %v4540_v54 = vadd.f32 %v10336_v29, %v10311_v58 }
 0xccb   : > { %6968 = vmatmul.msk.f32.gmra.mxu2 %vm956_vm2, %v9804_v3  ;;  %v5068_v57 = vmax.f32 %v10409_v40, 0.0  ;;  %v4687_v3 = vpop.f32.mrf.mxu3 }
 0xccd   : > { %7024 = vmatmul.msk.f32.gmra.mxu1 %vm956_vm2, %v5068_v57 }
 0xcce   : > { %v4881_v42 = vpop.f32.mrf.mxu2 }
 0xccf   : > { %v4882_v48 = vadd.f32 %v4881_v42, %v4672_v12  ;;  %v10437_v1 = vpop.f32.mrf.mxu1 }
 0xcd1   : > { %v10419_v8 = vadd.f32 %v4882_v48, %v4528_v21  ;;  %v4543_v21 = vadd.f32 %v10336_v29, %v10322_v56 }
 0xcd3   : > { %6969 = vmatmul.msk.f32.gmra.mxu2 %vm956_vm2, %v9796_v18  ;;  %v5069_v16 = vmax.f32 %v10419_v8, 0.0  ;;  %v4690_v18 = vpop.f32.mrf.mxu3 }
 0xcd5   : > { %7025 = vmatmul.msk.f32.gmra.mxu1 %vm956_vm2, %v5069_v16 }
 0xcd6   : > { %v4884_v24 = vpop.f32.mrf.mxu2 }
 0xcd7   : > { %v4885_v33 = vadd.f32 %v4884_v24, %v4675_v0  ;;  %v10449_v60 = vpop.f32.mrf.mxu1 }
 0xcd9   : > { %v10429_v55 = vadd.f32 %v4885_v33, %v4531_v32 }
 0xcdb   : > { %6970 = vmatmul.msk.f32.gmra.mxu2 %vm956_vm2, %v9789_v2  ;;  %v5070_v38 = vmax.f32 %v10429_v55, 0.0  ;;  %v4693_v2 = vpop.f32.mrf.mxu3 }
 0xcdd   : > { %7026 = vmatmul.msk.f32.gmra.mxu1 %vm956_vm2, %v5070_v38 }
 0xcde   : > { %v4887_v12 = vpop.f32.mrf.mxu2 }
 0xcdf   : > { %v4888_v37 = vadd.f32 %v4887_v12, %v4678_v31 }
 0xce1   : > { %v10439_v4 = vadd.f32 %v4888_v37, %v4534_v44 }
 0xce3   : > { %6971 = vmatmul.msk.f32.gmra.mxu2 %vm956_vm2, %v9784_v17  ;;  %v5071_v0 = vmax.f32 %v10439_v4, 0.0  ;;  %v4696_v17 = vpop.f32.mrf.mxu3 }
 0xce5   : > { %7027 = vmatmul.msk.f32.gmra.mxu1 %vm956_vm2, %v5071_v0  ;;  %v4552_v0 = vadd.f32 %v10336_v29, %v10362_v63  ;;  %v4555_v63 = vadd.f32 %v10336_v29, %v10379_v39  ;;  %v11570_v39 = vld [vmem:[#allocation18_spill] sm:$0xff] }
 0xce6   : > { %v4890_v14 = vpop.f32.mrf.mxu2 }
 0xce7   : > { %v4891_v30 = vadd.f32 %v4890_v14, %v4681_v53  ;;  %v10462_v53 = vpop.f32.mrf.mxu1 }
 0xce9   : > { %v10447_v47 = vadd.f32 %v4891_v30, %v4537_v34 }
 0xceb   : > { %6972 = vmatmul.msk.f32.gmra.mxu2 %vm956_vm2, %v9779_v52  ;;  %v5072_v31 = vmax.f32 %v10447_v47, 0.0  ;;  %v4699_v42 = vpop.f32.mrf.mxu3 }
 0xced   : > { %7028 = vmatmul.msk.f32.gmra.mxu1 %vm956_vm2, %v5072_v31 }
 0xcee   : > { %v4893_v22 = vpop.f32.mrf.mxu2 }
 0xcef   : > { %v4894_v43 = vadd.f32 %v4893_v22, %v4684_v46  ;;  %v4546_v46 = vadd.f32 %v10336_v29, %v10330_v49  ;;  %v10475_v24 = vpop.f32.mrf.mxu1 }
 0xcf1   : > { %v10457_v57 = vadd.f32 %v4894_v43, %v4540_v54 }
 0xcf3   : > { %6973 = vmatmul.msk.f32.gmra.mxu2 %vm956_vm2, %v9774_v61  ;;  %v5073_v10 = vmax.f32 %v10457_v57, 0.0  ;;  %v4702_v33 = vpop.f32.mrf.mxu3 }
 0xcf5   : > { %7029 = vmatmul.msk.f32.gmra.mxu1 %vm956_vm2, %v5073_v10  ;;  %v11567_v10 = vld [vmem:[#allocation12_spill] sm:$0xff] }
 0xcf6   : > { %v4896_v52 = vpop.f32.mrf.mxu2 }
 0xcf7   : > { %v4897_v48 = vadd.f32 %v4896_v52, %v4687_v3  ;;  %v4549_v3 = vadd.f32 %v10336_v29, %v10347_v9  ;;  %v10485_v44 = vpop.f32.mrf.mxu1 }
 0xcf9   : > { %v10467_v16 = vadd.f32 %v4897_v48, %v4543_v21  ;;  %v11568_v48 = vld [vmem:[#allocation14_spill] sm:$0xff] }
 0xcfb   : > { %6974 = vmatmul.msk.f32.gmra.mxu2 %vm956_vm2, %v9766_v26  ;;  %v5074_v58 = vmax.f32 %v10467_v16, 0.0 }
 0xcfd   : > { %7030 = vmatmul.msk.f32.gmra.mxu1 %vm956_vm2, %v5074_v58  ;;  %v5000_v58 = vmul.f32 %v10467_v16, %v11568_v48 }
 0xcfe   : > { %v4899_v61 = vpop.f32.mrf.mxu2 }
 0xcff   : > { %v4900_v32 = vadd.f32 %v4899_v61, %v4690_v18  ;;  %v4705_v18 = vpop.f32.mrf.mxu3  ;;  %v10497_v9 = vpop.f32.mrf.mxu1  ;;  %v11569_v61 = vld [vmem:[#allocation16_spill] sm:$0xff] }
 0xd01   : > { %v10477_v38 = vadd.f32 %v4900_v32, %v4546_v46  ;;  %v4999_v46 = vmul.f32 %v10457_v57, %v11569_v61 }
 0xd03   : > { %6975 = vmatmul.msk.f32.gmra.mxu2 %vm956_vm2, %v9761_v45  ;;  %v5075_v56 = vmax.f32 %v10477_v38, 0.0  ;;  %v5001_v52 = vmul.f32 %v10477_v38, %v11567_v10 }
 0xd05   : > { %7031 = vmatmul.msk.f32.gmra.mxu1 %vm956_vm2, %v5075_v56 }
 0xd06   : > { %v4902_v26 = vpop.f32.mrf.mxu2 }
 0xd07   : > { %v4903_v12 = vadd.f32 %v4902_v26, %v4693_v2  ;;  %v11565_v2 = vld [vmem:[#allocation9_spill] sm:$0xff]  ;;  %v4708_v22 = vpop.f32.mrf.mxu3  ;;  %v10516_v56 = vpop.f32.mrf.mxu1 }
 0xd09   : > { %v10487_v49 = vadd.f32 %v4903_v12, %v4549_v3  ;;  %v4558_v12 = vadd.f32 %v10336_v29, %v10389_v28  ;;  %v11574_v28 = vld [vmem:[#allocation28_spill] sm:$0xff] }
 0xd0b   : > { %6976 = vmatmul.msk.f32.gmra.mxu2 %vm956_vm2, %v9763_v13  ;;  %v5076_v37 = vmax.f32 %v10487_v49, 0.0  ;;  %v11566_v13 = vld [vmem:[#allocation10_spill] sm:$0xff] }
 0xd0c   : > { %v5002_v54 = vmul.f32 %v10487_v49, %v11566_v13 }
 0xd0d   : > { %7032 = vmatmul.msk.f32.gmra.mxu1 %vm956_vm2, %v5076_v37 }
 0xd0e   : > { %v4905_v45 = vpop.f32.mrf.mxu2 }
 0xd0f   : > { %v4906_v14 = vadd.f32 %v4905_v45, %v4696_v17  ;;  %v4711_v3 = vpop.f32.mrf.mxu3  ;;  %v11571_v45 = vld [vmem:[#allocation20_spill] sm:$0xff] }
 0xd11   : > { %v10495_v34 = vadd.f32 %v4906_v14, %v4552_v0  ;;  %v4997_v0 = vmul.f32 %v10439_v4, %v11571_v45 }
 0xd13   : > { %v5003_v30 = vmul.f32 %v10495_v34, %v11565_v2  ;;  %v5077_v31 = vmax.f32 %v10495_v34, 0.0 }
 0xd15   : > { %5020 = vmatpush.msrb.mxu3 %v5003_v30  ;;  %7033 = vmatmul.msk.f32.gmra.mxu1 %vm956_vm2, %v5077_v31  ;;  %v11572_v30 = vld [vmem:[#allocation23_spill] sm:$0xff] }
 0xd16   : > { %v4908_v43 = vpop.f32.mrf.mxu2  ;;  %v4996_v31 = vmul.f32 %v10429_v55, %v11572_v30 }
 0xd17   : > { %v4909_v17 = vadd.f32 %v4908_v43, %v4699_v42  ;;  %5021 = vmatpush.msrb.mxu3 %v5002_v54  ;;  %v4998_v42 = vmul.f32 %v10447_v47, %v11570_v39  ;;  %v11573_v54 = vld [vmem:[#allocation26_spill] sm:$0xff] }
 0xd18   : > { %v4995_v43 = vmul.f32 %v10419_v8, %v11573_v54 }
 0xd19   : > { %v10509_v21 = vadd.f32 %v4909_v17, %v4555_v63  ;;  %5022 = vmatpush.msrb.mxu3 %v5001_v52  ;;  %v4561_v52 = vadd.f32 %v10336_v29, %v10401_v41 }
 0xd1b   : > { %5023 = vmatpush.msrb.mxu3 %v5000_v58  ;;  %v5078_v32 = vmax.f32 %v10509_v21, 0.0  ;;  %v10537_v58 = vpop.f32.mrf.mxu1 }
 0xd1d   : > { %5024 = vmatpush.msrb.mxu3 %v4999_v46  ;;  %7034 = vmatmul.msk.f32.gmra.mxu1 %vm956_vm2, %v5078_v32  ;;  %v11575_v32 = vld [vmem:[#allocation35_spill] sm:$0xff] }
 0xd1e   : > { %v4911_v26 = vpop.f32.mrf.mxu2 }
 0xd1f   : > { %v4912_v37 = vadd.f32 %v4911_v26, %v4702_v33  ;;  %5025 = vmatpush.msrb.mxu3 %v4998_v42  ;;  %v4994_v33 = vmul.f32 %v10409_v40, %v11574_v28  ;;  %v4993_v42 = vmul.f32 %v10399_v5, %v11575_v32  ;;  %v4714_v26 = vpop.f32.mrf.mxu3 }
 0xd21   : > { %v10525_v14 = vadd.f32 %v4912_v37, %v4558_v12  ;;  %5026 = vmatpush.msrb.mxu3 %v4997_v0  ;;  %v11576_v37 = vld [vmem:[#allocation39_spill] sm:$0xff] }
 0xd22   : > { %v4992_v0 = vmul.f32 %v10391_v19, %v11576_v37 }
 0xd23   : > { %5027 = vmatpush.msrb.mxu3 %v4996_v31  ;;  %v5079_v63 = vmax.f32 %v10525_v14, 0.0  ;;  %v11577_v31 = vld [vmem:[#allocation42_spill] sm:$0xff] }
 0xd25   : > { %5028 = vmatpush.msrb.mxu3 %v4995_v43  ;;  %7035 = vmatmul.msk.f32.gmra.mxu1 %vm956_vm2, %v5079_v63  ;;  %v4991_v43 = vmul.f32 %v10381_v36, %v11577_v31 }
 0xd26   : > { %v4914_v17 = vpop.f32.mrf.mxu2 }
 0xd27   : > { %v4915_v46 = vadd.f32 %v4914_v17, %v4705_v18  ;;  %5029 = vmatpush.msrb.mxu3 %v4994_v33  ;;  %v11578_v18 = vld [vmem:[#allocation44_spill] sm:$0xff]  ;;  %v4564_v17 = vadd.f32 %v10336_v29, %v10414_v7  ;;  %v4717_v37 = vpop.f32.mrf.mxu3  ;;  %v7290_v7 = vld [vmem:[%s11466_s1] sm:$0xff] }
 0xd28   : > { %v4990_v63 = vmul.f32 %v10369_v6, %v11578_v18 }
 0xd29   : > { %v10541_v12 = vadd.f32 %v4915_v46, %v4561_v52  ;;  %5030 = vmatpush.msrb.mxu3 %v4993_v42  ;;  %v11579_v46 = vld [vmem:[#allocation45_spill] sm:$0xff] }
 0xd2a   : > { %v4989_v42 = vmul.f32 %v10357_v20, %v11579_v46 }
 0xd2b   : > { %5031 = vmatpush.msrb.mxu3 %v4992_v0  ;;  %v5080_v41 = vmax.f32 %v10541_v12, 0.0  ;;  %v10555_v0 = vpop.f32.mrf.mxu1 }
 0xd2d   : > { %5032 = vmatpush.msrb.mxu3 %v4991_v43  ;;  %7036 = vmatmul.msk.f32.gmra.mxu1 %vm956_vm2, %v5080_v41  ;;  %v11580_v43 = vld [vmem:[#allocation46_spill] sm:$0xff] }
 0xd2e   : > { %v4917_v33 = vpop.f32.mrf.mxu2  ;;  %v4988_v41 = vmul.f32 %v10345_v23, %v11580_v43 }
 0xd2f   : > { %v4918_v52 = vadd.f32 %v4917_v33, %v4708_v22  ;;  %5033 = vmatpush.msrb.mxu3 %v4990_v63  ;;  %v4567_v63 = vadd.f32 %v10336_v29, %v10427_v25 }
 0xd31   : > { %v10557_v31 = vadd.f32 %v4918_v52, %v4564_v17  ;;  %5034 = vmatpush.msrb.mxu3 %v4989_v42 }
 0xd33   : > { %5035 = vmatpush.msrb.mxu3 %v4988_v41  ;;  %v5081_v18 = vmax.f32 %v10557_v31, 0.0  ;;  %v10570_v52 = vpop.f32.mrf.mxu1  ;;  %v4720_v41 = vpop.f32.mrf.mxu3 }
 0xd34   : > { %5036 = vmatmul.f32.vlgmr.msrb.gmra.mxu3 %v7290_v7  ;;  %v4570_v7 = vadd.f32 %v10336_v29, %v10437_v1 }
 0xd35   : > { %7037 = vmatmul.msk.f32.gmra.mxu1 %vm956_vm2, %v5081_v18 }
 0xd36   : > { %v4920_v22 = vpop.f32.mrf.mxu2 }
 0xd37   : > { %v4921_v33 = vadd.f32 %v4920_v22, %v4711_v3 }
 0xd39   : > { %v10568_v17 = vadd.f32 %v4921_v33, %v4567_v63  ;;  %v4573_v63 = vadd.f32 %v10336_v29, %v10449_v60 }
 0xd3b   : > { %v5082_v42 = vmax.f32 %v10568_v17, 0.0  ;;  %v10579_v25 = vpop.f32.mrf.mxu1  ;;  %v4723_v22 = vpop.f32.mrf.mxu3 }
 0xd3d   : > { %7038 = vmatmul.msk.f32.gmra.mxu1 %vm956_vm2, %v5082_v42 }
 0xd3e   : > { %v4923_v43 = vpop.f32.mrf.mxu2 }
 0xd3f   : > { %v4924_v46 = vadd.f32 %v4923_v43, %v4714_v26  ;;  %v4576_v26 = vadd.f32 %v10336_v29, %v10462_v53 }
 0xd41   : > { %v10576_v18 = vadd.f32 %v4924_v46, %v4570_v7 }
 0xd43   : > { %v5083_v32 = vmax.f32 %v10576_v18, 0.0  ;;  %v10590_v46 = vpop.f32.mrf.mxu1 }
 0xd45   : > { %7039 = vmatmul.msk.f32.gmra.mxu1 %vm956_vm2, %v5083_v32  ;;  %v4726_v32 = vpop.f32.mrf.mxu3 }
 0xd46   : > { %v4926_v3 = vpop.f32.mrf.mxu2 }
 0xd47   : > { %v4927_v33 = vadd.f32 %v4926_v3, %v4717_v37  ;;  %v4579_v37 = vadd.f32 %v10336_v29, %v10475_v24 }
 0xd49   : > { %v10584_v42 = vadd.f32 %v4927_v33, %v4573_v63 }
 0xd4b   : > { %v5084_v28 = vmax.f32 %v10584_v42, 0.0 }
 0xd4d   : > { %7040 = vmatmul.msk.f32.gmra.mxu1 %vm956_vm2, %v5084_v28  ;;  %v10598_v28 = vpop.f32.mrf.mxu1  ;;  %v4729_v53 = vpop.f32.mrf.mxu3 }
 0xd4e   : > { %v4929_v1 = vpop.f32.mrf.mxu2 }
 0xd4f   : > { %v4930_v43 = vadd.f32 %v4929_v1, %v4720_v41  ;;  %v4582_v1 = vadd.f32 %v10336_v29, %v10485_v44 }
 0xd51   : > { %v10592_v7 = vadd.f32 %v4930_v43, %v4576_v26 }
 0xd53   : > { %v5085_v54 = vmax.f32 %v10592_v7, 0.0 }
 0xd55   : > { %7041 = vmatmul.msk.f32.gmra.mxu1 %vm956_vm2, %v5085_v54  ;;  %v10608_v43 = vpop.f32.mrf.mxu1 }
 0xd56   : > { %v4932_v60 = vpop.f32.mrf.mxu2 }
 0xd57   : > { %v4933_v3 = vadd.f32 %v4932_v60, %v4723_v22  ;;  %v4732_v22 = vpop.f32.mrf.mxu3 }
 0xd59   : > { %v10600_v63 = vadd.f32 %v4933_v3, %v4579_v37  ;;  %v4585_v37 = vadd.f32 %v10336_v29, %v10497_v9 }
 0xd5b   : > { %v5086_v33 = vmax.f32 %v10600_v63, 0.0 }
 0xd5d   : > { %7042 = vmatmul.msk.f32.gmra.mxu1 %vm956_vm2, %v5086_v33  ;;  %v10617_v44 = vpop.f32.mrf.mxu1 }
 0xd5e   : > { %v4935_v41 = vpop.f32.mrf.mxu2 }
 0xd5f   : > { %v4936_v26 = vadd.f32 %v4935_v41, %v4726_v32  ;;  %v4735_v41 = vpop.f32.mrf.mxu3 }
 0xd61   : > { %v10606_v54 = vadd.f32 %v4936_v26, %v4582_v1  ;;  %v4588_v1 = vadd.f32 %v10336_v29, %v10516_v56 }
 0xd63   : > { %v5087_v24 = vmax.f32 %v10606_v54, 0.0 }
 0xd65   : > { %7043 = vmatmul.msk.f32.gmra.mxu1 %vm956_vm2, %v5087_v24 }
 0xd66   : > { %v4938_v60 = vpop.f32.mrf.mxu2 }
 0xd67   : > { %v4939_v3 = vadd.f32 %v4938_v60, %v4729_v53  ;;  %v4591_v53 = vadd.f32 %v10336_v29, %v10537_v58  ;;  %v10628_v60 = vpop.f32.mrf.mxu1 }
 0xd69   : > { %v10614_v33 = vadd.f32 %v4939_v3, %v4585_v37 }
 0xd6b   : > { %v5088_v30 = vmax.f32 %v10614_v33, 0.0 }
 0xd6d   : > { %7044 = vmatmul.msk.f32.gmra.mxu1 %vm956_vm2, %v5088_v30  ;;  %v4738_v30 = vpop.f32.mrf.mxu3 }
 0xd6e   : > { %v4941_v32 = vpop.f32.mrf.mxu2 }
 0xd6f   : > { %v4942_v26 = vadd.f32 %v4941_v32, %v4732_v22  ;;  %v4594_v22 = vadd.f32 %v10336_v29, %v10555_v0 }
 0xd71   : > { %v10622_v24 = vadd.f32 %v4942_v26, %v4588_v1 }
 0xd73   : > { %v5089_v45 = vmax.f32 %v10622_v24, 0.0 }
 0xd75   : > { %7045 = vmatmul.msk.f32.gmra.mxu1 %vm956_vm2, %v5089_v45  ;;  %v10636_v45 = vpop.f32.mrf.mxu1  ;;  %v4741_v58 = vpop.f32.mrf.mxu3 }
 0xd76   : > { %v4944_v9 = vpop.f32.mrf.mxu2 }
 0xd77   : > { %v4945_v37 = vadd.f32 %v4944_v9, %v4735_v41  ;;  %v4597_v9 = vadd.f32 %v10336_v29, %v10570_v52 }
 0xd79   : > { %v10630_v3 = vadd.f32 %v4945_v37, %v4591_v53 }
 0xd7b   : > { %v5090_v39 = vmax.f32 %v10630_v3, 0.0 }
 0xd7d   : > { %7046 = vmatmul.msk.f32.gmra.mxu1 %vm956_vm2, %v5090_v39  ;;  %v10646_v37 = vpop.f32.mrf.mxu1 }
 0xd7e   : > { %v4947_v56 = vpop.f32.mrf.mxu2 }
 0xd7f   : > { %v4948_v32 = vadd.f32 %v4947_v56, %v4738_v30  ;;  %v4744_v30 = vpop.f32.mrf.mxu3 }
 0xd81   : > { %v10638_v1 = vadd.f32 %v4948_v32, %v4594_v22  ;;  %v4600_v22 = vadd.f32 %v10336_v29, %v10579_v25  ;;  %v5016_v25 = vmul.f32 %v10630_v3, %v11539_v59 }
 0xd83   : > { %v5091_v26 = vmax.f32 %v10638_v1, 0.0  ;;  %v5017_v29 = vmul.f32 %v10638_v1, %v11538_v50 }
 0xd85   : > { %7047 = vmatmul.msk.f32.gmra.mxu1 %vm956_vm2, %v5091_v26 }
 0xd86   : > { %v4950_v41 = vpop.f32.mrf.mxu2 }
 0xd87   : > { %v4951_v53 = vadd.f32 %v4950_v41, %v4741_v58  ;;  %v10657_v41 = vpop.f32.mrf.mxu1 }
 0xd89   : > { %v10644_v39 = vadd.f32 %v4951_v53, %v4597_v9  ;;  %v5015_v53 = vmul.f32 %v10622_v24, %v11540_v35 }
 0xd8b   : > { %v5092_v0 = vmax.f32 %v10644_v39, 0.0  ;;  %v5018_v9 = vmul.f32 %v10644_v39, %v11537_v27 }
 0xd8d   : > { %7048 = vmatmul.msk.f32.gmra.mxu1 %vm956_vm2, %v5092_v0  ;;  %v5014_v0 = vmul.f32 %v10614_v33, %v11541_v51 }
 0xd8e   : > { %v4953_v56 = vpop.f32.mrf.mxu2 }
 0xd8f   : > { %v4954_v32 = vadd.f32 %v4953_v56, %v4744_v30  ;;  %v5013_v30 = vmul.f32 %v10606_v54, %v11542_v11  ;;  %v5012_v56 = vmul.f32 %v10600_v63, %v11543_v62 }
 0xd91   : > { %v10652_v26 = vadd.f32 %v4954_v32, %v4600_v22  ;;  %v11581_v22 = vld [vmem:[#allocation19_spill] sm:$0xff] }
 0xd92   : > { %v5011_v32 = vmul.f32 %v10592_v7, %v11581_v22 }
 0xd93   : > { %v5019_v52 = vmul.f32 %v10652_v26, %v11536_v15  ;;  %v5093_v58 = vmax.f32 %v10652_v26, 0.0 }
 0xd95   : > { %5040 = vmatpush.msra.mxu0 %v5019_v52  ;;  %7049 = vmatmul.msk.f32.gmra.mxu1 %vm956_vm2, %v5093_v58  ;;  %v11582_v52 = vld [vmem:[#allocation22_spill] sm:$0xff] }
 0xd96   : > { %v5010_v58 = vmul.f32 %v10584_v42, %v11582_v52 }
 0xd97   : > { %5041 = vmatpush.msra.mxu0 %v5018_v9  ;;  %v11583_v9 = vld [vmem:[#allocation24_spill] sm:$0xff] }
 0xd99   : > { %5042 = vmatpush.msra.mxu0 %v5017_v29  ;;  %v5009_v29 = vmul.f32 %v10576_v18, %v11583_v9 }
 0xd9b   : > { %5043 = vmatpush.msra.mxu0 %v5016_v25  ;;  %v11584_v25 = vld [vmem:[#allocation27_spill] sm:$0xff] }
 0xd9d   : > { %5044 = vmatpush.msra.mxu0 %v5015_v53  ;;  %v5008_v53 = vmul.f32 %v10568_v17, %v11584_v25 }
 0xd9f   : > { %5045 = vmatpush.msra.mxu0 %v5014_v0  ;;  %v11585_v0 = vld [vmem:[#allocation30_spill] sm:$0xff] }
 0xda1   : > { %5046 = vmatpush.msra.mxu0 %v5013_v30  ;;  %v5007_v30 = vmul.f32 %v10557_v31, %v11585_v0 }
 0xda3   : > { %5047 = vmatpush.msra.mxu0 %v5012_v56  ;;  %v11586_v56 = vld [vmem:[#allocation37_spill] sm:$0xff] }
 0xda4   : > { %v5006_v22 = vmul.f32 %v10541_v12, %v11586_v56 }
 0xda5   : > { %5048 = vmatpush.msra.mxu0 %v5011_v32  ;;  %v11587_v32 = vld [vmem:[#allocation41_spill] sm:$0xff] }
 0xda6   : > { %v5005_v52 = vmul.f32 %v10525_v14, %v11587_v32 }
 0xda7   : > { %5049 = vmatpush.msra.mxu0 %v5010_v58  ;;  %v11588_v58 = vld [vmem:[#allocation43_spill] sm:$0xff] }
 0xda8   : > { %v5004_v9 = vmul.f32 %v10509_v21, %v11588_v58 }
 0xda9   : > { %5050 = vmatpush.msra.mxu0 %v5009_v29  ;;  %v7291_v29 = vld [vmem:[%s11466_s1 + $0x8] sm:$0xff] }
 0xdab   : > { %5051 = vmatpush.msra.mxu0 %v5008_v53  ;;  %v6984_v53 = vld [vmem:[%s11285_s5 + $0x138] sm:$0xff] }
 0xdad   : > { %5052 = vmatpush.msra.mxu0 %v5007_v30  ;;  %v7091_v30 = vld [vmem:[%s11286_s6 + $0x128] sm:$0xff] }
 0xdaf   : > { %5053 = vmatpush.msra.mxu0 %v5006_v22  ;;  %v7093_v22 = vld [vmem:[%s11286_s6 + $0x138] sm:$0xff] }
 0xdb0   : > { %5753 = vmatpush.msrb.mxu2 %v7093_v22  ;;  %v6981_v22 = vld [vmem:[%s11285_s5 + $0x120] sm:$0xff] }
 0xdb1   : > { %5054 = vmatpush.msra.mxu0 %v5005_v52  ;;  %v7092_v52 = vld [vmem:[%s11286_s6 + $0x130] sm:$0xff] }
 0xdb2   : > { %5754 = vmatpush.msrb.mxu2 %v7092_v52 }
 0xdb3   : > { %5055 = vmatpush.msra.mxu0 %v5004_v9  ;;  %v6983_v9 = vld [vmem:[%s11285_s5 + $0x130] sm:$0xff] }
 0xdb4   : > { %5056 = vmatmul.f32.vlgmr.msra.gmra.mxu0 %v7291_v29  ;;  %5755 = vmatpush.msrb.mxu2 %v7091_v30  ;;  %v6982_v29 = vld [vmem:[%s11285_s5 + $0x128] sm:$0xff] }
 0xdb5   : > { %5119 = vmatpush.msrb.mxu0 %v6984_v53  ;;  %v7090_v53 = vld [vmem:[%s11286_s6 + $0x120] sm:$0xff] }
 0xdb6   : > { %5756 = vmatpush.msrb.mxu2 %v7090_v53 }
 0xdb7   : > { %5120 = vmatpush.msrb.mxu0 %v6983_v9  ;;  %v5037_v52 = vpop.f32.mrf.mxu3 }
 0xdb9   : > { %5121 = vmatpush.msrb.mxu0 %v6982_v29  ;;  %v7292_v29 = vld [vmem:[%s11478_s2] sm:$0xff] }
 0xdbb   : > { %5122 = vmatpush.msrb.mxu0 %v6981_v22  ;;  %v7295_v22 = vld [vmem:[%s11478_s2 + $0x18] sm:$0xff] }
 0xe31   : > { %v5057_v58 = vpop.f32.mrf.mxu0 }
 0xe32   : > { %v5058_v32 = vadd.f32 %v5057_v58, %v5037_v52  ;;  %v7293_v58 = vld [vmem:[%s11478_s2 + $0x8] sm:$0xff]  ;;  %v7296_v52 = vld [vmem:[%s11478_s2 + $0x20] sm:$0xff] }
 0xe34   : > { %v5099_v9 = vmax.f32 %v5058_v32, 0.0  ;;  %7094 = vmatmul.msk.f32.vlgmr.msrb.gmra.mxu2 %vm956_vm2, %v5058_v32  ;;  %v7294_v32 = vld [vmem:[%s11478_s2 + $0x10] sm:$0xff] }
 0xe36   : > { %6985 = vmatmul.msk.f32.vlgmr.msrb.gmra.mxu0 %vm956_vm2, %v5099_v9  ;;  %v7297_v9 = vld [vmem:[%s11478_s2 + $0x28] sm:$0xff] }
 0xeb3   : > { %v5124_v30 = vpop.f32.mrf.mxu0 }
 0xeb4   : > { %5142 = vmatpush.msra.mxu0 %v5124_v30  ;;  %v7298_v30 = vld [vmem:[%s11478_s2 + $0x30] sm:$0xff] }
 0xeb5   : > { %6986 = vmatmul.msk.f32.vlgmr.msra.gmra.mxu0 %vm456_vm0, %v7292_v29 }
 0xeb7   : > { %v5758_v53 = vpop.f32.mrf.mxu2 }
 0xeb8   : > { %5776 = vmatpush.msra.mxu2 %v5758_v53  ;;  %v7300_v53 = vld [vmem:[%s11478_s2 + $0x40] sm:$0xff] }
 0xeb9   : > { %7095 = vmatmul.msk.f32.vlgmr.msra.gmra.mxu2 %vm456_vm0, %v7292_v29  ;;  %v7299_v29 = vld [vmem:[%s11478_s2 + $0x38] sm:$0xff] }
 0xebd   : > { %6987 = vmatmul.msk.f32.gmra.mxu0 %vm456_vm0, %v7293_v58 }
 0xec1   : > { %7096 = vmatmul.msk.f32.gmra.mxu2 %vm456_vm0, %v7293_v58  ;;  %v7301_v58 = vld [vmem:[%s11478_s2 + $0x48] sm:$0xff] }
 0xec5   : > { %6988 = vmatmul.msk.f32.gmra.mxu0 %vm456_vm0, %v7294_v32 }
 0xec9   : > { %7097 = vmatmul.msk.f32.gmra.mxu2 %vm456_vm0, %v7294_v32  ;;  %v7302_v32 = vld [vmem:[%s11478_s2 + $0x50] sm:$0xff] }
 0xecd   : > { %6989 = vmatmul.msk.f32.gmra.mxu0 %vm456_vm0, %v7295_v22 }
 0xed1   : > { %7098 = vmatmul.msk.f32.gmra.mxu2 %vm456_vm0, %v7295_v22  ;;  %v7303_v22 = vld [vmem:[%s11478_s2 + $0x58] sm:$0xff] }
 0xed5   : > { %6990 = vmatmul.msk.f32.gmra.mxu0 %vm456_vm0, %v7296_v52 }
 0xed9   : > { %7099 = vmatmul.msk.f32.gmra.mxu2 %vm456_vm0, %v7296_v52  ;;  %v7053_v52 = vld [vmem:[%s11287_s7 + $0x98] sm:$0xff] }
 0xeda   : > { %5628 = vmatpush.msra.mxu3 %v7053_v52  ;;  %v10813_v52 = vld [vmem:[%s11288_s8 + $0x8] ss:$0 sm:$0xff] }
 0xedd   : > { %6991 = vmatmul.msk.f32.gmra.mxu0 %vm456_vm0, %v7297_v9 }
 0xee1   : > { %7100 = vmatmul.msk.f32.gmra.mxu2 %vm456_vm0, %v7297_v9  ;;  %v7052_v9 = vld [vmem:[%s11287_s7 + $0x90] sm:$0xff] }
 0xee2   : > { %5629 = vmatpush.msra.mxu3 %v7052_v9 }
 0xee5   : > { %6992 = vmatmul.msk.f32.gmra.mxu0 %vm456_vm0, %v7298_v30 }
 0xee9   : > { %7101 = vmatmul.msk.f32.gmra.mxu2 %vm456_vm0, %v7298_v30  ;;  %v7304_v30 = vld [vmem:[%s11478_s2 + $0x60] sm:$0xff] }
 0xeed   : > { %6993 = vmatmul.msk.f32.gmra.mxu0 %vm456_vm0, %v7299_v29 }
 0xef1   : > { %7102 = vmatmul.msk.f32.gmra.mxu2 %vm456_vm0, %v7299_v29  ;;  %v7051_v29 = vld [vmem:[%s11287_s7 + $0x88] sm:$0xff] }
 0xef2   : > { %5630 = vmatpush.msra.mxu3 %v7051_v29 }
 0xef5   : > { %6994 = vmatmul.msk.f32.gmra.mxu0 %vm456_vm0, %v7300_v53 }
 0xef9   : > { %7103 = vmatmul.msk.f32.gmra.mxu2 %vm456_vm0, %v7300_v53  ;;  %v7050_v53 = vld [vmem:[%s11287_s7 + $0x80] sm:$0xff] }
 0xefa   : > { %5631 = vmatpush.msra.mxu3 %v7050_v53  ;;  %v7308_v53 = vld [vmem:[%s11478_s2 + $0x80] sm:$0xff] }
 0xefd   : > { %6995 = vmatmul.msk.f32.gmra.mxu0 %vm456_vm0, %v7301_v58 }
 0xf01   : > { %7104 = vmatmul.msk.f32.gmra.mxu2 %vm456_vm0, %v7301_v58  ;;  %v7305_v58 = vld [vmem:[%s11478_s2 + $0x68] sm:$0xff] }
 0xf05   : > { %6996 = vmatmul.msk.f32.gmra.mxu0 %vm456_vm0, %v7302_v32 }
 0xf09   : > { %7105 = vmatmul.msk.f32.gmra.mxu2 %vm456_vm0, %v7302_v32  ;;  %v7306_v32 = vld [vmem:[%s11478_s2 + $0x70] sm:$0xff] }
 0xf0d   : > { %6997 = vmatmul.msk.f32.gmra.mxu0 %vm456_vm0, %v7303_v22 }
 0xf11   : > { %7106 = vmatmul.msk.f32.gmra.mxu2 %vm456_vm0, %v7303_v22  ;;  %v7307_v22 = vld [vmem:[%s11478_s2 + $0x78] sm:$0xff] }
 0xf15   : > { %6998 = vmatmul.msk.f32.gmra.mxu0 %vm456_vm0, %v7304_v30 }
 0xf19   : > { %7107 = vmatmul.msk.f32.gmra.mxu2 %vm456_vm0, %v7304_v30 }
 0xf1d   : > { %6999 = vmatmul.msk.f32.gmra.mxu0 %vm456_vm0, %v7305_v58 }
 0xf21   : > { %7108 = vmatmul.msk.f32.gmra.mxu2 %vm456_vm0, %v7305_v58 }
 0xf25   : > { %7000 = vmatmul.msk.f32.gmra.mxu0 %vm456_vm0, %v7306_v32 }
 0xf29   : > { %7109 = vmatmul.msk.f32.gmra.mxu2 %vm456_vm0, %v7306_v32 }
 0xf2d   : > { %7001 = vmatmul.msk.f32.gmra.mxu0 %vm456_vm0, %v7307_v22 }
 0xf31   : > { %7110 = vmatmul.msk.f32.gmra.mxu2 %vm456_vm0, %v7307_v22 }
 0xf32   : > { %v5144_v9 = vpop.f32.mrf.mxu0 }
 0xf33   : > { %v5354_v30 = vadd.f32 %v10590_v46, %v5144_v9  ;;  %v7309_v46 = vld [vmem:[%s11478_s2 + $0x88] sm:$0xff] }
 0xf35   : > { %v5450_v29 = vadd.f32 %v10813_v52, %v5354_v30  ;;  %7002 = vmatmul.msk.f32.gmra.mxu0 %vm456_vm0, %v7308_v53 }
 0xf37   : > { %v5482_v58 = vmax.f32 %v5450_v29, 0.0 }
 0xf39   : > { %7054 = vmatmul.msk.f32.vlgmr.msra.gmra.mxu3 %vm956_vm2, %v5482_v58  ;;  %7111 = vmatmul.msk.f32.gmra.mxu2 %vm456_vm0, %v7308_v53  ;;  %v5377_v53 = vpop.f32.mrf.mxu1 }
 0xf3a   : > { %v5147_v32 = vpop.f32.mrf.mxu0 }
 0xf3b   : > { %v5357_v56 = vadd.f32 %v10598_v28, %v5147_v32  ;;  %v7310_v28 = vld [vmem:[%s11478_s2 + $0x90] sm:$0xff] }
 0xf3d   : > { %v5451_v22 = vadd.f32 %v10813_v52, %v5357_v56  ;;  %7003 = vmatmul.msk.f32.gmra.mxu0 %vm456_vm0, %v7309_v46 }
 0xf3f   : > { %v5483_v9 = vmax.f32 %v5451_v22, 0.0 }
 0xf41   : > { %7055 = vmatmul.msk.f32.gmra.mxu3 %vm956_vm2, %v5483_v9  ;;  %7112 = vmatmul.msk.f32.gmra.mxu2 %vm456_vm0, %v7309_v46  ;;  %v5380_v9 = vpop.f32.mrf.mxu1 }
 0xf42   : > { %v5150_v30 = vpop.f32.mrf.mxu0 }
 0xf43   : > { %v5360_v29 = vadd.f32 %v10608_v43, %v5150_v30  ;;  %v7311_v43 = vld [vmem:[%s11478_s2 + $0x98] sm:$0xff] }
 0xf45   : > { %v5452_v58 = vadd.f32 %v10813_v52, %v5360_v29  ;;  %7004 = vmatmul.msk.f32.gmra.mxu0 %vm456_vm0, %v7310_v28 }
 0xf47   : > { %v5484_v56 = vmax.f32 %v5452_v58, 0.0 }
 0xf49   : > { %7056 = vmatmul.msk.f32.gmra.mxu3 %vm956_vm2, %v5484_v56  ;;  %7113 = vmatmul.msk.f32.gmra.mxu2 %vm456_vm0, %v7310_v28 }
 0xf4a   : > { %v5153_v32 = vpop.f32.mrf.mxu0 }
 0xf4b   : > { %v5363_v22 = vadd.f32 %v10617_v44, %v5153_v32  ;;  %v7312_v44 = vld [vmem:[%s11478_s2 + $0xa0] sm:$0xff]  ;;  %v5383_v32 = vpop.f32.mrf.mxu1 }
 0xf4d   : > { %v5453_v46 = vadd.f32 %v10813_v52, %v5363_v22  ;;  %7005 = vmatmul.msk.f32.gmra.mxu0 %vm456_vm0, %v7311_v43 }
 0xf4f   : > { %v5485_v30 = vmax.f32 %v5453_v46, 0.0 }
 0xf51   : > { %7057 = vmatmul.msk.f32.gmra.mxu3 %vm956_vm2, %v5485_v30  ;;  %7114 = vmatmul.msk.f32.gmra.mxu2 %vm456_vm0, %v7311_v43 }
 0xf52   : > { %v5156_v29 = vpop.f32.mrf.mxu0 }
 0xf53   : > { %v5366_v58 = vadd.f32 %v10628_v60, %v5156_v29  ;;  %v7313_v60 = vld [vmem:[%s11478_s2 + $0xa8] sm:$0xff]  ;;  %v5386_v29 = vpop.f32.mrf.mxu1 }
 0xf55   : > { %v5454_v28 = vadd.f32 %v10813_v52, %v5366_v58  ;;  %7006 = vmatmul.msk.f32.gmra.mxu0 %vm456_vm0, %v7312_v44 }
 0xf57   : > { %v5486_v56 = vmax.f32 %v5454_v28, 0.0 }
 0xf59   : > { %7058 = vmatmul.msk.f32.gmra.mxu3 %vm956_vm2, %v5486_v56  ;;  %7115 = vmatmul.msk.f32.gmra.mxu2 %vm456_vm0, %v7312_v44 }
 0xf5a   : > { %v5159_v22 = vpop.f32.mrf.mxu0 }
 0xf5b   : > { %v5369_v46 = vadd.f32 %v10636_v45, %v5159_v22  ;;  %v7314_v45 = vld [vmem:[%s11478_s2 + $0xb0] sm:$0xff] }
 0xf5d   : > { %v5455_v43 = vadd.f32 %v10813_v52, %v5369_v46  ;;  %7007 = vmatmul.msk.f32.gmra.mxu0 %vm456_vm0, %v7313_v60 }
 0xf5f   : > { %v5487_v30 = vmax.f32 %v5455_v43, 0.0  ;;  %v5389_v43 = vpop.f32.mrf.mxu1 }
 0xf61   : > { %7059 = vmatmul.msk.f32.gmra.mxu3 %vm956_vm2, %v5487_v30  ;;  %7116 = vmatmul.msk.f32.gmra.mxu2 %vm456_vm0, %v7313_v60 }
 0xf62   : > { %v5162_v58 = vpop.f32.mrf.mxu0 }
 0xf63   : > { %v5372_v28 = vadd.f32 %v10646_v37, %v5162_v58  ;;  %v7315_v37 = vld [vmem:[%s11478_s2 + $0xb8] sm:$0xff] }
 0xf65   : > { %v5456_v44 = vadd.f32 %v10813_v52, %v5372_v28  ;;  %7008 = vmatmul.msk.f32.gmra.mxu0 %vm456_vm0, %v7314_v45 }
 0xf67   : > { %v5488_v56 = vmax.f32 %v5456_v44, 0.0 }
 0xf69   : > { %7060 = vmatmul.msk.f32.gmra.mxu3 %vm956_vm2, %v5488_v56  ;;  %7117 = vmatmul.msk.f32.gmra.mxu2 %vm456_vm0, %v7314_v45  ;;  %v5392_v45 = vpop.f32.mrf.mxu1 }
 0xf6a   : > { %v5165_v22 = vpop.f32.mrf.mxu0 }
 0xf6b   : > { %v5375_v46 = vadd.f32 %v10657_v41, %v5165_v22  ;;  %v10884_v41 = vld [vmem:[%s11478_s2 + $0xc0] sm:$0xff] }
 0xf6d   : > { %v5457_v60 = vadd.f32 %v10813_v52, %v5375_v46  ;;  %7009 = vmatmul.msk.f32.gmra.mxu0 %vm456_vm0, %v7315_v37 }
 0xf6f   : > { %v5489_v30 = vmax.f32 %v5457_v60, 0.0 }
 0xf71   : > { %7061 = vmatmul.msk.f32.gmra.mxu3 %vm956_vm2, %v5489_v30  ;;  %7118 = vmatmul.msk.f32.gmra.mxu2 %vm456_vm0, %v7315_v37  ;;  %v5395_v30 = vpop.f32.mrf.mxu1 }
 0xf72   : > { %v5168_v58 = vpop.f32.mrf.mxu0 }
 0xf73   : > { %v5378_v28 = vadd.f32 %v5377_v53, %v5168_v58  ;;  %v10893_v53 = vld [vmem:[%s11478_s2 + $0xc8] sm:$0xff] }
 0xf75   : > { %v5458_v44 = vadd.f32 %v10813_v52, %v5378_v28  ;;  %7010 = vmatmul.msk.f32.gmra.mxu0 %vm456_vm0, %v10884_v41 }
 0xf77   : > { %v5490_v56 = vmax.f32 %v5458_v44, 0.0 }
 0xf79   : > { %7062 = vmatmul.msk.f32.gmra.mxu3 %vm956_vm2, %v5490_v56 }
 0xf7a   : > { %v5171_v22 = vpop.f32.mrf.mxu0 }
 0xf7b   : > { %v5381_v46 = vadd.f32 %v5380_v9, %v5171_v22  ;;  %v10902_v9 = vld [vmem:[%s11478_s2 + $0xd0] sm:$0xff]  ;;  %v5398_v22 = vpop.f32.mrf.mxu1 }
 0xf7d   : > { %v5459_v60 = vadd.f32 %v10813_v52, %v5381_v46  ;;  %7011 = vmatmul.msk.f32.gmra.mxu0 %vm456_vm0, %v10893_v53 }
 0xf7f   : > { %v5491_v37 = vmax.f32 %v5459_v60, 0.0 }
 0xf81   : > { %7063 = vmatmul.msk.f32.gmra.mxu3 %vm956_vm2, %v5491_v37 }
 0xf82   : > { %v5174_v58 = vpop.f32.mrf.mxu0 }
 0xf83   : > { %v5384_v28 = vadd.f32 %v5383_v32, %v5174_v58  ;;  %v10911_v32 = vld [vmem:[%s11478_s2 + $0xd8] sm:$0xff] }
 0xf84   : > { %v7089_v58 = vld [vmem:[%s11286_s6 + $0x118] sm:$0xff] }
 0xf85   : > { %v5460_v44 = vadd.f32 %v10813_v52, %v5384_v28  ;;  %7012 = vmatmul.msk.f32.gmra.mxu0 %vm456_vm0, %v10902_v9 }
 0xf86   : > { %5982 = vmatpush.msrb.mxu0 %v7089_v58  ;;  %v5401_v58 = vpop.f32.mrf.mxu1 }
 0xf87   : > { %v5492_v56 = vmax.f32 %v5460_v44, 0.0  ;;  %v7087_v44 = vld [vmem:[%s11286_s6 + $0x108] sm:$0xff] }
 0xf89   : > { %7064 = vmatmul.msk.f32.gmra.mxu3 %vm956_vm2, %v5492_v56 }
 0xf8a   : > { %v5177_v46 = vpop.f32.mrf.mxu0 }
 0xf8b   : > { %v5387_v60 = vadd.f32 %v5386_v29, %v5177_v46  ;;  %v7088_v29 = vld [vmem:[%s11286_s6 + $0x110] sm:$0xff] }
 0xf8c   : > { %5983 = vmatpush.msrb.mxu0 %v7088_v29  ;;  %v10932_v29 = vld [vmem:[%s11478_s2 + $0xe0] sm:$0xff] }
 0xf8d   : > { %v5461_v37 = vadd.f32 %v10813_v52, %v5387_v60  ;;  %7013 = vmatmul.msk.f32.gmra.mxu0 %vm456_vm0, %v10911_v32  ;;  %v7086_v60 = vld [vmem:[%s11286_s6 + $0x100] sm:$0xff] }
 0xf8e   : > { %5984 = vmatpush.msrb.mxu0 %v7087_v44 }
 0xf8f   : > { %v5493_v28 = vmax.f32 %v5461_v37, 0.0 }
 0xf90   : > { %5985 = vmatpush.msrb.mxu0 %v7086_v60  ;;  %v10941_v60 = vld [vmem:[%s11478_s2 + $0xe8] sm:$0xff] }
 0xf91   : > { %7065 = vmatmul.msk.f32.gmra.mxu3 %vm956_vm2, %v5493_v28 }
 0xf92   : > { %v5180_v56 = vpop.f32.mrf.mxu0 }
 0xf93   : > { %v5390_v46 = vadd.f32 %v5389_v43, %v5180_v56 }
 0xf95   : > { %v5462_v37 = vadd.f32 %v10813_v52, %v5390_v46  ;;  %7014 = vmatmul.msk.f32.gmra.mxu0 %vm456_vm0, %v10932_v29  ;;  %v5404_v46 = vpop.f32.mrf.mxu1 }
 0xf97   : > { %v5494_v28 = vmax.f32 %v5462_v37, 0.0 }
 0xf99   : > { %7066 = vmatmul.msk.f32.gmra.mxu3 %vm956_vm2, %v5494_v28 }
 0xf9a   : > { %v5183_v43 = vpop.f32.mrf.mxu0 }
 0xf9b   : > { %v5393_v44 = vadd.f32 %v5392_v45, %v5183_v43  ;;  %v10950_v45 = vld [vmem:[%s11478_s2 + $0xf0] sm:$0xff] }
 0xf9d   : > { %v5463_v56 = vadd.f32 %v10813_v52, %v5393_v44  ;;  %7015 = vmatmul.msk.f32.gmra.mxu0 %vm456_vm0, %v10941_v60  ;;  %v5407_v44 = vpop.f32.mrf.mxu1 }
 0xf9f   : > { %v5495_v0 = vmax.f32 %v5463_v56, 0.0 }
 0xfa1   : > { %7067 = vmatmul.msk.f32.gmra.mxu3 %vm956_vm2, %v5495_v0 }
 0xfa2   : > { %v5186_v25 = vpop.f32.mrf.mxu0 }
 0xfa3   : > { %v5396_v37 = vadd.f32 %v5395_v30, %v5186_v25  ;;  %v10959_v25 = vld [vmem:[%s11478_s2 + $0xf8] sm:$0xff]  ;;  %s7342_s2 = scalar_lea.hbm %s7341_s21, 8 }
 0xfa4   : > { %p7343_p11 = scmp.ne.s32.totalorder %s7341_s21, %s7342_s2  ;;  %p7348_p1 = scmp.lt.s32.totalorder %s7346_s16, %s7342_s2 }
 0xfa5   : > { %v5464_v28 = vadd.f32 %v10813_v52, %v5396_v37  ;;  %7016 = vmatmul.msk.f32.gmra.mxu0 %vm456_vm0, %v10950_v45  ;;  %v5410_v37 = vpop.f32.mrf.mxu1 }
 0xfa6   : > { %p7344_p12 = pnand %p7343_p11, %p7489_p5  ;;  %p7349_p2 = por %p7348_p1, %p7347_p0 }
 0xfa7   : > { %v5496_v43 = vmax.f32 %v5464_v28, 0.0 }
 0xfa8   : > { %p7345_p13 = pneg %p7344_p12 }
 0xfa9   : > { %7068 = vmatmul.msk.f32.gmra.mxu3 %vm956_vm2, %v5496_v43 }
 0xfaa   : > { %v5189_v62 = vpop.f32.mrf.mxu0  ;;  %p7350_p3 = pnand %p7349_p2, %p7345_p13 }
 0xfab   : > { %v5399_v56 = vadd.f32 %v5398_v22, %v5189_v62 }
 0xfad   : > { %v5465_v0 = vadd.f32 %v10813_v52, %v5399_v56  ;;  %7017 = vmatmul.msk.f32.gmra.mxu0 %vm456_vm0, %v10959_v25  ;;  %v5413_v51 = vpop.f32.mrf.mxu1 }
 0xfaf   : > { %v5497_v30 = vmax.f32 %v5465_v0, 0.0 }
 0xfb1   : > { %7069 = vmatmul.msk.f32.gmra.mxu3 %vm956_vm2, %v5497_v30 }
 0xfb2   : > { %v5192_v28 = vpop.f32.mrf.mxu0 }
 0xfb3   : > { %v5402_v11 = vadd.f32 %v5401_v58, %v5192_v28 }
 0xfb5   : > { %v5466_v43 = vadd.f32 %v10813_v52, %v5402_v11  ;;  %7127 = vmatmul.msk.f32.vlgmr.msrb.gmra.mxu0 %vm956_vm2, %v10345_v23  ;;  %v5416_v23 = vpop.f32.mrf.mxu1 }
 0xfb7   : > { %v5498_v62 = vmax.f32 %v5466_v43, 0.0 }
 0xfb9   : > { %7070 = vmatmul.msk.f32.gmra.mxu3 %vm956_vm2, %v5498_v62 }
 0xfba   : > { %v5195_v22 = vpop.f32.mrf.mxu0 }
 0xfbb   : > { %v5405_v56 = vadd.f32 %v5404_v46, %v5195_v22 }
 0xfbd   : > { %v5467_v35 = vadd.f32 %v10813_v52, %v5405_v56  ;;  %7128 = vmatmul.msk.f32.gmra.mxu0 %vm956_vm2, %v10357_v20  ;;  %v5419_v20 = vpop.f32.mrf.mxu1 }
 0xfbf   : > { %v5499_v0 = vmax.f32 %v5467_v35, 0.0 }
 0xfc1   : > { %7071 = vmatmul.msk.f32.gmra.mxu3 %vm956_vm2, %v5499_v0 }
 0xfc2   : > { %v5198_v58 = vpop.f32.mrf.mxu0 }
 0xfc3   : > { %v5408_v30 = vadd.f32 %v5407_v44, %v5198_v58 }
 0xfc5   : > { %v5468_v11 = vadd.f32 %v10813_v52, %v5408_v30  ;;  %7129 = vmatmul.msk.f32.gmra.mxu0 %vm956_vm2, %v10369_v6 }
 0xfc7   : > { %v5500_v28 = vmax.f32 %v5468_v11, 0.0 }
 0xfc9   : > { %7072 = vmatmul.msk.f32.gmra.mxu3 %vm956_vm2, %v5500_v28 }
 0xfca   : > { %v5201_v46 = vpop.f32.mrf.mxu0 }
 0xfcb   : > { %v5411_v43 = vadd.f32 %v5410_v37, %v5201_v46  ;;  %v5422_v37 = vpop.f32.mrf.mxu1 }
 0xfcd   : > { %v5469_v62 = vadd.f32 %v10813_v52, %v5411_v43  ;;  %7130 = vmatmul.msk.f32.gmra.mxu0 %vm956_vm2, %v10381_v36  ;;  %v10992_v43 = vpop.f32.mrf.mxu3 }
 0xfcf   : > { %v5501_v35 = vmax.f32 %v5469_v62, 0.0 }
 0xfd1   : > { %7073 = vmatmul.msk.f32.gmra.mxu3 %vm956_vm2, %v5501_v35 }
 0xfd2   : > { %v5204_v44 = vpop.f32.mrf.mxu0 }
 0xfd3   : > { %v5414_v22 = vadd.f32 %v5413_v51, %v5204_v44  ;;  %v5425_v28 = vpop.f32.mrf.mxu1 }
 0xfd5   : > { %v5470_v56 = vadd.f32 %v10813_v52, %v5414_v22  ;;  %7131 = vmatmul.msk.f32.gmra.mxu0 %vm956_vm2, %v10391_v19 }
 0xfd7   : > { %v5502_v6 = vmax.f32 %v5470_v56, 0.0  ;;  %v10998_v56 = vpop.f32.mrf.mxu3 }
 0xfd9   : > { %7074 = vmatmul.msk.f32.gmra.mxu3 %vm956_vm2, %v5502_v6 }
 0xfda   : > { %v5207_v0 = vpop.f32.mrf.mxu0 }
 0xfdb   : > { %v5417_v58 = vadd.f32 %v5416_v23, %v5207_v0  ;;  %v5428_v35 = vpop.f32.mrf.mxu1 }
 0xfdd   : > { %v5471_v30 = vadd.f32 %v10813_v52, %v5417_v58  ;;  %7132 = vmatmul.msk.f32.gmra.mxu0 %vm956_vm2, %v10399_v5 }
 0xfdf   : > { %v5503_v36 = vmax.f32 %v5471_v30, 0.0  ;;  %v11007_v30 = vpop.f32.mrf.mxu3 }
 0xfe1   : > { %7075 = vmatmul.msk.f32.gmra.mxu3 %vm956_vm2, %v5503_v36 }
 0xfe2   : > { %v5210_v51 = vpop.f32.mrf.mxu0 }
 0xfe3   : > { %v5420_v11 = vadd.f32 %v5419_v20, %v5210_v51 }
 0xfe5   : > { %v5472_v46 = vadd.f32 %v10813_v52, %v5420_v11  ;;  %7133 = vmatmul.msk.f32.gmra.mxu0 %vm956_vm2, %v10409_v40 }
 0xfe7   : > { %v5504_v19 = vmax.f32 %v5472_v46, 0.0 }
 0xfe9   : > { %7076 = vmatmul.msk.f32.gmra.mxu3 %vm956_vm2, %v5504_v19  ;;  %v11013_v19 = vpop.f32.mrf.mxu3 }
 0xfea   : > { %v5213_v23 = vpop.f32.mrf.mxu0 }
 0xfeb   : > { %v5423_v62 = vadd.f32 %v5422_v37, %v5213_v23  ;;  %v5431_v37 = vpop.f32.mrf.mxu1 }
 0xfed   : > { %v5473_v5 = vadd.f32 %v10813_v52, %v5423_v62  ;;  %7134 = vmatmul.msk.f32.gmra.mxu0 %vm956_vm2, %v10419_v8 }
 0xfef   : > { %v5505_v20 = vmax.f32 %v5473_v5, 0.0 }
 0xff1   : > { %7077 = vmatmul.msk.f32.gmra.mxu3 %vm956_vm2, %v5505_v20  ;;  %v5778_v20 = vpop.f32.mrf.mxu2  ;;  %7119 = vmatmul.msk.f32.gmra.mxu2 %vm456_vm0, %v10884_v41 }
 0xff2   : > { %v5216_v44 = vpop.f32.mrf.mxu0 }
 0xff3   : > { %v5426_v22 = vadd.f32 %v5425_v28, %v5216_v44  ;;  %v5434_v51 = vpop.f32.mrf.mxu1  ;;  %v11022_v44 = vpop.f32.mrf.mxu3 }
 0xff5   : > { %v5474_v40 = vadd.f32 %v10813_v52, %v5426_v22  ;;  %7135 = vmatmul.msk.f32.gmra.mxu0 %vm956_vm2, %v10429_v55 }
 0xff7   : > { %v5506_v6 = vmax.f32 %v5474_v40, 0.0 }
 0xff9   : > { %7078 = vmatmul.msk.f32.gmra.mxu3 %vm956_vm2, %v5506_v6 }
 0xffa   : > { %v5219_v0 = vpop.f32.mrf.mxu0 }
 0xffb   : > { %v5429_v58 = vadd.f32 %v5428_v35, %v5219_v0  ;;  %v5437_v62 = vpop.f32.mrf.mxu1  ;;  %v11030_v41 = vpop.f32.mrf.mxu3 }
 0xffd   : > { %v5475_v8 = vadd.f32 %v10813_v52, %v5429_v58  ;;  %7136 = vmatmul.msk.f32.gmra.mxu0 %vm956_vm2, %v10439_v4 }
 0xfff   : > { %v5507_v36 = vmax.f32 %v5475_v8, 0.0 }
0x1001   : > { %7079 = vmatmul.msk.f32.gmra.mxu3 %vm956_vm2, %v5507_v36 }
0x1002   : > { %v5222_v11 = vpop.f32.mrf.mxu0 }
0x1003   : > { %v5432_v28 = vadd.f32 %v5431_v37, %v5222_v11  ;;  %v5440_v6 = vpop.f32.mrf.mxu1 }
0x1005   : > { %v5476_v55 = vadd.f32 %v10813_v52, %v5432_v28  ;;  %7137 = vmatmul.msk.f32.gmra.mxu0 %vm956_vm2, %v10447_v47 }
0x1007   : > { %v5508_v46 = vmax.f32 %v5476_v55, 0.0  ;;  %v5651_v55 = vpop.f32.mrf.mxu3 }
0x1009   : > { %7080 = vmatmul.msk.f32.gmra.mxu3 %vm956_vm2, %v5508_v46 }
0x100a   : > { %v5225_v23 = vpop.f32.mrf.mxu0 }
0x100b   : > { %v5435_v4 = vadd.f32 %v5434_v51, %v5225_v23  ;;  %v5443_v51 = vpop.f32.mrf.mxu1 }
0x100d   : > { %v5477_v5 = vadd.f32 %v10813_v52, %v5435_v4  ;;  %7138 = vmatmul.msk.f32.gmra.mxu0 %vm956_vm2, %v10457_v57  ;;  %v5781_v57 = vpop.f32.mrf.mxu2  ;;  %7120 = vmatmul.msk.f32.gmra.mxu2 %vm456_vm0, %v10893_v53 }
0x100f   : > { %v5509_v35 = vmax.f32 %v5477_v5, 0.0 }
0x1011   : > { %7081 = vmatmul.msk.f32.gmra.mxu3 %vm956_vm2, %v5509_v35  ;;  %v5654_v35 = vpop.f32.mrf.mxu3 }
0x1012   : > { %v5228_v47 = vpop.f32.mrf.mxu0 }
0x1013   : > { %v5438_v22 = vadd.f32 %v5437_v62, %v5228_v47  ;;  %v5446_v23 = vpop.f32.mrf.mxu1 }
0x1015   : > { %v5478_v40 = vadd.f32 %v10813_v52, %v5438_v22  ;;  %7139 = vmatmul.msk.f32.gmra.mxu0 %vm956_vm2, %v10467_v16  ;;  %v5784_v16 = vpop.f32.mrf.mxu2  ;;  %7121 = vmatmul.msk.f32.gmra.mxu2 %vm456_vm0, %v10902_v9 }
0x1017   : > { %v5510_v37 = vmax.f32 %v5478_v40, 0.0 }
0x1019   : > { %7082 = vmatmul.msk.f32.gmra.mxu3 %vm956_vm2, %v5510_v37 }
0x101a   : > { %v5231_v0 = vpop.f32.mrf.mxu0 }
0x101b   : > { %v5441_v58 = vadd.f32 %v5440_v6, %v5231_v0 }
0x101d   : > { %v5479_v8 = vadd.f32 %v10813_v52, %v5441_v58  ;;  %7140 = vmatmul.msk.f32.gmra.mxu0 %vm956_vm2, %v10477_v38  ;;  %v5787_v38 = vpop.f32.mrf.mxu2  ;;  %7122 = vmatmul.msk.f32.gmra.mxu2 %vm456_vm0, %v10911_v32 }
0x101f   : > { %v5511_v36 = vmax.f32 %v5479_v8, 0.0 }
0x1021   : > { %7083 = vmatmul.msk.f32.gmra.mxu3 %vm956_vm2, %v5511_v36 }
0x1022   : > { %v5234_v11 = vpop.f32.mrf.mxu0 }
0x1023   : > { %v5444_v28 = vadd.f32 %v5443_v51, %v5234_v11 }
0x1025   : > { %v5480_v53 = vadd.f32 %v10813_v52, %v5444_v28  ;;  %7141 = vmatmul.msk.f32.gmra.mxu0 %vm956_vm2, %v10487_v49  ;;  %v11050_v49 = vld [vmem:[%s11288_s8 + $0x9] ss:$0 sm:$0xff]  ;;  %v5790_v47 = vpop.f32.mrf.mxu2  ;;  %7123 = vmatmul.msk.f32.gmra.mxu2 %vm456_vm0, %v10932_v29 }
0x1026   : > { %v5637_v37 = vadd.f32 %v11050_v49, %v10998_v56 }
0x1027   : > { %v5512_v46 = vmax.f32 %v5480_v53, 0.0 }
0x1029   : > { %7084 = vmatmul.msk.f32.gmra.mxu3 %vm956_vm2, %v5512_v46 }
0x102a   : > { %v5237_v4 = vpop.f32.mrf.mxu0 }
0x102b   : > { %v5447_v62 = vadd.f32 %v5446_v23, %v5237_v4 }
0x102d   : > { %v5481_v9 = vadd.f32 %v10813_v52, %v5447_v62  ;;  %7142 = vmatmul.msk.f32.gmra.mxu0 %vm956_vm2, %v10495_v34  ;;  %v5634_v52 = vadd.f32 %v11050_v49, %v10992_v43  ;;  %v5793_v34 = vpop.f32.mrf.mxu2  ;;  %7124 = vmatmul.msk.f32.gmra.mxu2 %vm456_vm0, %v10941_v60  ;;  %v11069_v43 = vpop.f32.mrf.mxu3  ;;  %v5640_v60 = vadd.f32 %v11050_v49, %v11007_v30 }
0x102e   : > { %v5652_v62 = vadd.f32 %v11050_v49, %v5651_v55 }
0x102f   : > { %v5513_v5 = vmax.f32 %v5481_v9, 0.0 }
0x1031   : > { %7085 = vmatmul.msk.f32.gmra.mxu3 %vm956_vm2, %v5513_v5 }
0x1032   : > { %v5987_v32 = vpop.f32.mrf.mxu0 }
0x1033   : > { %v5988_v22 = vadd.f32 %v5987_v32, %v5778_v20  ;;  %v5655_v32 = vadd.f32 %v11050_v49, %v5654_v35 }
0x1035   : > { %v11057_v40 = vadd.f32 %v5988_v22, %v5634_v52  ;;  %7143 = vmatmul.msk.f32.gmra.mxu0 %vm956_vm2, %v10509_v21  ;;  %v5796_v20 = vpop.f32.mrf.mxu2  ;;  %7125 = vmatmul.msk.f32.gmra.mxu2 %vm456_vm0, %v10950_v45  ;;  %v11083_v36 = vpop.f32.mrf.mxu3 }
0x103a   : > { %v5990_v6 = vpop.f32.mrf.mxu0 }
0x103b   : > { %v5991_v0 = vadd.f32 %v5990_v6, %v5781_v57  ;;  %v5643_v57 = vadd.f32 %v11050_v49, %v11013_v19 }
0x103d   : > { %v11065_v29 = vadd.f32 %v5991_v0, %v5637_v37  ;;  %7144 = vmatmul.msk.f32.gmra.mxu0 %vm956_vm2, %v10525_v14  ;;  %v5799_v56 = vpop.f32.mrf.mxu2  ;;  %7126 = vmatmul.msk.f32.gmra.mxu2 %vm456_vm0, %v10959_v25  ;;  %v11093_v25 = vpop.f32.mrf.mxu3 }
0x1042   : > { %v5993_v21 = vpop.f32.mrf.mxu0 }
0x1043   : > { %v5994_v58 = vadd.f32 %v5993_v21, %v5784_v16 }
0x1045   : > { %v11075_v8 = vadd.f32 %v5994_v58, %v5640_v60  ;;  %7145 = vmatmul.msk.f32.gmra.mxu0 %vm956_vm2, %v10541_v12  ;;  %v11089_v30 = vpop.f32.mrf.mxu2  ;;  %v5646_v12 = vadd.f32 %v11050_v49, %v11022_v44  ;;  %v5666_v44 = vpop.f32.mrf.mxu3 }
0x104a   : > { %v5996_v14 = vpop.f32.mrf.mxu0 }
0x104b   : > { %v5997_v45 = vadd.f32 %v5996_v14, %v5787_v38 }
0x104d   : > { %v11085_v51 = vadd.f32 %v5997_v45, %v5643_v57  ;;  %7146 = vmatmul.msk.f32.gmra.mxu0 %vm956_vm2, %v10557_v31  ;;  %v11099_v19 = vpop.f32.mrf.mxu2  ;;  %v5649_v31 = vadd.f32 %v11050_v49, %v11030_v41 }
0x1052   : > { %v5999_v16 = vpop.f32.mrf.mxu0 }
0x1053   : > { %v6000_v11 = vadd.f32 %v5999_v16, %v5790_v47 }
0x1055   : > { %v11095_v28 = vadd.f32 %v6000_v11, %v5646_v12  ;;  %7147 = vmatmul.msk.f32.gmra.mxu0 %vm956_vm2, %v10568_v17  ;;  %v5808_v23 = vpop.f32.mrf.mxu2  ;;  %v5669_v17 = vpop.f32.mrf.mxu3 }
0x105a   : > { %v6002_v53 = vpop.f32.mrf.mxu0 }
0x105b   : > { %v6003_v46 = vadd.f32 %v6002_v53, %v5793_v34 }
0x105d   : > { %v11103_v38 = vadd.f32 %v6003_v46, %v5649_v31  ;;  %7148 = vmatmul.msk.f32.gmra.mxu0 %vm956_vm2, %v10576_v18  ;;  %v5811_v47 = vpop.f32.mrf.mxu2  ;;  %v5672_v55 = vpop.f32.mrf.mxu3 }
0x105e   : > { %v5673_v31 = vadd.f32 %v11050_v49, %v5672_v55  ;;  %v5664_v55 = vadd.f32 %v11050_v49, %v11093_v25 }
0x1062   : > { %v6005_v4 = vpop.f32.mrf.mxu0 }
0x1063   : > { %v6006_v9 = vadd.f32 %v6005_v4, %v5796_v20 }
0x1065   : > { %v11108_v5 = vadd.f32 %v6006_v9, %v5652_v62  ;;  %7149 = vmatmul.msk.f32.gmra.mxu0 %vm956_vm2, %v10584_v42  ;;  %v5814_v18 = vpop.f32.mrf.mxu2  ;;  %v5675_v42 = vpop.f32.mrf.mxu3 }
0x1066   : > { %v5676_v12 = vadd.f32 %v11050_v49, %v5675_v42  ;;  %v5667_v42 = vadd.f32 %v11050_v49, %v5666_v44  ;;  %v5661_v44 = vadd.f32 %v11050_v49, %v11083_v36 }
0x106a   : > { %v6008_v41 = vpop.f32.mrf.mxu0 }
0x106b   : > { %v6009_v52 = vadd.f32 %v6008_v41, %v5799_v56 }
0x106d   : > { %v11113_v22 = vadd.f32 %v6009_v52, %v5655_v32  ;;  %7150 = vmatmul.msk.f32.gmra.mxu0 %vm956_vm2, %v10592_v7  ;;  %v5817_v6 = vpop.f32.mrf.mxu2  ;;  %v5678_v20 = vpop.f32.mrf.mxu3 }
0x106e   : > { %v5679_v11 = vadd.f32 %v11050_v49, %v5678_v20 }
0x1072   : > { %v6011_v34 = vpop.f32.mrf.mxu0 }
0x1075   : > { %7151 = vmatmul.msk.f32.gmra.mxu0 %vm956_vm2, %v10600_v63  ;;  %v5820_v0 = vpop.f32.mrf.mxu2  ;;  %v5681_v60 = vpop.f32.mrf.mxu3 }
0x107a   : > { %v6014_v37 = vpop.f32.mrf.mxu0 }
0x107d   : > { %7152 = vmatmul.msk.f32.gmra.mxu0 %vm956_vm2, %v10606_v54  ;;  %v5823_v21 = vpop.f32.mrf.mxu2  ;;  %v5684_v14 = vpop.f32.mrf.mxu3 }
0x1082   : > { %v6017_v35 = vpop.f32.mrf.mxu0 }
0x1085   : > { %7153 = vmatmul.msk.f32.gmra.mxu0 %vm956_vm2, %v10614_v33  ;;  %v5826_v63 = vpop.f32.mrf.mxu2  ;;  %v5687_v33 = vpop.f32.mrf.mxu3 }
0x108a   : > { %v6020_v7 = vpop.f32.mrf.mxu0 }
0x108b   : > { %v6021_v9 = vadd.f32 %v6020_v7, %v5811_v47  ;;  %v5658_v7 = vadd.f32 %v11050_v49, %v11069_v43  ;;  %v11591_v43 = vld [vmem:[#allocation23_spill] sm:$0xff] }
0x108d   : > { %7154 = vmatmul.msk.f32.gmra.mxu0 %vm956_vm2, %v10622_v24  ;;  %v5829_v54 = vpop.f32.mrf.mxu2  ;;  %v6094_v47 = vadd.f32 %v6021_v9, %v5667_v42  ;;  %v11595_v9 = vld [vmem:[#allocation39_spill] sm:$0xff] }
0x1092   : > { %v6023_v58 = vpop.f32.mrf.mxu0 }
0x1093   : > { %v6024_v46 = vadd.f32 %v6023_v58, %v5814_v18  ;;  %v11589_v58 = vld [vmem:[#allocation18_spill] sm:$0xff] }
0x1095   : > { %7155 = vmatmul.msk.f32.gmra.mxu0 %vm956_vm2, %v10630_v3  ;;  %v5832_v45 = vpop.f32.mrf.mxu2 }
0x109a   : > { %v6026_v56 = vpop.f32.mrf.mxu0 }
0x109b   : > { %v6027_v53 = vadd.f32 %v6026_v56, %v5817_v6  ;;  %v6018_v6 = vadd.f32 %v6017_v35, %v5808_v23  ;;  %v6012_v23 = vadd.f32 %v6011_v34, %v11089_v30  ;;  %v5685_v34 = vadd.f32 %v11050_v49, %v5684_v14 }
0x109c   : > { %v5688_v14 = vadd.f32 %v11050_v49, %v5687_v33 }
0x109d   : > { %7156 = vmatmul.msk.f32.gmra.mxu0 %vm956_vm2, %v10638_v1  ;;  %v5670_v1 = vadd.f32 %v11050_v49, %v5669_v17  ;;  %v6096_v41 = vadd.f32 %v6027_v53, %v5673_v31  ;;  %v5835_v52 = vpop.f32.mrf.mxu2  ;;  %v6015_v17 = vadd.f32 %v6014_v37, %v11099_v19  ;;  %v6093_v35 = vadd.f32 %v6018_v6, %v5664_v55 }
0x109e   : > { %v6126_v37 = vmul.f32 %v6094_v47, %v11569_v61  ;;  %v11592_v61 = vld [vmem:[#allocation26_spill] sm:$0xff] }
0x109f   : > { %v6092_v19 = vadd.f32 %v6015_v17, %v5661_v44  ;;  %v6125_v36 = vmul.f32 %v6093_v35, %v11589_v58 }
0x10a2   : > { %v6029_v57 = vpop.f32.mrf.mxu0 }
0x10a3   : > { %v6030_v16 = vadd.f32 %v6029_v57, %v5820_v0  ;;  %v6095_v0 = vadd.f32 %v6024_v46, %v5670_v1  ;;  %v11590_v57 = vld [vmem:[#allocation20_spill] sm:$0xff]  ;;  %v11594_v46 = vld [vmem:[#allocation35_spill] sm:$0xff] }
0x10a5   : > { %7157 = vmatmul.msk.f32.gmra.mxu0 %vm956_vm2, %v10644_v39  ;;  %v6097_v4 = vadd.f32 %v6030_v16, %v5676_v12  ;;  %v5690_v39 = vpop.f32.mrf.mxu3  ;;  %v6127_v25 = vmul.f32 %v6095_v0, %v11568_v48  ;;  %v5838_v30 = vpop.f32.mrf.mxu2  ;;  %v6124_v48 = vmul.f32 %v6092_v19, %v11590_v57  ;;  %v6122_v12 = vmul.f32 %v11113_v22, %v11592_v61 }
0x10a6   : > { %v6119_v22 = vmul.f32 %v11095_v28, %v11595_v9  ;;  %v5691_v42 = vadd.f32 %v11050_v49, %v5690_v39  ;;  %v11599_v28 = vld [vmem:[#allocation46_spill] sm:$0xff] }
0x10a7   : > { %v6129_v18 = vmul.f32 %v6097_v4, %v11566_v13  ;;  %v6120_v4 = vmul.f32 %v11103_v38, %v11594_v46  ;;  %v11598_v38 = vld [vmem:[#allocation45_spill] sm:$0xff] }
0x10a8   : > { %v6116_v0 = vmul.f32 %v11065_v29, %v11598_v38 }
0x10aa   : > { %v6032_v24 = vpop.f32.mrf.mxu0 }
0x10ab   : > { %v6033_v3 = vadd.f32 %v6032_v24, %v5823_v21 }
0x10ad   : > { %v6098_v62 = vadd.f32 %v6033_v3, %v5679_v11  ;;  %7158 = vmatmul.msk.f32.gmra.mxu0 %vm956_vm2, %v10652_v26  ;;  %v5682_v26 = vadd.f32 %v11050_v49, %v5681_v60  ;;  %v5693_v60 = vpop.f32.mrf.mxu3  ;;  %v11593_v11 = vld [vmem:[#allocation28_spill] sm:$0xff] }
0x10ae   : > { %v6121_v53 = vmul.f32 %v11108_v5, %v11593_v11 }
0x10af   : > { %v6130_v32 = vmul.f32 %v6098_v62, %v11565_v2  ;;  %v6128_v2 = vmul.f32 %v6096_v41, %v11567_v10  ;;  %v6091_v10 = vadd.f32 %v6012_v23, %v5658_v7  ;;  %v5841_v62 = vpop.f32.mrf.mxu2  ;;  %v11596_v41 = vld [vmem:[#allocation42_spill] sm:$0xff] }
0x10b0   : > { %v6118_v5 = vmul.f32 %v11085_v51, %v11596_v41 }
0x10b1   : > { %6147 = vmatpush.msra.mxu0 %v6130_v32  ;;  %v6123_v24 = vmul.f32 %v6091_v10, %v11591_v43  ;;  %v11597_v32 = vld [vmem:[#allocation44_spill] sm:$0xff] }
0x10b2   : > { %v6035_v20 = vpop.f32.mrf.mxu0  ;;  %v6117_v33 = vmul.f32 %v11075_v8, %v11597_v32  ;;  %v7324_v8 = vld [vmem:[%s11466_s1] sm:$0xff] }
0x10b3   : > { %v6036_v21 = vadd.f32 %v6035_v20, %v5826_v63  ;;  %6148 = vmatpush.msra.mxu0 %v6129_v18 }
0x10b5   : > { %v11148_v13 = vadd.f32 %v6036_v21, %v5682_v26  ;;  %6149 = vmatpush.msra.mxu0 %v6128_v2  ;;  %v6115_v26 = vmul.f32 %v11057_v40, %v11599_v28 }
0x10b7   : > { %6150 = vmatpush.msra.mxu0 %v6127_v25  ;;  %v5844_v51 = vpop.f32.mrf.mxu2 }
0x10b9   : > { %6151 = vmatpush.msra.mxu0 %v6126_v37 }
0x10ba   : > { %v6038_v63 = vpop.f32.mrf.mxu0 }
0x10bb   : > { %v6039_v56 = vadd.f32 %v6038_v63, %v5829_v54  ;;  %6152 = vmatpush.msra.mxu0 %v6125_v36  ;;  %v5696_v54 = vpop.f32.mrf.mxu3 }
0x10bc   : > { %v5697_v2 = vadd.f32 %v11050_v49, %v5696_v54 }
0x10bd   : > { %v11157_v16 = vadd.f32 %v6039_v56, %v5685_v34  ;;  %6153 = vmatpush.msra.mxu0 %v6124_v48 }
0x10bf   : > { %6154 = vmatpush.msra.mxu0 %v6123_v24  ;;  %v5847_v47 = vpop.f32.mrf.mxu2 }
0x10c1   : > { %6155 = vmatpush.msra.mxu0 %v6122_v12 }
0x10c2   : > { %v6041_v3 = vpop.f32.mrf.mxu0 }
0x10c3   : > { %v6042_v31 = vadd.f32 %v6041_v3, %v5832_v45  ;;  %6156 = vmatpush.msra.mxu0 %v6121_v53  ;;  %v5699_v18 = vpop.f32.mrf.mxu3 }
0x10c4   : > { %v5700_v7 = vadd.f32 %v11050_v49, %v5699_v18 }
0x10c5   : > { %v11167_v1 = vadd.f32 %v6042_v31, %v5688_v14  ;;  %6157 = vmatpush.msra.mxu0 %v6120_v4 }
0x10c7   : > { %6158 = vmatpush.msra.mxu0 %v6119_v22  ;;  %v5850_v25 = vpop.f32.mrf.mxu2 }
0x10c9   : > { %6159 = vmatpush.msra.mxu0 %v6118_v5 }
0x10ca   : > { %v6044_v45 = vpop.f32.mrf.mxu0 }
0x10cb   : > { %v6045_v6 = vadd.f32 %v6044_v45, %v5835_v52  ;;  %6160 = vmatpush.msra.mxu0 %v6117_v33  ;;  %v5694_v52 = vadd.f32 %v11050_v49, %v5693_v60  ;;  %v5702_v29 = vpop.f32.mrf.mxu3 }
0x10cc   : > { %v5703_v10 = vadd.f32 %v11050_v49, %v5702_v29  ;;  %v6191_v29 = vld [vmem:[%s11289_s9 + $0x18] sm:$0xff] }
0x10cd   : > { %v11178_v55 = vadd.f32 %v6045_v6, %v5691_v42  ;;  %6161 = vmatpush.msra.mxu0 %v6116_v0  ;;  %6211 = vmatpush.msra.mxu1 %v6191_v29 }
0x10cf   : > { %6162 = vmatpush.msra.mxu0 %v6115_v26  ;;  %v5853_v63 = vpop.f32.mrf.mxu2 }
0x10d0   : > { %6163 = vmatmul.f32.vlgmr.msra.gmra.mxu0 %v7324_v8 }
0x10d2   : > { %v6047_v39 = vpop.f32.mrf.mxu0 }
0x10d3   : > { %v6048_v20 = vadd.f32 %v6047_v39, %v5838_v30  ;;  %v5705_v23 = vpop.f32.mrf.mxu3 }
0x10d4   : > { %v5706_v56 = vadd.f32 %v11050_v49, %v5705_v23 }
0x10d5   : > { %v11186_v17 = vadd.f32 %v6048_v20, %v5694_v52 }
0x10d7   : > { %v5856_v24 = vpop.f32.mrf.mxu2 }
0x10da   : > { %v6050_v21 = vpop.f32.mrf.mxu0 }
0x10db   : > { %v6051_v44 = vadd.f32 %v6050_v21, %v5841_v62  ;;  %v5708_v58 = vpop.f32.mrf.mxu3 }
0x10dd   : > { %v11189_v40 = vadd.f32 %v6051_v44, %v5697_v2 }
0x10df   : > { %v5859_v11 = vpop.f32.mrf.mxu2 }
0x10e2   : > { %v6053_v35 = vpop.f32.mrf.mxu0 }
0x10e3   : > { %v6054_v19 = vadd.f32 %v6053_v35, %v5844_v51  ;;  %v5711_v48 = vpop.f32.mrf.mxu3 }
0x10e4   : > { %v5712_v35 = vadd.f32 %v11050_v49, %v5711_v48 }
0x10e5   : > { %v11192_v37 = vadd.f32 %v6054_v19, %v5700_v7 }
0x10e7   : > { %v5862_v54 = vpop.f32.mrf.mxu2 }
0x10ea   : > { %v6056_v60 = vpop.f32.mrf.mxu0 }
0x10eb   : > { %v6057_v36 = vadd.f32 %v6056_v60, %v5847_v47  ;;  %v5714_v12 = vpop.f32.mrf.mxu3  ;;  %v6190_v47 = vld [vmem:[%s11289_s9 + $0x10] sm:$0xff]  ;;  %v6188_v60 = vld [vmem:[%s11289_s9] sm:$0xff] }
0x10ec   : > { %v5715_v21 = vadd.f32 %v11050_v49, %v5714_v12  ;;  %6212 = vmatpush.msra.mxu1 %v6190_v47 }
0x10ed   : > { %v11195_v30 = vadd.f32 %v6057_v36, %v5703_v10  ;;  %v5709_v10 = vadd.f32 %v11050_v49, %v5708_v58 }
0x10ef   : > { %v5865_v4 = vpop.f32.mrf.mxu2 }
0x10f2   : > { %v6059_v34 = vpop.f32.mrf.mxu0 }
0x10f3   : > { %v6060_v57 = vadd.f32 %v6059_v34, %v5850_v25  ;;  %v5717_v3 = vpop.f32.mrf.mxu3 }
0x10f4   : > { %v5718_v8 = vadd.f32 %v11050_v49, %v5717_v3 }
0x10f5   : > { %v6107_v43 = vadd.f32 %v6060_v57, %v5706_v56  ;;  %v11600_v56 = vld [vmem:[#allocation11_spill] sm:$0xff]  ;;  %v11601_v57 = vld [vmem:[#allocation13_spill] sm:$0xff] }
0x10f7   : > { %v5868_v22 = vpop.f32.mrf.mxu2 }
0x10fa   : > { %v6062_v61 = vpop.f32.mrf.mxu0 }
0x10fb   : > { %v5720_v46 = vpop.f32.mrf.mxu3  ;;  %v6063_v25 = vadd.f32 %v6062_v61, %v5853_v63  ;;  %v11603_v61 = vld [vmem:[#allocation17_spill] sm:$0xff] }
0x10fc   : > { %v5721_v18 = vadd.f32 %v11050_v49, %v5720_v46  ;;  %v6139_v12 = vmul.f32 %v6107_v43, %v11603_v61  ;;  %v11609_v46 = vld [vmem:[#allocation37_spill] sm:$0xff] }
0x10fd   : > { %v6108_v34 = vadd.f32 %v6063_v25, %v5709_v10 }
0x10ff   : > { %v5871_v32 = vpop.f32.mrf.mxu2 }
0x1102   : > { %v6065_v53 = vpop.f32.mrf.mxu0 }
0x1103   : > { %v5723_v9 = vpop.f32.mrf.mxu3  ;;  %v6066_v2 = vadd.f32 %v6065_v53, %v5856_v24  ;;  %v11606_v53 = vld [vmem:[#allocation24_spill] sm:$0xff] }
0x1104   : > { %v5724_v42 = vadd.f32 %v11050_v49, %v5723_v9  ;;  %v6136_v3 = vmul.f32 %v11189_v40, %v11606_v53  ;;  %v11611_v40 = vld [vmem:[#allocation43_spill] sm:$0xff] }
0x110a   : > { %v6068_v14 = vpop.f32.mrf.mxu0 }
0x110b   : > { %v5726_v5 = vpop.f32.mrf.mxu3  ;;  %v6069_v39 = vadd.f32 %v6068_v14, %v5859_v11  ;;  %v11607_v14 = vld [vmem:[#allocation27_spill] sm:$0xff] }
0x110c   : > { %v5727_v6 = vadd.f32 %v11050_v49, %v5726_v5  ;;  %v11604_v49 = vld [vmem:[#allocation19_spill] sm:$0xff] }
0x110d   : > { %v6110_v7 = vadd.f32 %v6069_v39, %v5715_v21  ;;  %v6138_v58 = vmul.f32 %v11195_v30, %v11604_v49  ;;  %v6133_v30 = vmul.f32 %v11167_v1, %v11609_v46 }
0x110f   : > { %v6142_v63 = vmul.f32 %v6110_v7, %v11600_v56 }
0x1112   : > { %v6071_v31 = vpop.f32.mrf.mxu0 }
0x1113   : > { %v6072_v28 = vadd.f32 %v6071_v31, %v5862_v54  ;;  %v6135_v54 = vmul.f32 %v11186_v17, %v11607_v14  ;;  %v11608_v31 = vld [vmem:[#allocation30_spill] sm:$0xff]  ;;  %v7325_v17 = vld [vmem:[%s11466_s1 + $0x8] sm:$0xff]  ;;  %s6222_s1 = scalar_lea.sflag [#allocation3], %s377_s29 }
0x1114   : > { %v6134_v43 = vmul.f32 %v11178_v55, %v11608_v31 }
0x1115   : > { %v6111_v44 = vadd.f32 %v6072_v28, %v5718_v8 }
0x1117   : > { %v6143_v36 = vmul.f32 %v6111_v44, %v11539_v59  ;;  %v11605_v59 = vld [vmem:[#allocation22_spill] sm:$0xff] }
0x1118   : > { %v6137_v11 = vmul.f32 %v11192_v37, %v11605_v59  ;;  %v11610_v37 = vld [vmem:[#allocation41_spill] sm:$0xff] }
0x111a   : > { %v6074_v62 = vpop.f32.mrf.mxu0 }
0x111b   : > { %v6075_v38 = vadd.f32 %v6074_v62, %v5865_v4  ;;  %v6132_v4 = vmul.f32 %v11157_v16, %v11610_v37  ;;  %v6131_v62 = vmul.f32 %v11148_v13, %v11611_v40  ;;  %v7221_v13 = vld [vmem:[%s11290_s10] ss:$0 sm:$0xff] }
0x111d   : > { %v6112_v52 = vadd.f32 %v6075_v38, %v5721_v18 }
0x111f   : > { %v6144_v19 = vmul.f32 %v6112_v52, %v11538_v50  ;;  %v11602_v50 = vld [vmem:[#allocation15_spill] sm:$0xff] }
0x1120   : > { %v6140_v24 = vmul.f32 %v6108_v34, %v11602_v50 }
0x1122   : > { %v6077_v41 = vpop.f32.mrf.mxu0 }
0x1123   : > { %v6078_v33 = vadd.f32 %v6077_v41, %v5868_v22 }
0x1125   : > { %v6113_v26 = vadd.f32 %v6078_v33, %v5724_v42 }
0x1127   : > { %v6145_v23 = vmul.f32 %v6113_v26, %v11537_v27  ;;  %v6109_v27 = vadd.f32 %v6066_v2, %v5712_v35 }
0x1129   : > { %v6141_v48 = vmul.f32 %v6109_v27, %v11601_v57 }
0x112a   : > { %v6080_v45 = vpop.f32.mrf.mxu0 }
0x112b   : > { %v6081_v0 = vadd.f32 %v6080_v45, %v5871_v32 }
0x112d   : > { %v6114_v51 = vadd.f32 %v6081_v0, %v5727_v6 }
0x112f   : > { %v6146_v20 = vmul.f32 %v6114_v51, %v11536_v15  ;;  %v6189_v15 = vld [vmem:[%s11289_s9 + $0x8] sm:$0xff] }
0x1130   : > { %6213 = vmatpush.msra.mxu1 %v6189_v15 }
0x1131   : > { %6167 = vmatpush.msrb.mxu3 %v6146_v20 }
0x1132   : > { %6214 = vmatpush.msra.mxu1 %v6188_v60 }
0x1133   : > { %6168 = vmatpush.msrb.mxu3 %v6145_v23 }
0x1135   : > { %6169 = vmatpush.msrb.mxu3 %v6144_v19 }
0x1137   : > { %6170 = vmatpush.msrb.mxu3 %v6143_v36 }
0x1139   : > { %6171 = vmatpush.msrb.mxu3 %v6142_v63 }
0x113b   : > { %6172 = vmatpush.msrb.mxu3 %v6141_v48 }
0x113d   : > { %6173 = vmatpush.msrb.mxu3 %v6140_v24 }
0x113f   : > { %6174 = vmatpush.msrb.mxu3 %v6139_v12 }
0x1141   : > { %6175 = vmatpush.msrb.mxu3 %v6138_v58 }
0x1143   : > { %6176 = vmatpush.msrb.mxu3 %v6137_v11 }
0x1145   : > { %6177 = vmatpush.msrb.mxu3 %v6136_v3 }
0x1147   : > { %6178 = vmatpush.msrb.mxu3 %v6135_v54 }
0x1149   : > { %6179 = vmatpush.msrb.mxu3 %v6134_v43 }
0x114b   : > { %6180 = vmatpush.msrb.mxu3 %v6133_v30 }
0x114d   : > { %6181 = vmatpush.msrb.mxu3 %v6132_v4  ;;  %v6164_v55 = vpop.f32.mrf.mxu0 }
0x114f   : > { %6182 = vmatpush.msrb.mxu3 %v6131_v62 }
0x1150   : > { %6183 = vmatmul.f32.vlgmr.msrb.gmra.mxu3 %v7325_v17 }
0x11d3   : > { %v6184_v9 = vpop.f32.mrf.mxu3 }
0x11d4   : > { %v6185_v22 = vadd.f32 %v6184_v9, %v6164_v55 }
0x11d6   : > { %v6187_v41 = vmax.f32 %v6185_v22, 0.0 }
0x11d8   : > { %7159 = vmatmul.msk.f32.vlgmr.msra.gmra.mxu1 %vm956_vm2, %v6187_v41 }
0x1255   : > { %v6216_v16 = vpop.f32.mrf.mxu1 }
0x1256   : > { %v6217_v1 = vadd.f32 %v7221_v13, %v6216_v16 }
0x1258   : > { %6220 = vst.msk [vmem:[%s379_s22] sm:$0xff] %vm6219_vm3, %v6217_v1 }
0x1259   : > { %7353 = shalt.err (!%p7350_p3)
}
0x125a   : > { %7167 = dma.vmem_to_hbm [thread:$0]  (%p7489_p5), %s6235_s24, 128, %s6237_s25, %s6222_s1  }
0x125b PF: > { %p7173_p4 = scmp.ge.s32.totalorder %s7388_s20, 2  ;;  %s6248_s29 = sand.u32 1, %s7376_s17  }
0x125c   : > { %s6249_s0 = scalar_lea.sflag [#allocation3], %s6248_s29 }
0x125d   : > { %p7170_p7 = pnand %p7173_p4, %p7493_p6 }
0x125f   : > { %p7171_p8 = pneg %p7170_p7 }
0x1261   : > { %7371 = dma.done.wait (%p7171_p8), %s6249_s0, 128  }
0x1262   : > { %7373 = vsyncadd (%p7171_p8), %s6249_s0, 4294967168  ;;  %p21_p9 = scmp.ge.s32.totalorder %s7476_s23, 4   ;;  %s11612_s17 = smov %s7380_s18 }
0x1263   : > { %s11613_s18 = smov %s7384_s19  ;;  %s11614_s19 = smov %s7487_s26 }
0x1264   : > { %s11615_s20 = smov %s7476_s23  ;;  %23 = sbr.rel (!%p21_p9) target bundleno = 7 (0x7), region = 111 }
0x1269   :  { %6255 = vsyncpa [#allocation3], 1 }
0x126a   :  { %6257 = vsyncpa [#allocation3 + $0x1], 1 }

</bundles_post_ra>
